<compile_context>
chip_gen: v7x
topology: tpu7x:2x2x1
jax: 0.10.0
libtpu: 0.0.40
codegen_flags: <defaults>
</compile_context>

<pallas_src>
import functools

import jax
import jax.numpy as jnp
import numpy as np
from jax.experimental import pallas as pl
from jax.experimental.pallas import tpu as pltpu

BN_EPS = 1e-5
MARGIN = 128          # lane margin around the padded-flat activation scratch

_CPARAMS = pltpu.CompilerParams(dimension_semantics=("arbitrary",))


# ----------------------------- Pallas kernels ------------------------------ #


def _stem_kernel(mask_ref, p_ref, w_ref, s_ref, b_ref, y_ref):
    """y[C0, Mp] = relu(bn(conv1)) in transposed (channels x padded-flat) layout."""
    acc = jnp.dot(w_ref[...], p_ref[...], preferred_element_type=jnp.float32)
    act = jnp.maximum(acc * s_ref[...] + b_ref[...], 0.0) * mask_ref[...]
    y_ref[...] = act.astype(jnp.bfloat16)


def _block_core(mask_ref, p1_ref, w1_ref, s1_ref, b1_ref,
                w2_ref, s2_ref, b2_ref, xs_ref, wsc_ref, ssc_ref, bsc_ref,
                a_ref, Wp, Mp):
    """Shared BasicBlock body.  Returns the f32 [planes, Mp] block output."""
    mask = mask_ref[...]                                   # (1, Mp); 1 = valid pixel

    # conv1 (+ BN + ReLU) from glue-gathered patches (stride already applied).
    acc1 = jnp.dot(w1_ref[...], p1_ref[...], preferred_element_type=jnp.float32)
    act1 = jnp.maximum(acc1 * s1_ref[...] + b1_ref[...], 0.0) * mask

    # Stash conv1's output in a zero-margined padded-flat VMEM scratch so that
    # conv2's nine 3x3 taps become shifted column slices (in-kernel im2col).
    a_ref[...] = jnp.zeros(a_ref.shape, a_ref.dtype)
    a_ref[:, MARGIN:MARGIN + Mp] = act1.astype(jnp.bfloat16)

    cin = a_ref.shape[0]
    acc2 = None
    for dy in range(3):
        for dx in range(3):
            t = dy * 3 + dx
            d = (dy - 1) * Wp + (dx - 1)                   # flat shift of tap (dy, dx)
            sl = a_ref[:, MARGIN + d:MARGIN + d + Mp]      # [cin, Mp] bf16
            wt = w2_ref[:, t * cin:(t + 1) * cin]          # [planes, cin] bf16
            term = jnp.dot(wt, sl, preferred_element_type=jnp.float32)
            acc2 = term if acc2 is None else acc2 + term

    # Shortcut: 1x1 conv + BN.  Identity shortcuts pass an identity matrix,
    # unit scale and zero shift, which reproduces the input exactly.
    sc = jnp.dot(wsc_ref[...], xs_ref[...], preferred_element_type=jnp.float32)
    sc = sc * ssc_ref[...] + bsc_ref[...]

    # conv2 BN + residual + ReLU; re-zero the padding columns for the next block.
    out = jnp.maximum(acc2 * s2_ref[...] + b2_ref[...] + sc, 0.0) * mask
    return out


def _block_kernel(mask_ref, p1_ref, w1_ref, s1_ref, b1_ref,
                  w2_ref, s2_ref, b2_ref, xs_ref, wsc_ref, ssc_ref, bsc_ref,
                  y_ref, a_ref, *, Wp, Mp):
    out = _block_core(mask_ref, p1_ref, w1_ref, s1_ref, b1_ref,
                      w2_ref, s2_ref, b2_ref, xs_ref, wsc_ref, ssc_ref, bsc_ref,
                      a_ref, Wp, Mp)
    y_ref[...] = out.astype(jnp.bfloat16)


def _block_head_kernel(mask_ref, p1_ref, w1_ref, s1_ref, b1_ref,
                       w2_ref, s2_ref, b2_ref, xs_ref, wsc_ref, ssc_ref, bsc_ref,
                       pool_ref, wl_ref, bl_ref,
                       logits_ref, lat_ref, a_ref, *, Wp, Mp):
    out = _block_core(mask_ref, p1_ref, w1_ref, s1_ref, b1_ref,
                      w2_ref, s2_ref, b2_ref, xs_ref, wsc_ref, ssc_ref, bsc_ref,
                      a_ref, Wp, Mp)
    # Fused AvgPool2d(4)+flatten (pool_ref averages each sample's interior
    # columns) and Linear, all in f32 (tiny GEMMs).
    pooled = jnp.dot(out, pool_ref[...], preferred_element_type=jnp.float32)   # [feat, N]
    lat_ref[...] = pooled
    logits_ref[...] = (jnp.dot(wl_ref[...], pooled,
                               preferred_element_type=jnp.float32) + bl_ref[...])


# ------------------------------ glue helpers -------------------------------- #


def _fs(x):
    """Full-array BlockSpec (everything fits comfortably in VMEM)."""
    assert x.ndim == 2
    return pl.BlockSpec(x.shape, lambda i: (0, 0))


def _make_mask(N, Ho, Wo):
    """1.0 at valid pixels, 0.0 at the zero-padding columns of the padded-flat map."""
    m = jnp.zeros((N, Ho + 2, Wo + 2), jnp.float32)
    m = m.at[:, 1:Ho + 1, 1:Wo + 1].set(1.0)
    return m.reshape(1, N * (Ho + 2) * (Wo + 2))


def _make_pool_matrix(N, Ho, Wo):
    """[Mp, N] matrix averaging each sample's interior columns (AvgPool2d)."""
    base = jnp.zeros((Ho + 2, Wo + 2), jnp.float32)
    base = base.at[1:Ho + 1, 1:Wo + 1].set(1.0 / (Ho * Wo))
    eye = jnp.eye(N, dtype=jnp.float32)
    pool = eye[:, None, None, :] * base[None, :, :, None]        # [N, Hp, Wp, N]
    return pool.reshape(N * (Ho + 2) * (Wo + 2), N)


def _conv_patches_padded(xp, stride):
    """xp: [C, N, H+2, W+2] zero-padded activation (channels-first).
    Returns bf16 patches [9*C, N*(Ho+2)*(Wo+2)] whose columns are padded-flat
    output positions (padding columns zeroed), plus the output spatial size."""
    C, N, Hp, Wp = xp.shape
    H, W = Hp - 2, Wp - 2
    Ho = (H - 1) // stride + 1
    Wo = (W - 1) // stride + 1
    taps = []
    for dy in range(3):
        for dx in range(3):
            taps.append(xp[:, :, dy:dy + (Ho - 1) * stride + 1:stride,
                              dx:dx + (Wo - 1) * stride + 1:stride])
    p = jnp.stack(taps, axis=0).reshape(9 * C, N, Ho, Wo)
    p = jnp.pad(p, ((0, 0), (0, 0), (1, 1), (1, 1)))
    return p.reshape(9 * C, N * (Ho + 2) * (Wo + 2)).astype(jnp.bfloat16), (N, Ho, Wo)


def _shortcut_input_padded(xp, stride):
    """Strided spatial subsample of xp, re-padded and flattened to the output
    map's padded-flat layout (feeds the 1x1 shortcut conv / identity residual)."""
    C, N, Hp, Wp = xp.shape
    H, W = Hp - 2, Wp - 2
    Ho = (H - 1) // stride + 1
    Wo = (W - 1) // stride + 1
    sub = xp[:, :, 1:1 + (Ho - 1) * stride + 1:stride,
                   1:1 + (Wo - 1) * stride + 1:stride]
    sub = jnp.pad(sub, ((0, 0), (0, 0), (1, 1), (1, 1)))
    return sub.reshape(C, N * (Ho + 2) * (Wo + 2)).astype(jnp.bfloat16)


def _bn_cols(bn, c):
    scale, shift = bn
    return (scale.reshape(c, 1).astype(jnp.float32),
            shift.reshape(c, 1).astype(jnp.float32))


# ------------------------------ parameter init ------------------------------ #


def fold_bn(gamma, beta, mean, var):
    scale = gamma / jnp.sqrt(var + BN_EPS)
    shift = beta - mean * scale
    return scale, shift


def init_conv(key, kh, kw, cin, cout):
    fan_in = kh * kw * cin
    return jax.random.normal(key, (kh, kw, cin, cout), jnp.float32) * (2.0 / fan_in) ** 0.5


def init_bn(key, c):
    k1, k2, k3, k4 = jax.random.split(key, 4)
    gamma = 1.0 + 0.1 * jax.random.normal(k1, (c,), jnp.float32)
    beta = 0.1 * jax.random.normal(k2, (c,), jnp.float32)
    mean = 0.1 * jax.random.normal(k3, (c,), jnp.float32)
    var = 1.0 + 0.5 * jax.random.uniform(k4, (c,), jnp.float32)
    return fold_bn(gamma, beta, mean, var)


def init_basic_block(key, in_planes, planes, stride):
    ks = jax.random.split(key, 6)
    p = {
        "conv1": init_conv(ks[0], 3, 3, in_planes, planes),
        "bn1": init_bn(ks[1], planes),
        "conv2": init_conv(ks[2], 3, 3, planes, planes),
        "bn2": init_bn(ks[3], planes),
        "stride": stride,
    }
    if stride != 1 or in_planes != planes:          # downsample shortcut
        p["sc_conv"] = init_conv(ks[4], 1, 1, in_planes, planes)
        p["sc_bn"] = init_bn(ks[5], planes)
    return p


def init_resnet(key, num_blocks=(1, 1, 1, 1), num_classes=10, wm=0.125):
    # widths = [int(64*wm), ...] exactly as in the PyTorch __init__
    widths = [int(64 * wm), int(128 * wm), int(256 * wm), int(512 * wm)]
    keys = jax.random.split(key, 8)
    params = {
        "conv1": init_conv(keys[0], 3, 3, 3, widths[0]),
        "bn1": init_bn(keys[1], widths[0]),
    }
    first_stride = 1                                # dataset == 'cifar10'
    layer_strides = [first_stride, 2, 2, 2]
    in_planes = widths[0]
    layers = []
    for li in range(4):
        strides = [layer_strides[li]] + [1] * (num_blocks[li] - 1)
        bkeys = jax.random.split(keys[2 + li], len(strides))
        blocks = []
        for s, bk in zip(strides, bkeys):
            blocks.append(init_basic_block(bk, in_planes, widths[li], s))
            in_planes = widths[li]                  # expansion = 1
        layers.append(blocks)
    params["layers"] = layers
    lk1, lk2 = jax.random.split(keys[6], 2)
    feat = widths[3]
    params["linear_w"] = jax.random.normal(lk1, (feat, num_classes),
                                           jnp.float32) * (1.0 / feat) ** 0.5
    params["linear_b"] = 0.01 * jax.random.normal(lk2, (num_classes,), jnp.float32)
    return params


# --------------------------------- forward ---------------------------------- #


def _block_call(act_pf, spatial, blk, head=None):
    """One fused pallas_call for a BasicBlock (optionally with the pool+linear head)."""
    N, H, W = spatial
    cin = act_pf.shape[0]
    stride = blk["stride"]
    planes = blk["conv1"].shape[3]
    xp = act_pf.reshape(cin, N, H + 2, W + 2)
    patches, (N, Ho, Wo) = _conv_patches_padded(xp, stride)
    xs = _shortcut_input_padded(xp, stride)
    Mp = N * (Ho + 2) * (Wo + 2)
    Wp = Wo + 2
    mask = _make_mask(N, Ho, Wo)

    w1m = blk["conv1"].reshape(-1, planes).T.astype(jnp.bfloat16)
    w2m = blk["conv2"].reshape(-1, planes).T.astype(jnp.bfloat16)
    s1, b1 = _bn_cols(blk["bn1"], planes)
    s2, b2 = _bn_cols(blk["bn2"], planes)
    if "sc_conv" in blk:
        wscm = blk["sc_conv"].reshape(cin, planes).T.astype(jnp.bfloat16)
        ssc, bsc = _bn_cols(blk["sc_bn"], planes)
    else:  # identity shortcut (stride 1, same width): exact pass-through
        wscm = jnp.eye(planes, dtype=jnp.bfloat16)
        ssc = jnp.ones((planes, 1), jnp.float32)
        bsc = jnp.zeros((planes, 1), jnp.float32)

    ins = [mask, patches, w1m, s1, b1, w2m, s2, b2, xs, wscm, ssc, bsc]
    scratch = [pltpu.VMEM((planes, Mp + 2 * MARGIN), jnp.bfloat16)]

    if head is None:
        y = pl.pallas_call(
            functools.partial(_block_kernel, Wp=Wp, Mp=Mp),
            out_shape=jax.ShapeDtypeStruct((planes, Mp), jnp.bfloat16),
            grid=(1,),
            in_specs=[_fs(a) for a in ins],
            out_specs=pl.BlockSpec((planes, Mp), lambda i: (0, 0)),
            scratch_shapes=scratch,
            compiler_params=_CPARAMS,
        )(*ins)
        return y, (N, Ho, Wo)

    # Last block: fuse AvgPool2d(4) + flatten + Linear into the same kernel.
    wl, bl = head
    assert Ho == 4 and Wo == 4, "head expects the 4x4 final feature map (32x32 input)"
    ncls = wl.shape[1]
    ins = ins + [_make_pool_matrix(N, Ho, Wo),
                 wl.T.astype(jnp.float32),
                 bl.reshape(ncls, 1).astype(jnp.float32)]
    logits_t, lat_t = pl.pallas_call(
        functools.partial(_block_head_kernel, Wp=Wp, Mp=Mp),
        out_shape=(jax.ShapeDtypeStruct((ncls, N), jnp.float32),
                   jax.ShapeDtypeStruct((planes, N), jnp.float32)),
        grid=(1,),
        in_specs=[_fs(a) for a in ins],
        out_specs=(pl.BlockSpec((ncls, N), lambda i: (0, 0)),
                   pl.BlockSpec((planes, N), lambda i: (0, 0))),
        scratch_shapes=scratch,
        compiler_params=_CPARAMS,
    )(*ins)
    return logits_t, lat_t, (N, Ho, Wo)


def resnet_forward(params, x_nchw, with_latent=False, fake_relu=False, no_relu=False):
    assert not no_relu, "no_relu not yet supported for this architecture"
    del fake_relu  # only changes the backward pass in the reference; forward == relu

    # Stem: conv1 + bn1 + relu in the transposed (channels x padded-flat) layout.
    x = jnp.transpose(x_nchw, (1, 0, 2, 3))                  # [3, N, H, W]
    xp = jnp.pad(x, ((0, 0), (0, 0), (1, 1), (1, 1)))
    patches0, (N, Ho, Wo) = _conv_patches_padded(xp, 1)
    C0 = params["conv1"].shape[3]
    Mp = N * (Ho + 2) * (Wo + 2)
    mask0 = _make_mask(N, Ho, Wo)
    w0m = params["conv1"].reshape(-1, C0).T.astype(jnp.bfloat16)
    s0, b0 = _bn_cols(params["bn1"], C0)
    ins = [mask0, patches0, w0m, s0, b0]
    act = pl.pallas_call(
        _stem_kernel,
        out_shape=jax.ShapeDtypeStruct((C0, Mp), jnp.bfloat16),
        grid=(1,),
        in_specs=[_fs(a) for a in ins],
        out_specs=pl.BlockSpec((C0, Mp), lambda i: (0, 0)),
        compiler_params=_CPARAMS,
    )(*ins)
    spatial = (N, Ho, Wo)

    blocks = [blk for layer in params["layers"] for blk in layer]
    logits_t = lat_t = None
    for bi, blk in enumerate(blocks):
        if bi < len(blocks) - 1:
            act, spatial = _block_call(act, spatial, blk)
        else:
            logits_t, lat_t, spatial = _block_call(
                act, spatial, blk, head=(params["linear_w"], params["linear_b"]))
    final = logits_t.T
    if with_latent:
        return final, lat_t.T
    return final


# ------------------------ pure-JAX reference (check) ------------------------ #


def _conv_ref(x, w, stride, padding):
    return jax.lax.conv_general_dilated(
        x.astype(jnp.bfloat16), w.astype(jnp.bfloat16),
        window_strides=(stride, stride),
        padding=((padding, padding), (padding, padding)),
        dimension_numbers=("NCHW", "HWIO", "NCHW"),
        preferred_element_type=jnp.float32)


def _bn_ref(x, scale, shift):
    return x * scale.reshape(1, -1, 1, 1) + shift.reshape(1, -1, 1, 1)


def resnet_reference(params, x_nchw):
    """Pure-JAX reference mirroring the kernels' bf16 storage points exactly."""
    q = lambda v: v.astype(jnp.bfloat16).astype(jnp.float32)
    out = q(jax.nn.relu(_bn_ref(_conv_ref(x_nchw, params["conv1"], 1, 1),
                                *params["bn1"])))
    blocks = [blk for layer in params["layers"] for blk in layer]
    for bi, blk in enumerate(blocks):
        s = blk["stride"]
        h = q(jax.nn.relu(_bn_ref(_conv_ref(out, blk["conv1"], s, 1), *blk["bn1"])))
        h = _bn_ref(_conv_ref(h, blk["conv2"], 1, 1), *blk["bn2"])
        if "sc_conv" in blk:
            sc = _bn_ref(_conv_ref(out, blk["sc_conv"], s, 0), *blk["sc_bn"])
        else:
            sc = out
        out = jax.nn.relu(h + sc)
        if bi < len(blocks) - 1:
            out = q(out)
    pooled = jnp.mean(out, axis=(2, 3))                      # AvgPool2d(4) + flatten
    return pooled @ params["linear_w"] + params["linear_b"]


if __name__ == "__main__":
    key = jax.random.PRNGKey(0)
    pkey, xkey = jax.random.split(key)
    params = init_resnet(pkey, num_blocks=(1, 1, 1, 1), num_classes=10, wm=0.125)
    # PyTorch-style NCHW CIFAR-10 input at small batch
    x = jax.random.normal(xkey, (2, 3, 32, 32), jnp.float32)

    fwd = jax.jit(lambda inp: resnet_forward(params, inp))
    out = jax.block_until_ready(fwd(x))
    assert out.shape == (2, 10) and out.dtype == jnp.float32

    ref = jax.block_until_ready(jax.jit(lambda inp: resnet_reference(params, inp))(x))
    np.testing.assert_allclose(np.asarray(out), np.asarray(ref), rtol=2e-2, atol=2e-2)
    print("KERNEL_OK")
</pallas_src>

<mosaic_0001>
module attributes {stable_mosaic.version = 11 : i64} {
  func.func @_stem_kernel(%arg0: i32, %arg1: memref<1x2312xf32, #tpu.memory_space<vmem>>, %arg2: memref<27x2312xbf16, #tpu.memory_space<vmem>>, %arg3: memref<8x27xbf16, #tpu.memory_space<vmem>>, %arg4: memref<8x1xf32, #tpu.memory_space<vmem>>, %arg5: memref<8x1xf32, #tpu.memory_space<vmem>>, %arg6: memref<8x2312xbf16, #tpu.memory_space<vmem>>) attributes {dimension_semantics = [#tpu.dimension_semantics<arbitrary>], iteration_bounds = array<i64: 1>, scalar_prefetch = 0 : i64, scratch_operands = 0 : i64, tpu.core_type = #tpu.core_type<tc>, window_params = [{pipeline_mode = #tpu.pipeline_mode<synchronous>, transform_indices = @transform_0, window_bounds = array<i64: 1, 2312>}, {pipeline_mode = #tpu.pipeline_mode<synchronous>, transform_indices = @transform_1, window_bounds = array<i64: 27, 2312>}, {pipeline_mode = #tpu.pipeline_mode<synchronous>, transform_indices = @transform_2, window_bounds = array<i64: 8, 27>}, {pipeline_mode = #tpu.pipeline_mode<synchronous>, transform_indices = @transform_3, window_bounds = array<i64: 8, 1>}, {pipeline_mode = #tpu.pipeline_mode<synchronous>, transform_indices = @transform_4, window_bounds = array<i64: 8, 1>}, {pipeline_mode = #tpu.pipeline_mode<synchronous>, transform_indices = @transform_5, window_bounds = array<i64: 8, 2312>}]} {
    %c0 = arith.constant 0 : index
    %c0_0 = arith.constant 0 : index
    %0 = vector.load %arg3[%c0, %c0_0] : memref<8x27xbf16, #tpu.memory_space<vmem>>, vector<8x27xbf16>
    %c0_1 = arith.constant 0 : index
    %c0_2 = arith.constant 0 : index
    %1 = vector.load %arg2[%c0_1, %c0_2] : memref<27x2312xbf16, #tpu.memory_space<vmem>>, vector<27x2312xbf16>
    %cst = arith.constant dense<0.000000e+00> : vector<8x2312xf32>
    %2 = tpu.matmul %0, %1, %cst {dimension_numbers = #tpu.dot_dimension_numbers<[1], [0], [0], [1], [0, 0, 1, 1], [], []>} : vector<8x27xbf16>, vector<27x2312xbf16>, vector<8x2312xf32> -> vector<8x2312xf32>
    %c0_3 = arith.constant 0 : index
    %c0_4 = arith.constant 0 : index
    %3 = vector.load %arg4[%c0_3, %c0_4] : memref<8x1xf32, #tpu.memory_space<vmem>>, vector<8x1xf32>
    %4 = vector.broadcast %3 : vector<8x1xf32> to vector<8x2312xf32>
    %5 = arith.mulf %2, %4 : vector<8x2312xf32>
    %c0_5 = arith.constant 0 : index
    %c0_6 = arith.constant 0 : index
    %6 = vector.load %arg5[%c0_5, %c0_6] : memref<8x1xf32, #tpu.memory_space<vmem>>, vector<8x1xf32>
    %7 = vector.broadcast %6 : vector<8x1xf32> to vector<8x2312xf32>
    %8 = arith.addf %5, %7 : vector<8x2312xf32>
    %cst_7 = arith.constant 0.000000e+00 : f32
    %9 = vector.broadcast %cst_7 : f32 to vector<8x2312xf32>
    %10 = arith.maximumf %8, %9 : vector<8x2312xf32>
    %c0_8 = arith.constant 0 : index
    %c0_9 = arith.constant 0 : index
    %11 = vector.load %arg1[%c0_8, %c0_9] : memref<1x2312xf32, #tpu.memory_space<vmem>>, vector<1x2312xf32>
    %12 = vector.broadcast %11 : vector<1x2312xf32> to vector<8x2312xf32>
    %13 = arith.mulf %10, %12 : vector<8x2312xf32>
    %14 = arith.truncf %13 : vector<8x2312xf32> to vector<8x2312xbf16>
    %c0_10 = arith.constant 0 : index
    %c0_11 = arith.constant 0 : index
    %15 = vector.load %arg6[%c0_10, %c0_11] : memref<8x2312xbf16, #tpu.memory_space<vmem>>, vector<8x2312xbf16>
    tpu.vector_store %arg6[%c0_10, %c0_11], %14 {strides = array<i32>} : memref<8x2312xbf16, #tpu.memory_space<vmem>>, vector<8x2312xbf16>,
    return
  }
  func.func @transform_0(%arg0: i32) -> (i32, i32) {
    %c0_i32 = arith.constant 0 : i32
    %c0_i32_0 = arith.constant 0 : i32
    %c0_i32_1 = arith.constant 0 : i32
    return %c0_i32, %c0_i32_0 : i32, i32
  }
  func.func @transform_1(%arg0: i32) -> (i32, i32) {
    %c0_i32 = arith.constant 0 : i32
    %c0_i32_0 = arith.constant 0 : i32
    %c0_i32_1 = arith.constant 0 : i32
    return %c0_i32, %c0_i32_0 : i32, i32
  }
  func.func @transform_2(%arg0: i32) -> (i32, i32) {
    %c0_i32 = arith.constant 0 : i32
    %c0_i32_0 = arith.constant 0 : i32
    %c0_i32_1 = arith.constant 0 : i32
    return %c0_i32, %c0_i32_0 : i32, i32
  }
  func.func @transform_3(%arg0: i32) -> (i32, i32) {
    %c0_i32 = arith.constant 0 : i32
    %c0_i32_0 = arith.constant 0 : i32
    %c0_i32_1 = arith.constant 0 : i32
    return %c0_i32, %c0_i32_0 : i32, i32
  }
  func.func @transform_4(%arg0: i32) -> (i32, i32) {
    %c0_i32 = arith.constant 0 : i32
    %c0_i32_0 = arith.constant 0 : i32
    %c0_i32_1 = arith.constant 0 : i32
    return %c0_i32, %c0_i32_0 : i32, i32
  }
  func.func @transform_5(%arg0: i32) -> (i32, i32) {
    %c0_i32 = arith.constant 0 : i32
    %c0_i32_0 = arith.constant 0 : i32
    %c0_i32_1 = arith.constant 0 : i32
    return %c0_i32, %c0_i32_0 : i32, i32
  }
}

module attributes {stable_mosaic.version = 11 : i64} {
  func.func @_block_kernel(%arg0: i32, %arg1: memref<1x2312xf32, #tpu.memory_space<vmem>>, %arg2: memref<72x2312xbf16, #tpu.memory_space<vmem>>, %arg3: memref<8x72xbf16, #tpu.memory_space<vmem>>, %arg4: memref<8x1xf32, #tpu.memory_space<vmem>>, %arg5: memref<8x1xf32, #tpu.memory_space<vmem>>, %arg6: memref<8x72xbf16, #tpu.memory_space<vmem>>, %arg7: memref<8x1xf32, #tpu.memory_space<vmem>>, %arg8: memref<8x1xf32, #tpu.memory_space<vmem>>, %arg9: memref<8x2312xbf16, #tpu.memory_space<vmem>>, %arg10: memref<8x8xbf16, #tpu.memory_space<vmem>>, %arg11: memref<8x1xf32, #tpu.memory_space<vmem>>, %arg12: memref<8x1xf32, #tpu.memory_space<vmem>>, %arg13: memref<8x2312xbf16, #tpu.memory_space<vmem>>, %arg14: memref<8x2568xbf16, #tpu.memory_space<vmem>>) attributes {dimension_semantics = [#tpu.dimension_semantics<arbitrary>], iteration_bounds = array<i64: 1>, scalar_prefetch = 0 : i64, scratch_operands = 1 : i64, tpu.core_type = #tpu.core_type<tc>, window_params = [{pipeline_mode = #tpu.pipeline_mode<synchronous>, transform_indices = @transform_0, window_bounds = array<i64: 1, 2312>}, {pipeline_mode = #tpu.pipeline_mode<synchronous>, transform_indices = @transform_1, window_bounds = array<i64: 72, 2312>}, {pipeline_mode = #tpu.pipeline_mode<synchronous>, transform_indices = @transform_2, window_bounds = array<i64: 8, 72>}, {pipeline_mode = #tpu.pipeline_mode<synchronous>, transform_indices = @transform_3, window_bounds = array<i64: 8, 1>}, {pipeline_mode = #tpu.pipeline_mode<synchronous>, transform_indices = @transform_4, window_bounds = array<i64: 8, 1>}, {pipeline_mode = #tpu.pipeline_mode<synchronous>, transform_indices = @transform_5, window_bounds = array<i64: 8, 72>}, {pipeline_mode = #tpu.pipeline_mode<synchronous>, transform_indices = @transform_6, window_bounds = array<i64: 8, 1>}, {pipeline_mode = #tpu.pipeline_mode<synchronous>, transform_indices = @transform_7, window_bounds = array<i64: 8, 1>}, {pipeline_mode = #tpu.pipeline_mode<synchronous>, transform_indices = @transform_8, window_bounds = array<i64: 8, 2312>}, {pipeline_mode = #tpu.pipeline_mode<synchronous>, transform_indices = @transform_9, window_bounds = array<i64: 8, 8>}, {pipeline_mode = #tpu.pipeline_mode<synchronous>, transform_indices = @transform_10, window_bounds = array<i64: 8, 1>}, {pipeline_mode = #tpu.pipeline_mode<synchronous>, transform_indices = @transform_11, window_bounds = array<i64: 8, 1>}, {pipeline_mode = #tpu.pipeline_mode<synchronous>, transform_indices = @transform_12, window_bounds = array<i64: 8, 2312>}]} {
    %c0 = arith.constant 0 : index
    %c0_0 = arith.constant 0 : index
    %0 = vector.load %arg1[%c0, %c0_0] : memref<1x2312xf32, #tpu.memory_space<vmem>>, vector<1x2312xf32>
    %c0_1 = arith.constant 0 : index
    %c0_2 = arith.constant 0 : index
    %1 = vector.load %arg3[%c0_1, %c0_2] : memref<8x72xbf16, #tpu.memory_space<vmem>>, vector<8x72xbf16>
    %c0_3 = arith.constant 0 : index
    %c0_4 = arith.constant 0 : index
    %2 = vector.load %arg2[%c0_3, %c0_4] : memref<72x2312xbf16, #tpu.memory_space<vmem>>, vector<72x2312xbf16>
    %cst = arith.constant dense<0.000000e+00> : vector<8x2312xf32>
    %3 = tpu.matmul %1, %2, %cst {dimension_numbers = #tpu.dot_dimension_numbers<[1], [0], [0], [1], [0, 0, 1, 1], [], []>} : vector<8x72xbf16>, vector<72x2312xbf16>, vector<8x2312xf32> -> vector<8x2312xf32>
    %c0_5 = arith.constant 0 : index
    %c0_6 = arith.constant 0 : index
    %4 = vector.load %arg4[%c0_5, %c0_6] : memref<8x1xf32, #tpu.memory_space<vmem>>, vector<8x1xf32>
    %5 = vector.broadcast %4 : vector<8x1xf32> to vector<8x2312xf32>
    %6 = arith.mulf %3, %5 : vector<8x2312xf32>
    %c0_7 = arith.constant 0 : index
    %c0_8 = arith.constant 0 : index
    %7 = vector.load %arg5[%c0_7, %c0_8] : memref<8x1xf32, #tpu.memory_space<vmem>>, vector<8x1xf32>
    %8 = vector.broadcast %7 : vector<8x1xf32> to vector<8x2312xf32>
    %9 = arith.addf %6, %8 : vector<8x2312xf32>
    %cst_9 = arith.constant 0.000000e+00 : f32
    %10 = vector.broadcast %cst_9 : f32 to vector<8x2312xf32>
    %11 = arith.maximumf %9, %10 : vector<8x2312xf32>
    %12 = vector.broadcast %0 : vector<1x2312xf32> to vector<8x2312xf32>
    %13 = arith.mulf %11, %12 : vector<8x2312xf32>
    %cst_10 = arith.constant 0.000000e+00 : bf16
    %14 = vector.broadcast %cst_10 : bf16 to vector<8x2568xbf16>
    %c0_11 = arith.constant 0 : index
    %c0_12 = arith.constant 0 : index
    %15 = vector.load %arg14[%c0_11, %c0_12] : memref<8x2568xbf16, #tpu.memory_space<vmem>>, vector<8x2568xbf16>
    tpu.vector_store %arg14[%c0_11, %c0_12], %14 {strides = array<i32>} : memref<8x2568xbf16, #tpu.memory_space<vmem>>, vector<8x2568xbf16>,
    %16 = arith.truncf %13 : vector<8x2312xf32> to vector<8x2312xbf16>
    %c0_13 = arith.constant 0 : index
    %c128 = arith.constant 128 : index
    %17 = vector.load %arg14[%c0_13, %c128] : memref<8x2568xbf16, #tpu.memory_space<vmem>>, vector<8x2312xbf16>
    tpu.vector_store %arg14[%c0_13, %c128], %16 {strides = array<i32>} : memref<8x2568xbf16, #tpu.memory_space<vmem>>, vector<8x2312xbf16>,
    %c0_14 = arith.constant 0 : index
    %c93 = arith.constant 93 : index
    %18 = vector.load %arg14[%c0_14, %c93] : memref<8x2568xbf16, #tpu.memory_space<vmem>>, vector<8x2312xbf16>
    %c0_15 = arith.constant 0 : index
    %c0_16 = arith.constant 0 : index
    %19 = vector.load %arg6[%c0_15, %c0_16] : memref<8x72xbf16, #tpu.memory_space<vmem>>, vector<8x8xbf16>
    %cst_17 = arith.constant dense<0.000000e+00> : vector<8x2312xf32>
    %20 = tpu.matmul %19, %18, %cst_17 {dimension_numbers = #tpu.dot_dimension_numbers<[1], [0], [0], [1], [0, 0, 1, 1], [], []>} : vector<8x8xbf16>, vector<8x2312xbf16>, vector<8x2312xf32> -> vector<8x2312xf32>
    %c0_18 = arith.constant 0 : index
    %c94 = arith.constant 94 : index
    %21 = vector.load %arg14[%c0_18, %c94] : memref<8x2568xbf16, #tpu.memory_space<vmem>>, vector<8x2312xbf16>
    %c0_19 = arith.constant 0 : index
    %c8 = arith.constant 8 : index
    %22 = vector.load %arg6[%c0_19, %c8] : memref<8x72xbf16, #tpu.memory_space<vmem>>, vector<8x8xbf16>
    %cst_20 = arith.constant dense<0.000000e+00> : vector<8x2312xf32>
    %23 = tpu.matmul %22, %21, %cst_20 {dimension_numbers = #tpu.dot_dimension_numbers<[1], [0], [0], [1], [0, 0, 1, 1], [], []>} : vector<8x8xbf16>, vector<8x2312xbf16>, vector<8x2312xf32> -> vector<8x2312xf32>
    %24 = arith.addf %20, %23 : vector<8x2312xf32>
    %c0_21 = arith.constant 0 : index
    %c95 = arith.constant 95 : index
    %25 = vector.load %arg14[%c0_21, %c95] : memref<8x2568xbf16, #tpu.memory_space<vmem>>, vector<8x2312xbf16>
    %c0_22 = arith.constant 0 : index
    %c16 = arith.constant 16 : index
    %26 = vector.load %arg6[%c0_22, %c16] : memref<8x72xbf16, #tpu.memory_space<vmem>>, vector<8x8xbf16>
    %cst_23 = arith.constant dense<0.000000e+00> : vector<8x2312xf32>
    %27 = tpu.matmul %26, %25, %cst_23 {dimension_numbers = #tpu.dot_dimension_numbers<[1], [0], [0], [1], [0, 0, 1, 1], [], []>} : vector<8x8xbf16>, vector<8x2312xbf16>, vector<8x2312xf32> -> vector<8x2312xf32>
    %28 = arith.addf %24, %27 : vector<8x2312xf32>
    %c0_24 = arith.constant 0 : index
    %c127 = arith.constant 127 : index
    %29 = vector.load %arg14[%c0_24, %c127] : memref<8x2568xbf16, #tpu.memory_space<vmem>>, vector<8x2312xbf16>
    %c0_25 = arith.constant 0 : index
    %c24 = arith.constant 24 : index
    %30 = vector.load %arg6[%c0_25, %c24] : memref<8x72xbf16, #tpu.memory_space<vmem>>, vector<8x8xbf16>
    %cst_26 = arith.constant dense<0.000000e+00> : vector<8x2312xf32>
    %31 = tpu.matmul %30, %29, %cst_26 {dimension_numbers = #tpu.dot_dimension_numbers<[1], [0], [0], [1], [0, 0, 1, 1], [], []>} : vector<8x8xbf16>, vector<8x2312xbf16>, vector<8x2312xf32> -> vector<8x2312xf32>
    %32 = arith.addf %28, %31 : vector<8x2312xf32>
    %c0_27 = arith.constant 0 : index
    %c128_28 = arith.constant 128 : index
    %33 = vector.load %arg14[%c0_27, %c128_28] : memref<8x2568xbf16, #tpu.memory_space<vmem>>, vector<8x2312xbf16>
    %c0_29 = arith.constant 0 : index
    %c32 = arith.constant 32 : index
    %34 = vector.load %arg6[%c0_29, %c32] : memref<8x72xbf16, #tpu.memory_space<vmem>>, vector<8x8xbf16>
    %cst_30 = arith.constant dense<0.000000e+00> : vector<8x2312xf32>
    %35 = tpu.matmul %34, %33, %cst_30 {dimension_numbers = #tpu.dot_dimension_numbers<[1], [0], [0], [1], [0, 0, 1, 1], [], []>} : vector<8x8xbf16>, vector<8x2312xbf16>, vector<8x2312xf32> -> vector<8x2312xf32>
    %36 = arith.addf %32, %35 : vector<8x2312xf32>
    %c0_31 = arith.constant 0 : index
    %c129 = arith.constant 129 : index
    %37 = vector.load %arg14[%c0_31, %c129] : memref<8x2568xbf16, #tpu.memory_space<vmem>>, vector<8x2312xbf16>
    %c0_32 = arith.constant 0 : index
    %c40 = arith.constant 40 : index
    %38 = vector.load %arg6[%c0_32, %c40] : memref<8x72xbf16, #tpu.memory_space<vmem>>, vector<8x8xbf16>
    %cst_33 = arith.constant dense<0.000000e+00> : vector<8x2312xf32>
    %39 = tpu.matmul %38, %37, %cst_33 {dimension_numbers = #tpu.dot_dimension_numbers<[1], [0], [0], [1], [0, 0, 1, 1], [], []>} : vector<8x8xbf16>, vector<8x2312xbf16>, vector<8x2312xf32> -> vector<8x2312xf32>
    %40 = arith.addf %36, %39 : vector<8x2312xf32>
    %c0_34 = arith.constant 0 : index
    %c161 = arith.constant 161 : index
    %41 = vector.load %arg14[%c0_34, %c161] : memref<8x2568xbf16, #tpu.memory_space<vmem>>, vector<8x2312xbf16>
    %c0_35 = arith.constant 0 : index
    %c48 = arith.constant 48 : index
    %42 = vector.load %arg6[%c0_35, %c48] : memref<8x72xbf16, #tpu.memory_space<vmem>>, vector<8x8xbf16>
    %cst_36 = arith.constant dense<0.000000e+00> : vector<8x2312xf32>
    %43 = tpu.matmul %42, %41, %cst_36 {dimension_numbers = #tpu.dot_dimension_numbers<[1], [0], [0], [1], [0, 0, 1, 1], [], []>} : vector<8x8xbf16>, vector<8x2312xbf16>, vector<8x2312xf32> -> vector<8x2312xf32>
    %44 = arith.addf %40, %43 : vector<8x2312xf32>
    %c0_37 = arith.constant 0 : index
    %c162 = arith.constant 162 : index
    %45 = vector.load %arg14[%c0_37, %c162] : memref<8x2568xbf16, #tpu.memory_space<vmem>>, vector<8x2312xbf16>
    %c0_38 = arith.constant 0 : index
    %c56 = arith.constant 56 : index
    %46 = vector.load %arg6[%c0_38, %c56] : memref<8x72xbf16, #tpu.memory_space<vmem>>, vector<8x8xbf16>
    %cst_39 = arith.constant dense<0.000000e+00> : vector<8x2312xf32>
    %47 = tpu.matmul %46, %45, %cst_39 {dimension_numbers = #tpu.dot_dimension_numbers<[1], [0], [0], [1], [0, 0, 1, 1], [], []>} : vector<8x8xbf16>, vector<8x2312xbf16>, vector<8x2312xf32> -> vector<8x2312xf32>
    %48 = arith.addf %44, %47 : vector<8x2312xf32>
    %c0_40 = arith.constant 0 : index
    %c163 = arith.constant 163 : index
    %49 = vector.load %arg14[%c0_40, %c163] : memref<8x2568xbf16, #tpu.memory_space<vmem>>, vector<8x2312xbf16>
    %c0_41 = arith.constant 0 : index
    %c64 = arith.constant 64 : index
    %50 = vector.load %arg6[%c0_41, %c64] : memref<8x72xbf16, #tpu.memory_space<vmem>>, vector<8x8xbf16>
    %cst_42 = arith.constant dense<0.000000e+00> : vector<8x2312xf32>
    %51 = tpu.matmul %50, %49, %cst_42 {dimension_numbers = #tpu.dot_dimension_numbers<[1], [0], [0], [1], [0, 0, 1, 1], [], []>} : vector<8x8xbf16>, vector<8x2312xbf16>, vector<8x2312xf32> -> vector<8x2312xf32>
    %52 = arith.addf %48, %51 : vector<8x2312xf32>
    %c0_43 = arith.constant 0 : index
    %c0_44 = arith.constant 0 : index
    %53 = vector.load %arg10[%c0_43, %c0_44] : memref<8x8xbf16, #tpu.memory_space<vmem>>, vector<8x8xbf16>
    %c0_45 = arith.constant 0 : index
    %c0_46 = arith.constant 0 : index
    %54 = vector.load %arg9[%c0_45, %c0_46] : memref<8x2312xbf16, #tpu.memory_space<vmem>>, vector<8x2312xbf16>
    %cst_47 = arith.constant dense<0.000000e+00> : vector<8x2312xf32>
    %55 = tpu.matmul %53, %54, %cst_47 {dimension_numbers = #tpu.dot_dimension_numbers<[1], [0], [0], [1], [0, 0, 1, 1], [], []>} : vector<8x8xbf16>, vector<8x2312xbf16>, vector<8x2312xf32> -> vector<8x2312xf32>
    %c0_48 = arith.constant 0 : index
    %c0_49 = arith.constant 0 : index
    %56 = vector.load %arg11[%c0_48, %c0_49] : memref<8x1xf32, #tpu.memory_space<vmem>>, vector<8x1xf32>
    %57 = vector.broadcast %56 : vector<8x1xf32> to vector<8x2312xf32>
    %58 = arith.mulf %55, %57 : vector<8x2312xf32>
    %c0_50 = arith.constant 0 : index
    %c0_51 = arith.constant 0 : index
    %59 = vector.load %arg12[%c0_50, %c0_51] : memref<8x1xf32, #tpu.memory_space<vmem>>, vector<8x1xf32>
    %60 = vector.broadcast %59 : vector<8x1xf32> to vector<8x2312xf32>
    %61 = arith.addf %58, %60 : vector<8x2312xf32>
    %c0_52 = arith.constant 0 : index
    %c0_53 = arith.constant 0 : index
    %62 = vector.load %arg7[%c0_52, %c0_53] : memref<8x1xf32, #tpu.memory_space<vmem>>, vector<8x1xf32>
    %63 = vector.broadcast %62 : vector<8x1xf32> to vector<8x2312xf32>
    %64 = arith.mulf %52, %63 : vector<8x2312xf32>
    %c0_54 = arith.constant 0 : index
    %c0_55 = arith.constant 0 : index
    %65 = vector.load %arg8[%c0_54, %c0_55] : memref<8x1xf32, #tpu.memory_space<vmem>>, vector<8x1xf32>
    %66 = vector.broadcast %65 : vector<8x1xf32> to vector<8x2312xf32>
    %67 = arith.addf %64, %66 : vector<8x2312xf32>
    %68 = arith.addf %67, %61 : vector<8x2312xf32>
    %cst_56 = arith.constant 0.000000e+00 : f32
    %69 = vector.broadcast %cst_56 : f32 to vector<8x2312xf32>
    %70 = arith.maximumf %68, %69 : vector<8x2312xf32>
    %71 = vector.broadcast %0 : vector<1x2312xf32> to vector<8x2312xf32>
    %72 = arith.mulf %70, %71 : vector<8x2312xf32>
    %73 = arith.truncf %72 : vector<8x2312xf32> to vector<8x2312xbf16>
    %c0_57 = arith.constant 0 : index
    %c0_58 = arith.constant 0 : index
    %74 = vector.load %arg13[%c0_57, %c0_58] : memref<8x2312xbf16, #tpu.memory_space<vmem>>, vector<8x2312xbf16>
    tpu.vector_store %arg13[%c0_57, %c0_58], %73 {strides = array<i32>} : memref<8x2312xbf16, #tpu.memory_space<vmem>>, vector<8x2312xbf16>,
    return
  }
  func.func @transform_0(%arg0: i32) -> (i32, i32) {
    %c0_i32 = arith.constant 0 : i32
    %c0_i32_0 = arith.constant 0 : i32
    %c0_i32_1 = arith.constant 0 : i32
    return %c0_i32, %c0_i32_0 : i32, i32
  }
  func.func @transform_1(%arg0: i32) -> (i32, i32) {
    %c0_i32 = arith.constant 0 : i32
    %c0_i32_0 = arith.constant 0 : i32
    %c0_i32_1 = arith.constant 0 : i32
    return %c0_i32, %c0_i32_0 : i32, i32
  }
  func.func @transform_2(%arg0: i32) -> (i32, i32) {
    %c0_i32 = arith.constant 0 : i32
    %c0_i32_0 = arith.constant 0 : i32
    %c0_i32_1 = arith.constant 0 : i32
    return %c0_i32, %c0_i32_0 : i32, i32
  }
  func.func @transform_3(%arg0: i32) -> (i32, i32) {
    %c0_i32 = arith.constant 0 : i32
    %c0_i32_0 = arith.constant 0 : i32
    %c0_i32_1 = arith.constant 0 : i32
    return %c0_i32, %c0_i32_0 : i32, i32
  }
  func.func @transform_4(%arg0: i32) -> (i32, i32) {
    %c0_i32 = arith.constant 0 : i32
    %c0_i32_0 = arith.constant 0 : i32
    %c0_i32_1 = arith.constant 0 : i32
    return %c0_i32, %c0_i32_0 : i32, i32
  }
  func.func @transform_5(%arg0: i32) -> (i32, i32) {
    %c0_i32 = arith.constant 0 : i32
    %c0_i32_0 = arith.constant 0 : i32
    %c0_i32_1 = arith.constant 0 : i32
    return %c0_i32, %c0_i32_0 : i32, i32
  }
  func.func @transform_6(%arg0: i32) -> (i32, i32) {
    %c0_i32 = arith.constant 0 : i32
    %c0_i32_0 = arith.constant 0 : i32
    %c0_i32_1 = arith.constant 0 : i32
    return %c0_i32, %c0_i32_0 : i32, i32
  }
  func.func @transform_7(%arg0: i32) -> (i32, i32) {
    %c0_i32 = arith.constant 0 : i32
    %c0_i32_0 = arith.constant 0 : i32
    %c0_i32_1 = arith.constant 0 : i32
    return %c0_i32, %c0_i32_0 : i32, i32
  }
  func.func @transform_8(%arg0: i32) -> (i32, i32) {
    %c0_i32 = arith.constant 0 : i32
    %c0_i32_0 = arith.constant 0 : i32
    %c0_i32_1 = arith.constant 0 : i32
    return %c0_i32, %c0_i32_0 : i32, i32
  }
  func.func @transform_9(%arg0: i32) -> (i32, i32) {
    %c0_i32 = arith.constant 0 : i32
    %c0_i32_0 = arith.constant 0 : i32
    %c0_i32_1 = arith.constant 0 : i32
    return %c0_i32, %c0_i32_0 : i32, i32
  }
  func.func @transform_10(%arg0: i32) -> (i32, i32) {
    %c0_i32 = arith.constant 0 : i32
    %c0_i32_0 = arith.constant 0 : i32
    %c0_i32_1 = arith.constant 0 : i32
    return %c0_i32, %c0_i32_0 : i32, i32
  }
  func.func @transform_11(%arg0: i32) -> (i32, i32) {
    %c0_i32 = arith.constant 0 : i32
    %c0_i32_0 = arith.constant 0 : i32
    %c0_i32_1 = arith.constant 0 : i32
    return %c0_i32, %c0_i32_0 : i32, i32
  }
  func.func @transform_12(%arg0: i32) -> (i32, i32) {
    %c0_i32 = arith.constant 0 : i32
    %c0_i32_0 = arith.constant 0 : i32
    %c0_i32_1 = arith.constant 0 : i32
    return %c0_i32, %c0_i32_0 : i32, i32
  }
}

module attributes {stable_mosaic.version = 11 : i64} {
  func.func @_block_kernel(%arg0: i32, %arg1: memref<1x648xf32, #tpu.memory_space<vmem>>, %arg2: memref<72x648xbf16, #tpu.memory_space<vmem>>, %arg3: memref<16x72xbf16, #tpu.memory_space<vmem>>, %arg4: memref<16x1xf32, #tpu.memory_space<vmem>>, %arg5: memref<16x1xf32, #tpu.memory_space<vmem>>, %arg6: memref<16x144xbf16, #tpu.memory_space<vmem>>, %arg7: memref<16x1xf32, #tpu.memory_space<vmem>>, %arg8: memref<16x1xf32, #tpu.memory_space<vmem>>, %arg9: memref<8x648xbf16, #tpu.memory_space<vmem>>, %arg10: memref<16x8xbf16, #tpu.memory_space<vmem>>, %arg11: memref<16x1xf32, #tpu.memory_space<vmem>>, %arg12: memref<16x1xf32, #tpu.memory_space<vmem>>, %arg13: memref<16x648xbf16, #tpu.memory_space<vmem>>, %arg14: memref<16x904xbf16, #tpu.memory_space<vmem>>) attributes {dimension_semantics = [#tpu.dimension_semantics<arbitrary>], iteration_bounds = array<i64: 1>, scalar_prefetch = 0 : i64, scratch_operands = 1 : i64, tpu.core_type = #tpu.core_type<tc>, window_params = [{pipeline_mode = #tpu.pipeline_mode<synchronous>, transform_indices = @transform_0, window_bounds = array<i64: 1, 648>}, {pipeline_mode = #tpu.pipeline_mode<synchronous>, transform_indices = @transform_1, window_bounds = array<i64: 72, 648>}, {pipeline_mode = #tpu.pipeline_mode<synchronous>, transform_indices = @transform_2, window_bounds = array<i64: 16, 72>}, {pipeline_mode = #tpu.pipeline_mode<synchronous>, transform_indices = @transform_3, window_bounds = array<i64: 16, 1>}, {pipeline_mode = #tpu.pipeline_mode<synchronous>, transform_indices = @transform_4, window_bounds = array<i64: 16, 1>}, {pipeline_mode = #tpu.pipeline_mode<synchronous>, transform_indices = @transform_5, window_bounds = array<i64: 16, 144>}, {pipeline_mode = #tpu.pipeline_mode<synchronous>, transform_indices = @transform_6, window_bounds = array<i64: 16, 1>}, {pipeline_mode = #tpu.pipeline_mode<synchronous>, transform_indices = @transform_7, window_bounds = array<i64: 16, 1>}, {pipeline_mode = #tpu.pipeline_mode<synchronous>, transform_indices = @transform_8, window_bounds = array<i64: 8, 648>}, {pipeline_mode = #tpu.pipeline_mode<synchronous>, transform_indices = @transform_9, window_bounds = array<i64: 16, 8>}, {pipeline_mode = #tpu.pipeline_mode<synchronous>, transform_indices = @transform_10, window_bounds = array<i64: 16, 1>}, {pipeline_mode = #tpu.pipeline_mode<synchronous>, transform_indices = @transform_11, window_bounds = array<i64: 16, 1>}, {pipeline_mode = #tpu.pipeline_mode<synchronous>, transform_indices = @transform_12, window_bounds = array<i64: 16, 648>}]} {
    %c0 = arith.constant 0 : index
    %c0_0 = arith.constant 0 : index
    %0 = vector.load %arg1[%c0, %c0_0] : memref<1x648xf32, #tpu.memory_space<vmem>>, vector<1x648xf32>
    %c0_1 = arith.constant 0 : index
    %c0_2 = arith.constant 0 : index
    %1 = vector.load %arg3[%c0_1, %c0_2] : memref<16x72xbf16, #tpu.memory_space<vmem>>, vector<16x72xbf16>
    %c0_3 = arith.constant 0 : index
    %c0_4 = arith.constant 0 : index
    %2 = vector.load %arg2[%c0_3, %c0_4] : memref<72x648xbf16, #tpu.memory_space<vmem>>, vector<72x648xbf16>
    %cst = arith.constant dense<0.000000e+00> : vector<16x648xf32>
    %3 = tpu.matmul %1, %2, %cst {dimension_numbers = #tpu.dot_dimension_numbers<[1], [0], [0], [1], [0, 0, 1, 1], [], []>} : vector<16x72xbf16>, vector<72x648xbf16>, vector<16x648xf32> -> vector<16x648xf32>
    %c0_5 = arith.constant 0 : index
    %c0_6 = arith.constant 0 : index
    %4 = vector.load %arg4[%c0_5, %c0_6] : memref<16x1xf32, #tpu.memory_space<vmem>>, vector<16x1xf32>
    %5 = vector.broadcast %4 : vector<16x1xf32> to vector<16x648xf32>
    %6 = arith.mulf %3, %5 : vector<16x648xf32>
    %c0_7 = arith.constant 0 : index
    %c0_8 = arith.constant 0 : index
    %7 = vector.load %arg5[%c0_7, %c0_8] : memref<16x1xf32, #tpu.memory_space<vmem>>, vector<16x1xf32>
    %8 = vector.broadcast %7 : vector<16x1xf32> to vector<16x648xf32>
    %9 = arith.addf %6, %8 : vector<16x648xf32>
    %cst_9 = arith.constant 0.000000e+00 : f32
    %10 = vector.broadcast %cst_9 : f32 to vector<16x648xf32>
    %11 = arith.maximumf %9, %10 : vector<16x648xf32>
    %12 = vector.broadcast %0 : vector<1x648xf32> to vector<16x648xf32>
    %13 = arith.mulf %11, %12 : vector<16x648xf32>
    %cst_10 = arith.constant 0.000000e+00 : bf16
    %14 = vector.broadcast %cst_10 : bf16 to vector<16x904xbf16>
    %c0_11 = arith.constant 0 : index
    %c0_12 = arith.constant 0 : index
    %15 = vector.load %arg14[%c0_11, %c0_12] : memref<16x904xbf16, #tpu.memory_space<vmem>>, vector<16x904xbf16>
    tpu.vector_store %arg14[%c0_11, %c0_12], %14 {strides = array<i32>} : memref<16x904xbf16, #tpu.memory_space<vmem>>, vector<16x904xbf16>,
    %16 = arith.truncf %13 : vector<16x648xf32> to vector<16x648xbf16>
    %c0_13 = arith.constant 0 : index
    %c128 = arith.constant 128 : index
    %17 = vector.load %arg14[%c0_13, %c128] : memref<16x904xbf16, #tpu.memory_space<vmem>>, vector<16x648xbf16>
    tpu.vector_store %arg14[%c0_13, %c128], %16 {strides = array<i32>} : memref<16x904xbf16, #tpu.memory_space<vmem>>, vector<16x648xbf16>,
    %c0_14 = arith.constant 0 : index
    %c109 = arith.constant 109 : index
    %18 = vector.load %arg14[%c0_14, %c109] : memref<16x904xbf16, #tpu.memory_space<vmem>>, vector<16x648xbf16>
    %c0_15 = arith.constant 0 : index
    %c0_16 = arith.constant 0 : index
    %19 = vector.load %arg6[%c0_15, %c0_16] : memref<16x144xbf16, #tpu.memory_space<vmem>>, vector<16x16xbf16>
    %cst_17 = arith.constant dense<0.000000e+00> : vector<16x648xf32>
    %20 = tpu.matmul %19, %18, %cst_17 {dimension_numbers = #tpu.dot_dimension_numbers<[1], [0], [0], [1], [0, 0, 1, 1], [], []>} : vector<16x16xbf16>, vector<16x648xbf16>, vector<16x648xf32> -> vector<16x648xf32>
    %c0_18 = arith.constant 0 : index
    %c110 = arith.constant 110 : index
    %21 = vector.load %arg14[%c0_18, %c110] : memref<16x904xbf16, #tpu.memory_space<vmem>>, vector<16x648xbf16>
    %c0_19 = arith.constant 0 : index
    %c16 = arith.constant 16 : index
    %22 = vector.load %arg6[%c0_19, %c16] : memref<16x144xbf16, #tpu.memory_space<vmem>>, vector<16x16xbf16>
    %cst_20 = arith.constant dense<0.000000e+00> : vector<16x648xf32>
    %23 = tpu.matmul %22, %21, %cst_20 {dimension_numbers = #tpu.dot_dimension_numbers<[1], [0], [0], [1], [0, 0, 1, 1], [], []>} : vector<16x16xbf16>, vector<16x648xbf16>, vector<16x648xf32> -> vector<16x648xf32>
    %24 = arith.addf %20, %23 : vector<16x648xf32>
    %c0_21 = arith.constant 0 : index
    %c111 = arith.constant 111 : index
    %25 = vector.load %arg14[%c0_21, %c111] : memref<16x904xbf16, #tpu.memory_space<vmem>>, vector<16x648xbf16>
    %c0_22 = arith.constant 0 : index
    %c32 = arith.constant 32 : index
    %26 = vector.load %arg6[%c0_22, %c32] : memref<16x144xbf16, #tpu.memory_space<vmem>>, vector<16x16xbf16>
    %cst_23 = arith.constant dense<0.000000e+00> : vector<16x648xf32>
    %27 = tpu.matmul %26, %25, %cst_23 {dimension_numbers = #tpu.dot_dimension_numbers<[1], [0], [0], [1], [0, 0, 1, 1], [], []>} : vector<16x16xbf16>, vector<16x648xbf16>, vector<16x648xf32> -> vector<16x648xf32>
    %28 = arith.addf %24, %27 : vector<16x648xf32>
    %c0_24 = arith.constant 0 : index
    %c127 = arith.constant 127 : index
    %29 = vector.load %arg14[%c0_24, %c127] : memref<16x904xbf16, #tpu.memory_space<vmem>>, vector<16x648xbf16>
    %c0_25 = arith.constant 0 : index
    %c48 = arith.constant 48 : index
    %30 = vector.load %arg6[%c0_25, %c48] : memref<16x144xbf16, #tpu.memory_space<vmem>>, vector<16x16xbf16>
    %cst_26 = arith.constant dense<0.000000e+00> : vector<16x648xf32>
    %31 = tpu.matmul %30, %29, %cst_26 {dimension_numbers = #tpu.dot_dimension_numbers<[1], [0], [0], [1], [0, 0, 1, 1], [], []>} : vector<16x16xbf16>, vector<16x648xbf16>, vector<16x648xf32> -> vector<16x648xf32>
    %32 = arith.addf %28, %31 : vector<16x648xf32>
    %c0_27 = arith.constant 0 : index
    %c128_28 = arith.constant 128 : index
    %33 = vector.load %arg14[%c0_27, %c128_28] : memref<16x904xbf16, #tpu.memory_space<vmem>>, vector<16x648xbf16>
    %c0_29 = arith.constant 0 : index
    %c64 = arith.constant 64 : index
    %34 = vector.load %arg6[%c0_29, %c64] : memref<16x144xbf16, #tpu.memory_space<vmem>>, vector<16x16xbf16>
    %cst_30 = arith.constant dense<0.000000e+00> : vector<16x648xf32>
    %35 = tpu.matmul %34, %33, %cst_30 {dimension_numbers = #tpu.dot_dimension_numbers<[1], [0], [0], [1], [0, 0, 1, 1], [], []>} : vector<16x16xbf16>, vector<16x648xbf16>, vector<16x648xf32> -> vector<16x648xf32>
    %36 = arith.addf %32, %35 : vector<16x648xf32>
    %c0_31 = arith.constant 0 : index
    %c129 = arith.constant 129 : index
    %37 = vector.load %arg14[%c0_31, %c129] : memref<16x904xbf16, #tpu.memory_space<vmem>>, vector<16x648xbf16>
    %c0_32 = arith.constant 0 : index
    %c80 = arith.constant 80 : index
    %38 = vector.load %arg6[%c0_32, %c80] : memref<16x144xbf16, #tpu.memory_space<vmem>>, vector<16x16xbf16>
    %cst_33 = arith.constant dense<0.000000e+00> : vector<16x648xf32>
    %39 = tpu.matmul %38, %37, %cst_33 {dimension_numbers = #tpu.dot_dimension_numbers<[1], [0], [0], [1], [0, 0, 1, 1], [], []>} : vector<16x16xbf16>, vector<16x648xbf16>, vector<16x648xf32> -> vector<16x648xf32>
    %40 = arith.addf %36, %39 : vector<16x648xf32>
    %c0_34 = arith.constant 0 : index
    %c145 = arith.constant 145 : index
    %41 = vector.load %arg14[%c0_34, %c145] : memref<16x904xbf16, #tpu.memory_space<vmem>>, vector<16x648xbf16>
    %c0_35 = arith.constant 0 : index
    %c96 = arith.constant 96 : index
    %42 = vector.load %arg6[%c0_35, %c96] : memref<16x144xbf16, #tpu.memory_space<vmem>>, vector<16x16xbf16>
    %cst_36 = arith.constant dense<0.000000e+00> : vector<16x648xf32>
    %43 = tpu.matmul %42, %41, %cst_36 {dimension_numbers = #tpu.dot_dimension_numbers<[1], [0], [0], [1], [0, 0, 1, 1], [], []>} : vector<16x16xbf16>, vector<16x648xbf16>, vector<16x648xf32> -> vector<16x648xf32>
    %44 = arith.addf %40, %43 : vector<16x648xf32>
    %c0_37 = arith.constant 0 : index
    %c146 = arith.constant 146 : index
    %45 = vector.load %arg14[%c0_37, %c146] : memref<16x904xbf16, #tpu.memory_space<vmem>>, vector<16x648xbf16>
    %c0_38 = arith.constant 0 : index
    %c112 = arith.constant 112 : index
    %46 = vector.load %arg6[%c0_38, %c112] : memref<16x144xbf16, #tpu.memory_space<vmem>>, vector<16x16xbf16>
    %cst_39 = arith.constant dense<0.000000e+00> : vector<16x648xf32>
    %47 = tpu.matmul %46, %45, %cst_39 {dimension_numbers = #tpu.dot_dimension_numbers<[1], [0], [0], [1], [0, 0, 1, 1], [], []>} : vector<16x16xbf16>, vector<16x648xbf16>, vector<16x648xf32> -> vector<16x648xf32>
    %48 = arith.addf %44, %47 : vector<16x648xf32>
    %c0_40 = arith.constant 0 : index
    %c147 = arith.constant 147 : index
    %49 = vector.load %arg14[%c0_40, %c147] : memref<16x904xbf16, #tpu.memory_space<vmem>>, vector<16x648xbf16>
    %c0_41 = arith.constant 0 : index
    %c128_42 = arith.constant 128 : index
    %50 = vector.load %arg6[%c0_41, %c128_42] : memref<16x144xbf16, #tpu.memory_space<vmem>>, vector<16x16xbf16>
    %cst_43 = arith.constant dense<0.000000e+00> : vector<16x648xf32>
    %51 = tpu.matmul %50, %49, %cst_43 {dimension_numbers = #tpu.dot_dimension_numbers<[1], [0], [0], [1], [0, 0, 1, 1], [], []>} : vector<16x16xbf16>, vector<16x648xbf16>, vector<16x648xf32> -> vector<16x648xf32>
    %52 = arith.addf %48, %51 : vector<16x648xf32>
    %c0_44 = arith.constant 0 : index
    %c0_45 = arith.constant 0 : index
    %53 = vector.load %arg10[%c0_44, %c0_45] : memref<16x8xbf16, #tpu.memory_space<vmem>>, vector<16x8xbf16>
    %c0_46 = arith.constant 0 : index
    %c0_47 = arith.constant 0 : index
    %54 = vector.load %arg9[%c0_46, %c0_47] : memref<8x648xbf16, #tpu.memory_space<vmem>>, vector<8x648xbf16>
    %cst_48 = arith.constant dense<0.000000e+00> : vector<16x648xf32>
    %55 = tpu.matmul %53, %54, %cst_48 {dimension_numbers = #tpu.dot_dimension_numbers<[1], [0], [0], [1], [0, 0, 1, 1], [], []>} : vector<16x8xbf16>, vector<8x648xbf16>, vector<16x648xf32> -> vector<16x648xf32>
    %c0_49 = arith.constant 0 : index
    %c0_50 = arith.constant 0 : index
    %56 = vector.load %arg11[%c0_49, %c0_50] : memref<16x1xf32, #tpu.memory_space<vmem>>, vector<16x1xf32>
    %57 = vector.broadcast %56 : vector<16x1xf32> to vector<16x648xf32>
    %58 = arith.mulf %55, %57 : vector<16x648xf32>
    %c0_51 = arith.constant 0 : index
    %c0_52 = arith.constant 0 : index
    %59 = vector.load %arg12[%c0_51, %c0_52] : memref<16x1xf32, #tpu.memory_space<vmem>>, vector<16x1xf32>
    %60 = vector.broadcast %59 : vector<16x1xf32> to vector<16x648xf32>
    %61 = arith.addf %58, %60 : vector<16x648xf32>
    %c0_53 = arith.constant 0 : index
    %c0_54 = arith.constant 0 : index
    %62 = vector.load %arg7[%c0_53, %c0_54] : memref<16x1xf32, #tpu.memory_space<vmem>>, vector<16x1xf32>
    %63 = vector.broadcast %62 : vector<16x1xf32> to vector<16x648xf32>
    %64 = arith.mulf %52, %63 : vector<16x648xf32>
    %c0_55 = arith.constant 0 : index
    %c0_56 = arith.constant 0 : index
    %65 = vector.load %arg8[%c0_55, %c0_56] : memref<16x1xf32, #tpu.memory_space<vmem>>, vector<16x1xf32>
    %66 = vector.broadcast %65 : vector<16x1xf32> to vector<16x648xf32>
    %67 = arith.addf %64, %66 : vector<16x648xf32>
    %68 = arith.addf %67, %61 : vector<16x648xf32>
    %cst_57 = arith.constant 0.000000e+00 : f32
    %69 = vector.broadcast %cst_57 : f32 to vector<16x648xf32>
    %70 = arith.maximumf %68, %69 : vector<16x648xf32>
    %71 = vector.broadcast %0 : vector<1x648xf32> to vector<16x648xf32>
    %72 = arith.mulf %70, %71 : vector<16x648xf32>
    %73 = arith.truncf %72 : vector<16x648xf32> to vector<16x648xbf16>
    %c0_58 = arith.constant 0 : index
    %c0_59 = arith.constant 0 : index
    %74 = vector.load %arg13[%c0_58, %c0_59] : memref<16x648xbf16, #tpu.memory_space<vmem>>, vector<16x648xbf16>
    tpu.vector_store %arg13[%c0_58, %c0_59], %73 {strides = array<i32>} : memref<16x648xbf16, #tpu.memory_space<vmem>>, vector<16x648xbf16>,
    return
  }
  func.func @transform_0(%arg0: i32) -> (i32, i32) {
    %c0_i32 = arith.constant 0 : i32
    %c0_i32_0 = arith.constant 0 : i32
    %c0_i32_1 = arith.constant 0 : i32
    return %c0_i32, %c0_i32_0 : i32, i32
  }
  func.func @transform_1(%arg0: i32) -> (i32, i32) {
    %c0_i32 = arith.constant 0 : i32
    %c0_i32_0 = arith.constant 0 : i32
    %c0_i32_1 = arith.constant 0 : i32
    return %c0_i32, %c0_i32_0 : i32, i32
  }
  func.func @transform_2(%arg0: i32) -> (i32, i32) {
    %c0_i32 = arith.constant 0 : i32
    %c0_i32_0 = arith.constant 0 : i32
    %c0_i32_1 = arith.constant 0 : i32
    return %c0_i32, %c0_i32_0 : i32, i32
  }
  func.func @transform_3(%arg0: i32) -> (i32, i32) {
    %c0_i32 = arith.constant 0 : i32
    %c0_i32_0 = arith.constant 0 : i32
    %c0_i32_1 = arith.constant 0 : i32
    return %c0_i32, %c0_i32_0 : i32, i32
  }
  func.func @transform_4(%arg0: i32) -> (i32, i32) {
    %c0_i32 = arith.constant 0 : i32
    %c0_i32_0 = arith.constant 0 : i32
    %c0_i32_1 = arith.constant 0 : i32
    return %c0_i32, %c0_i32_0 : i32, i32
  }
  func.func @transform_5(%arg0: i32) -> (i32, i32) {
    %c0_i32 = arith.constant 0 : i32
    %c0_i32_0 = arith.constant 0 : i32
    %c0_i32_1 = arith.constant 0 : i32
    return %c0_i32, %c0_i32_0 : i32, i32
  }
  func.func @transform_6(%arg0: i32) -> (i32, i32) {
    %c0_i32 = arith.constant 0 : i32
    %c0_i32_0 = arith.constant 0 : i32
    %c0_i32_1 = arith.constant 0 : i32
    return %c0_i32, %c0_i32_0 : i32, i32
  }
  func.func @transform_7(%arg0: i32) -> (i32, i32) {
    %c0_i32 = arith.constant 0 : i32
    %c0_i32_0 = arith.constant 0 : i32
    %c0_i32_1 = arith.constant 0 : i32
    return %c0_i32, %c0_i32_0 : i32, i32
  }
  func.func @transform_8(%arg0: i32) -> (i32, i32) {
    %c0_i32 = arith.constant 0 : i32
    %c0_i32_0 = arith.constant 0 : i32
    %c0_i32_1 = arith.constant 0 : i32
    return %c0_i32, %c0_i32_0 : i32, i32
  }
  func.func @transform_9(%arg0: i32) -> (i32, i32) {
    %c0_i32 = arith.constant 0 : i32
    %c0_i32_0 = arith.constant 0 : i32
    %c0_i32_1 = arith.constant 0 : i32
    return %c0_i32, %c0_i32_0 : i32, i32
  }
  func.func @transform_10(%arg0: i32) -> (i32, i32) {
    %c0_i32 = arith.constant 0 : i32
    %c0_i32_0 = arith.constant 0 : i32
    %c0_i32_1 = arith.constant 0 : i32
    return %c0_i32, %c0_i32_0 : i32, i32
  }
  func.func @transform_11(%arg0: i32) -> (i32, i32) {
    %c0_i32 = arith.constant 0 : i32
    %c0_i32_0 = arith.constant 0 : i32
    %c0_i32_1 = arith.constant 0 : i32
    return %c0_i32, %c0_i32_0 : i32, i32
  }
  func.func @transform_12(%arg0: i32) -> (i32, i32) {
    %c0_i32 = arith.constant 0 : i32
    %c0_i32_0 = arith.constant 0 : i32
    %c0_i32_1 = arith.constant 0 : i32
    return %c0_i32, %c0_i32_0 : i32, i32
  }
}

module attributes {stable_mosaic.version = 11 : i64} {
  func.func @_block_kernel(%arg0: i32, %arg1: memref<1x200xf32, #tpu.memory_space<vmem>>, %arg2: memref<144x200xbf16, #tpu.memory_space<vmem>>, %arg3: memref<32x144xbf16, #tpu.memory_space<vmem>>, %arg4: memref<32x1xf32, #tpu.memory_space<vmem>>, %arg5: memref<32x1xf32, #tpu.memory_space<vmem>>, %arg6: memref<32x288xbf16, #tpu.memory_space<vmem>>, %arg7: memref<32x1xf32, #tpu.memory_space<vmem>>, %arg8: memref<32x1xf32, #tpu.memory_space<vmem>>, %arg9: memref<16x200xbf16, #tpu.memory_space<vmem>>, %arg10: memref<32x16xbf16, #tpu.memory_space<vmem>>, %arg11: memref<32x1xf32, #tpu.memory_space<vmem>>, %arg12: memref<32x1xf32, #tpu.memory_space<vmem>>, %arg13: memref<32x200xbf16, #tpu.memory_space<vmem>>, %arg14: memref<32x456xbf16, #tpu.memory_space<vmem>>) attributes {dimension_semantics = [#tpu.dimension_semantics<arbitrary>], iteration_bounds = array<i64: 1>, scalar_prefetch = 0 : i64, scratch_operands = 1 : i64, tpu.core_type = #tpu.core_type<tc>, window_params = [{pipeline_mode = #tpu.pipeline_mode<synchronous>, transform_indices = @transform_0, window_bounds = array<i64: 1, 200>}, {pipeline_mode = #tpu.pipeline_mode<synchronous>, transform_indices = @transform_1, window_bounds = array<i64: 144, 200>}, {pipeline_mode = #tpu.pipeline_mode<synchronous>, transform_indices = @transform_2, window_bounds = array<i64: 32, 144>}, {pipeline_mode = #tpu.pipeline_mode<synchronous>, transform_indices = @transform_3, window_bounds = array<i64: 32, 1>}, {pipeline_mode = #tpu.pipeline_mode<synchronous>, transform_indices = @transform_4, window_bounds = array<i64: 32, 1>}, {pipeline_mode = #tpu.pipeline_mode<synchronous>, transform_indices = @transform_5, window_bounds = array<i64: 32, 288>}, {pipeline_mode = #tpu.pipeline_mode<synchronous>, transform_indices = @transform_6, window_bounds = array<i64: 32, 1>}, {pipeline_mode = #tpu.pipeline_mode<synchronous>, transform_indices = @transform_7, window_bounds = array<i64: 32, 1>}, {pipeline_mode = #tpu.pipeline_mode<synchronous>, transform_indices = @transform_8, window_bounds = array<i64: 16, 200>}, {pipeline_mode = #tpu.pipeline_mode<synchronous>, transform_indices = @transform_9, window_bounds = array<i64: 32, 16>}, {pipeline_mode = #tpu.pipeline_mode<synchronous>, transform_indices = @transform_10, window_bounds = array<i64: 32, 1>}, {pipeline_mode = #tpu.pipeline_mode<synchronous>, transform_indices = @transform_11, window_bounds = array<i64: 32, 1>}, {pipeline_mode = #tpu.pipeline_mode<synchronous>, transform_indices = @transform_12, window_bounds = array<i64: 32, 200>}]} {
    %c0 = arith.constant 0 : index
    %c0_0 = arith.constant 0 : index
    %0 = vector.load %arg1[%c0, %c0_0] : memref<1x200xf32, #tpu.memory_space<vmem>>, vector<1x200xf32>
    %c0_1 = arith.constant 0 : index
    %c0_2 = arith.constant 0 : index
    %1 = vector.load %arg3[%c0_1, %c0_2] : memref<32x144xbf16, #tpu.memory_space<vmem>>, vector<32x144xbf16>
    %c0_3 = arith.constant 0 : index
    %c0_4 = arith.constant 0 : index
    %2 = vector.load %arg2[%c0_3, %c0_4] : memref<144x200xbf16, #tpu.memory_space<vmem>>, vector<144x200xbf16>
    %cst = arith.constant dense<0.000000e+00> : vector<32x200xf32>
    %3 = tpu.matmul %1, %2, %cst {dimension_numbers = #tpu.dot_dimension_numbers<[1], [0], [0], [1], [0, 0, 1, 1], [], []>} : vector<32x144xbf16>, vector<144x200xbf16>, vector<32x200xf32> -> vector<32x200xf32>
    %c0_5 = arith.constant 0 : index
    %c0_6 = arith.constant 0 : index
    %4 = vector.load %arg4[%c0_5, %c0_6] : memref<32x1xf32, #tpu.memory_space<vmem>>, vector<32x1xf32>
    %5 = vector.broadcast %4 : vector<32x1xf32> to vector<32x200xf32>
    %6 = arith.mulf %3, %5 : vector<32x200xf32>
    %c0_7 = arith.constant 0 : index
    %c0_8 = arith.constant 0 : index
    %7 = vector.load %arg5[%c0_7, %c0_8] : memref<32x1xf32, #tpu.memory_space<vmem>>, vector<32x1xf32>
    %8 = vector.broadcast %7 : vector<32x1xf32> to vector<32x200xf32>
    %9 = arith.addf %6, %8 : vector<32x200xf32>
    %cst_9 = arith.constant 0.000000e+00 : f32
    %10 = vector.broadcast %cst_9 : f32 to vector<32x200xf32>
    %11 = arith.maximumf %9, %10 : vector<32x200xf32>
    %12 = vector.broadcast %0 : vector<1x200xf32> to vector<32x200xf32>
    %13 = arith.mulf %11, %12 : vector<32x200xf32>
    %cst_10 = arith.constant 0.000000e+00 : bf16
    %14 = vector.broadcast %cst_10 : bf16 to vector<32x456xbf16>
    %c0_11 = arith.constant 0 : index
    %c0_12 = arith.constant 0 : index
    %15 = vector.load %arg14[%c0_11, %c0_12] : memref<32x456xbf16, #tpu.memory_space<vmem>>, vector<32x456xbf16>
    tpu.vector_store %arg14[%c0_11, %c0_12], %14 {strides = array<i32>} : memref<32x456xbf16, #tpu.memory_space<vmem>>, vector<32x456xbf16>,
    %16 = arith.truncf %13 : vector<32x200xf32> to vector<32x200xbf16>
    %c0_13 = arith.constant 0 : index
    %c128 = arith.constant 128 : index
    %17 = vector.load %arg14[%c0_13, %c128] : memref<32x456xbf16, #tpu.memory_space<vmem>>, vector<32x200xbf16>
    tpu.vector_store %arg14[%c0_13, %c128], %16 {strides = array<i32>} : memref<32x456xbf16, #tpu.memory_space<vmem>>, vector<32x200xbf16>,
    %c0_14 = arith.constant 0 : index
    %c117 = arith.constant 117 : index
    %18 = vector.load %arg14[%c0_14, %c117] : memref<32x456xbf16, #tpu.memory_space<vmem>>, vector<32x200xbf16>
    %c0_15 = arith.constant 0 : index
    %c0_16 = arith.constant 0 : index
    %19 = vector.load %arg6[%c0_15, %c0_16] : memref<32x288xbf16, #tpu.memory_space<vmem>>, vector<32x32xbf16>
    %cst_17 = arith.constant dense<0.000000e+00> : vector<32x200xf32>
    %20 = tpu.matmul %19, %18, %cst_17 {dimension_numbers = #tpu.dot_dimension_numbers<[1], [0], [0], [1], [0, 0, 1, 1], [], []>} : vector<32x32xbf16>, vector<32x200xbf16>, vector<32x200xf32> -> vector<32x200xf32>
    %c0_18 = arith.constant 0 : index
    %c118 = arith.constant 118 : index
    %21 = vector.load %arg14[%c0_18, %c118] : memref<32x456xbf16, #tpu.memory_space<vmem>>, vector<32x200xbf16>
    %c0_19 = arith.constant 0 : index
    %c32 = arith.constant 32 : index
    %22 = vector.load %arg6[%c0_19, %c32] : memref<32x288xbf16, #tpu.memory_space<vmem>>, vector<32x32xbf16>
    %cst_20 = arith.constant dense<0.000000e+00> : vector<32x200xf32>
    %23 = tpu.matmul %22, %21, %cst_20 {dimension_numbers = #tpu.dot_dimension_numbers<[1], [0], [0], [1], [0, 0, 1, 1], [], []>} : vector<32x32xbf16>, vector<32x200xbf16>, vector<32x200xf32> -> vector<32x200xf32>
    %24 = arith.addf %20, %23 : vector<32x200xf32>
    %c0_21 = arith.constant 0 : index
    %c119 = arith.constant 119 : index
    %25 = vector.load %arg14[%c0_21, %c119] : memref<32x456xbf16, #tpu.memory_space<vmem>>, vector<32x200xbf16>
    %c0_22 = arith.constant 0 : index
    %c64 = arith.constant 64 : index
    %26 = vector.load %arg6[%c0_22, %c64] : memref<32x288xbf16, #tpu.memory_space<vmem>>, vector<32x32xbf16>
    %cst_23 = arith.constant dense<0.000000e+00> : vector<32x200xf32>
    %27 = tpu.matmul %26, %25, %cst_23 {dimension_numbers = #tpu.dot_dimension_numbers<[1], [0], [0], [1], [0, 0, 1, 1], [], []>} : vector<32x32xbf16>, vector<32x200xbf16>, vector<32x200xf32> -> vector<32x200xf32>
    %28 = arith.addf %24, %27 : vector<32x200xf32>
    %c0_24 = arith.constant 0 : index
    %c127 = arith.constant 127 : index
    %29 = vector.load %arg14[%c0_24, %c127] : memref<32x456xbf16, #tpu.memory_space<vmem>>, vector<32x200xbf16>
    %c0_25 = arith.constant 0 : index
    %c96 = arith.constant 96 : index
    %30 = vector.load %arg6[%c0_25, %c96] : memref<32x288xbf16, #tpu.memory_space<vmem>>, vector<32x32xbf16>
    %cst_26 = arith.constant dense<0.000000e+00> : vector<32x200xf32>
    %31 = tpu.matmul %30, %29, %cst_26 {dimension_numbers = #tpu.dot_dimension_numbers<[1], [0], [0], [1], [0, 0, 1, 1], [], []>} : vector<32x32xbf16>, vector<32x200xbf16>, vector<32x200xf32> -> vector<32x200xf32>
    %32 = arith.addf %28, %31 : vector<32x200xf32>
    %c0_27 = arith.constant 0 : index
    %c128_28 = arith.constant 128 : index
    %33 = vector.load %arg14[%c0_27, %c128_28] : memref<32x456xbf16, #tpu.memory_space<vmem>>, vector<32x200xbf16>
    %c0_29 = arith.constant 0 : index
    %c128_30 = arith.constant 128 : index
    %34 = vector.load %arg6[%c0_29, %c128_30] : memref<32x288xbf16, #tpu.memory_space<vmem>>, vector<32x32xbf16>
    %cst_31 = arith.constant dense<0.000000e+00> : vector<32x200xf32>
    %35 = tpu.matmul %34, %33, %cst_31 {dimension_numbers = #tpu.dot_dimension_numbers<[1], [0], [0], [1], [0, 0, 1, 1], [], []>} : vector<32x32xbf16>, vector<32x200xbf16>, vector<32x200xf32> -> vector<32x200xf32>
    %36 = arith.addf %32, %35 : vector<32x200xf32>
    %c0_32 = arith.constant 0 : index
    %c129 = arith.constant 129 : index
    %37 = vector.load %arg14[%c0_32, %c129] : memref<32x456xbf16, #tpu.memory_space<vmem>>, vector<32x200xbf16>
    %c0_33 = arith.constant 0 : index
    %c160 = arith.constant 160 : index
    %38 = vector.load %arg6[%c0_33, %c160] : memref<32x288xbf16, #tpu.memory_space<vmem>>, vector<32x32xbf16>
    %cst_34 = arith.constant dense<0.000000e+00> : vector<32x200xf32>
    %39 = tpu.matmul %38, %37, %cst_34 {dimension_numbers = #tpu.dot_dimension_numbers<[1], [0], [0], [1], [0, 0, 1, 1], [], []>} : vector<32x32xbf16>, vector<32x200xbf16>, vector<32x200xf32> -> vector<32x200xf32>
    %40 = arith.addf %36, %39 : vector<32x200xf32>
    %c0_35 = arith.constant 0 : index
    %c137 = arith.constant 137 : index
    %41 = vector.load %arg14[%c0_35, %c137] : memref<32x456xbf16, #tpu.memory_space<vmem>>, vector<32x200xbf16>
    %c0_36 = arith.constant 0 : index
    %c192 = arith.constant 192 : index
    %42 = vector.load %arg6[%c0_36, %c192] : memref<32x288xbf16, #tpu.memory_space<vmem>>, vector<32x32xbf16>
    %cst_37 = arith.constant dense<0.000000e+00> : vector<32x200xf32>
    %43 = tpu.matmul %42, %41, %cst_37 {dimension_numbers = #tpu.dot_dimension_numbers<[1], [0], [0], [1], [0, 0, 1, 1], [], []>} : vector<32x32xbf16>, vector<32x200xbf16>, vector<32x200xf32> -> vector<32x200xf32>
    %44 = arith.addf %40, %43 : vector<32x200xf32>
    %c0_38 = arith.constant 0 : index
    %c138 = arith.constant 138 : index
    %45 = vector.load %arg14[%c0_38, %c138] : memref<32x456xbf16, #tpu.memory_space<vmem>>, vector<32x200xbf16>
    %c0_39 = arith.constant 0 : index
    %c224 = arith.constant 224 : index
    %46 = vector.load %arg6[%c0_39, %c224] : memref<32x288xbf16, #tpu.memory_space<vmem>>, vector<32x32xbf16>
    %cst_40 = arith.constant dense<0.000000e+00> : vector<32x200xf32>
    %47 = tpu.matmul %46, %45, %cst_40 {dimension_numbers = #tpu.dot_dimension_numbers<[1], [0], [0], [1], [0, 0, 1, 1], [], []>} : vector<32x32xbf16>, vector<32x200xbf16>, vector<32x200xf32> -> vector<32x200xf32>
    %48 = arith.addf %44, %47 : vector<32x200xf32>
    %c0_41 = arith.constant 0 : index
    %c139 = arith.constant 139 : index
    %49 = vector.load %arg14[%c0_41, %c139] : memref<32x456xbf16, #tpu.memory_space<vmem>>, vector<32x200xbf16>
    %c0_42 = arith.constant 0 : index
    %c256 = arith.constant 256 : index
    %50 = vector.load %arg6[%c0_42, %c256] : memref<32x288xbf16, #tpu.memory_space<vmem>>, vector<32x32xbf16>
    %cst_43 = arith.constant dense<0.000000e+00> : vector<32x200xf32>
    %51 = tpu.matmul %50, %49, %cst_43 {dimension_numbers = #tpu.dot_dimension_numbers<[1], [0], [0], [1], [0, 0, 1, 1], [], []>} : vector<32x32xbf16>, vector<32x200xbf16>, vector<32x200xf32> -> vector<32x200xf32>
    %52 = arith.addf %48, %51 : vector<32x200xf32>
    %c0_44 = arith.constant 0 : index
    %c0_45 = arith.constant 0 : index
    %53 = vector.load %arg10[%c0_44, %c0_45] : memref<32x16xbf16, #tpu.memory_space<vmem>>, vector<32x16xbf16>
    %c0_46 = arith.constant 0 : index
    %c0_47 = arith.constant 0 : index
    %54 = vector.load %arg9[%c0_46, %c0_47] : memref<16x200xbf16, #tpu.memory_space<vmem>>, vector<16x200xbf16>
    %cst_48 = arith.constant dense<0.000000e+00> : vector<32x200xf32>
    %55 = tpu.matmul %53, %54, %cst_48 {dimension_numbers = #tpu.dot_dimension_numbers<[1], [0], [0], [1], [0, 0, 1, 1], [], []>} : vector<32x16xbf16>, vector<16x200xbf16>, vector<32x200xf32> -> vector<32x200xf32>
    %c0_49 = arith.constant 0 : index
    %c0_50 = arith.constant 0 : index
    %56 = vector.load %arg11[%c0_49, %c0_50] : memref<32x1xf32, #tpu.memory_space<vmem>>, vector<32x1xf32>
    %57 = vector.broadcast %56 : vector<32x1xf32> to vector<32x200xf32>
    %58 = arith.mulf %55, %57 : vector<32x200xf32>
    %c0_51 = arith.constant 0 : index
    %c0_52 = arith.constant 0 : index
    %59 = vector.load %arg12[%c0_51, %c0_52] : memref<32x1xf32, #tpu.memory_space<vmem>>, vector<32x1xf32>
    %60 = vector.broadcast %59 : vector<32x1xf32> to vector<32x200xf32>
    %61 = arith.addf %58, %60 : vector<32x200xf32>
    %c0_53 = arith.constant 0 : index
    %c0_54 = arith.constant 0 : index
    %62 = vector.load %arg7[%c0_53, %c0_54] : memref<32x1xf32, #tpu.memory_space<vmem>>, vector<32x1xf32>
    %63 = vector.broadcast %62 : vector<32x1xf32> to vector<32x200xf32>
    %64 = arith.mulf %52, %63 : vector<32x200xf32>
    %c0_55 = arith.constant 0 : index
    %c0_56 = arith.constant 0 : index
    %65 = vector.load %arg8[%c0_55, %c0_56] : memref<32x1xf32, #tpu.memory_space<vmem>>, vector<32x1xf32>
    %66 = vector.broadcast %65 : vector<32x1xf32> to vector<32x200xf32>
    %67 = arith.addf %64, %66 : vector<32x200xf32>
    %68 = arith.addf %67, %61 : vector<32x200xf32>
    %cst_57 = arith.constant 0.000000e+00 : f32
    %69 = vector.broadcast %cst_57 : f32 to vector<32x200xf32>
    %70 = arith.maximumf %68, %69 : vector<32x200xf32>
    %71 = vector.broadcast %0 : vector<1x200xf32> to vector<32x200xf32>
    %72 = arith.mulf %70, %71 : vector<32x200xf32>
    %73 = arith.truncf %72 : vector<32x200xf32> to vector<32x200xbf16>
    %c0_58 = arith.constant 0 : index
    %c0_59 = arith.constant 0 : index
    %74 = vector.load %arg13[%c0_58, %c0_59] : memref<32x200xbf16, #tpu.memory_space<vmem>>, vector<32x200xbf16>
    tpu.vector_store %arg13[%c0_58, %c0_59], %73 {strides = array<i32>} : memref<32x200xbf16, #tpu.memory_space<vmem>>, vector<32x200xbf16>,
    return
  }
  func.func @transform_0(%arg0: i32) -> (i32, i32) {
    %c0_i32 = arith.constant 0 : i32
    %c0_i32_0 = arith.constant 0 : i32
    %c0_i32_1 = arith.constant 0 : i32
    return %c0_i32, %c0_i32_0 : i32, i32
  }
  func.func @transform_1(%arg0: i32) -> (i32, i32) {
    %c0_i32 = arith.constant 0 : i32
    %c0_i32_0 = arith.constant 0 : i32
    %c0_i32_1 = arith.constant 0 : i32
    return %c0_i32, %c0_i32_0 : i32, i32
  }
  func.func @transform_2(%arg0: i32) -> (i32, i32) {
    %c0_i32 = arith.constant 0 : i32
    %c0_i32_0 = arith.constant 0 : i32
    %c0_i32_1 = arith.constant 0 : i32
    return %c0_i32, %c0_i32_0 : i32, i32
  }
  func.func @transform_3(%arg0: i32) -> (i32, i32) {
    %c0_i32 = arith.constant 0 : i32
    %c0_i32_0 = arith.constant 0 : i32
    %c0_i32_1 = arith.constant 0 : i32
    return %c0_i32, %c0_i32_0 : i32, i32
  }
  func.func @transform_4(%arg0: i32) -> (i32, i32) {
    %c0_i32 = arith.constant 0 : i32
    %c0_i32_0 = arith.constant 0 : i32
    %c0_i32_1 = arith.constant 0 : i32
    return %c0_i32, %c0_i32_0 : i32, i32
  }
  func.func @transform_5(%arg0: i32) -> (i32, i32) {
    %c0_i32 = arith.constant 0 : i32
    %c0_i32_0 = arith.constant 0 : i32
    %c0_i32_1 = arith.constant 0 : i32
    return %c0_i32, %c0_i32_0 : i32, i32
  }
  func.func @transform_6(%arg0: i32) -> (i32, i32) {
    %c0_i32 = arith.constant 0 : i32
    %c0_i32_0 = arith.constant 0 : i32
    %c0_i32_1 = arith.constant 0 : i32
    return %c0_i32, %c0_i32_0 : i32, i32
  }
  func.func @transform_7(%arg0: i32) -> (i32, i32) {
    %c0_i32 = arith.constant 0 : i32
    %c0_i32_0 = arith.constant 0 : i32
    %c0_i32_1 = arith.constant 0 : i32
    return %c0_i32, %c0_i32_0 : i32, i32
  }
  func.func @transform_8(%arg0: i32) -> (i32, i32) {
    %c0_i32 = arith.constant 0 : i32
    %c0_i32_0 = arith.constant 0 : i32
    %c0_i32_1 = arith.constant 0 : i32
    return %c0_i32, %c0_i32_0 : i32, i32
  }
  func.func @transform_9(%arg0: i32) -> (i32, i32) {
    %c0_i32 = arith.constant 0 : i32
    %c0_i32_0 = arith.constant 0 : i32
    %c0_i32_1 = arith.constant 0 : i32
    return %c0_i32, %c0_i32_0 : i32, i32
  }
  func.func @transform_10(%arg0: i32) -> (i32, i32) {
    %c0_i32 = arith.constant 0 : i32
    %c0_i32_0 = arith.constant 0 : i32
    %c0_i32_1 = arith.constant 0 : i32
    return %c0_i32, %c0_i32_0 : i32, i32
  }
  func.func @transform_11(%arg0: i32) -> (i32, i32) {
    %c0_i32 = arith.constant 0 : i32
    %c0_i32_0 = arith.constant 0 : i32
    %c0_i32_1 = arith.constant 0 : i32
    return %c0_i32, %c0_i32_0 : i32, i32
  }
  func.func @transform_12(%arg0: i32) -> (i32, i32) {
    %c0_i32 = arith.constant 0 : i32
    %c0_i32_0 = arith.constant 0 : i32
    %c0_i32_1 = arith.constant 0 : i32
    return %c0_i32, %c0_i32_0 : i32, i32
  }
}

module attributes {stable_mosaic.version = 11 : i64} {
  func.func @_block_head_kernel(%arg0: i32, %arg1: memref<1x72xf32, #tpu.memory_space<vmem>>, %arg2: memref<288x72xbf16, #tpu.memory_space<vmem>>, %arg3: memref<64x288xbf16, #tpu.memory_space<vmem>>, %arg4: memref<64x1xf32, #tpu.memory_space<vmem>>, %arg5: memref<64x1xf32, #tpu.memory_space<vmem>>, %arg6: memref<64x576xbf16, #tpu.memory_space<vmem>>, %arg7: memref<64x1xf32, #tpu.memory_space<vmem>>, %arg8: memref<64x1xf32, #tpu.memory_space<vmem>>, %arg9: memref<32x72xbf16, #tpu.memory_space<vmem>>, %arg10: memref<64x32xbf16, #tpu.memory_space<vmem>>, %arg11: memref<64x1xf32, #tpu.memory_space<vmem>>, %arg12: memref<64x1xf32, #tpu.memory_space<vmem>>, %arg13: memref<72x2xf32, #tpu.memory_space<vmem>>, %arg14: memref<10x64xf32, #tpu.memory_space<vmem>>, %arg15: memref<10x1xf32, #tpu.memory_space<vmem>>, %arg16: memref<10x2xf32, #tpu.memory_space<vmem>>, %arg17: memref<64x2xf32, #tpu.memory_space<vmem>>, %arg18: memref<64x328xbf16, #tpu.memory_space<vmem>>) attributes {dimension_semantics = [#tpu.dimension_semantics<arbitrary>], iteration_bounds = array<i64: 1>, scalar_prefetch = 0 : i64, scratch_operands = 1 : i64, tpu.core_type = #tpu.core_type<tc>, window_params = [{pipeline_mode = #tpu.pipeline_mode<synchronous>, transform_indices = @transform_0, window_bounds = array<i64: 1, 72>}, {pipeline_mode = #tpu.pipeline_mode<synchronous>, transform_indices = @transform_1, window_bounds = array<i64: 288, 72>}, {pipeline_mode = #tpu.pipeline_mode<synchronous>, transform_indices = @transform_2, window_bounds = array<i64: 64, 288>}, {pipeline_mode = #tpu.pipeline_mode<synchronous>, transform_indices = @transform_3, window_bounds = array<i64: 64, 1>}, {pipeline_mode = #tpu.pipeline_mode<synchronous>, transform_indices = @transform_4, window_bounds = array<i64: 64, 1>}, {pipeline_mode = #tpu.pipeline_mode<synchronous>, transform_indices = @transform_5, window_bounds = array<i64: 64, 576>}, {pipeline_mode = #tpu.pipeline_mode<synchronous>, transform_indices = @transform_6, window_bounds = array<i64: 64, 1>}, {pipeline_mode = #tpu.pipeline_mode<synchronous>, transform_indices = @transform_7, window_bounds = array<i64: 64, 1>}, {pipeline_mode = #tpu.pipeline_mode<synchronous>, transform_indices = @transform_8, window_bounds = array<i64: 32, 72>}, {pipeline_mode = #tpu.pipeline_mode<synchronous>, transform_indices = @transform_9, window_bounds = array<i64: 64, 32>}, {pipeline_mode = #tpu.pipeline_mode<synchronous>, transform_indices = @transform_10, window_bounds = array<i64: 64, 1>}, {pipeline_mode = #tpu.pipeline_mode<synchronous>, transform_indices = @transform_11, window_bounds = array<i64: 64, 1>}, {pipeline_mode = #tpu.pipeline_mode<synchronous>, transform_indices = @transform_12, window_bounds = array<i64: 72, 2>}, {pipeline_mode = #tpu.pipeline_mode<synchronous>, transform_indices = @transform_13, window_bounds = array<i64: 10, 64>}, {pipeline_mode = #tpu.pipeline_mode<synchronous>, transform_indices = @transform_14, window_bounds = array<i64: 10, 1>}, {pipeline_mode = #tpu.pipeline_mode<synchronous>, transform_indices = @transform_15, window_bounds = array<i64: 10, 2>}, {pipeline_mode = #tpu.pipeline_mode<synchronous>, transform_indices = @transform_16, window_bounds = array<i64: 64, 2>}]} {
    %c0 = arith.constant 0 : index
    %c0_0 = arith.constant 0 : index
    %0 = vector.load %arg1[%c0, %c0_0] : memref<1x72xf32, #tpu.memory_space<vmem>>, vector<1x72xf32>
    %c0_1 = arith.constant 0 : index
    %c0_2 = arith.constant 0 : index
    %1 = vector.load %arg3[%c0_1, %c0_2] : memref<64x288xbf16, #tpu.memory_space<vmem>>, vector<64x288xbf16>
    %c0_3 = arith.constant 0 : index
    %c0_4 = arith.constant 0 : index
    %2 = vector.load %arg2[%c0_3, %c0_4] : memref<288x72xbf16, #tpu.memory_space<vmem>>, vector<288x72xbf16>
    %cst = arith.constant dense<0.000000e+00> : vector<64x72xf32>
    %3 = tpu.matmul %1, %2, %cst {dimension_numbers = #tpu.dot_dimension_numbers<[1], [0], [0], [1], [0, 0, 1, 1], [], []>} : vector<64x288xbf16>, vector<288x72xbf16>, vector<64x72xf32> -> vector<64x72xf32>
    %c0_5 = arith.constant 0 : index
    %c0_6 = arith.constant 0 : index
    %4 = vector.load %arg4[%c0_5, %c0_6] : memref<64x1xf32, #tpu.memory_space<vmem>>, vector<64x1xf32>
    %5 = vector.broadcast %4 : vector<64x1xf32> to vector<64x72xf32>
    %6 = arith.mulf %3, %5 : vector<64x72xf32>
    %c0_7 = arith.constant 0 : index
    %c0_8 = arith.constant 0 : index
    %7 = vector.load %arg5[%c0_7, %c0_8] : memref<64x1xf32, #tpu.memory_space<vmem>>, vector<64x1xf32>
    %8 = vector.broadcast %7 : vector<64x1xf32> to vector<64x72xf32>
    %9 = arith.addf %6, %8 : vector<64x72xf32>
    %cst_9 = arith.constant 0.000000e+00 : f32
    %10 = vector.broadcast %cst_9 : f32 to vector<64x72xf32>
    %11 = arith.maximumf %9, %10 : vector<64x72xf32>
    %12 = vector.broadcast %0 : vector<1x72xf32> to vector<64x72xf32>
    %13 = arith.mulf %11, %12 : vector<64x72xf32>
    %cst_10 = arith.constant 0.000000e+00 : bf16
    %14 = vector.broadcast %cst_10 : bf16 to vector<64x328xbf16>
    %c0_11 = arith.constant 0 : index
    %c0_12 = arith.constant 0 : index
    %15 = vector.load %arg18[%c0_11, %c0_12] : memref<64x328xbf16, #tpu.memory_space<vmem>>, vector<64x328xbf16>
    tpu.vector_store %arg18[%c0_11, %c0_12], %14 {strides = array<i32>} : memref<64x328xbf16, #tpu.memory_space<vmem>>, vector<64x328xbf16>,
    %16 = arith.truncf %13 : vector<64x72xf32> to vector<64x72xbf16>
    %c0_13 = arith.constant 0 : index
    %c128 = arith.constant 128 : index
    %17 = vector.load %arg18[%c0_13, %c128] : memref<64x328xbf16, #tpu.memory_space<vmem>>, vector<64x72xbf16>
    tpu.vector_store %arg18[%c0_13, %c128], %16 {strides = array<i32>} : memref<64x328xbf16, #tpu.memory_space<vmem>>, vector<64x72xbf16>,
    %c0_14 = arith.constant 0 : index
    %c121 = arith.constant 121 : index
    %18 = vector.load %arg18[%c0_14, %c121] : memref<64x328xbf16, #tpu.memory_space<vmem>>, vector<64x72xbf16>
    %c0_15 = arith.constant 0 : index
    %c0_16 = arith.constant 0 : index
    %19 = vector.load %arg6[%c0_15, %c0_16] : memref<64x576xbf16, #tpu.memory_space<vmem>>, vector<64x64xbf16>
    %cst_17 = arith.constant dense<0.000000e+00> : vector<64x72xf32>
    %20 = tpu.matmul %19, %18, %cst_17 {dimension_numbers = #tpu.dot_dimension_numbers<[1], [0], [0], [1], [0, 0, 1, 1], [], []>} : vector<64x64xbf16>, vector<64x72xbf16>, vector<64x72xf32> -> vector<64x72xf32>
    %c0_18 = arith.constant 0 : index
    %c122 = arith.constant 122 : index
    %21 = vector.load %arg18[%c0_18, %c122] : memref<64x328xbf16, #tpu.memory_space<vmem>>, vector<64x72xbf16>
    %c0_19 = arith.constant 0 : index
    %c64 = arith.constant 64 : index
    %22 = vector.load %arg6[%c0_19, %c64] : memref<64x576xbf16, #tpu.memory_space<vmem>>, vector<64x64xbf16>
    %cst_20 = arith.constant dense<0.000000e+00> : vector<64x72xf32>
    %23 = tpu.matmul %22, %21, %cst_20 {dimension_numbers = #tpu.dot_dimension_numbers<[1], [0], [0], [1], [0, 0, 1, 1], [], []>} : vector<64x64xbf16>, vector<64x72xbf16>, vector<64x72xf32> -> vector<64x72xf32>
    %24 = arith.addf %20, %23 : vector<64x72xf32>
    %c0_21 = arith.constant 0 : index
    %c123 = arith.constant 123 : index
    %25 = vector.load %arg18[%c0_21, %c123] : memref<64x328xbf16, #tpu.memory_space<vmem>>, vector<64x72xbf16>
    %c0_22 = arith.constant 0 : index
    %c128_23 = arith.constant 128 : index
    %26 = vector.load %arg6[%c0_22, %c128_23] : memref<64x576xbf16, #tpu.memory_space<vmem>>, vector<64x64xbf16>
    %cst_24 = arith.constant dense<0.000000e+00> : vector<64x72xf32>
    %27 = tpu.matmul %26, %25, %cst_24 {dimension_numbers = #tpu.dot_dimension_numbers<[1], [0], [0], [1], [0, 0, 1, 1], [], []>} : vector<64x64xbf16>, vector<64x72xbf16>, vector<64x72xf32> -> vector<64x72xf32>
    %28 = arith.addf %24, %27 : vector<64x72xf32>
    %c0_25 = arith.constant 0 : index
    %c127 = arith.constant 127 : index
    %29 = vector.load %arg18[%c0_25, %c127] : memref<64x328xbf16, #tpu.memory_space<vmem>>, vector<64x72xbf16>
    %c0_26 = arith.constant 0 : index
    %c192 = arith.constant 192 : index
    %30 = vector.load %arg6[%c0_26, %c192] : memref<64x576xbf16, #tpu.memory_space<vmem>>, vector<64x64xbf16>
    %cst_27 = arith.constant dense<0.000000e+00> : vector<64x72xf32>
    %31 = tpu.matmul %30, %29, %cst_27 {dimension_numbers = #tpu.dot_dimension_numbers<[1], [0], [0], [1], [0, 0, 1, 1], [], []>} : vector<64x64xbf16>, vector<64x72xbf16>, vector<64x72xf32> -> vector<64x72xf32>
    %32 = arith.addf %28, %31 : vector<64x72xf32>
    %c0_28 = arith.constant 0 : index
    %c128_29 = arith.constant 128 : index
    %33 = vector.load %arg18[%c0_28, %c128_29] : memref<64x328xbf16, #tpu.memory_space<vmem>>, vector<64x72xbf16>
    %c0_30 = arith.constant 0 : index
    %c256 = arith.constant 256 : index
    %34 = vector.load %arg6[%c0_30, %c256] : memref<64x576xbf16, #tpu.memory_space<vmem>>, vector<64x64xbf16>
    %cst_31 = arith.constant dense<0.000000e+00> : vector<64x72xf32>
    %35 = tpu.matmul %34, %33, %cst_31 {dimension_numbers = #tpu.dot_dimension_numbers<[1], [0], [0], [1], [0, 0, 1, 1], [], []>} : vector<64x64xbf16>, vector<64x72xbf16>, vector<64x72xf32> -> vector<64x72xf32>
    %36 = arith.addf %32, %35 : vector<64x72xf32>
    %c0_32 = arith.constant 0 : index
    %c129 = arith.constant 129 : index
    %37 = vector.load %arg18[%c0_32, %c129] : memref<64x328xbf16, #tpu.memory_space<vmem>>, vector<64x72xbf16>
    %c0_33 = arith.constant 0 : index
    %c320 = arith.constant 320 : index
    %38 = vector.load %arg6[%c0_33, %c320] : memref<64x576xbf16, #tpu.memory_space<vmem>>, vector<64x64xbf16>
    %cst_34 = arith.constant dense<0.000000e+00> : vector<64x72xf32>
    %39 = tpu.matmul %38, %37, %cst_34 {dimension_numbers = #tpu.dot_dimension_numbers<[1], [0], [0], [1], [0, 0, 1, 1], [], []>} : vector<64x64xbf16>, vector<64x72xbf16>, vector<64x72xf32> -> vector<64x72xf32>
    %40 = arith.addf %36, %39 : vector<64x72xf32>
    %c0_35 = arith.constant 0 : index
    %c133 = arith.constant 133 : index
    %41 = vector.load %arg18[%c0_35, %c133] : memref<64x328xbf16, #tpu.memory_space<vmem>>, vector<64x72xbf16>
    %c0_36 = arith.constant 0 : index
    %c384 = arith.constant 384 : index
    %42 = vector.load %arg6[%c0_36, %c384] : memref<64x576xbf16, #tpu.memory_space<vmem>>, vector<64x64xbf16>
    %cst_37 = arith.constant dense<0.000000e+00> : vector<64x72xf32>
    %43 = tpu.matmul %42, %41, %cst_37 {dimension_numbers = #tpu.dot_dimension_numbers<[1], [0], [0], [1], [0, 0, 1, 1], [], []>} : vector<64x64xbf16>, vector<64x72xbf16>, vector<64x72xf32> -> vector<64x72xf32>
    %44 = arith.addf %40, %43 : vector<64x72xf32>
    %c0_38 = arith.constant 0 : index
    %c134 = arith.constant 134 : index
    %45 = vector.load %arg18[%c0_38, %c134] : memref<64x328xbf16, #tpu.memory_space<vmem>>, vector<64x72xbf16>
    %c0_39 = arith.constant 0 : index
    %c448 = arith.constant 448 : index
    %46 = vector.load %arg6[%c0_39, %c448] : memref<64x576xbf16, #tpu.memory_space<vmem>>, vector<64x64xbf16>
    %cst_40 = arith.constant dense<0.000000e+00> : vector<64x72xf32>
    %47 = tpu.matmul %46, %45, %cst_40 {dimension_numbers = #tpu.dot_dimension_numbers<[1], [0], [0], [1], [0, 0, 1, 1], [], []>} : vector<64x64xbf16>, vector<64x72xbf16>, vector<64x72xf32> -> vector<64x72xf32>
    %48 = arith.addf %44, %47 : vector<64x72xf32>
    %c0_41 = arith.constant 0 : index
    %c135 = arith.constant 135 : index
    %49 = vector.load %arg18[%c0_41, %c135] : memref<64x328xbf16, #tpu.memory_space<vmem>>, vector<64x72xbf16>
    %c0_42 = arith.constant 0 : index
    %c512 = arith.constant 512 : index
    %50 = vector.load %arg6[%c0_42, %c512] : memref<64x576xbf16, #tpu.memory_space<vmem>>, vector<64x64xbf16>
    %cst_43 = arith.constant dense<0.000000e+00> : vector<64x72xf32>
    %51 = tpu.matmul %50, %49, %cst_43 {dimension_numbers = #tpu.dot_dimension_numbers<[1], [0], [0], [1], [0, 0, 1, 1], [], []>} : vector<64x64xbf16>, vector<64x72xbf16>, vector<64x72xf32> -> vector<64x72xf32>
    %52 = arith.addf %48, %51 : vector<64x72xf32>
    %c0_44 = arith.constant 0 : index
    %c0_45 = arith.constant 0 : index
    %53 = vector.load %arg10[%c0_44, %c0_45] : memref<64x32xbf16, #tpu.memory_space<vmem>>, vector<64x32xbf16>
    %c0_46 = arith.constant 0 : index
    %c0_47 = arith.constant 0 : index
    %54 = vector.load %arg9[%c0_46, %c0_47] : memref<32x72xbf16, #tpu.memory_space<vmem>>, vector<32x72xbf16>
    %cst_48 = arith.constant dense<0.000000e+00> : vector<64x72xf32>
    %55 = tpu.matmul %53, %54, %cst_48 {dimension_numbers = #tpu.dot_dimension_numbers<[1], [0], [0], [1], [0, 0, 1, 1], [], []>} : vector<64x32xbf16>, vector<32x72xbf16>, vector<64x72xf32> -> vector<64x72xf32>
    %c0_49 = arith.constant 0 : index
    %c0_50 = arith.constant 0 : index
    %56 = vector.load %arg11[%c0_49, %c0_50] : memref<64x1xf32, #tpu.memory_space<vmem>>, vector<64x1xf32>
    %57 = vector.broadcast %56 : vector<64x1xf32> to vector<64x72xf32>
    %58 = arith.mulf %55, %57 : vector<64x72xf32>
    %c0_51 = arith.constant 0 : index
    %c0_52 = arith.constant 0 : index
    %59 = vector.load %arg12[%c0_51, %c0_52] : memref<64x1xf32, #tpu.memory_space<vmem>>, vector<64x1xf32>
    %60 = vector.broadcast %59 : vector<64x1xf32> to vector<64x72xf32>
    %61 = arith.addf %58, %60 : vector<64x72xf32>
    %c0_53 = arith.constant 0 : index
    %c0_54 = arith.constant 0 : index
    %62 = vector.load %arg7[%c0_53, %c0_54] : memref<64x1xf32, #tpu.memory_space<vmem>>, vector<64x1xf32>
    %63 = vector.broadcast %62 : vector<64x1xf32> to vector<64x72xf32>
    %64 = arith.mulf %52, %63 : vector<64x72xf32>
    %c0_55 = arith.constant 0 : index
    %c0_56 = arith.constant 0 : index
    %65 = vector.load %arg8[%c0_55, %c0_56] : memref<64x1xf32, #tpu.memory_space<vmem>>, vector<64x1xf32>
    %66 = vector.broadcast %65 : vector<64x1xf32> to vector<64x72xf32>
    %67 = arith.addf %64, %66 : vector<64x72xf32>
    %68 = arith.addf %67, %61 : vector<64x72xf32>
    %cst_57 = arith.constant 0.000000e+00 : f32
    %69 = vector.broadcast %cst_57 : f32 to vector<64x72xf32>
    %70 = arith.maximumf %68, %69 : vector<64x72xf32>
    %71 = vector.broadcast %0 : vector<1x72xf32> to vector<64x72xf32>
    %72 = arith.mulf %70, %71 : vector<64x72xf32>
    %c0_58 = arith.constant 0 : index
    %c0_59 = arith.constant 0 : index
    %73 = vector.load %arg13[%c0_58, %c0_59] : memref<72x2xf32, #tpu.memory_space<vmem>>, vector<72x2xf32>
    %cst_60 = arith.constant dense<0.000000e+00> : vector<64x2xf32>
    %74 = tpu.matmul %72, %73, %cst_60 {dimension_numbers = #tpu.dot_dimension_numbers<[1], [0], [0], [1], [0, 0, 1, 1], [], []>} : vector<64x72xf32>, vector<72x2xf32>, vector<64x2xf32> -> vector<64x2xf32>
    %c0_61 = arith.constant 0 : index
    %c0_62 = arith.constant 0 : index
    %75 = vector.load %arg17[%c0_61, %c0_62] : memref<64x2xf32, #tpu.memory_space<vmem>>, vector<64x2xf32>
    tpu.vector_store %arg17[%c0_61, %c0_62], %74 {strides = array<i32>} : memref<64x2xf32, #tpu.memory_space<vmem>>, vector<64x2xf32>,
    %c0_63 = arith.constant 0 : index
    %c0_64 = arith.constant 0 : index
    %76 = vector.load %arg14[%c0_63, %c0_64] : memref<10x64xf32, #tpu.memory_space<vmem>>, vector<10x64xf32>
    %cst_65 = arith.constant dense<0.000000e+00> : vector<10x2xf32>
    %77 = tpu.matmul %76, %74, %cst_65 {dimension_numbers = #tpu.dot_dimension_numbers<[1], [0], [0], [1], [0, 0, 1, 1], [], []>} : vector<10x64xf32>, vector<64x2xf32>, vector<10x2xf32> -> vector<10x2xf32>
    %c0_66 = arith.constant 0 : index
    %c0_67 = arith.constant 0 : index
    %78 = vector.load %arg15[%c0_66, %c0_67] : memref<10x1xf32, #tpu.memory_space<vmem>>, vector<10x1xf32>
    %79 = vector.broadcast %78 : vector<10x1xf32> to vector<10x2xf32>
    %80 = arith.addf %77, %79 : vector<10x2xf32>
    %c0_68 = arith.constant 0 : index
    %c0_69 = arith.constant 0 : index
    %81 = vector.load %arg16[%c0_68, %c0_69] : memref<10x2xf32, #tpu.memory_space<vmem>>, vector<10x2xf32>
    tpu.vector_store %arg16[%c0_68, %c0_69], %80 {strides = array<i32>} : memref<10x2xf32, #tpu.memory_space<vmem>>, vector<10x2xf32>,
    return
  }
  func.func @transform_0(%arg0: i32) -> (i32, i32) {
    %c0_i32 = arith.constant 0 : i32
    %c0_i32_0 = arith.constant 0 : i32
    %c0_i32_1 = arith.constant 0 : i32
    return %c0_i32, %c0_i32_0 : i32, i32
  }
  func.func @transform_1(%arg0: i32) -> (i32, i32) {
    %c0_i32 = arith.constant 0 : i32
    %c0_i32_0 = arith.constant 0 : i32
    %c0_i32_1 = arith.constant 0 : i32
    return %c0_i32, %c0_i32_0 : i32, i32
  }
  func.func @transform_2(%arg0: i32) -> (i32, i32) {
    %c0_i32 = arith.constant 0 : i32
    %c0_i32_0 = arith.constant 0 : i32
    %c0_i32_1 = arith.constant 0 : i32
    return %c0_i32, %c0_i32_0 : i32, i32
  }
  func.func @transform_3(%arg0: i32) -> (i32, i32) {
    %c0_i32 = arith.constant 0 : i32
    %c0_i32_0 = arith.constant 0 : i32
    %c0_i32_1 = arith.constant 0 : i32
    return %c0_i32, %c0_i32_0 : i32, i32
  }
  func.func @transform_4(%arg0: i32) -> (i32, i32) {
    %c0_i32 = arith.constant 0 : i32
    %c0_i32_0 = arith.constant 0 : i32
    %c0_i32_1 = arith.constant 0 : i32
    return %c0_i32, %c0_i32_0 : i32, i32
  }
  func.func @transform_5(%arg0: i32) -> (i32, i32) {
    %c0_i32 = arith.constant 0 : i32
    %c0_i32_0 = arith.constant 0 : i32
    %c0_i32_1 = arith.constant 0 : i32
    return %c0_i32, %c0_i32_0 : i32, i32
  }
  func.func @transform_6(%arg0: i32) -> (i32, i32) {
    %c0_i32 = arith.constant 0 : i32
    %c0_i32_0 = arith.constant 0 : i32
    %c0_i32_1 = arith.constant 0 : i32
    return %c0_i32, %c0_i32_0 : i32, i32
  }
  func.func @transform_7(%arg0: i32) -> (i32, i32) {
    %c0_i32 = arith.constant 0 : i32
    %c0_i32_0 = arith.constant 0 : i32
    %c0_i32_1 = arith.constant 0 : i32
    return %c0_i32, %c0_i32_0 : i32, i32
  }
  func.func @transform_8(%arg0: i32) -> (i32, i32) {
    %c0_i32 = arith.constant 0 : i32
    %c0_i32_0 = arith.constant 0 : i32
    %c0_i32_1 = arith.constant 0 : i32
    return %c0_i32, %c0_i32_0 : i32, i32
  }
  func.func @transform_9(%arg0: i32) -> (i32, i32) {
    %c0_i32 = arith.constant 0 : i32
    %c0_i32_0 = arith.constant 0 : i32
    %c0_i32_1 = arith.constant 0 : i32
    return %c0_i32, %c0_i32_0 : i32, i32
  }
  func.func @transform_10(%arg0: i32) -> (i32, i32) {
    %c0_i32 = arith.constant 0 : i32
    %c0_i32_0 = arith.constant 0 : i32
    %c0_i32_1 = arith.constant 0 : i32
    return %c0_i32, %c0_i32_0 : i32, i32
  }
  func.func @transform_11(%arg0: i32) -> (i32, i32) {
    %c0_i32 = arith.constant 0 : i32
    %c0_i32_0 = arith.constant 0 : i32
    %c0_i32_1 = arith.constant 0 : i32
    return %c0_i32, %c0_i32_0 : i32, i32
  }
  func.func @transform_12(%arg0: i32) -> (i32, i32) {
    %c0_i32 = arith.constant 0 : i32
    %c0_i32_0 = arith.constant 0 : i32
    %c0_i32_1 = arith.constant 0 : i32
    return %c0_i32, %c0_i32_0 : i32, i32
  }
  func.func @transform_13(%arg0: i32) -> (i32, i32) {
    %c0_i32 = arith.constant 0 : i32
    %c0_i32_0 = arith.constant 0 : i32
    %c0_i32_1 = arith.constant 0 : i32
    return %c0_i32, %c0_i32_0 : i32, i32
  }
  func.func @transform_14(%arg0: i32) -> (i32, i32) {
    %c0_i32 = arith.constant 0 : i32
    %c0_i32_0 = arith.constant 0 : i32
    %c0_i32_1 = arith.constant 0 : i32
    return %c0_i32, %c0_i32_0 : i32, i32
  }
  func.func @transform_15(%arg0: i32) -> (i32, i32) {
    %c0_i32 = arith.constant 0 : i32
    %c0_i32_0 = arith.constant 0 : i32
    %c0_i32_1 = arith.constant 0 : i32
    return %c0_i32, %c0_i32_0 : i32, i32
  }
  func.func @transform_16(%arg0: i32) -> (i32, i32) {
    %c0_i32 = arith.constant 0 : i32
    %c0_i32_0 = arith.constant 0 : i32
    %c0_i32_1 = arith.constant 0 : i32
    return %c0_i32, %c0_i32_0 : i32, i32
  }
}

</mosaic_0001>

<bundles_post_ra>
// kernel: _lambda_.5
= control target key start
LH: loop header
LB: loop body
LE: loop exit
PB: predicated region body
PF: predicated region fallthrough
CT: control target
= control target key end

     0   :  { %vm239_vm0 = vcmask 1044480   ;;  %vm240_vm1 = vcmask 1045504   ;;  %v1130_v1 = vmov 65535   ;;  %v1131_v3 = vmov 0   ;;  %s1466_s1 = inlined_call_operand.vmem [shape: bf16[27,2312], index: 1, kind: input, shape index: {}]   ;;  %s1467_s2 = inlined_call_operand.vmem [shape: bf16[8,27], index: 2, kind: input, shape index: {}]   ;;  %s1468_s3 = inlined_call_operand.vmem [shape: f32[8,1], index: 3, kind: input, shape index: {}]   ;;  %s1469_s4 = inlined_call_operand.vmem [shape: f32[8,1], index: 4, kind: input, shape index: {}]   ;;  %s1470_s0 = inlined_call_operand.vmem [shape: f32[1,2312], index: 0, kind: input, shape index: {}]   ;;  %s1471_s5 = inlined_call_operand.vmem [shape: bf16[8,2312], index: 5, kind: output, shape index: {}]  }
   0x1   :  { %v1074_v0 = vld [vmem:[%s1466_s1 + $0x4] ss:$76 sps:$4 sm:$0xff]   ;;  %v241_v2 = vsel %vm239_vm0, 4294967295, %v1130_v1  ;;  %332 = vmatprep.mubr.bf16.mxu0 %v1131_v3  ;;  %373 = vmatprep.mubr.bf16.mxu1 %v1131_v3  ;;  %v1076_v4 = vld [vmem:[%s1466_s1 + $0xc] ss:$76 sps:$4 sm:$0xff]   ;;  %vm235_vm2 = vcmask 220160   ;;  %v784_v1 = vlaneseq }
   0x2   :  { %1073 = vset.pattern.permute.xlu0 %v1131_v3  ;;  %300 = vmatprep.subr.bf16.mxu0 %v1074_v0  ;;  %v1078_v5 = vld [vmem:[%s1466_s1] ss:$76 sps:$4 sm:$0xff]   ;;  %v1079_v6 = vld [vmem:[%s1466_s1 + $0x8] ss:$76 sps:$4 sm:$0xff]   ;;  %v1179_v7 = vsel %vm240_vm1, %v241_v2, 0  ;;  %v1132_v60 = vmov 0.0  }
   0x3   :  { %341 = vmatprep.subr.bf16.mxu1 %v1076_v4  ;;  %v1080_v8 = vld [vmem:[%s1466_s1 + $0x9c] ss:$76 sps:$4 sm:$0x3f]   ;;  %301 = vmatpush1.bf16.msra.mxu0 %v1078_v5  ;;  %v1082_v9 = vld [vmem:[%s1466_s1 + $0xa4] ss:$76 sps:$4 sm:$0x3f]  }
   0x4   :  { %342 = vmatpush1.bf16.msra.mxu1 %v1079_v6  ;;  %v247_v10 = vand.u32 %v1080_v8, %v1179_v7  ;;  %v1084_v11 = vld [vmem:[%s1466_s1 + $0x98] ss:$76 sps:$4 sm:$0x3f]   ;;  %v1085_v12 = vld [vmem:[%s1466_s1 + $0xa0] ss:$76 sps:$4 sm:$0x3f]   ;;  %v253_v13 = vand.u32 %v1082_v9, %v1179_v7 }
   0x5   :  { %v244_v14 = vand.u32 %v1084_v11, %v1179_v7  ;;  %v250_v15 = vand.u32 %v1085_v12, %v1179_v7  ;;  %v1200_v16 = vld [vmem:[%s1467_s2] sm:$0xf]  ;;  %v1086_v17 = vld [vmem:[%s1466_s1 + $0x10] ss:$76 sps:$4 sm:$0xff]   ;;  %v1089_v19 = vld [vmem:[%s1466_s1 + $0x18] ss:$76 sps:$4 sm:$0xff]  }
   0x6   :  { %302 = vmatprep.subr.bf16.mxu0 %v247_v10  ;;  %v1088_v18 = vld [vmem:[%s1466_s1 + $0x14] ss:$76 sps:$4 sm:$0xff]   ;;  %343 = vmatprep.subr.bf16.mxu1 %v253_v13  ;;  %v1091_v20 = vld [vmem:[%s1466_s1 + $0x1c] ss:$76 sps:$4 sm:$0xff]   ;;  %v1100_v29 = vld [vmem:[%s1466_s1 + $0x24] ss:$76 sps:$4 sm:$0xff]  }
   0x7   :  { %303 = vmatpush1.bf16.msra.mxu0 %v244_v14  ;;  %v1092_v21 = vld [vmem:[%s1466_s1 + $0xa8] ss:$76 sps:$4 sm:$0x3f]   ;;  %v1094_v22 = vld [vmem:[%s1466_s1 + $0xac] ss:$76 sps:$4 sm:$0x3f]  }
   0x8   :  { %344 = vmatpush1.bf16.msra.mxu1 %v250_v15  ;;  %382 = vmatprep.subr.bf16.mxu0 %v1088_v18  ;;  %v1095_v23 = vld [vmem:[%s1466_s1 + $0xb0] ss:$76 sps:$4 sm:$0x3f]   ;;  %v1097_v24 = vld [vmem:[%s1466_s1 + $0xb4] ss:$76 sps:$4 sm:$0x3f]   ;;  %v259_v25 = vand.u32 %v1094_v22, %v1179_v7  ;;  %v256_v27 = vand.u32 %v1092_v21, %v1179_v7 }
   0x9   :  { %423 = vmatprep.subr.bf16.mxu1 %v1091_v20  ;;  %v265_v26 = vand.u32 %v1097_v24, %v1179_v7  ;;  %v262_v28 = vand.u32 %v1095_v23, %v1179_v7  ;;  %v1103_v30 = vld [vmem:[%s1466_s1 + $0x2c] ss:$76 sps:$4 sm:$0xff]   ;;  %v1101_v32 = vld [vmem:[%s1466_s1 + $0x28] ss:$76 sps:$4 sm:$0xff]   ;;  %v1110_v45 = vld [vmem:[%s1466_s1 + $0x30] ss:$76 sps:$4 sm:$0xff]  }
   0xa   :  { %1028 = vmatmul.mubr.msk.bf16.vlgmr.msra.gmra.mrb[0].mxu0 %vm235_vm2, %v1200_v16  ;;  %v1098_v31 = vld [vmem:[%s1466_s1 + $0x20] ss:$76 sps:$4 sm:$0xff]   ;;  %v1104_v33 = vld [vmem:[%s1466_s1 + $0xb8] ss:$76 sps:$4 sm:$0x3f]   ;;  %vm1133_vm3 = vmmov 0  }
   0xb   :  { %1029 = vmatmul.mubr.msk.bf16.vlgmr.msra.gmra.mrb[0].mxu1 %vm235_vm2, %v1200_v16  ;;  %383 = vmatpush1.bf16.msra.mxu0 %v1086_v17  ;;  %v1106_v34 = vld [vmem:[%s1466_s1 + $0xbc] ss:$76 sps:$4 sm:$0x3f]   ;;  %v1107_v35 = vld [vmem:[%s1466_s1 + $0xc0] ss:$76 sps:$4 sm:$0x3f]   ;;  %v268_v40 = vand.u32 %v1104_v33, %v1179_v7 }
   0xc   :  { %424 = vmatpush1.bf16.msra.mxu1 %v1089_v19  ;;  %384 = vmatprep.subr.bf16.mxu0 %v259_v25  ;;  %v1109_v36 = vld [vmem:[%s1466_s1 + $0xc4] ss:$76 sps:$4 sm:$0x3f]   ;;  %v271_v37 = vand.u32 %v1106_v34, %v1179_v7  ;;  %v1112_v39 = vld [vmem:[%s1466_s1 + $0x34] ss:$76 sps:$4 sm:$0xff]   ;;  %v274_v41 = vand.u32 %v1107_v35, %v1179_v7  ;;  %v1342_v4 = vshrl.u32 %v784_v1, 7 }
   0xd   :  { %414 = vmatprep.mubr.bf16.mxu0 %v1131_v3  ;;  %425 = vmatprep.subr.bf16.mxu1 %v265_v26  ;;  %v277_v38 = vand.u32 %v1109_v36, %v1179_v7  ;;  %v1115_v42 = vld [vmem:[%s1466_s1 + $0x3c] ss:$76 sps:$4 sm:$0xff]   ;;  %v1118_v43 = vld [vmem:[%s1466_s1 + $0xcc] ss:$76 sps:$4 sm:$0x3f]   ;;  %v709_v53 = vld [vmem:[%s1468_s3] sm:$0xff] }
   0xe   :  { %455 = vmatprep.mubr.bf16.mxu1 %v1131_v3  ;;  %v1121_v44 = vld [vmem:[%s1466_s1 + $0xd4] ss:$76 sps:$4 sm:$0x3f]   ;;  %v1113_v47 = vld [vmem:[%s1466_s1 + $0x38] ss:$76 sps:$4 sm:$0xff]   ;;  %v283_v49 = vand.u32 %v1118_v43, %v1179_v7  ;;  %712 = vperm.xlu0 %1073, %v709_v53   ;;  %v1350_v6 = vsub.s32 2, %v1342_v4 }
   0xf   :  { %385 = vmatpush1.bf16.msra.mxu0 %v256_v27  ;;  %v1116_v46 = vld [vmem:[%s1466_s1 + $0xc8] ss:$76 sps:$4 sm:$0x3f]   ;;  %v1119_v48 = vld [vmem:[%s1466_s1 + $0xd0] ss:$76 sps:$4 sm:$0x3f]   ;;  %v289_v50 = vand.u32 %v1121_v44, %v1179_v7 }
  0x10   :  { %426 = vmatpush1.bf16.msra.mxu1 %v262_v28  ;;  %464 = vmatprep.subr.bf16.mxu0 %v1100_v29  ;;  %v280_v51 = vand.u32 %v1116_v46, %v1179_v7  ;;  %v286_v52 = vand.u32 %v1119_v48, %v1179_v7  ;;  %v1124_v54 = vld [vmem:[%s1466_s1 + $0x44] ss:$76 sps:$4 sm:$0xff]   ;;  %v1128_v55 = vld [vmem:[%s1466_s1 + $0xdc] ss:$76 sps:$4 sm:$0x3f]   ;;  %v1356_v10 = vsub.s32 1, %v1342_v4 }
  0x11   :  { %505 = vmatprep.subr.bf16.mxu1 %v1103_v30  ;;  %v1122_v56 = vld [vmem:[%s1466_s1 + $0x40] ss:$76 sps:$4 sm:$0xff]   ;;  %v1125_v57 = vld [vmem:[%s1466_s1 + $0x48] ss:$76 sps:$4 sm:$0xff]   ;;  %v295_v61 = vand.u32 %v1128_v55, %v1179_v7  ;;  %v798_v11 = vsub.s32 3, %v1342_v4  ;;  %v802_v34 = vsub.s32 4, %v1342_v4 }
  0x12   :  { %1030 = vmatmul.mubr.msk.bf16.vlgmr.msra.gmra.mrb[4].mxu0 %vm235_vm2, %v1200_v16  ;;  %v1126_v58 = vld [vmem:[%s1466_s1 + $0xd8] ss:$76 sps:$4 sm:$0x3f]   ;;  %v1129_v59 = vld [vmem:[%s1466_s1 + $0xe0] ss:$76 sps:$4 sm:$0x3f]  }
  0x13   :  { %1031 = vmatmul.mubr.msk.bf16.vlgmr.msra.gmra.mrb[4].mxu1 %vm235_vm2, %v1200_v16  ;;  %465 = vmatpush1.bf16.msra.mxu0 %v1098_v31  ;;  %v292_v62 = vand.u32 %v1126_v58, %v1179_v7  ;;  %v298_v63 = vand.u32 %v1129_v59, %v1179_v7  ;;  %v734_v0 = vld [vmem:[%s1469_s4] sm:$0xff]  ;;  %v810_v35 = vsub.s32 6, %v1342_v4  ;;  %vm984_vm4 = vcmask 60416  }
  0x14   :  { %506 = vmatpush1.bf16.msra.mxu1 %v1101_v32  ;;  %466 = vmatprep.subr.bf16.mxu0 %v271_v37  ;;  %v778_v9 = vld [vmem:[%s1470_s0] sm:$0xff] }
  0x15   :  { %507 = vmatprep.subr.bf16.mxu1 %v277_v38  ;;  %496 = vmatprep.mubr.bf16.mxu0 %v1131_v3  ;;  %v795_v24 = vrot.slane %v778_v9, %v1350_v6  ;;  %v791_v27 = vrot.slane %v778_v9, %v1356_v10  ;;  %v799_v29 = vrot.slane %v778_v9, %v798_v11 }
  0x16   :  { %537 = vmatprep.mubr.bf16.mxu1 %v1131_v3  ;;  %737 = vperm.xlu0 %1073, %v734_v0   ;;  %v803_v55 = vrot.slane %v778_v9, %v802_v34 }
  0x17   :  { %467 = vmatpush1.bf16.msra.mxu0 %v268_v40  ;;  %v806_v40 = vsub.s32 5, %v1342_v4 }
  0x18   :  { %508 = vmatpush1.bf16.msra.mxu1 %v274_v41  ;;  %546 = vmatprep.subr.bf16.mxu0 %v1112_v39  ;;  %v814_v41 = vsub.s32 7, %v1342_v4 }
  0x19   :  { %587 = vmatprep.subr.bf16.mxu1 %v1115_v42 }
  0x1a   :  { %1032 = vmatmul.mubr.msk.bf16.vlgmr.msra.gmra.mrb[8].mxu0 %vm235_vm2, %v1200_v16 }
  0x1b   :  { %1033 = vmatmul.mubr.msk.bf16.vlgmr.msra.gmra.mrb[8].mxu1 %vm235_vm2, %v1200_v16  ;;  %547 = vmatpush1.bf16.msra.mxu0 %v1110_v45 }
  0x1c   :  { %588 = vmatpush1.bf16.msra.mxu1 %v1113_v47  ;;  %548 = vmatprep.subr.bf16.mxu0 %v283_v49 }
  0x1d   :  { %589 = vmatprep.subr.bf16.mxu1 %v289_v50  ;;  %578 = vmatprep.mubr.bf16.mxu0 %v1131_v3 }
  0x1e   :  { %619 = vmatprep.mubr.bf16.mxu1 %v1131_v3 }
  0x1f   :  { %549 = vmatpush1.bf16.msra.mxu0 %v280_v51 }
  0x20   :  { %590 = vmatpush1.bf16.msra.mxu1 %v286_v52  ;;  %628 = vmatprep.subr.bf16.mxu0 %v1124_v54 }
  0x21   :  { %1061 = vmatprep.subr.bf16.mxu1 %v1132_v60 }
  0x22   :  { %1034 = vmatmul.mubr.msk.bf16.vlgmr.msra.gmra.mrb[12].mxu0 %vm235_vm2, %v1200_v16 }
  0x23   :  { %1035 = vmatmul.mubr.msk.bf16.vlgmr.msra.gmra.mrb[12].mxu1 %vm235_vm2, %v1200_v16  ;;  %629 = vmatpush1.bf16.msra.mxu0 %v1122_v56 }
  0x24   :  { %1062 = vmatpush3.bf16.msra.mxu1 %v1125_v57  ;;  %630 = vmatprep.subr.bf16.mxu0 %v295_v61  ;;  %v811_v57 = vrot.slane %v778_v9, %v810_v35  ;;  %v807_v61 = vrot.slane %v778_v9, %v806_v40 }
  0x25   :  { %1063 = vmatprep.subr.bf16.mxu1 %v1132_v60  ;;  %660 = vmatprep.mubr.bf16.mxu0 %v1131_v3  ;;  %v1347_v3 = vsub.s32 0, %v1342_v4 }
  0x26   :  { %1065 = vmatprep.mubr.msk.bf16.mxu1 %vm1133_vm3, %v1132_v60 }
  0x27   :  { %631 = vmatpush1.bf16.msra.mxu0 %v292_v62  ;;  %v787_v23 = vrot.slane %v778_v9, %v1347_v3 }
  0x28   :  { %1064 = vmatpush3.bf16.msra.mxu1 %v298_v63  ;;  %v815_v63 = vrot.slane %v778_v9, %v814_v41  ;;  %v779_v9 = vld [vmem:[%s1470_s0 + $0x8] sm:$0xff] }
  0x2a   :  { %1036 = vmatmul.mubr.msk.bf16.vlgmr.msra.gmra.mrb[16].mxu0 %vm235_vm2, %v1200_v16 }
  0x2b   :  { %1066 = vmatmul.mubr.msk.bf16.vlgmr.msra.gmra.mrb[16].mxu1 %vm235_vm2, %v1200_v16 }
  0x8d   :  { %v1340_v2 = vpop.permute.xlu0 %712 }
  0x95   :  { %v1344_v5 = vpop.permute.xlu0 %737 }
  0xdd   :  { %v334_v7 = vpop.f32.mrb[0].mxu0 }
  0xde   :  { %v375_v8 = vpop.f32.mrb[0].mxu1  ;;  %v715_v12 = vmul.f32 %v1340_v2, %v334_v7  ;;  %v336_v14 = vpop.f32.mrb[1].mxu0 }
  0xdf   :  { %v717_v13 = vmul.f32 %v1340_v2, %v375_v8  ;;  %v377_v15 = vpop.f32.mrb[1].mxu1  ;;  %v716_v16 = vmul.f32 %v1340_v2, %v336_v14  ;;  %v338_v18 = vpop.f32.mrb[2].mxu0 }
  0xe0   :  { %v718_v17 = vmul.f32 %v1340_v2, %v377_v15  ;;  %v379_v19 = vpop.f32.mrb[2].mxu1  ;;  %v339_v20 = vpop.f32.mrb[3].mxu0  ;;  %v740_v22 = vadd.f32 %v1344_v5, %v715_v12 }
  0xe1   :  { %v380_v21 = vpop.f32.mrb[3].mxu1  ;;  %v742_v25 = vadd.f32 %v1344_v5, %v717_v13  ;;  %v741_v26 = vadd.f32 %v1344_v5, %v716_v16 }
  0xe2   :  { %v743_v28 = vadd.f32 %v1344_v5, %v718_v17  ;;  %v759_v30 = vmax.f32 %v740_v22, 0.0 }
  0xe3   :  { %v761_v31 = vmax.f32 %v742_v25, 0.0  ;;  %v760_v32 = vmax.f32 %v741_v26, 0.0 }
  0xe4   :  { %v762_v33 = vmax.f32 %v743_v28, 0.0  ;;  %v879_v36 = vmul.f32 %v787_v23, %v759_v30 }
  0xe5   :  { %v881_v37 = vmul.f32 %v795_v24, %v761_v31  ;;  %v416_v38 = vpop.f32.mrb[4].mxu0  ;;  %v880_v42 = vmul.f32 %v791_v27, %v760_v32  ;;  %v827_v31 = vrot.slane %v779_v9, %v1350_v6 }
  0xe6   :  { %v457_v39 = vpop.f32.mrb[4].mxu1  ;;  %v882_v43 = vmul.f32 %v799_v29, %v762_v33  ;;  %v719_v44 = vmul.f32 %v1340_v2, %v416_v38  ;;  %v418_v46 = vpop.f32.mrb[5].mxu0  ;;  %v819_v29 = vrot.slane %v779_v9, %v1347_v3 }
  0xe7   :  { %v721_v45 = vmul.f32 %v1340_v2, %v457_v39  ;;  %v459_v47 = vpop.f32.mrb[5].mxu1  ;;  %v720_v48 = vmul.f32 %v1340_v2, %v418_v46  ;;  %v420_v50 = vpop.f32.mrb[6].mxu0  ;;  %v1048_v52 = vpack.c.bf16 %v880_v42, %v879_v36  ;;  %v831_v39 = vrot.slane %v779_v9, %v798_v11 }
  0xe8   :  { %v722_v49 = vmul.f32 %v1340_v2, %v459_v47  ;;  %v461_v51 = vpop.f32.mrb[6].mxu1  ;;  %v1049_v53 = vpack.c.bf16 %v882_v43, %v881_v37  ;;  %v744_v54 = vadd.f32 %v1344_v5, %v719_v44  ;;  %v421_v58 = vpop.f32.mrb[7].mxu0  ;;  %v823_v37 = vrot.slane %v779_v9, %v1356_v10 }
  0xe9   :  { %v746_v56 = vadd.f32 %v1344_v5, %v721_v45  ;;  %v462_v59 = vpop.f32.mrb[7].mxu1  ;;  %v745_v60 = vadd.f32 %v1344_v5, %v720_v48  ;;  %975 = vst [vmem:[%s1471_s5] sm:$0xff] %v1048_v52 }
  0xea   :  { %v747_v62 = vadd.f32 %v1344_v5, %v722_v49  ;;  %976 = vst [vmem:[%s1471_s5 + $0x8] sm:$0xff] %v1049_v53  ;;  %v763_v0 = vmax.f32 %v744_v54, 0.0 }
  0xeb   :  { %v765_v1 = vmax.f32 %v746_v56, 0.0  ;;  %v764_v7 = vmax.f32 %v745_v60, 0.0 }
  0xec   :  { %v766_v8 = vmax.f32 %v747_v62, 0.0  ;;  %v883_v12 = vmul.f32 %v803_v55, %v763_v0  ;;  %v835_v62 = vrot.slane %v779_v9, %v802_v34  ;;  %v843_v0 = vrot.slane %v779_v9, %v810_v35 }
  0xed   :  { %v885_v13 = vmul.f32 %v811_v57, %v765_v1  ;;  %v884_v14 = vmul.f32 %v807_v61, %v764_v7  ;;  %v498_v16 = vpop.f32.mrb[8].mxu0  ;;  %v839_v34 = vrot.slane %v779_v9, %v806_v40  ;;  %v847_v35 = vrot.slane %v779_v9, %v814_v41 }
  0xee   :  { %v886_v15 = vmul.f32 %v815_v63, %v766_v8  ;;  %v539_v17 = vpop.f32.mrb[8].mxu1  ;;  %v723_v18 = vmul.f32 %v1340_v2, %v498_v16  ;;  %v500_v20 = vpop.f32.mrb[9].mxu0 }
  0xef   :  { %v725_v19 = vmul.f32 %v1340_v2, %v539_v17  ;;  %v541_v21 = vpop.f32.mrb[9].mxu1  ;;  %v1050_v22 = vpack.c.bf16 %v884_v14, %v883_v12  ;;  %v724_v24 = vmul.f32 %v1340_v2, %v500_v20  ;;  %v502_v26 = vpop.f32.mrb[10].mxu0 }
  0xf0   :  { %v1051_v23 = vpack.c.bf16 %v886_v15, %v885_v13  ;;  %v726_v25 = vmul.f32 %v1340_v2, %v541_v21  ;;  %v543_v27 = vpop.f32.mrb[10].mxu1  ;;  %v748_v28 = vadd.f32 %v1344_v5, %v723_v18  ;;  %v503_v32 = vpop.f32.mrb[11].mxu0 }
  0xf1   :  { %v750_v30 = vadd.f32 %v1344_v5, %v725_v19  ;;  %v544_v33 = vpop.f32.mrb[11].mxu1  ;;  %977 = vst [vmem:[%s1471_s5 + $0x10] sm:$0xff] %v1050_v22  ;;  %v749_v36 = vadd.f32 %v1344_v5, %v724_v24  ;;  %v780_v22 = vld [vmem:[%s1470_s0 + $0x10] sm:$0x7] }
  0xf2   :  { %978 = vst [vmem:[%s1471_s5 + $0x18] sm:$0xff] %v1051_v23  ;;  %v751_v38 = vadd.f32 %v1344_v5, %v726_v25  ;;  %v767_v42 = vmax.f32 %v748_v28, 0.0  ;;  %v859_v32 = vrot.slane %v780_v22, %v1350_v6 }
  0xf3   :  { %v769_v43 = vmax.f32 %v750_v30, 0.0  ;;  %v768_v44 = vmax.f32 %v749_v36, 0.0  ;;  %v851_v30 = vrot.slane %v780_v22, %v1347_v3 }
  0xf4   :  { %v770_v45 = vmax.f32 %v751_v38, 0.0  ;;  %v887_v46 = vmul.f32 %v819_v29, %v767_v42 }
  0xf5   :  { %v889_v47 = vmul.f32 %v827_v31, %v769_v43  ;;  %v888_v48 = vmul.f32 %v823_v37, %v768_v44  ;;  %v580_v50 = vpop.f32.mrb[12].mxu0  ;;  %v855_v37 = vrot.slane %v780_v22, %v1356_v10 }
  0xf6   :  { %v890_v49 = vmul.f32 %v831_v39, %v770_v45  ;;  %v621_v51 = vpop.f32.mrb[12].mxu1  ;;  %v727_v52 = vmul.f32 %v1340_v2, %v580_v50  ;;  %v582_v54 = vpop.f32.mrb[13].mxu0 }
  0xf7   :  { %v729_v53 = vmul.f32 %v1340_v2, %v621_v51  ;;  %v623_v55 = vpop.f32.mrb[13].mxu1  ;;  %v1052_v56 = vpack.c.bf16 %v888_v48, %v887_v46  ;;  %v728_v11 = vmul.f32 %v1340_v2, %v582_v54  ;;  %v584_v59 = vpop.f32.mrb[14].mxu0 }
  0xf8   :  { %v1053_v57 = vpack.c.bf16 %v890_v49, %v889_v47  ;;  %v730_v58 = vmul.f32 %v1340_v2, %v623_v55  ;;  %v625_v60 = vpop.f32.mrb[14].mxu1  ;;  %v752_v61 = vadd.f32 %v1344_v5, %v727_v52  ;;  %v585_v1 = vpop.f32.mrb[15].mxu0 }
  0xf9   :  { %v754_v63 = vadd.f32 %v1344_v5, %v729_v53  ;;  %v626_v7 = vpop.f32.mrb[15].mxu1  ;;  %979 = vst [vmem:[%s1471_s5 + $0x20] sm:$0xff] %v1052_v56  ;;  %v753_v8 = vadd.f32 %v1344_v5, %v728_v11 }
  0xfa   :  { %980 = vst [vmem:[%s1471_s5 + $0x28] sm:$0xff] %v1053_v57  ;;  %v755_v12 = vadd.f32 %v1344_v5, %v730_v58  ;;  %v771_v13 = vmax.f32 %v752_v61, 0.0 }
  0xfb   :  { %v773_v14 = vmax.f32 %v754_v63, 0.0  ;;  %v772_v15 = vmax.f32 %v753_v8, 0.0 }
  0xfc   :  { %v774_v16 = vmax.f32 %v755_v12, 0.0  ;;  %v891_v17 = vmul.f32 %v835_v62, %v771_v13 }
  0xfd   :  { %v893_v18 = vmul.f32 %v843_v0, %v773_v14  ;;  %v892_v19 = vmul.f32 %v839_v34, %v772_v15  ;;  %v662_v21 = vpop.f32.mrb[16].mxu0 }
  0xfe   :  { %v894_v20 = vmul.f32 %v847_v35, %v774_v16  ;;  %v703_v23 = vpop.f32.mrb[16].mxu1  ;;  %v731_v40 = vmul.f32 %v1340_v2, %v662_v21  ;;  %v664_v4 = vpop.f32.mrb[17].mxu0 }
  0xff   :  { %v733_v24 = vmul.f32 %v1340_v2, %v703_v23  ;;  %v1067_v41 = vpop.f32.mrb[17].mxu1  ;;  %v1054_v9 = vpack.c.bf16 %v892_v19, %v891_v17  ;;  %v732_v26 = vmul.f32 %v1340_v2, %v664_v4  ;;  %v666_v27 = vpop.f32.mrb[18].mxu0 }
 0x100   :  { %v1055_v25 = vpack.c.bf16 %v894_v20, %v893_v18  ;;  %v706_v28 = vpop.f32.mrb[18].mxu1  ;;  %v756_v29 = vadd.f32 %v1344_v5, %v731_v40  ;;  %v667_v33 = vpop.f32.mrb[19].mxu0 }
 0x101   :  { %v758_v31 = vadd.f32 %v1344_v5, %v733_v24  ;;  %v1068_v36 = vpop.f32.mrb[19].mxu1  ;;  %981 = vst [vmem:[%s1471_s5 + $0x30] sm:$0xff] %v1054_v9  ;;  %v757_v2 = vadd.f32 %v1344_v5, %v732_v26 }
 0x102   :  { %982 = vst [vmem:[%s1471_s5 + $0x38] sm:$0xff] %v1055_v25  ;;  %v775_v38 = vmax.f32 %v756_v29, 0.0 }
 0x103   :  { %v777_v3 = vmax.f32 %v758_v31, 0.0  ;;  %v776_v39 = vmax.f32 %v757_v2, 0.0 }
 0x104   :  { %v895_v42 = vmul.f32 %v851_v30, %v775_v38 }
 0x105   :  { %v897_v43 = vmul.f32 %v859_v32, %v777_v3  ;;  %v896_v6 = vmul.f32 %v855_v37, %v776_v39 }
 0x107   :  { %v1057_v44 = vpack.c.bf16 %v897_v43, %v897_v43  ;;  %v1056_v45 = vpack.c.bf16 %v896_v6, %v895_v42 }
 0x109   :  { %985 = vst.msk [vmem:[%s1471_s5 + $0x48] sm:$0xf] %vm984_vm4, %v1057_v44  ;;  %983 = vst [vmem:[%s1471_s5 + $0x40] sm:$0xff] %v1056_v45 }

// kernel: _lambda_.6
= control target key start
LH: loop header
LB: loop body
LE: loop exit
PB: predicated region body
PF: predicated region fallthrough
CT: control target
= control target key end

     0   :  { %v10362_v1 = vmov 0   ;;  %vm572_vm0 = vcmask 1043456   ;;  %vm568_vm1 = vcmask 588800   ;;  %vm8167_vm2 = vmmov 0   ;;  %s8168_s25 = smov 120   ;;  %s8169_s27 = smov 34   ;;  %s10347_s1 = inlined_call_operand.vmem [shape: bf16[72,2312], index: 1, kind: input, shape index: {}]   ;;  %s10348_s2 = inlined_call_operand.vmem [shape: bf16[8,72], index: 2, kind: input, shape index: {}]   ;;  %s10349_s3 = inlined_call_operand.vmem [shape: f32[8,1], index: 3, kind: input, shape index: {}]   ;;  %s10350_s4 = inlined_call_operand.vmem [shape: f32[8,1], index: 4, kind: input, shape index: {}]   ;;  %s10351_s5 = inlined_call_operand.vmem [shape: bf16[8,72], index: 5, kind: input, shape index: {}]   ;;  %s10352_s0 = inlined_call_operand.vmem [shape: f32[1,2312], index: 0, kind: input, shape index: {}]   ;;  %s10353_s6 = inlined_call_operand.vmem [shape: f32[8,1], index: 6, kind: input, shape index: {}]   ;;  %s10354_s7 = inlined_call_operand.vmem [shape: f32[8,1], index: 7, kind: input, shape index: {}]   ;;  %s10355_s8 = inlined_call_operand.vmem [shape: bf16[8,2312], index: 8, kind: input, shape index: {}]   ;;  %s10356_s10 = inlined_call_operand.vmem [shape: f32[8,1], index: 10, kind: input, shape index: {}]   ;;  %s10357_s11 = inlined_call_operand.vmem [shape: f32[8,1], index: 11, kind: input, shape index: {}]   ;;  %s10358_s9 = inlined_call_operand.vmem [shape: bf16[8,8], index: 9, kind: input, shape index: {}]   ;;  %s10359_s12 = inlined_call_operand.vmem [shape: bf16[8,2312], index: 12, kind: output, shape index: {}]  }
   0x1   :  { %v7973_v0 = vld [vmem:[%s10347_s1 + $0x4] ss:$76 sps:$4 sm:$0xff]   ;;  %662 = vmatprep.mubr.bf16.mxu0 %v10362_v1  ;;  %1225 = vst [vmem:[#allocation2] sm:$0xff] %v10362_v1  ;;  %1226 = vst [vmem:[#allocation2 + $0x8] sm:$0xff] %v10362_v1  ;;  %703 = vmatprep.mubr.bf16.mxu1 %v10362_v1  ;;  %v7975_v2 = vld [vmem:[%s10347_s1 + $0xc] ss:$76 sps:$4 sm:$0xff]  }
   0x2   :  { %1227 = vst [vmem:[#allocation2 + $0x10] sm:$0xff] %v10362_v1  ;;  %1228 = vst [vmem:[#allocation2 + $0x18] sm:$0xff] %v10362_v1  ;;  %7971 = vset.pattern.permute.xlu0 %v10362_v1  ;;  %7972 = vset.pattern.permute.xlu1 %v10362_v1  ;;  %v7977_v3 = vld [vmem:[%s10347_s1] ss:$76 sps:$4 sm:$0xff]   ;;  %v7978_v4 = vld [vmem:[%s10347_s1 + $0x8] ss:$76 sps:$4 sm:$0xff]  }
   0x3   :  { %1229 = vst [vmem:[#allocation2 + $0x20] sm:$0xff] %v10362_v1  ;;  %1230 = vst [vmem:[#allocation2 + $0x28] sm:$0xff] %v10362_v1  ;;  %630 = vmatprep.subr.bf16.mxu0 %v7973_v0  ;;  %671 = vmatprep.subr.bf16.mxu1 %v7975_v2  ;;  %v7979_v5 = vld [vmem:[%s10347_s1 + $0x9c] ss:$76 sps:$4 sm:$0xff]   ;;  %v7981_v6 = vld [vmem:[%s10347_s1 + $0xa4] ss:$76 sps:$4 sm:$0xff]  }
   0x4   :  { %1231 = vst [vmem:[#allocation2 + $0x30] sm:$0xff] %v10362_v1  ;;  %1232 = vst [vmem:[#allocation2 + $0x38] sm:$0xff] %v10362_v1  ;;  %631 = vmatpush1.bf16.msra.mxu0 %v7977_v3  ;;  %672 = vmatpush1.bf16.msra.mxu1 %v7978_v4  ;;  %v7983_v7 = vld [vmem:[%s10347_s1 + $0x98] ss:$76 sps:$4 sm:$0xff]   ;;  %v7984_v8 = vld [vmem:[%s10347_s1 + $0xa0] ss:$76 sps:$4 sm:$0xff]  }
   0x5   :  { %1233 = vst [vmem:[#allocation2 + $0x40] sm:$0xff] %v10362_v1  ;;  %1234 = vst [vmem:[#allocation2 + $0x48] sm:$0xff] %v10362_v1  ;;  %632 = vmatprep.subr.bf16.mxu0 %v7979_v5  ;;  %673 = vmatprep.subr.bf16.mxu1 %v7981_v6  ;;  %v7985_v9 = vld [vmem:[%s10347_s1 + $0x134] ss:$76 sps:$4 sm:$0xff]   ;;  %v7987_v10 = vld [vmem:[%s10347_s1 + $0x13c] ss:$76 sps:$4 sm:$0xff]  }
   0x6   :  { %v7989_v11 = vld [vmem:[%s10347_s1 + $0x130] ss:$76 sps:$4 sm:$0xff]   ;;  %v7990_v12 = vld [vmem:[%s10347_s1 + $0x138] ss:$76 sps:$4 sm:$0xff]   ;;  %v7993_v14 = vld [vmem:[%s10347_s1 + $0x1d4] ss:$76 sps:$4 sm:$0xff]  }
   0x7   :  { %v7991_v13 = vld [vmem:[%s10347_s1 + $0x1cc] ss:$76 sps:$4 sm:$0xff]   ;;  %v126_v15 = vld [vmem:[%s10347_s1 + $0x260] sm:$0xff]  ;;  %v7995_v17 = vld [vmem:[%s10347_s1 + $0x1c8] ss:$76 sps:$4 sm:$0xff]   ;;  %vm1235_vm3 = vcmask 60416  }
   0x8   :  { %633 = vmatpush1.bf16.msra.mxu0 %v7983_v7  ;;  %674 = vmatpush1.bf16.msra.mxu1 %v7984_v8  ;;  %v127_v16 = vld [vmem:[%s10347_s1 + $0x268] sm:$0xff]  ;;  %v7996_v18 = vld [vmem:[%s10347_s1 + $0x1d0] ss:$76 sps:$4 sm:$0xff]   ;;  %v7187_v19 = vcombine.high %v126_v15, %v126_v15  ;;  %v7186_v21 = vcombine.low %v126_v15, %v126_v15  ;;  %v8003_v23 = vld [vmem:[%s10347_s1 + $0x14] ss:$76 sps:$4 sm:$0xff]   ;;  %vm1426_vm4 = vcmask 277504  }
   0x9   :  { %634 = vmatprep.subr.bf16.mxu0 %v7985_v9  ;;  %675 = vmatprep.subr.bf16.mxu1 %v7987_v10  ;;  %v7189_v20 = vcombine.high %v127_v16, %v127_v16  ;;  %v7188_v22 = vcombine.low %v127_v16, %v127_v16  ;;  %v8006_v26 = vld [vmem:[%s10347_s1 + $0x1c] ss:$76 sps:$4 sm:$0xff]   ;;  %v8330_v27 = vld [vmem:[%s10348_s2] sm:$0xf]  ;;  %v8004_v29 = vld [vmem:[%s10347_s1 + $0x18] ss:$76 sps:$4 sm:$0xff]  }
   0xa   :  { %v574_v24 = vsel %vm572_vm0, %v7186_v21, 0  ;;  %v8001_v28 = vld [vmem:[%s10347_s1 + $0x10] ss:$76 sps:$4 sm:$0xff]   ;;  %v8009_v30 = vld [vmem:[%s10347_s1 + $0xac] ss:$76 sps:$4 sm:$0xff]   ;;  %v130_v0 = vld [vmem:[%s10347_s1 + $0x280] sm:$0xff] }
   0xb   :  { %v580_v25 = vsel %vm572_vm0, %v7188_v22, 0  ;;  %v8012_v31 = vld [vmem:[%s10347_s1 + $0xb4] ss:$76 sps:$4 sm:$0xff]   ;;  %v8010_v33 = vld [vmem:[%s10347_s1 + $0xb0] ss:$76 sps:$4 sm:$0xff]   ;;  %v131_v2 = vld [vmem:[%s10347_s1 + $0x288] sm:$0xff]  ;;  %v7195_v5 = vcombine.high %v130_v0, %v130_v0  ;;  %v7194_v7 = vcombine.low %v130_v0, %v130_v0 }
   0xc   :  { %635 = vmatpush1.bf16.msra.mxu0 %v7989_v11  ;;  %676 = vmatpush1.bf16.msra.mxu1 %v7990_v12  ;;  %v8007_v32 = vld [vmem:[%s10347_s1 + $0xa8] ss:$76 sps:$4 sm:$0xff]   ;;  %v8015_v34 = vld [vmem:[%s10347_s1 + $0x144] ss:$76 sps:$4 sm:$0xff]   ;;  %v8018_v35 = vld [vmem:[%s10347_s1 + $0x14c] ss:$76 sps:$4 sm:$0xff]   ;;  %v7197_v6 = vcombine.high %v131_v2, %v131_v2  ;;  %v7196_v8 = vcombine.low %v131_v2, %v131_v2 }
   0xd   :  { %636 = vmatprep.subr.bf16.mxu0 %v7991_v13  ;;  %677 = vmatprep.subr.bf16.mxu1 %v7993_v14  ;;  %v8013_v36 = vld [vmem:[%s10347_s1 + $0x140] ss:$76 sps:$4 sm:$0xff]   ;;  %v8016_v37 = vld [vmem:[%s10347_s1 + $0x148] ss:$76 sps:$4 sm:$0xff]   ;;  %v8024_v39 = vld [vmem:[%s10347_s1 + $0x1e4] ss:$76 sps:$4 sm:$0xff]  }
   0xe   :  { %v8021_v38 = vld [vmem:[%s10347_s1 + $0x1dc] ss:$76 sps:$4 sm:$0xff]   ;;  %v128_v40 = vld [vmem:[%s10347_s1 + $0x270] sm:$0xff]  ;;  %v8019_v42 = vld [vmem:[%s10347_s1 + $0x1d8] ss:$76 sps:$4 sm:$0xff]   ;;  %v598_v10 = vsel %vm572_vm0, %v7194_v7, 0 }
   0xf   :  { %v129_v41 = vld [vmem:[%s10347_s1 + $0x278] sm:$0xff]  ;;  %v8022_v43 = vld [vmem:[%s10347_s1 + $0x1e0] ss:$76 sps:$4 sm:$0xff]   ;;  %v7191_v44 = vcombine.high %v128_v40, %v128_v40  ;;  %v7190_v46 = vcombine.low %v128_v40, %v128_v40  ;;  %v8031_v48 = vld [vmem:[%s10347_s1 + $0x24] ss:$76 sps:$4 sm:$0xff]   ;;  %v604_v11 = vsel %vm572_vm0, %v7196_v8, 0 }
  0x10   :  { %637 = vmatpush1.bf16.msra.mxu0 %v7995_v17  ;;  %678 = vmatpush1.bf16.msra.mxu1 %v7996_v18  ;;  %v7193_v45 = vcombine.high %v129_v41, %v129_v41  ;;  %v7192_v47 = vcombine.low %v129_v41, %v129_v41  ;;  %v8034_v51 = vld [vmem:[%s10347_s1 + $0x2c] ss:$76 sps:$4 sm:$0xff]   ;;  %v8032_v53 = vld [vmem:[%s10347_s1 + $0x28] ss:$76 sps:$4 sm:$0xff]   ;;  %v8040_v55 = vld [vmem:[%s10347_s1 + $0xc4] ss:$76 sps:$4 sm:$0xff]  }
  0x11   :  { %7205 = vmatprep.subr.msk.bf16.mxu0 %vm572_vm0, %v7187_v19  ;;  %7207 = vmatprep.subr.msk.bf16.mxu1 %vm572_vm0, %v7189_v20  ;;  %v586_v49 = vsel %vm572_vm0, %v7190_v46, 0  ;;  %v8029_v52 = vld [vmem:[%s10347_s1 + $0x20] ss:$76 sps:$4 sm:$0xff]   ;;  %v8037_v54 = vld [vmem:[%s10347_s1 + $0xbc] ss:$76 sps:$4 sm:$0xff]   ;;  %v10360_v41 = vmov 0.0  }
  0x12   :  { %v592_v50 = vsel %vm572_vm0, %v7192_v47, 0  ;;  %v8035_v56 = vld [vmem:[%s10347_s1 + $0xb8] ss:$76 sps:$4 sm:$0xff]   ;;  %v8038_v57 = vld [vmem:[%s10347_s1 + $0xc0] ss:$76 sps:$4 sm:$0xff]   ;;  %vm1445_vm5 = vcmask 64512  }
  0x13   :  { %v8043_v58 = vld [vmem:[%s10347_s1 + $0x154] ss:$76 sps:$4 sm:$0xff]   ;;  %v8046_v59 = vld [vmem:[%s10347_s1 + $0x15c] ss:$76 sps:$4 sm:$0xff]   ;;  %v8044_v61 = vld [vmem:[%s10347_s1 + $0x158] ss:$76 sps:$4 sm:$0xff]  }
  0x14   :  { %639 = vmatpush1.bf16.msra.mxu0 %v574_v24  ;;  %680 = vmatpush1.bf16.msra.mxu1 %v580_v25  ;;  %v8041_v60 = vld [vmem:[%s10347_s1 + $0x150] ss:$76 sps:$4 sm:$0xff]   ;;  %v8049_v62 = vld [vmem:[%s10347_s1 + $0x1ec] ss:$76 sps:$4 sm:$0xff]   ;;  %v8052_v63 = vld [vmem:[%s10347_s1 + $0x1f4] ss:$76 sps:$4 sm:$0xff]  }
  0x15   :  { %712 = vmatprep.subr.bf16.mxu0 %v8003_v23  ;;  %753 = vmatprep.subr.bf16.mxu1 %v8006_v26  ;;  %v8047_v3 = vld [vmem:[%s10347_s1 + $0x1e8] ss:$76 sps:$4 sm:$0xff]   ;;  %v8050_v4 = vld [vmem:[%s10347_s1 + $0x1f0] ss:$76 sps:$4 sm:$0xff]   ;;  %v1039_v9 = vld [vmem:[%s10349_s3] sm:$0xff]  ;;  %s8171_s14 = smov 33  }
  0x16   :  { %v8059_v12 = vld [vmem:[%s10347_s1 + $0x34] ss:$76 sps:$4 sm:$0xff]   ;;  %v8062_v13 = vld [vmem:[%s10347_s1 + $0x3c] ss:$76 sps:$4 sm:$0xff]   ;;  %1042 = vperm.xlu0 %7971, %v1039_v9   ;;  %v8060_v16 = vld [vmem:[%s10347_s1 + $0x38] ss:$76 sps:$4 sm:$0xff]  }
  0x17   :  { %7206 = vmatmul.mubr.msk.bf16.vlgmr.msra.gmra.mrb[0].mxu0 %vm568_vm1, %v8330_v27  ;;  %7208 = vmatmul.mubr.msk.bf16.vlgmr.msra.gmra.mrb[0].mxu1 %vm568_vm1, %v8330_v27  ;;  %v1064_v14 = vld [vmem:[%s10350_s4] sm:$0xff]  ;;  %v8057_v15 = vld [vmem:[%s10347_s1 + $0x30] ss:$76 sps:$4 sm:$0xff]   ;;  %v8065_v17 = vld [vmem:[%s10347_s1 + $0xcc] ss:$76 sps:$4 sm:$0xff]   ;;  %s8172_s15 = smov 112  }
  0x18   :  { %713 = vmatpush1.bf16.msra.mxu0 %v8001_v28  ;;  %754 = vmatpush1.bf16.msra.mxu1 %v8004_v29  ;;  %v8068_v18 = vld [vmem:[%s10347_s1 + $0xd4] ss:$76 sps:$4 sm:$0xff]   ;;  %v8066_v20 = vld [vmem:[%s10347_s1 + $0xd0] ss:$76 sps:$4 sm:$0xff]   ;;  %v8074_v22 = vld [vmem:[%s10347_s1 + $0x16c] ss:$76 sps:$4 sm:$0xff]  }
  0x19   :  { %714 = vmatprep.subr.bf16.mxu0 %v8009_v30  ;;  %755 = vmatprep.subr.bf16.mxu1 %v8012_v31  ;;  %v8063_v19 = vld [vmem:[%s10347_s1 + $0xc8] ss:$76 sps:$4 sm:$0xff]   ;;  %v8071_v21 = vld [vmem:[%s10347_s1 + $0x164] ss:$76 sps:$4 sm:$0xff]   ;;  %v8069_v23 = vld [vmem:[%s10347_s1 + $0x160] ss:$76 sps:$4 sm:$0xff]  }
  0x1a   :  { %744 = vmatprep.mubr.bf16.mxu0 %v10362_v1  ;;  %785 = vmatprep.mubr.bf16.mxu1 %v10362_v1  ;;  %v8072_v24 = vld [vmem:[%s10347_s1 + $0x168] ss:$76 sps:$4 sm:$0xff]   ;;  %v8080_v26 = vld [vmem:[%s10347_s1 + $0x204] ss:$76 sps:$4 sm:$0xff]   ;;  %v133_v29 = vld [vmem:[%s10347_s1 + $0x298] sm:$0xff]  ;;  %s8173_s4 = smov 1  }
  0x1b   :  { %1067 = vperm.xlu0 %7971, %v1064_v14   ;;  %v8077_v25 = vld [vmem:[%s10347_s1 + $0x1fc] ss:$76 sps:$4 sm:$0xff]   ;;  %v132_v28 = vld [vmem:[%s10347_s1 + $0x290] sm:$0xff]  ;;  %v8075_v30 = vld [vmem:[%s10347_s1 + $0x1f8] ss:$76 sps:$4 sm:$0xff]   ;;  %s8174_s2 = smov 104  }
  0x1c   :  { %715 = vmatpush1.bf16.msra.mxu0 %v8007_v32  ;;  %756 = vmatpush1.bf16.msra.mxu1 %v8010_v33  ;;  %v8078_v31 = vld [vmem:[%s10347_s1 + $0x200] ss:$76 sps:$4 sm:$0xff]   ;;  %v7199_v32 = vcombine.high %v132_v28, %v132_v28  ;;  %v7201_v33 = vcombine.high %v133_v29, %v133_v29  ;;  %v8088_v40 = vld [vmem:[%s10347_s1 + $0x48] ss:$76 sps:$4 sm:$0xff]   ;;  %v8093_v46 = vld [vmem:[%s10347_s1 + $0x170] ss:$76 sps:$4 sm:$0xff]  }
  0x1d   :  { %716 = vmatprep.subr.bf16.mxu0 %v8015_v34  ;;  %757 = vmatprep.subr.bf16.mxu1 %v8018_v35  ;;  %v7198_v34 = vcombine.low %v132_v28, %v132_v28  ;;  %v7200_v35 = vcombine.low %v133_v29, %v133_v29  ;;  %v8096_v47 = vld [vmem:[%s10347_s1 + $0x178] ss:$76 sps:$4 sm:$0xff]   ;;  %vm1953_vm6 = vcmask 285696   ;;  %s8175_s16 = smov 96   ;;  %s8176_s17 = smov 127   ;;  %vm2481_vm7 = vcmask 269312  }
  0x1e   :  { %s8177_s18 = smov 88   ;;  %s8178_s21 = smov 95   ;;  %vm3090_vm8 = vcmask 7168   ;;  %vm4186_vm9 = vcmask 1039360   ;;  %vm4733_vm10 = vcmask 777216   ;;  %vm5280_vm11 = vcmask 769024  }
  0x1f   :  { %s8180_s22 = smov 94   ;;  %s8181_s23 = smov 72   ;;  %vm5827_vm12 = vcmask 760832  }
  0x20   :  { %717 = vmatpush1.bf16.msra.mxu0 %v8013_v36  ;;  %758 = vmatpush1.bf16.msra.mxu1 %v8016_v37  ;;  %v610_v36 = vsel %vm572_vm0, %v7198_v34, 0  ;;  %v616_v37 = vsel %vm572_vm0, %v7200_v35, 0  ;;  %s8183_s24 = smov 64  }
  0x21   :  { %718 = vmatprep.subr.bf16.mxu0 %v8021_v38  ;;  %759 = vmatprep.subr.bf16.mxu1 %v8024_v39  ;;  %v8087_v38 = vld [vmem:[%s10347_s1 + $0x44] ss:$76 sps:$4 sm:$0xff]   ;;  %v8085_v39 = vld [vmem:[%s10347_s1 + $0x40] ss:$76 sps:$4 sm:$0xff]  }
  0x24   :  { %719 = vmatpush1.bf16.msra.mxu0 %v8019_v42  ;;  %760 = vmatpush1.bf16.msra.mxu1 %v8022_v43  ;;  %v8091_v42 = vld [vmem:[%s10347_s1 + $0xdc] ss:$76 sps:$4 sm:$0xff]   ;;  %v8089_v43 = vld [vmem:[%s10347_s1 + $0xd8] ss:$76 sps:$4 sm:$0xff]  }
  0x25   :  { %7209 = vmatprep.subr.msk.bf16.mxu0 %vm572_vm0, %v7191_v44  ;;  %7211 = vmatprep.subr.msk.bf16.mxu1 %vm572_vm0, %v7193_v45  ;;  %v8092_v44 = vld [vmem:[%s10347_s1 + $0xe0] ss:$76 sps:$4 sm:$0xff]  }
  0x26   :  { %v8095_v45 = vld [vmem:[%s10347_s1 + $0x174] ss:$76 sps:$4 sm:$0xff]  }
  0x28   :  { %721 = vmatpush1.bf16.msra.mxu0 %v586_v49  ;;  %762 = vmatpush1.bf16.msra.mxu1 %v592_v50  ;;  %v134_v49 = vld [vmem:[%s10347_s1 + $0x2a0] sm:$0xff]  ;;  %v8097_v50 = vld [vmem:[%s10347_s1 + $0x208] ss:$76 sps:$4 sm:$0xff]  }
  0x29   :  { %794 = vmatprep.subr.bf16.mxu0 %v8031_v48  ;;  %835 = vmatprep.subr.bf16.mxu1 %v8034_v51  ;;  %v8099_v48 = vld [vmem:[%s10347_s1 + $0x20c] ss:$76 sps:$4 sm:$0xff]   ;;  %v8100_v51 = vld [vmem:[%s10347_s1 + $0x210] ss:$76 sps:$4 sm:$0xff]  }
  0x2b   :  { %7210 = vmatmul.mubr.msk.bf16.vlgmr.msra.gmra.mrb[4].mxu0 %vm568_vm1, %v8330_v27  ;;  %7212 = vmatmul.mubr.msk.bf16.vlgmr.msra.gmra.mrb[4].mxu1 %vm568_vm1, %v8330_v27 }
  0x2c   :  { %795 = vmatpush1.bf16.msra.mxu0 %v8029_v52  ;;  %836 = vmatpush1.bf16.msra.mxu1 %v8032_v53  ;;  %v7203_v52 = vcombine.high %v134_v49, %v134_v49  ;;  %v7202_v53 = vcombine.low %v134_v49, %v134_v49 }
  0x2d   :  { %796 = vmatprep.subr.bf16.mxu0 %v8037_v54  ;;  %837 = vmatprep.subr.bf16.mxu1 %v8040_v55  ;;  %v8103_v54 = vld [vmem:[%s10347_s1 + $0x2a8] ss:$0 sps:$4 sm:$0xff]   ;;  %s8182_s1 = smov 93  }
  0x2e   :  { %826 = vmatprep.mubr.bf16.mxu0 %v10362_v1  ;;  %867 = vmatprep.mubr.bf16.mxu1 %v10362_v1  ;;  %v622_v55 = vsel %vm572_vm0, %v7202_v53, 0 }
  0x30   :  { %797 = vmatpush1.bf16.msra.mxu0 %v8035_v56  ;;  %838 = vmatpush1.bf16.msra.mxu1 %v8038_v57  ;;  %v628_v56 = vsel %vm572_vm0, %v8103_v54, 0  ;;  %v8590_v57 = vld [vmem:[%s10351_s5] sm:$0xf] }
  0x31   :  { %798 = vmatprep.subr.bf16.mxu0 %v8043_v58  ;;  %839 = vmatprep.subr.bf16.mxu1 %v8046_v59  ;;  %v8594_v58 = vcombine.low %v8590_v57, %v8590_v57  ;;  %v1111_v59 = vlaneseq }
  0x33   :  { %1338 = vrot.lane.b32.xlu1 %v8594_v58, %s8168_s25 }
  0x34   :  { %799 = vmatpush1.bf16.msra.mxu0 %v8041_v60  ;;  %840 = vmatpush1.bf16.msra.mxu1 %v8044_v61 }
  0x35   :  { %800 = vmatprep.subr.bf16.mxu0 %v8049_v62  ;;  %841 = vmatprep.subr.bf16.mxu1 %v8052_v63 }
  0x38   :  { %801 = vmatpush1.bf16.msra.mxu0 %v8047_v3  ;;  %842 = vmatpush1.bf16.msra.mxu1 %v8050_v4  ;;  %v8612_v3 = vld [vmem:[%s10352_s0] sm:$0xff] }
  0x39   :  { %7213 = vmatprep.subr.msk.bf16.mxu0 %vm572_vm0, %v7195_v5  ;;  %7215 = vmatprep.subr.msk.bf16.mxu1 %vm572_vm0, %v7197_v6 }
  0x3c   :  { %803 = vmatpush1.bf16.msra.mxu0 %v598_v10  ;;  %844 = vmatpush1.bf16.msra.mxu1 %v604_v11 }
  0x3d   :  { %876 = vmatprep.subr.bf16.mxu0 %v8059_v12  ;;  %917 = vmatprep.subr.bf16.mxu1 %v8062_v13 }
  0x3f   :  { %7214 = vmatmul.mubr.msk.bf16.vlgmr.msra.gmra.mrb[8].mxu0 %vm568_vm1, %v8330_v27  ;;  %7216 = vmatmul.mubr.msk.bf16.vlgmr.msra.gmra.mrb[8].mxu1 %vm568_vm1, %v8330_v27 }
  0x40   :  { %877 = vmatpush1.bf16.msra.mxu0 %v8057_v15  ;;  %918 = vmatpush1.bf16.msra.mxu1 %v8060_v16 }
  0x41   :  { %878 = vmatprep.subr.bf16.mxu0 %v8065_v17  ;;  %919 = vmatprep.subr.bf16.mxu1 %v8068_v18 }
  0x42   :  { %908 = vmatprep.mubr.bf16.mxu0 %v10362_v1  ;;  %949 = vmatprep.mubr.bf16.mxu1 %v10362_v1 }
  0x44   :  { %879 = vmatpush1.bf16.msra.mxu0 %v8063_v19  ;;  %920 = vmatpush1.bf16.msra.mxu1 %v8066_v20 }
  0x45   :  { %880 = vmatprep.subr.bf16.mxu0 %v8071_v21  ;;  %921 = vmatprep.subr.bf16.mxu1 %v8074_v22 }
  0x48   :  { %881 = vmatpush1.bf16.msra.mxu0 %v8069_v23  ;;  %922 = vmatpush1.bf16.msra.mxu1 %v8072_v24 }
  0x49   :  { %882 = vmatprep.subr.bf16.mxu0 %v8077_v25  ;;  %923 = vmatprep.subr.bf16.mxu1 %v8080_v26 }
  0x4c   :  { %883 = vmatpush1.bf16.msra.mxu0 %v8075_v30  ;;  %924 = vmatpush1.bf16.msra.mxu1 %v8078_v31 }
  0x4d   :  { %7217 = vmatprep.subr.msk.bf16.mxu0 %vm572_vm0, %v7199_v32  ;;  %7219 = vmatprep.subr.msk.bf16.mxu1 %vm572_vm0, %v7201_v33 }
  0x50   :  { %885 = vmatpush1.bf16.msra.mxu0 %v610_v36  ;;  %926 = vmatpush1.bf16.msra.mxu1 %v616_v37 }
  0x51   :  { %958 = vmatprep.subr.bf16.mxu0 %v8087_v38  ;;  %7558 = vmatprep.subr.bf16.mxu1 %v10360_v41 }
  0x53   :  { %7218 = vmatmul.mubr.msk.bf16.vlgmr.msra.gmra.mrb[12].mxu0 %vm568_vm1, %v8330_v27  ;;  %7220 = vmatmul.mubr.msk.bf16.vlgmr.msra.gmra.mrb[12].mxu1 %vm568_vm1, %v8330_v27 }
  0x54   :  { %959 = vmatpush1.bf16.msra.mxu0 %v8085_v39  ;;  %7559 = vmatpush3.bf16.msra.mxu1 %v8088_v40 }
  0x55   :  { %960 = vmatprep.subr.bf16.mxu0 %v8091_v42  ;;  %7560 = vmatprep.subr.bf16.mxu1 %v10360_v41 }
  0x56   :  { %990 = vmatprep.mubr.bf16.mxu0 %v10362_v1  ;;  %7568 = vmatprep.mubr.msk.bf16.mxu1 %vm8167_vm2, %v10360_v41 }
  0x58   :  { %961 = vmatpush1.bf16.msra.mxu0 %v8089_v43  ;;  %7561 = vmatpush3.bf16.msra.mxu1 %v8092_v44 }
  0x59   :  { %962 = vmatprep.subr.bf16.mxu0 %v8095_v45  ;;  %7562 = vmatprep.subr.bf16.mxu1 %v10360_v41 }
  0x5c   :  { %963 = vmatpush1.bf16.msra.mxu0 %v8093_v46  ;;  %7563 = vmatpush3.bf16.msra.mxu1 %v8096_v47 }
  0x5d   :  { %964 = vmatprep.subr.bf16.mxu0 %v8099_v48  ;;  %7564 = vmatprep.subr.bf16.mxu1 %v10360_v41 }
  0x60   :  { %965 = vmatpush1.bf16.msra.mxu0 %v8097_v50  ;;  %7565 = vmatpush3.bf16.msra.mxu1 %v8100_v51 }
  0x61   :  { %7221 = vmatprep.subr.msk.bf16.mxu0 %vm572_vm0, %v7203_v52  ;;  %7566 = vmatprep.subr.bf16.mxu1 %v10360_v41 }
  0x64   :  { %967 = vmatpush1.bf16.msra.mxu0 %v622_v55  ;;  %7567 = vmatpush3.bf16.msra.mxu1 %v628_v56 }
  0x67   :  { %7222 = vmatmul.mubr.msk.bf16.vlgmr.msra.gmra.mrb[16].mxu0 %vm568_vm1, %v8330_v27  ;;  %7569 = vmatmul.mubr.msk.bf16.vlgmr.msra.gmra.mrb[16].mxu1 %vm568_vm1, %v8330_v27  ;;  %v8599_v27 = vshrl.u32 %v1111_v59, 7 }
  0x68   :  { %1538 = vmatprep.mubr.bf16.mxu0 %v10362_v1  ;;  %1579 = vmatprep.mubr.bf16.mxu1 %v10362_v1 }
  0x69   :  { %v8604_v62 = vsub.s32 0, %v8599_v27  ;;  %v8607_v63 = vsub.s32 2, %v8599_v27  ;;  %v8615_v4 = vsub.s32 1, %v8599_v27  ;;  %v1125_v5 = vsub.s32 3, %v8599_v27 }
  0x6a   :  { %v1129_v35 = vsub.s32 4, %v8599_v27  ;;  %v1137_v36 = vsub.s32 6, %v8599_v27  ;;  %v1133_v37 = vsub.s32 5, %v8599_v27  ;;  %v1141_v43 = vsub.s32 7, %v8599_v27 }
  0x6b   :  { %v8626_v18 = vrot.slane %v8612_v3, %v8604_v62  ;;  %v8630_v19 = vrot.slane %v8612_v3, %v8607_v63  ;;  %v8636_v22 = vrot.slane %v8612_v3, %v8615_v4  ;;  %v8641_v23 = vrot.slane %v8612_v3, %v1125_v5 }
  0x6c   :  { %v8672_v50 = vrot.slane %v8612_v3, %v1129_v35  ;;  %v8685_v59 = vrot.slane %v8612_v3, %v1137_v36 }
  0x95   :  { %v8597_v60 = vpop.permute.xlu0 %1042 }
  0x9a   :  { %v8601_v61 = vpop.permute.xlu0 %1067 }
  0xea   :  { %v664_v0 = vpop.f32.mrb[0].mxu0  ;;  %v705_v2 = vpop.f32.mrb[0].mxu1 }
  0xeb   :  { %v1045_v6 = vmul.f32 %v8597_v60, %v664_v0  ;;  %v1047_v7 = vmul.f32 %v8597_v60, %v705_v2  ;;  %v666_v8 = vpop.f32.mrb[1].mxu0  ;;  %v707_v9 = vpop.f32.mrb[1].mxu1  ;;  %v8690_v0 = vrot.slane %v8612_v3, %v1133_v37 }
  0xec   :  { %v1046_v10 = vmul.f32 %v8597_v60, %v666_v8  ;;  %v1048_v11 = vmul.f32 %v8597_v60, %v707_v9  ;;  %v668_v12 = vpop.f32.mrb[2].mxu0  ;;  %v709_v13 = vpop.f32.mrb[2].mxu1  ;;  %v8697_v9 = vrot.slane %v8612_v3, %v1141_v43 }
  0xed   :  { %v669_v14 = vpop.f32.mrb[3].mxu0  ;;  %v710_v15 = vpop.f32.mrb[3].mxu1  ;;  %v1070_v16 = vadd.f32 %v8601_v61, %v1045_v6  ;;  %v1072_v17 = vadd.f32 %v8601_v61, %v1047_v7 }
  0xee   :  { %v1071_v20 = vadd.f32 %v8601_v61, %v1046_v10  ;;  %v1073_v21 = vadd.f32 %v8601_v61, %v1048_v11 }
  0xef   :  { %v1089_v24 = vmax.f32 %v1070_v16, 0.0  ;;  %v1091_v25 = vmax.f32 %v1072_v17, 0.0 }
  0xf0   :  { %v1090_v26 = vmax.f32 %v1071_v20, 0.0  ;;  %v1092_v28 = vmax.f32 %v1073_v21, 0.0 }
  0xf1   :  { %v8644_v29 = vmul.f32 %v8626_v18, %v1089_v24  ;;  %v8647_v30 = vmul.f32 %v8630_v19, %v1091_v25  ;;  %v8726_v25 = vld [vmem:[%s10352_s0 + $0x8] sm:$0xff] }
  0xf2   :  { %v8650_v31 = vmul.f32 %v8636_v22, %v1090_v26  ;;  %v8653_v32 = vmul.f32 %v8641_v23, %v1092_v28 }
  0xf4   :  { %v7512_v33 = vpack.c.bf16 %v8650_v31, %v8644_v29  ;;  %v7513_v34 = vpack.c.bf16 %v8653_v32, %v8647_v30 }
  0xf6   :  { %1314 = vst [vmem:[#allocation2 + $0x4] sm:$0xff] %v7512_v33  ;;  %1315 = vst [vmem:[#allocation2 + $0xc] sm:$0xff] %v7513_v34 }
  0xfd   :  { %v1325_v38 = vld [vmem:[#allocation2 + $0x8] sm:$0xff]  ;;  %v1324_v39 = vld [vmem:[#allocation2] sm:$0xff] }
  0xfe   :  { %v746_v40 = vpop.f32.mrb[4].mxu0  ;;  %v787_v42 = vpop.f32.mrb[4].mxu1  ;;  %v8663_v44 = vcombine.low %v1325_v38, %v1325_v38  ;;  %v8665_v45 = vcombine.low %v1324_v39, %v1324_v39  ;;  %v8699_v10 = vcombine.high %v1324_v39, %v1324_v39  ;;  %v8715_v20 = vcombine.high %v1325_v38, %v1325_v38 }
  0xff   :  { %v1049_v46 = vmul.f32 %v8597_v60, %v746_v40  ;;  %v1051_v47 = vmul.f32 %v8597_v60, %v787_v42  ;;  %v748_v48 = vpop.f32.mrb[5].mxu0  ;;  %v789_v49 = vpop.f32.mrb[5].mxu1 }
 0x100   :  { %v1050_v51 = vmul.f32 %v8597_v60, %v748_v48  ;;  %v1052_v52 = vmul.f32 %v8597_v60, %v789_v49  ;;  %v750_v53 = vpop.f32.mrb[6].mxu0  ;;  %1392 = vrot.lane.b32.xlu0 %v8663_v44, %s8169_s27  ;;  %1388 = vrot.lane.b32.xlu1 %v8665_v45, %s8169_s27  ;;  %v791_v54 = vpop.f32.mrb[6].mxu1  ;;  %v8736_v48 = vrot.slane %v8726_v25, %v8604_v62 }
 0x101   :  { %v1074_v55 = vadd.f32 %v8601_v61, %v1049_v46  ;;  %v1076_v56 = vadd.f32 %v8601_v61, %v1051_v47  ;;  %v751_v2 = vpop.f32.mrb[7].mxu0  ;;  %v792_v6 = vpop.f32.mrb[7].mxu1 }
 0x102   :  { %v1075_v7 = vadd.f32 %v8601_v61, %v1050_v51  ;;  %v1077_v8 = vadd.f32 %v8601_v61, %v1052_v52  ;;  %v8752_v2 = vrot.slane %v8726_v25, %v8615_v4 }
 0x103   :  { %v1093_v11 = vmax.f32 %v1074_v55, 0.0  ;;  %v1095_v12 = vmax.f32 %v1076_v56, 0.0  ;;  %v8748_v56 = vrot.slane %v8726_v25, %v8607_v63 }
 0x104   :  { %v1094_v13 = vmax.f32 %v1075_v7, 0.0  ;;  %v1096_v14 = vmax.f32 %v1077_v8, 0.0  ;;  %1390 = vrot.lane.b32.xlu1 %v8699_v10, %s8169_s27 }
 0x105   :  { %v8704_v15 = vmul.f32 %v8672_v50, %v1093_v11  ;;  %v8707_v16 = vmul.f32 %v8685_v59, %v1095_v12  ;;  %v8759_v12 = vrot.slane %v8726_v25, %v1125_v5 }
 0x106   :  { %v8710_v17 = vmul.f32 %v8690_v0, %v1094_v13  ;;  %v8713_v3 = vmul.f32 %v8697_v9, %v1096_v14 }
 0x108   :  { %v7514_v21 = vpack.c.bf16 %v8710_v17, %v8704_v15  ;;  %v7515_v24 = vpack.c.bf16 %v8713_v3, %v8707_v16  ;;  %1394 = vrot.lane.b32.xlu1 %v8715_v20, %s8169_s27 }
 0x10a   :  { %1316 = vst [vmem:[#allocation2 + $0x14] sm:$0xff] %v7514_v21  ;;  %1317 = vst [vmem:[#allocation2 + $0x1c] sm:$0xff] %v7515_v24 }
 0x111   :  { %v1326_v26 = vld [vmem:[#allocation2 + $0x10] sm:$0xff]  ;;  %v1327_v28 = vld [vmem:[#allocation2 + $0x18] sm:$0xff] }
 0x112   :  { %v828_v33 = vpop.f32.mrb[8].mxu0  ;;  %v869_v34 = vpop.f32.mrb[8].mxu1  ;;  %v8728_v38 = vcombine.low %v1326_v26, %v1326_v26  ;;  %v8730_v39 = vcombine.low %v1327_v28, %v1327_v28  ;;  %v8761_v13 = vcombine.high %v1326_v26, %v1326_v26  ;;  %v8777_v26 = vcombine.high %v1327_v28, %v1327_v28 }
 0x113   :  { %v1053_v40 = vmul.f32 %v8597_v60, %v828_v33  ;;  %v1055_v42 = vmul.f32 %v8597_v60, %v869_v34  ;;  %v830_v46 = vpop.f32.mrb[9].mxu0  ;;  %v871_v47 = vpop.f32.mrb[9].mxu1 }
 0x114   :  { %v1054_v49 = vmul.f32 %v8597_v60, %v830_v46  ;;  %v1056_v51 = vmul.f32 %v8597_v60, %v871_v47  ;;  %v832_v52 = vpop.f32.mrb[10].mxu0  ;;  %1396 = vrot.lane.b32.xlu0 %v8728_v38, %s8169_s27  ;;  %1400 = vrot.lane.b32.xlu1 %v8730_v39, %s8169_s27  ;;  %v873_v53 = vpop.f32.mrb[10].mxu1 }
 0x115   :  { %v1078_v54 = vadd.f32 %v8601_v61, %v1053_v40  ;;  %v1080_v55 = vadd.f32 %v8601_v61, %v1055_v42  ;;  %v833_v6 = vpop.f32.mrb[11].mxu0  ;;  %v874_v7 = vpop.f32.mrb[11].mxu1 }
 0x116   :  { %v1079_v8 = vadd.f32 %v8601_v61, %v1054_v49  ;;  %v1081_v11 = vadd.f32 %v8601_v61, %v1056_v51 }
 0x117   :  { %v1097_v14 = vmax.f32 %v1078_v54, 0.0  ;;  %v1099_v21 = vmax.f32 %v1080_v55, 0.0  ;;  %v8793_v55 = vrot.slane %v8726_v25, %v1129_v35 }
 0x118   :  { %v1098_v24 = vmax.f32 %v1079_v8, 0.0  ;;  %v1100_v33 = vmax.f32 %v1081_v11, 0.0  ;;  %1398 = vrot.lane.b32.xlu0 %v8761_v13, %s8169_s27 }
 0x119   :  { %v8766_v34 = vmul.f32 %v8736_v48, %v1097_v14  ;;  %v8769_v40 = vmul.f32 %v8748_v56, %v1099_v21  ;;  %10369 = vst [vmem:[#allocation3_spill] sm:$0xff] %v8793_v55  ;;  %v8799_v14 = vrot.slane %v8726_v25, %v1137_v36  ;;  %v8812_v36 = vrot.slane %v8726_v25, %v1133_v37 }
 0x11a   :  { %v8772_v42 = vmul.f32 %v8752_v2, %v1098_v24  ;;  %v8775_v5 = vmul.f32 %v8759_v12, %v1100_v33 }
 0x11b   :  { %10370 = vst [vmem:[#allocation4_spill] sm:$0xff] %v8799_v14  ;;  %10371 = vst [vmem:[#allocation5_spill] sm:$0xff] %v8812_v36 }
 0x11c   :  { %v7516_v46 = vpack.c.bf16 %v8772_v42, %v8766_v34  ;;  %v7517_v47 = vpack.c.bf16 %v8775_v5, %v8769_v40  ;;  %1402 = vrot.lane.b32.xlu0 %v8777_v26, %s8169_s27 }
 0x11e   :  { %1318 = vst [vmem:[#allocation2 + $0x24] sm:$0xff] %v7516_v46  ;;  %1319 = vst [vmem:[#allocation2 + $0x2c] sm:$0xff] %v7517_v47 }
 0x125   :  { %v1328_v49 = vld [vmem:[#allocation2 + $0x20] sm:$0xff]  ;;  %v1329_v11 = vld [vmem:[#allocation2 + $0x28] sm:$0xff] }
 0x126   :  { %v910_v51 = vpop.f32.mrb[12].mxu0  ;;  %v951_v52 = vpop.f32.mrb[12].mxu1  ;;  %v8785_v53 = vcombine.high %v1328_v49, %v1328_v49  ;;  %v8787_v54 = vcombine.low %v1328_v49, %v1328_v49  ;;  %v8817_v49 = vrot.slane %v8726_v25, %v1141_v43 }
 0x127   :  { %v1057_v28 = vmul.f32 %v8597_v60, %v910_v51  ;;  %v1059_v6 = vmul.f32 %v8597_v60, %v951_v52  ;;  %v912_v7 = vpop.f32.mrb[13].mxu0  ;;  %v953_v8 = vpop.f32.mrb[13].mxu1 }
 0x128   :  { %v1058_v21 = vmul.f32 %v8597_v60, %v912_v7  ;;  %v1060_v24 = vmul.f32 %v8597_v60, %v953_v8  ;;  %v914_v33 = vpop.f32.mrb[14].mxu0  ;;  %1406 = vrot.lane.b32.xlu0 %v8785_v53, %s8169_s27  ;;  %1404 = vrot.lane.b32.xlu1 %v8787_v54, %s8169_s27  ;;  %v955_v35 = vpop.f32.mrb[14].mxu1  ;;  %10372 = vst [vmem:[#allocation6_spill] sm:$0xff] %v8817_v49 }
 0x129   :  { %v1082_v46 = vadd.f32 %v8601_v61, %v1057_v28  ;;  %v1084_v47 = vadd.f32 %v8601_v61, %v1059_v6  ;;  %v915_v51 = vpop.f32.mrb[15].mxu0  ;;  %v956_v52 = vpop.f32.mrb[15].mxu1  ;;  %v8821_v33 = vcombine.high %v1329_v11, %v1329_v11  ;;  %v8823_v28 = vcombine.low %v1329_v11, %v1329_v11 }
 0x12a   :  { %v1083_v7 = vadd.f32 %v8601_v61, %v1058_v21  ;;  %v1085_v8 = vadd.f32 %v8601_v61, %v1060_v24 }
 0x12b   :  { %v1101_v6 = vmax.f32 %v1082_v46, 0.0  ;;  %v1103_v35 = vmax.f32 %v1084_v47, 0.0  ;;  %v44_v47 = vld [vmem:[%s10352_s0 + $0x10] sm:$0x7]  ;;  %s8170_s0 = smov 35  }
 0x12c   :  { %v1102_v41 = vmax.f32 %v1083_v7, 0.0  ;;  %v1104_v37 = vmax.f32 %v1085_v8, 0.0  ;;  %1410 = vrot.lane.b32.xlu0 %v8821_v33, %s8169_s27  ;;  %1408 = vrot.lane.b32.xlu1 %v8823_v28, %s8169_s27 }
 0x12d   :  { %v8830_v27 = vmul.f32 %v8793_v55, %v1101_v6  ;;  %v8833_v43 = vmul.f32 %v8799_v14, %v1103_v35  ;;  %v8861_v14 = vrot.slane %v44_v47, %v8604_v62 }
 0x12e   :  { %v8836_v25 = vmul.f32 %v8812_v36, %v1102_v41  ;;  %v8839_v11 = vmul.f32 %v8817_v49, %v1104_v37 }
 0x130   :  { %v7518_v21 = vpack.c.bf16 %v8836_v25, %v8830_v27  ;;  %v7519_v24 = vpack.c.bf16 %v8839_v11, %v8833_v43 }
 0x132   :  { %1320 = vst [vmem:[#allocation2 + $0x34] sm:$0xff] %v7518_v21  ;;  %1321 = vst [vmem:[#allocation2 + $0x3c] sm:$0xff] %v7519_v24 }
 0x139   :  { %v1330_v46 = vld [vmem:[#allocation2 + $0x30] sm:$0xff]  ;;  %v1331_v37 = vld [vmem:[#allocation2 + $0x38] sm:$0xff] }
 0x13a   :  { %v992_v51 = vpop.f32.mrb[16].mxu0  ;;  %v1033_v52 = vpop.f32.mrb[16].mxu1  ;;  %v8848_v41 = vcombine.high %v1330_v46, %v1330_v46  ;;  %v8850_v7 = vcombine.low %v1330_v46, %v1330_v46  ;;  %v8871_v36 = vcombine.high %v1331_v37, %v1331_v37 }
 0x13b   :  { %v1061_v8 = vmul.f32 %v8597_v60, %v992_v51  ;;  %v1063_v6 = vmul.f32 %v8597_v60, %v1033_v52  ;;  %v994_v35 = vpop.f32.mrb[17].mxu0  ;;  %v7570_v1 = vpop.f32.mrb[17].mxu1  ;;  %v8865_v52 = vrot.slane %v44_v47, %v8607_v63 }
 0x13c   :  { %v1062_v21 = vmul.f32 %v8597_v60, %v994_v35  ;;  %v996_v24 = vpop.f32.mrb[18].mxu0  ;;  %1414 = vrot.lane.b32.xlu0 %v8848_v41, %s8169_s27  ;;  %1412 = vrot.lane.b32.xlu1 %v8850_v7, %s8169_s27  ;;  %v1036_v49 = vpop.f32.mrb[18].mxu1 }
 0x13d   :  { %v1086_v46 = vadd.f32 %v8601_v61, %v1061_v8  ;;  %v1088_v51 = vadd.f32 %v8601_v61, %v1063_v6  ;;  %10373 = vst [vmem:[#allocation7_spill] sm:$0xff] %v8865_v52  ;;  %v997_v1 = vpop.f32.mrb[19].mxu0  ;;  %v7571_v60 = vpop.f32.mrb[19].mxu1  ;;  %v8869_v24 = vrot.slane %v44_v47, %v8615_v4  ;;  %v8873_v49 = vcombine.low %v1331_v37, %v1331_v37 }
 0x13e   :  { %v1087_v35 = vadd.f32 %v8601_v61, %v1062_v21 }
 0x13f   :  { %v1105_v8 = vmax.f32 %v1086_v46, 0.0  ;;  %v1107_v55 = vmax.f32 %v1088_v51, 0.0  ;;  %v8914_v51 = vpop.permute.xlu1 %1338 }
 0x140   :  { %v1106_v62 = vmax.f32 %v1087_v35, 0.0  ;;  %1418 = vrot.lane.b32.xlu0 %v8871_v36, %s8169_s27  ;;  %1416 = vrot.lane.b32.xlu1 %v8873_v49, %s8169_s27 }
 0x141   :  { %v8880_v63 = vmul.f32 %v8861_v14, %v1105_v8  ;;  %v1224_v61 = vmul.f32 %v8865_v52, %v1107_v55 }
 0x142   :  { %v8884_v4 = vmul.f32 %v8869_v24, %v1106_v62 }
 0x143   :  { %v7521_v47 = vpack.c.bf16 %v1224_v61, %v1224_v61 }
 0x144   :  { %v7520_v6 = vpack.c.bf16 %v8884_v4, %v8880_v63 }
 0x145   :  { %1323 = vst.msk [vmem:[#allocation2 + $0x4c] sm:$0xf] %vm1235_vm3, %v7521_v47  ;;  %v10374_v47 = vmov 0  }
 0x146   :  { %1322 = vst [vmem:[#allocation2 + $0x44] sm:$0xff] %v7520_v6 }
 0x14d   :  { %v1332_v37 = vld [vmem:[#allocation2 + $0x40] sm:$0xff]  ;;  %v8897_v55 = vld [vmem:[#allocation2 + $0x48] ss:$0 sps:$4 sm:$0xff]  }
 0x14e   :  { %v8889_v21 = vcombine.high %v1332_v37, %v1332_v37  ;;  %v8891_v46 = vcombine.low %v1332_v37, %v1332_v37 }
 0x150   :  { %1422 = vrot.lane.b32.xlu0 %v8889_v21, %s8169_s27  ;;  %1420 = vrot.lane.b32.xlu1 %v8891_v46, %s8169_s27 }
 0x154   :  { %1915 = vrot.lane.b32.xlu0 %v8665_v45, %s8170_s0  ;;  %1424 = vrot.lane.b32.xlu1 %v8897_v55, %s8169_s27 }
 0x158   :  { %1919 = vrot.lane.b32.xlu0 %v8663_v44, %s8170_s0  ;;  %1917 = vrot.lane.b32.xlu1 %v8699_v10, %s8170_s0 }
 0x15c   :  { %1923 = vrot.lane.b32.xlu0 %v8728_v38, %s8170_s0  ;;  %1921 = vrot.lane.b32.xlu1 %v8715_v20, %s8170_s0 }
 0x160   :  { %1927 = vrot.lane.b32.xlu0 %v8730_v39, %s8170_s0  ;;  %1925 = vrot.lane.b32.xlu1 %v8761_v13, %s8170_s0 }
 0x164   :  { %1931 = vrot.lane.b32.xlu0 %v8787_v54, %s8170_s0  ;;  %1929 = vrot.lane.b32.xlu1 %v8777_v26, %s8170_s0 }
 0x168   :  { %1935 = vrot.lane.b32.xlu0 %v8823_v28, %s8170_s0  ;;  %1933 = vrot.lane.b32.xlu1 %v8785_v53, %s8170_s0 }
 0x16c   :  { %1939 = vrot.lane.b32.xlu0 %v8850_v7, %s8170_s0  ;;  %1937 = vrot.lane.b32.xlu1 %v8821_v33, %s8170_s0 }
 0x170   :  { %1943 = vrot.lane.b32.xlu0 %v8873_v49, %s8170_s0  ;;  %1941 = vrot.lane.b32.xlu1 %v8848_v41, %s8170_s0 }
 0x172   :  { %v1389_v1 = vpop.permute.xlu1 %1388  ;;  %v1393_v60 = vpop.permute.xlu0 %1392 }
 0x174   :  { %1947 = vrot.lane.b32.xlu0 %v8891_v46, %s8170_s0  ;;  %1945 = vrot.lane.b32.xlu1 %v8871_v36, %s8170_s0 }
 0x176   :  { %v1391_v35 = vpop.permute.xlu1 %1390 }
 0x177   :  { %v1427_v8 = vsel %vm1426_vm4, %v1389_v1, %v1391_v35  ;;  %v1428_v62 = vsel %vm1426_vm4, %v1391_v35, %v1393_v60 }
 0x178   :  { %1951 = vrot.lane.b32.xlu0 %v8897_v55, %s8170_s0  ;;  %1949 = vrot.lane.b32.xlu1 %v8889_v21, %s8170_s0  ;;  %v1450_v61 = vsel %vm572_vm0, %v1427_v8, 0 }
 0x179   :  { %7254 = vmatprep.subr.msk.bf16.mxu0 %vm572_vm0, %v1428_v62 }
 0x17a   :  { %1507 = vmatpush1.bf16.msra.mxu0 %v1450_v61  ;;  %v1395_v6 = vpop.permute.xlu1 %1394 }
 0x17b   :  { %v1429_v37 = vsel %vm1426_vm4, %v1393_v60, %v1395_v6 }
 0x17c   :  { %2445 = vrot.lane.b32.xlu0 %v8699_v10, %s8171_s14  ;;  %2443 = vrot.lane.b32.xlu1 %v8665_v45, %s8171_s14  ;;  %v1456_v8 = vsel %vm572_vm0, %v1429_v37, 0 }
 0x17d   :  { %7255 = vmatmul.mubr.msk.bf16.vlgmr.msra.gmra.mrb[20].mxu0 %vm1445_vm5, %v8914_v51 }
 0x17e   :  { %1620 = vmatprep.mubr.bf16.mxu0 %v10374_v47 }
 0x180   :  { %2449 = vrot.lane.b32.xlu0 %v8715_v20, %s8171_s14  ;;  %2447 = vrot.lane.b32.xlu1 %v8663_v44, %s8171_s14 }
 0x184   :  { %2441 = vrot.lane.b32.xlu0 %v8594_v58, %s8172_s15  ;;  %2451 = vrot.lane.b32.xlu1 %v8728_v38, %s8171_s14 }
 0x186   :  { %v1397_v1 = vpop.permute.xlu0 %1396  ;;  %v1401_v62 = vpop.permute.xlu1 %1400 }
 0x187   :  { %v1430_v35 = vsel %vm1426_vm4, %v1395_v6, %v1397_v1 }
 0x188   :  { %2455 = vrot.lane.b32.xlu0 %v8730_v39, %s8171_s14  ;;  %2453 = vrot.lane.b32.xlu1 %v8761_v13, %s8171_s14 }
 0x189   :  { %7256 = vmatprep.subr.msk.bf16.mxu1 %vm572_vm0, %v1430_v35 }
 0x18a   :  { %1548 = vmatpush1.bf16.msra.mxu1 %v1456_v8  ;;  %v1399_v61 = vpop.permute.xlu0 %1398 }
 0x18b   :  { %v1431_v52 = vsel %vm1426_vm4, %v1397_v1, %v1399_v61  ;;  %v1432_v60 = vsel %vm1426_vm4, %v1399_v61, %v1401_v62 }
 0x18c   :  { %2459 = vrot.lane.b32.xlu0 %v8787_v54, %s8171_s14  ;;  %2457 = vrot.lane.b32.xlu1 %v8777_v26, %s8171_s14  ;;  %v1462_v6 = vsel %vm572_vm0, %v1431_v52, 0 }
 0x18d   :  { %7258 = vmatprep.subr.msk.bf16.mxu0 %vm572_vm0, %v1432_v60  ;;  %7257 = vmatmul.mubr.msk.bf16.vlgmr.msra.gmra.mrb[20].mxu1 %vm1445_vm5, %v8914_v51 }
 0x18e   :  { %1589 = vmatpush1.bf16.msra.mxu0 %v1462_v6  ;;  %1661 = vmatprep.mubr.bf16.mxu1 %v10374_v47  ;;  %v1403_v52 = vpop.permute.xlu0 %1402 }
 0x18f   :  { %v1433_v37 = vsel %vm1426_vm4, %v1401_v62, %v1403_v52 }
 0x190   :  { %2463 = vrot.lane.b32.xlu0 %v8823_v28, %s8171_s14  ;;  %2461 = vrot.lane.b32.xlu1 %v8785_v53, %s8171_s14  ;;  %v1468_v61 = vsel %vm572_vm0, %v1433_v37, 0 }
 0x191   :  { %7259 = vmatmul.mubr.msk.bf16.vlgmr.msra.gmra.mrb[24].mxu0 %vm1445_vm5, %v8914_v51 }
 0x192   :  { %1702 = vmatprep.mubr.bf16.mxu0 %v10374_v47 }
 0x194   :  { %2467 = vrot.lane.b32.xlu0 %v8850_v7, %s8171_s14  ;;  %2465 = vrot.lane.b32.xlu1 %v8821_v33, %s8171_s14 }
 0x198   :  { %2471 = vrot.lane.b32.xlu0 %v8873_v49, %s8171_s14  ;;  %2469 = vrot.lane.b32.xlu1 %v8848_v41, %s8171_s14 }
 0x19a   :  { %v1405_v1 = vpop.permute.xlu1 %1404  ;;  %v1407_v35 = vpop.permute.xlu0 %1406 }
 0x19b   :  { %v1434_v8 = vsel %vm1426_vm4, %v1403_v52, %v1405_v1  ;;  %v1435_v60 = vsel %vm1426_vm4, %v1405_v1, %v1407_v35 }
 0x19c   :  { %2475 = vrot.lane.b32.xlu0 %v8891_v46, %s8171_s14  ;;  %2473 = vrot.lane.b32.xlu1 %v8871_v36, %s8171_s14  ;;  %v1474_v52 = vsel %vm572_vm0, %v1435_v60, 0 }
 0x19d   :  { %7260 = vmatprep.subr.msk.bf16.mxu1 %vm572_vm0, %v1434_v8  ;;  %v2997_v8 = vld [vmem:[#allocation2 + $0x48] sm:$0xff] }
 0x19e   :  { %1630 = vmatpush1.bf16.msra.mxu1 %v1468_v61  ;;  %v1409_v6 = vpop.permute.xlu1 %1408  ;;  %v7329_v61 = vcombine.low %v2997_v8, %v2997_v8 }
 0x19f   :  { %v1436_v62 = vsel %vm1426_vm4, %v1407_v35, %v1409_v6 }
 0x1a0   :  { %2479 = vrot.lane.b32.xlu0 %v8897_v55, %s8171_s14  ;;  %2477 = vrot.lane.b32.xlu1 %v8889_v21, %s8171_s14  ;;  %v1411_v55 = vpop.permute.xlu0 %1410 }
 0x1a1   :  { %7261 = vmatmul.mubr.msk.bf16.vlgmr.msra.gmra.mrb[24].mxu1 %vm1445_vm5, %v8914_v51  ;;  %7262 = vmatprep.subr.msk.bf16.mxu0 %vm572_vm0, %v1436_v62 }
 0x1a2   :  { %1671 = vmatpush1.bf16.msra.mxu0 %v1474_v52  ;;  %1743 = vmatprep.mubr.bf16.mxu1 %v10374_v47 }
 0x1a4   :  { %3052 = vrot.lane.b32.xlu0 %v8699_v10, %s8173_s4  ;;  %3050 = vrot.lane.b32.xlu1 %v8665_v45, %s8173_s4  ;;  %v1437_v45 = vsel %vm1426_vm4, %v1409_v6, %v1411_v55  ;;  %v10375_v6 = vmov 0.0  }
 0x1a5   :  { %7263 = vmatmul.mubr.msk.bf16.vlgmr.msra.gmra.mrb[28].mxu0 %vm1445_vm5, %v8914_v51 }
 0x1a6   :  { %1784 = vmatprep.mubr.bf16.mxu0 %v10374_v47 }
 0x1a8   :  { %3056 = vrot.lane.b32.xlu0 %v8715_v20, %s8173_s4  ;;  %3054 = vrot.lane.b32.xlu1 %v8663_v44, %s8173_s4  ;;  %v1480_v44 = vsel %vm572_vm0, %v1437_v45, 0 }
 0x1ac   :  { %2998 = vrot.lane.b32.xlu0 %v8594_v58, %s8174_s2  ;;  %3058 = vrot.lane.b32.xlu1 %v8728_v38, %s8173_s4 }
 0x1ae   :  { %v1413_v10 = vpop.permute.xlu1 %1412  ;;  %v1415_v37 = vpop.permute.xlu0 %1414 }
 0x1af   :  { %v1438_v1 = vsel %vm1426_vm4, %v1411_v55, %v1413_v10  ;;  %v1439_v20 = vsel %vm1426_vm4, %v1413_v10, %v1415_v37  ;;  %v7330_v55 = vcombine.high %v2997_v8, %v2997_v8 }
 0x1b0   :  { %3062 = vrot.lane.b32.xlu0 %v8730_v39, %s8173_s4  ;;  %3060 = vrot.lane.b32.xlu1 %v8761_v13, %s8173_s4  ;;  %v1486_v39 = vsel %vm572_vm0, %v1439_v20, 0  ;;  %v9076_v20 = vpack.c.bf16 %v8644_v29, %v8644_v29 }
 0x1b1   :  { %7264 = vmatprep.subr.msk.bf16.mxu1 %vm572_vm0, %v1438_v1 }
 0x1b2   :  { %1712 = vmatpush1.bf16.msra.mxu1 %v1480_v44  ;;  %v1417_v38 = vpop.permute.xlu1 %1416  ;;  %v1419_v13 = vpop.permute.xlu0 %1418  ;;  %v9072_v44 = vpack.c.bf16 %v8650_v31, %v8650_v31 }
 0x1b3   :  { %v1440_v35 = vsel %vm1426_vm4, %v1415_v37, %v1417_v38 }
 0x1b4   :  { %3066 = vrot.lane.b32.xlu0 %v8787_v54, %s8173_s4  ;;  %3064 = vrot.lane.b32.xlu1 %v8777_v26, %s8173_s4  ;;  %v1441_v26 = vsel %vm1426_vm4, %v1417_v38, %v1419_v13 }
 0x1b5   :  { %7265 = vmatmul.mubr.msk.bf16.vlgmr.msra.gmra.mrb[28].mxu1 %vm1445_vm5, %v8914_v51  ;;  %7266 = vmatprep.subr.msk.bf16.mxu0 %vm572_vm0, %v1440_v35 }
 0x1b6   :  { %1753 = vmatpush1.bf16.msra.mxu0 %v1486_v39  ;;  %1825 = vmatprep.mubr.bf16.mxu1 %v10374_v47 }
 0x1b8   :  { %3070 = vrot.lane.b32.xlu0 %v8823_v28, %s8173_s4  ;;  %3068 = vrot.lane.b32.xlu1 %v8785_v53, %s8173_s4 }
 0x1b9   :  { %7267 = vmatmul.mubr.msk.bf16.vlgmr.msra.gmra.mrb[32].mxu0 %vm1445_vm5, %v8914_v51 }
 0x1ba   :  { %1866 = vmatprep.mubr.bf16.mxu0 %v10374_v47 }
 0x1bc   :  { %3074 = vrot.lane.b32.xlu0 %v8850_v7, %s8173_s4  ;;  %3072 = vrot.lane.b32.xlu1 %v8821_v33, %s8173_s4  ;;  %v1492_v33 = vsel %vm572_vm0, %v1441_v26, 0  ;;  %v9095_v26 = vpack.c.bf16 %v8647_v30, %v8647_v30 }
 0x1c0   :  { %3078 = vrot.lane.b32.xlu0 %v8873_v49, %s8173_s4  ;;  %3076 = vrot.lane.b32.xlu1 %v8848_v41, %s8173_s4 }
 0x1c2   :  { %v1423_v53 = vpop.permute.xlu0 %1422  ;;  %v1421_v54 = vpop.permute.xlu1 %1420 }
 0x1c3   :  { %v1442_v28 = vsel %vm1426_vm4, %v1419_v13, %v1421_v54  ;;  %v1443_v7 = vsel %vm1426_vm4, %v1421_v54, %v1423_v53  ;;  %v9091_v13 = vpack.c.bf16 %v8653_v32, %v8653_v32 }
 0x1c4   :  { %3082 = vrot.lane.b32.xlu0 %v8891_v46, %s8173_s4  ;;  %3080 = vrot.lane.b32.xlu1 %v8871_v36, %s8173_s4  ;;  %v1498_v36 = vsel %vm572_vm0, %v1443_v7, 0 }
 0x1c5   :  { %7268 = vmatprep.subr.msk.bf16.mxu1 %vm572_vm0, %v1442_v28  ;;  %v9110_v28 = vpack.c.bf16 %v8704_v15, %v8704_v15 }
 0x1c6   :  { %1794 = vmatpush1.bf16.msra.mxu1 %v1492_v33  ;;  %v1916_v41 = vpop.permute.xlu0 %1915  ;;  %v1425_v49 = vpop.permute.xlu1 %1424 }
 0x1c7   :  { %v1444_v60 = vsel %vm1426_vm4, %v1423_v53, %v1425_v49  ;;  %7572 = vmatprep.subr.bf16.mxu1 %v10375_v6  ;;  %v1504_v62 = vsel %vm572_vm0, %v1425_v49, 0  ;;  %v9124_v49 = vpack.c.bf16 %v8707_v16, %v8707_v16 }
 0x1c8   :  { %3086 = vrot.lane.b32.xlu0 %v7329_v61, %s8173_s4  ;;  %3084 = vrot.lane.b32.xlu1 %v8889_v21, %s8173_s4  ;;  %v9128_v61 = vpack.c.bf16 %v8710_v17, %v8710_v17 }
 0x1c9   :  { %7269 = vmatmul.mubr.msk.bf16.vlgmr.msra.gmra.mrb[32].mxu1 %vm1445_vm5, %v8914_v51  ;;  %7270 = vmatprep.subr.msk.bf16.mxu0 %vm572_vm0, %v1444_v60 }
 0x1ca   :  { %1835 = vmatpush1.bf16.msra.mxu0 %v1498_v36  ;;  %7573 = vmatpush3.bf16.msra.mxu1 %v1504_v62  ;;  %v1920_v46 = vpop.permute.xlu0 %1919  ;;  %v1918_v52 = vpop.permute.xlu1 %1917 }
 0x1cb   :  { %v1954_v45 = vsel %vm1953_vm6, %v1916_v41, %v1918_v52  ;;  %v1955_v10 = vsel %vm1953_vm6, %v1918_v52, %v1920_v46  ;;  %7574 = vmatprep.mubr.msk.bf16.mxu1 %vm8167_vm2, %v10375_v6  ;;  %v9147_v52 = vpack.c.bf16 %v8713_v3, %v8713_v3 }
 0x1cc   :  { %3608 = vrot.lane.b32.xlu0 %v8594_v58, %s8175_s16  ;;  %3088 = vrot.lane.b32.xlu1 %v7330_v55, %s8173_s4  ;;  %v1976_v21 = vsel %vm572_vm0, %v1954_v45, 0 }
 0x1cd   :  { %7271 = vmatmul.mubr.msk.bf16.vlgmr.msra.gmra.mrb[36].mxu0 %vm1445_vm5, %v8914_v51  ;;  %7273 = vmatprep.subr.msk.bf16.mxu0 %vm572_vm0, %v1955_v10 }
 0x1ce   :  { %2033 = vmatpush1.bf16.msra.mxu0 %v1976_v21  ;;  %v1924_v37 = vpop.permute.xlu0 %1923  ;;  %v1922_v1 = vpop.permute.xlu1 %1921  ;;  %2064 = vmatprep.mubr.bf16.mxu0 %v10374_v47  ;;  %v9162_v21 = vpack.c.bf16 %v8769_v40, %v8769_v40 }
 0x1cf   :  { %v1956_v38 = vsel %vm1953_vm6, %v1920_v46, %v1922_v1  ;;  %v1957_v35 = vsel %vm1953_vm6, %v1922_v1, %v1924_v37  ;;  %v9143_v46 = vpack.c.bf16 %v8766_v34, %v8766_v34 }
 0x1d0   :  { %4150 = vrot.lane.b32.xlu0 %v9072_v44, %s8176_s17  ;;  %4148 = vrot.lane.b32.xlu1 %v9076_v20, %s8176_s17  ;;  %v1982_v31 = vsel %vm572_vm0, %v1956_v38, 0 }
 0x1d1   :  { %7575 = vmatmul.mubr.msk.bf16.vlgmr.msra.gmra.mrb[36].mxu1 %vm1445_vm5, %v8914_v51  ;;  %7275 = vmatprep.subr.msk.bf16.mxu1 %vm572_vm0, %v1957_v35 }
 0x1d2   :  { %2074 = vmatpush1.bf16.msra.mxu1 %v1982_v31  ;;  %v1928_v29 = vpop.permute.xlu0 %1927  ;;  %v1926_v39 = vpop.permute.xlu1 %1925  ;;  %2105 = vmatprep.mubr.bf16.mxu1 %v10374_v47  ;;  %v9181_v31 = vpack.c.bf16 %v8830_v27, %v8830_v27 }
 0x1d3   :  { %v1958_v53 = vsel %vm1953_vm6, %v1924_v37, %v1926_v39  ;;  %v1959_v54 = vsel %vm1953_vm6, %v1926_v39, %v1928_v29  ;;  %v9166_v37 = vpack.c.bf16 %v8772_v42, %v8772_v42 }
 0x1d4   :  { %4154 = vrot.lane.b32.xlu0 %v9091_v13, %s8176_s17  ;;  %4152 = vrot.lane.b32.xlu1 %v9095_v26, %s8176_s17  ;;  %v1988_v51 = vsel %vm572_vm0, %v1958_v53, 0 }
 0x1d5   :  { %7274 = vmatmul.mubr.msk.bf16.vlgmr.msra.gmra.mrb[20].mxu0 %vm1445_vm5, %v8590_v57  ;;  %7277 = vmatprep.subr.msk.bf16.mxu0 %vm572_vm0, %v1959_v54 }
 0x1d6   :  { %2115 = vmatpush1.bf16.msra.mxu0 %v1988_v51  ;;  %v1932_v30 = vpop.permute.xlu0 %1931  ;;  %v1930_v32 = vpop.permute.xlu1 %1929  ;;  %2146 = vmatprep.mubr.bf16.mxu0 %v10374_v47  ;;  %v9200_v51 = vpack.c.bf16 %v8833_v43, %v8833_v43 }
 0x1d7   :  { %v1960_v8 = vsel %vm1953_vm6, %v1928_v29, %v1930_v32  ;;  %v1961_v33 = vsel %vm1953_vm6, %v1930_v32, %v1932_v30  ;;  %v9185_v29 = vpack.c.bf16 %v8775_v5, %v8775_v5 }
 0x1d8   :  { %4146 = vrot.lane.b32.xlu0 %v8594_v58, %s8177_s18  ;;  %4156 = vrot.lane.b32.xlu1 %v9110_v28, %s8176_s17  ;;  %v1994_v7 = vsel %vm572_vm0, %v1960_v8, 0 }
 0x1d9   :  { %7276 = vmatmul.mubr.msk.bf16.vlgmr.msra.gmra.mrb[20].mxu1 %vm1445_vm5, %v8590_v57  ;;  %7279 = vmatprep.subr.msk.bf16.mxu1 %vm572_vm0, %v1961_v33 }
 0x1da   :  { %2156 = vmatpush1.bf16.msra.mxu1 %v1994_v7  ;;  %v1936_v15 = vpop.permute.xlu0 %1935  ;;  %v1934_v41 = vpop.permute.xlu1 %1933  ;;  %2187 = vmatprep.mubr.bf16.mxu1 %v10374_v47  ;;  %v9220_v7 = vpack.c.bf16 %v8880_v63, %v8880_v63 }
 0x1db   :  { %v1962_v60 = vsel %vm1953_vm6, %v1932_v30, %v1934_v41  ;;  %v1963_v62 = vsel %vm1953_vm6, %v1934_v41, %v1936_v15  ;;  %v9204_v30 = vpack.c.bf16 %v8836_v25, %v8836_v25 }
 0x1dc   :  { %4160 = vrot.lane.b32.xlu0 %v9124_v49, %s8176_s17  ;;  %4158 = vrot.lane.b32.xlu1 %v9128_v61, %s8176_s17  ;;  %v2000_v36 = vsel %vm572_vm0, %v1962_v60, 0 }
 0x1dd   :  { %7278 = vmatmul.mubr.msk.bf16.vlgmr.msra.gmra.mrb[24].mxu0 %vm1445_vm5, %v8590_v57  ;;  %7281 = vmatprep.subr.msk.bf16.mxu0 %vm572_vm0, %v1963_v62  ;;  %v9235_v62 = vld [vmem:[#allocation2 + $0x4c] ss:$0 sps:$4 sm:$0xff]  }
 0x1de   :  { %2197 = vmatpush1.bf16.msra.mxu0 %v2000_v36  ;;  %v1940_v16 = vpop.permute.xlu0 %1939  ;;  %v1938_v17 = vpop.permute.xlu1 %1937  ;;  %2228 = vmatprep.mubr.bf16.mxu0 %v10374_v47  ;;  %v9239_v36 = vpack.c.bf16 %v8884_v4, %v8884_v4 }
 0x1df   :  { %v1964_v55 = vsel %vm1953_vm6, %v1936_v15, %v1938_v17  ;;  %v1965_v45 = vsel %vm1953_vm6, %v1938_v17, %v1940_v16  ;;  %v9224_v15 = vpack.c.bf16 %v8839_v11, %v8839_v11  ;;  %v8146_v17 = vld [vmem:[%s10351_s5] sm:$0xf]  ;;  %s8179_s5 = smov 80  }
 0x1e0   :  { %4164 = vrot.lane.b32.xlu0 %v9143_v46, %s8176_s17  ;;  %4162 = vrot.lane.b32.xlu1 %v9147_v52, %s8176_s17  ;;  %v2006_v10 = vsel %vm572_vm0, %v1964_v55, 0 }
 0x1e1   :  { %7280 = vmatmul.mubr.msk.bf16.vlgmr.msra.gmra.mrb[24].mxu1 %vm1445_vm5, %v8590_v57  ;;  %7283 = vmatprep.subr.msk.bf16.mxu1 %vm572_vm0, %v1965_v45 }
 0x1e2   :  { %2238 = vmatpush1.bf16.msra.mxu1 %v2006_v10  ;;  %v1944_v3 = vpop.permute.xlu0 %1943  ;;  %v1942_v34 = vpop.permute.xlu1 %1941  ;;  %2269 = vmatprep.mubr.bf16.mxu1 %v10374_v47 }
 0x1e3   :  { %v1966_v1 = vsel %vm1953_vm6, %v1940_v16, %v1942_v34  ;;  %v1967_v38 = vsel %vm1953_vm6, %v1942_v34, %v1944_v3 }
 0x1e4   :  { %4168 = vrot.lane.b32.xlu0 %v9162_v21, %s8176_s17  ;;  %4166 = vrot.lane.b32.xlu1 %v9166_v37, %s8176_s17  ;;  %v2012_v35 = vsel %vm572_vm0, %v1966_v1, 0 }
 0x1e5   :  { %7282 = vmatmul.mubr.msk.bf16.vlgmr.msra.gmra.mrb[28].mxu0 %vm1445_vm5, %v8590_v57  ;;  %7285 = vmatprep.subr.msk.bf16.mxu0 %vm572_vm0, %v1967_v38 }
 0x1e6   :  { %2279 = vmatpush1.bf16.msra.mxu0 %v2012_v35  ;;  %v1948_v40 = vpop.permute.xlu0 %1947  ;;  %v1946_v42 = vpop.permute.xlu1 %1945  ;;  %2310 = vmatprep.mubr.bf16.mxu0 %v10374_v47 }
 0x1e7   :  { %v1968_v39 = vsel %vm1953_vm6, %v1944_v3, %v1946_v42  ;;  %v1969_v53 = vsel %vm1953_vm6, %v1946_v42, %v1948_v40 }
 0x1e8   :  { %4172 = vrot.lane.b32.xlu0 %v9181_v31, %s8176_s17  ;;  %4170 = vrot.lane.b32.xlu1 %v9185_v29, %s8176_s17  ;;  %v2018_v54 = vsel %vm572_vm0, %v1968_v39, 0 }
 0x1e9   :  { %7284 = vmatmul.mubr.msk.bf16.vlgmr.msra.gmra.mrb[28].mxu1 %vm1445_vm5, %v8590_v57  ;;  %7287 = vmatprep.subr.msk.bf16.mxu1 %vm572_vm0, %v1969_v53 }
 0x1ea   :  { %2320 = vmatpush1.bf16.msra.mxu1 %v2018_v54  ;;  %v1952_v5 = vpop.permute.xlu0 %1951  ;;  %v1950_v27 = vpop.permute.xlu1 %1949  ;;  %2351 = vmatprep.mubr.bf16.mxu1 %v10374_v47 }
 0x1eb   :  { %v1970_v32 = vsel %vm1953_vm6, %v1948_v40, %v1950_v27  ;;  %v1971_v8 = vsel %vm1953_vm6, %v1950_v27, %v1952_v5  ;;  %7578 = vmatprep.subr.bf16.mxu1 %v10375_v6  ;;  %v2030_v41 = vsel %vm572_vm0, %v1952_v5, 0 }
 0x1ec   :  { %4176 = vrot.lane.b32.xlu0 %v9200_v51, %s8176_s17  ;;  %4174 = vrot.lane.b32.xlu1 %v9204_v30, %s8176_s17  ;;  %v2024_v43 = vsel %vm572_vm0, %v1970_v32, 0 }
 0x1ed   :  { %7286 = vmatmul.mubr.msk.bf16.vlgmr.msra.gmra.mrb[32].mxu0 %vm1445_vm5, %v8590_v57  ;;  %7289 = vmatprep.subr.msk.bf16.mxu0 %vm572_vm0, %v1971_v8 }
 0x1ee   :  { %2361 = vmatpush1.bf16.msra.mxu0 %v2024_v43  ;;  %v2446_v25 = vpop.permute.xlu0 %2445  ;;  %v2444_v33 = vpop.permute.xlu1 %2443  ;;  %2392 = vmatprep.mubr.bf16.mxu0 %v10374_v47 }
 0x1ef   :  { %v2482_v63 = vsel %vm2481_vm7, %v2444_v33, %v2446_v25 }
 0x1f0   :  { %4180 = vrot.lane.b32.xlu0 %v9220_v7, %s8176_s17  ;;  %4178 = vrot.lane.b32.xlu1 %v9224_v15, %s8176_s17 }
 0x1f1   :  { %7288 = vmatmul.mubr.msk.bf16.vlgmr.msra.gmra.mrb[32].mxu1 %vm1445_vm5, %v8590_v57  ;;  %v2504_v57 = vsel %vm572_vm0, %v2482_v63, 0 }
 0x1f2   :  { %7579 = vmatpush3.bf16.msra.mxu1 %v2030_v41  ;;  %v2450_v60 = vpop.permute.xlu0 %2449  ;;  %v2448_v11 = vpop.permute.xlu1 %2447  ;;  %7580 = vmatprep.mubr.msk.bf16.mxu1 %vm8167_vm2, %v10375_v6 }
 0x1f3   :  { %v2483_v16 = vsel %vm2481_vm7, %v2446_v25, %v2448_v11  ;;  %v2484_v4 = vsel %vm2481_vm7, %v2448_v11, %v2450_v60 }
 0x1f4   :  { %4184 = vrot.lane.b32.xlu0 %v9235_v62, %s8176_s17  ;;  %4182 = vrot.lane.b32.xlu1 %v9239_v36, %s8176_s17  ;;  %v2510_v3 = vsel %vm572_vm0, %v2484_v4, 0 }
 0x1f5   :  { %7290 = vmatmul.mubr.msk.bf16.vlgmr.msra.gmra.mrb[36].mxu0 %vm1445_vm5, %v8146_v17  ;;  %7292 = vmatprep.subr.msk.bf16.mxu0 %vm572_vm0, %v2483_v16 }
 0x1f6   :  { %2561 = vmatpush1.bf16.msra.mxu0 %v2504_v57  ;;  %v9255_v55 = vpop.permute.xlu0 %2441  ;;  %v2452_v45 = vpop.permute.xlu1 %2451  ;;  %2592 = vmatprep.mubr.bf16.mxu0 %v10374_v47 }
 0x1f7   :  { %v2485_v10 = vsel %vm2481_vm7, %v2450_v60, %v2452_v45 }
 0x1f8   :  { %4697 = vrot.lane.b32.xlu0 %v9072_v44, %s8178_s21  ;;  %4695 = vrot.lane.b32.xlu1 %v9076_v20, %s8178_s21 }
 0x1f9   :  { %7581 = vmatmul.mubr.msk.bf16.vlgmr.msra.gmra.mrb[36].mxu1 %vm1445_vm5, %v8146_v17  ;;  %7294 = vmatprep.subr.msk.bf16.mxu1 %vm572_vm0, %v2485_v10 }
 0x1fa   :  { %2602 = vmatpush1.bf16.msra.mxu1 %v2510_v3  ;;  %v2456_v34 = vpop.permute.xlu0 %2455  ;;  %v2454_v1 = vpop.permute.xlu1 %2453  ;;  %2633 = vmatprep.mubr.bf16.mxu1 %v10374_v47 }
 0x1fb   :  { %v2486_v38 = vsel %vm2481_vm7, %v2452_v45, %v2454_v1  ;;  %v2487_v35 = vsel %vm2481_vm7, %v2454_v1, %v2456_v34 }
 0x1fc   :  { %4701 = vrot.lane.b32.xlu0 %v9091_v13, %s8178_s21  ;;  %4699 = vrot.lane.b32.xlu1 %v9095_v26, %s8178_s21  ;;  %v2516_v40 = vsel %vm572_vm0, %v2486_v38, 0 }
 0x1fd   :  { %7293 = vmatmul.mubr.msk.bf16.vlgmr.msra.gmra.mrb[20].mxu0 %vm1445_vm5, %v9255_v55  ;;  %7296 = vmatprep.subr.msk.bf16.mxu0 %vm572_vm0, %v2487_v35 }
 0x1fe   :  { %2643 = vmatpush1.bf16.msra.mxu0 %v2516_v40  ;;  %v2460_v42 = vpop.permute.xlu0 %2459  ;;  %v2458_v39 = vpop.permute.xlu1 %2457  ;;  %2674 = vmatprep.mubr.bf16.mxu0 %v10374_v47 }
 0x1ff   :  { %v2488_v53 = vsel %vm2481_vm7, %v2456_v34, %v2458_v39  ;;  %v2489_v54 = vsel %vm2481_vm7, %v2458_v39, %v2460_v42 }
 0x200   :  { %4693 = vrot.lane.b32.xlu0 %v8594_v58, %s8179_s5  ;;  %4703 = vrot.lane.b32.xlu1 %v9110_v28, %s8178_s21  ;;  %v2522_v5 = vsel %vm572_vm0, %v2488_v53, 0 }
 0x201   :  { %7295 = vmatmul.mubr.msk.bf16.vlgmr.msra.gmra.mrb[20].mxu1 %vm1445_vm5, %v9255_v55  ;;  %7298 = vmatprep.subr.msk.bf16.mxu1 %vm572_vm0, %v2489_v54 }
 0x202   :  { %2684 = vmatpush1.bf16.msra.mxu1 %v2522_v5  ;;  %v2464_v27 = vpop.permute.xlu0 %2463  ;;  %v2462_v32 = vpop.permute.xlu1 %2461  ;;  %2715 = vmatprep.mubr.bf16.mxu1 %v10374_v47 }
 0x203   :  { %v2490_v8 = vsel %vm2481_vm7, %v2460_v42, %v2462_v32  ;;  %v2491_v43 = vsel %vm2481_vm7, %v2462_v32, %v2464_v27 }
 0x204   :  { %4707 = vrot.lane.b32.xlu0 %v9124_v49, %s8178_s21  ;;  %4705 = vrot.lane.b32.xlu1 %v9128_v61, %s8178_s21  ;;  %v2528_v25 = vsel %vm572_vm0, %v2490_v8, 0 }
 0x205   :  { %7297 = vmatmul.mubr.msk.bf16.vlgmr.msra.gmra.mrb[24].mxu0 %vm1445_vm5, %v9255_v55  ;;  %7300 = vmatprep.subr.msk.bf16.mxu0 %vm572_vm0, %v2491_v43 }
 0x206   :  { %2725 = vmatpush1.bf16.msra.mxu0 %v2528_v25  ;;  %v2468_v33 = vpop.permute.xlu0 %2467  ;;  %v2466_v41 = vpop.permute.xlu1 %2465  ;;  %2756 = vmatprep.mubr.bf16.mxu0 %v10374_v47 }
 0x207   :  { %v2492_v63 = vsel %vm2481_vm7, %v2464_v27, %v2466_v41  ;;  %v2493_v60 = vsel %vm2481_vm7, %v2466_v41, %v2468_v33 }
 0x208   :  { %4711 = vrot.lane.b32.xlu0 %v9143_v46, %s8178_s21  ;;  %4709 = vrot.lane.b32.xlu1 %v9147_v52, %s8178_s21  ;;  %v2534_v11 = vsel %vm572_vm0, %v2492_v63, 0 }
 0x209   :  { %7299 = vmatmul.mubr.msk.bf16.vlgmr.msra.gmra.mrb[24].mxu1 %vm1445_vm5, %v9255_v55  ;;  %7302 = vmatprep.subr.msk.bf16.mxu1 %vm572_vm0, %v2493_v60 }
 0x20a   :  { %2766 = vmatpush1.bf16.msra.mxu1 %v2534_v11  ;;  %v2472_v16 = vpop.permute.xlu0 %2471  ;;  %v2470_v57 = vpop.permute.xlu1 %2469  ;;  %2797 = vmatprep.mubr.bf16.mxu1 %v10374_v47 }
 0x20b   :  { %v2494_v17 = vsel %vm2481_vm7, %v2468_v33, %v2470_v57  ;;  %v2495_v4 = vsel %vm2481_vm7, %v2470_v57, %v2472_v16 }
 0x20c   :  { %4715 = vrot.lane.b32.xlu0 %v9162_v21, %s8178_s21  ;;  %4713 = vrot.lane.b32.xlu1 %v9166_v37, %s8178_s21  ;;  %v2540_v45 = vsel %vm572_vm0, %v2494_v17, 0 }
 0x20d   :  { %7301 = vmatmul.mubr.msk.bf16.vlgmr.msra.gmra.mrb[28].mxu0 %vm1445_vm5, %v9255_v55  ;;  %7304 = vmatprep.subr.msk.bf16.mxu0 %vm572_vm0, %v2495_v4 }
 0x20e   :  { %2807 = vmatpush1.bf16.msra.mxu0 %v2540_v45  ;;  %v2476_v10 = vpop.permute.xlu0 %2475  ;;  %v2474_v3 = vpop.permute.xlu1 %2473  ;;  %2838 = vmatprep.mubr.bf16.mxu0 %v10374_v47 }
 0x20f   :  { %v2496_v34 = vsel %vm2481_vm7, %v2472_v16, %v2474_v3  ;;  %v2497_v1 = vsel %vm2481_vm7, %v2474_v3, %v2476_v10 }
 0x210   :  { %4719 = vrot.lane.b32.xlu0 %v9181_v31, %s8178_s21  ;;  %4717 = vrot.lane.b32.xlu1 %v9185_v29, %s8178_s21  ;;  %v2546_v38 = vsel %vm572_vm0, %v2496_v34, 0 }
 0x211   :  { %7303 = vmatmul.mubr.msk.bf16.vlgmr.msra.gmra.mrb[28].mxu1 %vm1445_vm5, %v9255_v55  ;;  %7306 = vmatprep.subr.msk.bf16.mxu1 %vm572_vm0, %v2497_v1 }
 0x212   :  { %2848 = vmatpush1.bf16.msra.mxu1 %v2546_v38  ;;  %v2480_v35 = vpop.permute.xlu0 %2479  ;;  %v2478_v40 = vpop.permute.xlu1 %2477  ;;  %2879 = vmatprep.mubr.bf16.mxu1 %v10374_v47 }
 0x213   :  { %v2498_v42 = vsel %vm2481_vm7, %v2476_v10, %v2478_v40  ;;  %v2499_v39 = vsel %vm2481_vm7, %v2478_v40, %v2480_v35  ;;  %7584 = vmatprep.subr.bf16.mxu1 %v10375_v6  ;;  %v2558_v27 = vsel %vm572_vm0, %v2480_v35, 0 }
 0x214   :  { %4723 = vrot.lane.b32.xlu0 %v9200_v51, %s8178_s21  ;;  %4721 = vrot.lane.b32.xlu1 %v9204_v30, %s8178_s21  ;;  %v2552_v53 = vsel %vm572_vm0, %v2498_v42, 0 }
 0x215   :  { %7305 = vmatmul.mubr.msk.bf16.vlgmr.msra.gmra.mrb[32].mxu0 %vm1445_vm5, %v9255_v55  ;;  %7308 = vmatprep.subr.msk.bf16.mxu0 %vm572_vm0, %v2499_v39 }
 0x216   :  { %2889 = vmatpush1.bf16.msra.mxu0 %v2552_v53  ;;  %v3053_v54 = vpop.permute.xlu0 %3052  ;;  %v3051_v5 = vpop.permute.xlu1 %3050  ;;  %2920 = vmatprep.mubr.bf16.mxu0 %v10374_v47 }
 0x217   :  { %v3091_v32 = vsel %vm3090_vm8, %v3051_v5, %v3053_v54 }
 0x218   :  { %4727 = vrot.lane.b32.xlu0 %v9220_v7, %s8178_s21  ;;  %4725 = vrot.lane.b32.xlu1 %v9224_v15, %s8178_s21  ;;  %v3114_v33 = vsel %vm572_vm0, %v3091_v32, 0 }
 0x219   :  { %7307 = vmatmul.mubr.msk.bf16.vlgmr.msra.gmra.mrb[32].mxu1 %vm1445_vm5, %v9255_v55 }
 0x21a   :  { %7585 = vmatpush3.bf16.msra.mxu1 %v2558_v27  ;;  %v3057_v8 = vpop.permute.xlu0 %3056  ;;  %v3055_v43 = vpop.permute.xlu1 %3054  ;;  %7586 = vmatprep.mubr.msk.bf16.mxu1 %vm8167_vm2, %v10375_v6 }
 0x21b   :  { %v3092_v25 = vsel %vm3090_vm8, %v3053_v54, %v3055_v43  ;;  %v3093_v41 = vsel %vm3090_vm8, %v3055_v43, %v3057_v8 }
 0x21c   :  { %4731 = vrot.lane.b32.xlu0 %v9235_v62, %s8178_s21  ;;  %4729 = vrot.lane.b32.xlu1 %v9239_v36, %s8178_s21  ;;  %v3120_v16 = vsel %vm572_vm0, %v3093_v41, 0 }
 0x21d   :  { %7309 = vmatmul.mubr.msk.bf16.vlgmr.msra.gmra.mrb[36].mxu0 %vm1445_vm5, %v9255_v55  ;;  %7331 = vmatprep.subr.msk.bf16.mxu0 %vm572_vm0, %v3092_v25 }
 0x21e   :  { %3171 = vmatpush1.bf16.msra.mxu0 %v3114_v33  ;;  %v9364_v63 = vpop.permute.xlu0 %2998  ;;  %v3059_v60 = vpop.permute.xlu1 %3058  ;;  %3202 = vmatprep.mubr.bf16.mxu0 %v10374_v47 }
 0x21f   :  { %v3094_v11 = vsel %vm3090_vm8, %v3057_v8, %v3059_v60 }
 0x220   :  { %5244 = vrot.lane.b32.xlu0 %v9072_v44, %s8180_s22  ;;  %5242 = vrot.lane.b32.xlu1 %v9076_v20, %s8180_s22 }
 0x221   :  { %7587 = vmatmul.mubr.msk.bf16.vlgmr.msra.gmra.mrb[36].mxu1 %vm1445_vm5, %v9255_v55  ;;  %7333 = vmatprep.subr.msk.bf16.mxu1 %vm572_vm0, %v3094_v11 }
 0x222   :  { %3212 = vmatpush1.bf16.msra.mxu1 %v3120_v16  ;;  %v3063_v57 = vpop.permute.xlu0 %3062  ;;  %v3061_v17 = vpop.permute.xlu1 %3060  ;;  %3243 = vmatprep.mubr.bf16.mxu1 %v10374_v47 }
 0x223   :  { %v3095_v4 = vsel %vm3090_vm8, %v3059_v60, %v3061_v17  ;;  %v3096_v45 = vsel %vm3090_vm8, %v3061_v17, %v3063_v57 }
 0x224   :  { %5248 = vrot.lane.b32.xlu0 %v9091_v13, %s8180_s22  ;;  %5246 = vrot.lane.b32.xlu1 %v9095_v26, %s8180_s22  ;;  %v3126_v55 = vsel %vm572_vm0, %v3095_v4, 0 }
 0x225   :  { %7332 = vmatmul.mubr.msk.bf16.vlgmr.msra.gmra.mrb[20].mxu0 %vm1445_vm5, %v9364_v63  ;;  %7335 = vmatprep.subr.msk.bf16.mxu0 %vm572_vm0, %v3096_v45 }
 0x226   :  { %3253 = vmatpush1.bf16.msra.mxu0 %v3126_v55  ;;  %v3067_v10 = vpop.permute.xlu0 %3066  ;;  %v3065_v3 = vpop.permute.xlu1 %3064  ;;  %3284 = vmatprep.mubr.bf16.mxu0 %v10374_v47 }
 0x227   :  { %v3097_v34 = vsel %vm3090_vm8, %v3063_v57, %v3065_v3  ;;  %v3098_v1 = vsel %vm3090_vm8, %v3065_v3, %v3067_v10 }
 0x228   :  { %v3132_v38 = vsel %vm572_vm0, %v3097_v34, 0  ;;  %5240 = vrot.lane.b32.xlu0 %v8594_v58, %s8181_s23  ;;  %5250 = vrot.lane.b32.xlu1 %v9110_v28, %s8180_s22 }
 0x229   :  { %7334 = vmatmul.mubr.msk.bf16.vlgmr.msra.gmra.mrb[20].mxu1 %vm1445_vm5, %v9364_v63  ;;  %7337 = vmatprep.subr.msk.bf16.mxu1 %vm572_vm0, %v3098_v1 }
 0x22a   :  { %3294 = vmatpush1.bf16.msra.mxu1 %v3132_v38  ;;  %v3071_v35 = vpop.permute.xlu0 %3070  ;;  %v3069_v40 = vpop.permute.xlu1 %3068  ;;  %3325 = vmatprep.mubr.bf16.mxu1 %v10374_v47 }
 0x22b   :  { %v3099_v42 = vsel %vm3090_vm8, %v3067_v10, %v3069_v40  ;;  %v3100_v39 = vsel %vm3090_vm8, %v3069_v40, %v3071_v35 }
 0x22c   :  { %v3138_v53 = vsel %vm572_vm0, %v3099_v42, 0  ;;  %5254 = vrot.lane.b32.xlu0 %v9124_v49, %s8180_s22  ;;  %5252 = vrot.lane.b32.xlu1 %v9128_v61, %s8180_s22 }
 0x22d   :  { %7336 = vmatmul.mubr.msk.bf16.vlgmr.msra.gmra.mrb[24].mxu0 %vm1445_vm5, %v9364_v63  ;;  %7339 = vmatprep.subr.msk.bf16.mxu0 %vm572_vm0, %v3100_v39 }
 0x22e   :  { %3335 = vmatpush1.bf16.msra.mxu0 %v3138_v53  ;;  %v3075_v54 = vpop.permute.xlu0 %3074  ;;  %v3073_v5 = vpop.permute.xlu1 %3072  ;;  %3366 = vmatprep.mubr.bf16.mxu0 %v10374_v47  ;;  %v3662_v53 = vsel %vm572_vm0, %v9076_v20, 0 }
 0x22f   :  { %v3101_v27 = vsel %vm3090_vm8, %v3071_v35, %v3073_v5  ;;  %v3102_v32 = vsel %vm3090_vm8, %v3073_v5, %v3075_v54 }
 0x230   :  { %v3144_v8 = vsel %vm572_vm0, %v3101_v27, 0  ;;  %5258 = vrot.lane.b32.xlu0 %v9143_v46, %s8180_s22  ;;  %5256 = vrot.lane.b32.xlu1 %v9147_v52, %s8180_s22  ;;  %v3668_v27 = vsel %vm572_vm0, %v9095_v26, 0 }
 0x231   :  { %7338 = vmatmul.mubr.msk.bf16.vlgmr.msra.gmra.mrb[24].mxu1 %vm1445_vm5, %v9364_v63  ;;  %7341 = vmatprep.subr.msk.bf16.mxu1 %vm572_vm0, %v3102_v32 }
 0x232   :  { %3376 = vmatpush1.bf16.msra.mxu1 %v3144_v8  ;;  %v3079_v43 = vpop.permute.xlu0 %3078  ;;  %v3077_v25 = vpop.permute.xlu1 %3076  ;;  %3407 = vmatprep.mubr.bf16.mxu1 %v10374_v47 }
 0x233   :  { %v3103_v33 = vsel %vm3090_vm8, %v3075_v54, %v3077_v25  ;;  %v3104_v41 = vsel %vm3090_vm8, %v3077_v25, %v3079_v43 }
 0x234   :  { %v3150_v60 = vsel %vm572_vm0, %v3103_v33, 0  ;;  %5262 = vrot.lane.b32.xlu0 %v9162_v21, %s8180_s22  ;;  %5260 = vrot.lane.b32.xlu1 %v9166_v37, %s8180_s22 }
 0x235   :  { %7340 = vmatmul.mubr.msk.bf16.vlgmr.msra.gmra.mrb[28].mxu0 %vm1445_vm5, %v9364_v63  ;;  %7343 = vmatprep.subr.msk.bf16.mxu0 %vm572_vm0, %v3104_v41 }
 0x236   :  { %3417 = vmatpush1.bf16.msra.mxu0 %v3150_v60  ;;  %v3083_v11 = vpop.permute.xlu0 %3082  ;;  %v3081_v16 = vpop.permute.xlu1 %3080  ;;  %3448 = vmatprep.mubr.bf16.mxu0 %v10374_v47 }
 0x237   :  { %v3105_v57 = vsel %vm3090_vm8, %v3079_v43, %v3081_v16  ;;  %v3106_v17 = vsel %vm3090_vm8, %v3081_v16, %v3083_v11 }
 0x238   :  { %v3156_v4 = vsel %vm572_vm0, %v3105_v57, 0  ;;  %5266 = vrot.lane.b32.xlu0 %v9181_v31, %s8180_s22  ;;  %5264 = vrot.lane.b32.xlu1 %v9185_v29, %s8180_s22 }
 0x239   :  { %7342 = vmatmul.mubr.msk.bf16.vlgmr.msra.gmra.mrb[28].mxu1 %vm1445_vm5, %v9364_v63  ;;  %7345 = vmatprep.subr.msk.bf16.mxu1 %vm572_vm0, %v3106_v17 }
 0x23a   :  { %3458 = vmatpush1.bf16.msra.mxu1 %v3156_v4  ;;  %v3087_v45 = vpop.permute.xlu0 %3086  ;;  %v3085_v55 = vpop.permute.xlu1 %3084  ;;  %3489 = vmatprep.mubr.bf16.mxu1 %v10374_v47  ;;  %v6912_v4 = vld [vmem:[%s10353_s6] sm:$0xff] }
 0x23b   :  { %v3107_v10 = vsel %vm3090_vm8, %v3083_v11, %v3085_v55  ;;  %v3108_v3 = vsel %vm3090_vm8, %v3085_v55, %v3087_v45  ;;  %7590 = vmatprep.subr.bf16.mxu1 %v10375_v6 }
 0x23c   :  { %v3162_v34 = vsel %vm572_vm0, %v3107_v10, 0  ;;  %5270 = vrot.lane.b32.xlu0 %v9200_v51, %s8180_s22  ;;  %5268 = vrot.lane.b32.xlu1 %v9204_v30, %s8180_s22 }
 0x23d   :  { %7344 = vmatmul.mubr.msk.bf16.vlgmr.msra.gmra.mrb[32].mxu0 %vm1445_vm5, %v9364_v63  ;;  %7347 = vmatprep.subr.msk.bf16.mxu0 %vm572_vm0, %v3108_v3  ;;  %v6937_v3 = vld [vmem:[%s10354_s7] sm:$0xff] }
 0x23e   :  { %3499 = vmatpush1.bf16.msra.mxu0 %v3162_v34  ;;  %v9453_v1 = vpop.permute.xlu0 %3608  ;;  %v3089_v38 = vpop.permute.xlu1 %3088  ;;  %3530 = vmatprep.mubr.bf16.mxu0 %v10374_v47 }
 0x23f   :  { %7369 = vmatprep.subr.msk.bf16.mxu0 %vm572_vm0, %v9072_v44  ;;  %v3109_v35 = vsel %vm3090_vm8, %v3087_v45, %v3089_v38 }
 0x240   :  { %v3168_v40 = vsel %vm572_vm0, %v3109_v35, 0  ;;  %5274 = vrot.lane.b32.xlu0 %v9220_v7, %s8180_s22  ;;  %5272 = vrot.lane.b32.xlu1 %v9224_v15, %s8180_s22 }
 0x241   :  { %7346 = vmatmul.mubr.msk.bf16.vlgmr.msra.gmra.mrb[32].mxu1 %vm1445_vm5, %v9364_v63 }
 0x242   :  { %7591 = vmatpush3.bf16.msra.mxu1 %v3168_v40  ;;  %v9466_v42 = vpop.permute.xlu0 %4150  ;;  %v9468_v39 = vpop.permute.xlu1 %4148  ;;  %7592 = vmatprep.mubr.msk.bf16.mxu1 %vm8167_vm2, %v10375_v6 }
 0x243   :  { %7371 = vmatprep.subr.msk.bf16.mxu1 %vm572_vm0, %v9091_v13 }
 0x244   :  { %5278 = vrot.lane.b32.xlu0 %v9235_v62, %s8180_s22  ;;  %5276 = vrot.lane.b32.xlu1 %v9239_v36, %s8180_s22 }
 0x245   :  { %7348 = vmatmul.mubr.msk.bf16.vlgmr.msra.gmra.mrb[36].mxu0 %vm1445_vm5, %v9364_v63 }
 0x246   :  { %3719 = vmatpush1.bf16.msra.mxu0 %v3662_v53  ;;  %v9482_v54 = vpop.permute.xlu0 %4154  ;;  %v9484_v5 = vpop.permute.xlu1 %4152  ;;  %3750 = vmatprep.mubr.bf16.mxu0 %v10374_v47 }
 0x247   :  { %7373 = vmatprep.subr.msk.bf16.mxu0 %vm572_vm0, %v9128_v61  ;;  %v4189_v45 = vsel %vm4186_vm9, %v9484_v5, %v9482_v54 }
 0x248   :  { %5791 = vrot.lane.b32.xlu0 %v9072_v44, %s8182_s1  ;;  %5789 = vrot.lane.b32.xlu1 %v9076_v20, %s8182_s1  ;;  %v3674_v44 = vsel %vm572_vm0, %v9110_v28, 0  ;;  %v4215_v10 = vsel %vm572_vm0, %v4189_v45, 0 }
 0x249   :  { %7593 = vmatmul.mubr.msk.bf16.vlgmr.msra.gmra.mrb[36].mxu1 %vm1445_vm5, %v9364_v63 }
 0x24a   :  { %3760 = vmatpush1.bf16.msra.mxu1 %v3668_v27  ;;  %v9497_v32 = vpop.permute.xlu0 %4146  ;;  %v9499_v8 = vpop.permute.xlu1 %4156  ;;  %3791 = vmatprep.mubr.bf16.mxu1 %v10374_v47 }
 0x24b   :  { %7375 = vmatprep.subr.msk.bf16.mxu1 %vm572_vm0, %v9147_v52  ;;  %v4190_v57 = vsel %vm4186_vm9, %v9482_v54, %v9499_v8 }
 0x24c   :  { %5795 = vrot.lane.b32.xlu0 %v9091_v13, %s8182_s1  ;;  %5793 = vrot.lane.b32.xlu1 %v9095_v26, %s8182_s1  ;;  %v3680_v13 = vsel %vm572_vm0, %v9124_v49, 0 }
 0x24d   :  { %7370 = vmatmul.mubr.msk.bf16.vlgmr.msra.gmra.mrb[20].mxu0 %vm1445_vm5, %v9453_v1 }
 0x24e   :  { %3801 = vmatpush1.bf16.msra.mxu0 %v3674_v44  ;;  %v9512_v20 = vpop.permute.xlu0 %4160  ;;  %v9514_v63 = vpop.permute.xlu1 %4158  ;;  %3832 = vmatprep.mubr.bf16.mxu0 %v10374_v47 }
 0x24f   :  { %7377 = vmatprep.subr.msk.bf16.mxu0 %vm572_vm0, %v9166_v37  ;;  %v4191_v34 = vsel %vm4186_vm9, %v9499_v8, %v9514_v63 }
 0x250   :  { %5787 = vrot.lane.b32.xlu0 %v8594_v58, %s8183_s24  ;;  %5797 = vrot.lane.b32.xlu1 %v9110_v28, %s8182_s1  ;;  %v3686_v58 = vsel %vm572_vm0, %v9143_v46, 0 }
 0x251   :  { %7372 = vmatmul.mubr.msk.bf16.vlgmr.msra.gmra.mrb[20].mxu1 %vm1445_vm5, %v9453_v1 }
 0x252   :  { %3842 = vmatpush1.bf16.msra.mxu1 %v3680_v13  ;;  %v9526_v26 = vpop.permute.xlu0 %4164  ;;  %v9528_v43 = vpop.permute.xlu1 %4162  ;;  %3873 = vmatprep.mubr.bf16.mxu1 %v10374_v47 }
 0x253   :  { %7379 = vmatprep.subr.msk.bf16.mxu1 %vm572_vm0, %v9185_v29  ;;  %v4194_v38 = vsel %vm4186_vm9, %v9528_v43, %v9526_v26 }
 0x254   :  { %5801 = vrot.lane.b32.xlu0 %v9124_v49, %s8182_s1  ;;  %5799 = vrot.lane.b32.xlu1 %v9128_v61, %s8182_s1  ;;  %v3692_v49 = vsel %vm572_vm0, %v9162_v21, 0 }
 0x255   :  { %7374 = vmatmul.mubr.msk.bf16.vlgmr.msra.gmra.mrb[24].mxu0 %vm1445_vm5, %v9453_v1 }
 0x256   :  { %3883 = vmatpush1.bf16.msra.mxu0 %v3686_v58  ;;  %v9541_v28 = vpop.permute.xlu0 %4168  ;;  %v9543_v25 = vpop.permute.xlu1 %4166  ;;  %3914 = vmatprep.mubr.bf16.mxu0 %v10374_v47 }
 0x257   :  { %7381 = vmatprep.subr.msk.bf16.mxu0 %vm572_vm0, %v9204_v30  ;;  %v4195_v27 = vsel %vm4186_vm9, %v9526_v26, %v9543_v25 }
 0x258   :  { %5805 = vrot.lane.b32.xlu0 %v9143_v46, %s8182_s1  ;;  %5803 = vrot.lane.b32.xlu1 %v9147_v52, %s8182_s1  ;;  %v3698_v46 = vsel %vm572_vm0, %v9181_v31, 0 }
 0x259   :  { %7376 = vmatmul.mubr.msk.bf16.vlgmr.msra.gmra.mrb[24].mxu1 %vm1445_vm5, %v9453_v1 }
 0x25a   :  { %3924 = vmatpush1.bf16.msra.mxu1 %v3692_v49  ;;  %v9556_v61 = vpop.permute.xlu0 %4172  ;;  %v9558_v33 = vpop.permute.xlu1 %4170  ;;  %3955 = vmatprep.mubr.bf16.mxu1 %v10374_v47 }
 0x25b   :  { %7383 = vmatprep.subr.msk.bf16.mxu1 %vm572_vm0, %v9224_v15  ;;  %v4198_v8 = vsel %vm4186_vm9, %v9558_v33, %v9556_v61  ;;  %v4197_v13 = vsel %vm4186_vm9, %v9541_v28, %v9558_v33 }
 0x25c   :  { %5809 = vrot.lane.b32.xlu0 %v9162_v21, %s8182_s1  ;;  %5807 = vrot.lane.b32.xlu1 %v9166_v37, %s8182_s1  ;;  %v3704_v21 = vsel %vm572_vm0, %v9200_v51, 0 }
 0x25d   :  { %7378 = vmatmul.mubr.msk.bf16.vlgmr.msra.gmra.mrb[28].mxu0 %vm1445_vm5, %v9453_v1 }
 0x25e   :  { %3965 = vmatpush1.bf16.msra.mxu0 %v3698_v46  ;;  %v9571_v52 = vpop.permute.xlu0 %4176  ;;  %v9573_v41 = vpop.permute.xlu1 %4174  ;;  %3996 = vmatprep.mubr.bf16.mxu0 %v10374_v47 }
 0x25f   :  { %7385 = vmatprep.subr.msk.bf16.mxu0 %vm572_vm0, %v9239_v36  ;;  %v4200_v26 = vsel %vm4186_vm9, %v9573_v41, %v9571_v52 }
 0x260   :  { %5813 = vrot.lane.b32.xlu0 %v9181_v31, %s8182_s1  ;;  %5811 = vrot.lane.b32.xlu1 %v9185_v29, %s8182_s1  ;;  %v3710_v31 = vsel %vm572_vm0, %v9220_v7, 0  ;;  %v4188_v29 = vsel %vm4186_vm9, %v9466_v42, %v9484_v5 }
 0x261   :  { %7380 = vmatmul.mubr.msk.bf16.vlgmr.msra.gmra.mrb[28].mxu1 %vm1445_vm5, %v9453_v1 }
 0x262   :  { %4006 = vmatpush1.bf16.msra.mxu1 %v3704_v21  ;;  %v9586_v37 = vpop.permute.xlu0 %4180  ;;  %v9588_v60 = vpop.permute.xlu1 %4178  ;;  %4037 = vmatprep.mubr.bf16.mxu1 %v10374_v47 }
 0x263   :  { %7596 = vmatprep.subr.bf16.mxu1 %v10375_v6  ;;  %v4202_v49 = vsel %vm4186_vm9, %v9588_v60, %v9586_v37 }
 0x264   :  { %5817 = vrot.lane.b32.xlu0 %v9200_v51, %s8182_s1  ;;  %5815 = vrot.lane.b32.xlu1 %v9204_v30, %s8182_s1  ;;  %v3716_v51 = vsel %vm572_vm0, %v9235_v62, 0  ;;  %v4187_v30 = vsel %vm4186_vm9, %v9468_v39, %v9466_v42  ;;  %v4193_v42 = vsel %vm4186_vm9, %v9512_v20, %v9528_v43  ;;  %v4196_v39 = vsel %vm4186_vm9, %v9543_v25, %v9541_v28 }
 0x265   :  { %7382 = vmatmul.mubr.msk.bf16.vlgmr.msra.gmra.mrb[32].mxu0 %vm1445_vm5, %v9453_v1  ;;  %v4227_v5 = vsel %vm572_vm0, %v4193_v42, 0  ;;  %v4239_v25 = vsel %vm572_vm0, %v4197_v13, 0  ;;  %v4199_v28 = vsel %vm4186_vm9, %v9556_v61, %v9573_v41  ;;  %v4201_v61 = vsel %vm4186_vm9, %v9571_v52, %v9588_v60 }
 0x266   :  { %4047 = vmatpush1.bf16.msra.mxu0 %v3710_v31  ;;  %v9603_v11 = vpop.permute.xlu0 %4184  ;;  %v9605_v16 = vpop.permute.xlu1 %4182  ;;  %4078 = vmatprep.mubr.bf16.mxu0 %v10374_v47  ;;  %v4245_v21 = vsel %vm572_vm0, %v4199_v28, 0 }
 0x267   :  { %7388 = vmatprep.subr.msk.bf16.mxu0 %vm572_vm0, %v4188_v29  ;;  %v4204_v41 = vsel %vm4186_vm9, %v9605_v16, %v9603_v11  ;;  %v4203_v52 = vsel %vm4186_vm9, %v9586_v37, %v9605_v16 }
 0x268   :  { %5821 = vrot.lane.b32.xlu0 %v9220_v7, %s8182_s1  ;;  %5819 = vrot.lane.b32.xlu1 %v9224_v15, %s8182_s1  ;;  %v4209_v15 = vsel %vm572_vm0, %v4187_v30, 0 }
 0x269   :  { %7384 = vmatmul.mubr.msk.bf16.vlgmr.msra.gmra.mrb[32].mxu1 %vm1445_vm5, %v9453_v1 }
 0x26a   :  { %7597 = vmatpush3.bf16.msra.mxu1 %v3716_v51  ;;  %v9623_v17 = vpop.permute.xlu0 %4697  ;;  %v9625_v7 = vpop.permute.xlu1 %4695  ;;  %7598 = vmatprep.mubr.msk.bf16.mxu1 %vm8167_vm2, %v10375_v6  ;;  %v4251_v51 = vsel %vm572_vm0, %v4201_v61, 0 }
 0x26b   :  { %7390 = vmatprep.subr.msk.bf16.mxu1 %vm572_vm0, %v4190_v57  ;;  %v4257_v57 = vsel %vm572_vm0, %v4203_v52, 0  ;;  %v4734_v45 = vsel %vm4733_vm10, %v9625_v7, %v9623_v17 }
 0x26c   :  { %5825 = vrot.lane.b32.xlu0 %v9235_v62, %s8182_s1  ;;  %5823 = vrot.lane.b32.xlu1 %v9239_v36, %s8182_s1  ;;  %v4192_v62 = vsel %vm4186_vm9, %v9514_v63, %v9512_v20  ;;  %v4233_v63 = vsel %vm572_vm0, %v4195_v27, 0 }
 0x26d   :  { %7386 = vmatmul.mubr.msk.bf16.vlgmr.msra.gmra.mrb[36].mxu0 %vm1445_vm5, %v9453_v1 }
 0x26e   :  { %4266 = vmatpush1.bf16.msra.mxu0 %v4209_v15  ;;  %v9646_v55 = vpop.permute.xlu0 %4701  ;;  %v9648_v36 = vpop.permute.xlu1 %4699  ;;  %4297 = vmatprep.mubr.bf16.mxu0 %v10374_v47 }
 0x26f   :  { %7392 = vmatprep.subr.msk.bf16.mxu0 %vm572_vm0, %v4192_v62  ;;  %v4735_v15 = vsel %vm4733_vm10, %v9623_v17, %v9648_v36  ;;  %v4736_v17 = vsel %vm4733_vm10, %v9648_v36, %v9646_v55 }
 0x270   :  { %6915 = vperm.xlu0 %7971, %v6912_v4   ;;  %v4263_v4 = vsel %vm572_vm0, %v9603_v11, 0  ;;  %v4756_v11 = vsel %vm572_vm0, %v4734_v45, 0 }
 0x271   :  { %7599 = vmatmul.mubr.msk.bf16.vlgmr.msra.gmra.mrb[36].mxu1 %vm1445_vm5, %v9453_v1  ;;  %v4221_v1 = vsel %vm572_vm0, %v4191_v34, 0 }
 0x272   :  { %4307 = vmatpush1.bf16.msra.mxu1 %v4215_v10  ;;  %v9664_v35 = vpop.permute.xlu0 %4693  ;;  %v9666_v40 = vpop.permute.xlu1 %4703  ;;  %4338 = vmatprep.mubr.bf16.mxu1 %v10374_v47 }
 0x273   :  { %7394 = vmatprep.subr.msk.bf16.mxu1 %vm572_vm0, %v4194_v38  ;;  %v4737_v62 = vsel %vm4733_vm10, %v9646_v55, %v9666_v40 }
 0x274   :  { %6940 = vperm.xlu0 %7971, %v6937_v3  }
 0x275   :  { %7389 = vmatmul.mubr.msk.bf16.vlgmr.msra.gmra.mrb[20].mxu0 %vm1445_vm5, %v9497_v32 }
 0x276   :  { %4348 = vmatpush1.bf16.msra.mxu0 %v4221_v1  ;;  %v9679_v53 = vpop.permute.xlu0 %4707  ;;  %v9681_v54 = vpop.permute.xlu1 %4705  ;;  %4379 = vmatprep.mubr.bf16.mxu0 %v10374_v47  ;;  %v4762_v1 = vsel %vm572_vm0, %v4736_v17, 0 }
 0x277   :  { %7396 = vmatprep.subr.msk.bf16.mxu0 %vm572_vm0, %v4196_v39  ;;  %v4739_v7 = vsel %vm4733_vm10, %v9681_v54, %v9679_v53  ;;  %v4738_v55 = vsel %vm4733_vm10, %v9666_v40, %v9681_v54 }
 0x279   :  { %7391 = vmatmul.mubr.msk.bf16.vlgmr.msra.gmra.mrb[20].mxu1 %vm1445_vm5, %v9497_v32 }
 0x27a   :  { %4389 = vmatpush1.bf16.msra.mxu1 %v4227_v5  ;;  %v9694_v44 = vpop.permute.xlu0 %4711  ;;  %v9696_v20 = vpop.permute.xlu1 %4709  ;;  %4420 = vmatprep.mubr.bf16.mxu1 %v10374_v47  ;;  %v4768_v5 = vsel %vm572_vm0, %v4738_v55, 0 }
 0x27b   :  { %7398 = vmatprep.subr.msk.bf16.mxu1 %vm572_vm0, %v4198_v8  ;;  %v4741_v36 = vsel %vm4733_vm10, %v9696_v20, %v9694_v44 }
 0x27d   :  { %7393 = vmatmul.mubr.msk.bf16.vlgmr.msra.gmra.mrb[24].mxu0 %vm1445_vm5, %v9497_v32 }
 0x27e   :  { %4430 = vmatpush1.bf16.msra.mxu0 %v4233_v63  ;;  %v9709_v43 = vpop.permute.xlu0 %4715  ;;  %v9711_v58 = vpop.permute.xlu1 %4713  ;;  %4461 = vmatprep.mubr.bf16.mxu0 %v10374_v47 }
 0x27f   :  { %7400 = vmatprep.subr.msk.bf16.mxu0 %vm572_vm0, %v4200_v26  ;;  %v4743_v40 = vsel %vm4733_vm10, %v9711_v58, %v9709_v43 }
 0x281   :  { %7395 = vmatmul.mubr.msk.bf16.vlgmr.msra.gmra.mrb[24].mxu1 %vm1445_vm5, %v9497_v32 }
 0x282   :  { %4471 = vmatpush1.bf16.msra.mxu1 %v4239_v25  ;;  %v9724_v33 = vpop.permute.xlu0 %4719  ;;  %v9726_v46 = vpop.permute.xlu1 %4717  ;;  %4502 = vmatprep.mubr.bf16.mxu1 %v10374_v47 }
 0x283   :  { %7402 = vmatprep.subr.msk.bf16.mxu1 %vm572_vm0, %v4202_v49 }
 0x285   :  { %7397 = vmatmul.mubr.msk.bf16.vlgmr.msra.gmra.mrb[28].mxu0 %vm1445_vm5, %v9497_v32 }
 0x286   :  { %4512 = vmatpush1.bf16.msra.mxu0 %v4245_v21  ;;  %v9739_v31 = vpop.permute.xlu0 %4723  ;;  %v9741_v29 = vpop.permute.xlu1 %4721  ;;  %4543 = vmatprep.mubr.bf16.mxu0 %v10374_v47 }
 0x287   :  { %7404 = vmatprep.subr.msk.bf16.mxu0 %vm572_vm0, %v4204_v41 }
 0x289   :  { %7399 = vmatmul.mubr.msk.bf16.vlgmr.msra.gmra.mrb[28].mxu1 %vm1445_vm5, %v9497_v32 }
 0x28a   :  { %4553 = vmatpush1.bf16.msra.mxu1 %v4251_v51  ;;  %v9751_v60 = vpop.permute.xlu0 %4727  ;;  %v9753_v30 = vpop.permute.xlu1 %4725  ;;  %4584 = vmatprep.mubr.bf16.mxu1 %v10374_v47 }
 0x28b   :  { %7602 = vmatprep.subr.bf16.mxu1 %v10375_v6 }
 0x28d   :  { %7401 = vmatmul.mubr.msk.bf16.vlgmr.msra.gmra.mrb[32].mxu0 %vm1445_vm5, %v9497_v32 }
 0x28e   :  { %4594 = vmatpush1.bf16.msra.mxu0 %v4257_v57  ;;  %v9763_v37 = vpop.permute.xlu0 %4731  ;;  %v9765_v16 = vpop.permute.xlu1 %4729  ;;  %4625 = vmatprep.mubr.bf16.mxu0 %v10374_v47 }
 0x28f   :  { %7407 = vmatprep.subr.msk.bf16.mxu0 %vm572_vm0, %v4735_v15  ;;  %v4750_v52 = vsel %vm4733_vm10, %v9751_v60, %v9765_v16 }
 0x290   :  { %v4804_v57 = vsel %vm572_vm0, %v4750_v52, 0 }
 0x291   :  { %7403 = vmatmul.mubr.msk.bf16.vlgmr.msra.gmra.mrb[32].mxu1 %vm1445_vm5, %v9497_v32 }
 0x292   :  { %7603 = vmatpush3.bf16.msra.mxu1 %v4263_v4  ;;  %v9779_v10 = vpop.permute.xlu0 %5244  ;;  %v9781_v3 = vpop.permute.xlu1 %5242  ;;  %7604 = vmatprep.mubr.msk.bf16.mxu1 %vm8167_vm2, %v10375_v6 }
 0x293   :  { %7409 = vmatprep.subr.msk.bf16.mxu1 %vm572_vm0, %v4737_v62  ;;  %v5281_v45 = vsel %vm5280_vm11, %v9781_v3, %v9779_v10 }
 0x295   :  { %7405 = vmatmul.mubr.msk.bf16.vlgmr.msra.gmra.mrb[36].mxu0 %vm1445_vm5, %v9497_v32 }
 0x296   :  { %4813 = vmatpush1.bf16.msra.mxu0 %v4756_v11  ;;  %v9795_v34 = vpop.permute.xlu0 %5248  ;;  %v9797_v38 = vpop.permute.xlu1 %5246  ;;  %4844 = vmatprep.mubr.bf16.mxu0 %v10374_v47  ;;  %v6887_v11 = vld [vmem:[%s10357_s11] sm:$0xff] }
 0x297   :  { %7411 = vmatprep.subr.msk.bf16.mxu0 %vm572_vm0, %v4739_v7  ;;  %v5282_v15 = vsel %vm5280_vm11, %v9779_v10, %v9797_v38  ;;  %v5303_v10 = vsel %vm572_vm0, %v5281_v45, 0  ;;  %v5283_v3 = vsel %vm5280_vm11, %v9797_v38, %v9795_v34 }
 0x298   :  { %v5309_v55 = vsel %vm572_vm0, %v5283_v3, 0 }
 0x299   :  { %7605 = vmatmul.mubr.msk.bf16.vlgmr.msra.gmra.mrb[36].mxu1 %vm1445_vm5, %v9497_v32  ;;  %v4740_v32 = vsel %vm4733_vm10, %v9679_v53, %v9696_v20  ;;  %v4742_v53 = vsel %vm4733_vm10, %v9694_v44, %v9711_v58  ;;  %v4745_v20 = vsel %vm4733_vm10, %v9726_v46, %v9724_v33  ;;  %v4744_v44 = vsel %vm4733_vm10, %v9709_v43, %v9726_v46 }
 0x29a   :  { %4854 = vmatpush1.bf16.msra.mxu1 %v4762_v1  ;;  %v9810_v42 = vpop.permute.xlu0 %5240  ;;  %v9812_v39 = vpop.permute.xlu1 %5250  ;;  %4885 = vmatprep.mubr.bf16.mxu1 %v10374_v47  ;;  %v4774_v8 = vsel %vm572_vm0, %v4740_v32, 0  ;;  %v4780_v26 = vsel %vm572_vm0, %v4742_v53, 0  ;;  %v4747_v58 = vsel %vm4733_vm10, %v9741_v29, %v9739_v31  ;;  %v4786_v49 = vsel %vm572_vm0, %v4744_v44, 0 }
 0x29b   :  { %7413 = vmatprep.subr.msk.bf16.mxu1 %vm572_vm0, %v4741_v36  ;;  %v4746_v43 = vsel %vm4733_vm10, %v9724_v33, %v9741_v29  ;;  %v4749_v46 = vsel %vm4733_vm10, %v9753_v30, %v9751_v60  ;;  %v4748_v33 = vsel %vm4733_vm10, %v9739_v31, %v9753_v30  ;;  %v4751_v29 = vsel %vm4733_vm10, %v9765_v16, %v9763_v37 }
 0x29c   :  { %v4792_v21 = vsel %vm572_vm0, %v4746_v43, 0  ;;  %v4798_v51 = vsel %vm572_vm0, %v4748_v33, 0  ;;  %v4810_v60 = vsel %vm572_vm0, %v9763_v37, 0  ;;  %v5284_v62 = vsel %vm5280_vm11, %v9795_v34, %v9812_v39  ;;  %v6862_v37 = vld [vmem:[%s10356_s10] sm:$0xff] }
 0x29d   :  { %7408 = vmatmul.mubr.msk.bf16.vlgmr.msra.gmra.mrb[20].mxu0 %vm1445_vm5, %v9664_v35  ;;  %6865 = vperm.xlu1 %7972, %v6862_v37  }
 0x29e   :  { %4895 = vmatpush1.bf16.msra.mxu0 %v4768_v5  ;;  %v9825_v54 = vpop.permute.xlu0 %5254  ;;  %v9827_v27 = vpop.permute.xlu1 %5252  ;;  %4926 = vmatprep.mubr.bf16.mxu0 %v10374_v47 }
 0x29f   :  { %7415 = vmatprep.subr.msk.bf16.mxu0 %vm572_vm0, %v4743_v40  ;;  %v5286_v17 = vsel %vm5280_vm11, %v9827_v27, %v9825_v54  ;;  %v5285_v34 = vsel %vm5280_vm11, %v9812_v39, %v9827_v27 }
 0x2a0   :  { %v5315_v36 = vsel %vm572_vm0, %v5285_v34, 0 }
 0x2a1   :  { %7410 = vmatmul.mubr.msk.bf16.vlgmr.msra.gmra.mrb[20].mxu1 %vm1445_vm5, %v9664_v35  ;;  %6890 = vperm.xlu1 %7972, %v6887_v11  }
 0x2a2   :  { %4936 = vmatpush1.bf16.msra.mxu1 %v4774_v8  ;;  %v9840_v63 = vpop.permute.xlu0 %5258  ;;  %v9842_v13 = vpop.permute.xlu1 %5256  ;;  %4967 = vmatprep.mubr.bf16.mxu1 %v10374_v47 }
 0x2a3   :  { %7417 = vmatprep.subr.msk.bf16.mxu1 %vm572_vm0, %v4745_v20  ;;  %v5288_v38 = vsel %vm5280_vm11, %v9842_v13, %v9840_v63 }
 0x2a5   :  { %7412 = vmatmul.mubr.msk.bf16.vlgmr.msra.gmra.mrb[24].mxu0 %vm1445_vm5, %v9664_v35 }
 0x2a6   :  { %4977 = vmatpush1.bf16.msra.mxu0 %v4780_v26  ;;  %5008 = vmatprep.mubr.bf16.mxu0 %v10374_v47  ;;  %v9857_v25 = vpop.permute.xlu0 %5262  ;;  %v9859_v28 = vpop.permute.xlu1 %5260 }
 0x2a7   :  { %7419 = vmatprep.subr.msk.bf16.mxu0 %vm572_vm0, %v4747_v58  ;;  %v5290_v39 = vsel %vm5280_vm11, %v9859_v28, %v9857_v25  ;;  %v5289_v27 = vsel %vm5280_vm11, %v9840_v63, %v9859_v28 }
 0x2a8   :  { %v5327_v20 = vsel %vm572_vm0, %v5289_v27, 0 }
 0x2a9   :  { %7414 = vmatmul.mubr.msk.bf16.vlgmr.msra.gmra.mrb[24].mxu1 %vm1445_vm5, %v9664_v35 }
 0x2aa   :  { %5018 = vmatpush1.bf16.msra.mxu1 %v4786_v49  ;;  %5049 = vmatprep.mubr.bf16.mxu1 %v10374_v47  ;;  %v9873_v61 = vpop.permute.xlu0 %5266  ;;  %v9875_v41 = vpop.permute.xlu1 %5264 }
 0x2ab   :  { %7421 = vmatprep.subr.msk.bf16.mxu1 %vm572_vm0, %v4749_v46  ;;  %v5291_v63 = vsel %vm5280_vm11, %v9857_v25, %v9875_v41 }
 0x2ac   :  { %v5333_v26 = vsel %vm572_vm0, %v5291_v63, 0 }
 0x2ad   :  { %7416 = vmatmul.mubr.msk.bf16.vlgmr.msra.gmra.mrb[28].mxu0 %vm1445_vm5, %v9664_v35 }
 0x2ae   :  { %5059 = vmatpush1.bf16.msra.mxu0 %v4792_v21  ;;  %5090 = vmatprep.mubr.bf16.mxu0 %v10374_v47  ;;  %v9894_v31 = vpop.permute.xlu0 %5270  ;;  %v9896_v30 = vpop.permute.xlu1 %5268 }
 0x2af   :  { %7423 = vmatprep.subr.msk.bf16.mxu0 %vm572_vm0, %v4751_v29  ;;  %v5293_v25 = vsel %vm5280_vm11, %v9873_v61, %v9896_v30 }
 0x2b0   :  { %v5339_v49 = vsel %vm572_vm0, %v5293_v25, 0  ;;  %v6335_v25 = vld [vmem:[%s10355_s8] sm:$0xff] }
 0x2b1   :  { %7418 = vmatmul.mubr.msk.bf16.vlgmr.msra.gmra.mrb[28].mxu1 %vm1445_vm5, %v9664_v35 }
 0x2b2   :  { %5100 = vmatpush1.bf16.msra.mxu1 %v4798_v51  ;;  %5131 = vmatprep.mubr.bf16.mxu1 %v10374_v47  ;;  %v9909_v16 = vpop.permute.xlu0 %5274  ;;  %v9911_v4 = vpop.permute.xlu1 %5272 }
 0x2b3   :  { %7608 = vmatprep.subr.bf16.mxu1 %v10375_v6  ;;  %v5296_v28 = vsel %vm5280_vm11, %v9911_v4, %v9909_v16  ;;  %v5295_v43 = vsel %vm5280_vm11, %v9894_v31, %v9911_v4 }
 0x2b5   :  { %7420 = vmatmul.mubr.msk.bf16.vlgmr.msra.gmra.mrb[32].mxu0 %vm1445_vm5, %v9664_v35 }
 0x2b6   :  { %5141 = vmatpush1.bf16.msra.mxu0 %v4804_v57  ;;  %5172 = vmatprep.mubr.bf16.mxu0 %v10374_v47  ;;  %v9940_v7 = vpop.permute.xlu0 %5278  ;;  %v5277_v1 = vpop.permute.xlu1 %5276 }
 0x2b7   :  { %7426 = vmatprep.subr.msk.bf16.mxu0 %vm572_vm0, %v5282_v15  ;;  %v5298_v46 = vsel %vm5280_vm11, %v5277_v1, %v9940_v7  ;;  %v5297_v33 = vsel %vm5280_vm11, %v9909_v16, %v5277_v1 }
 0x2b8   :  { %v5351_v29 = vsel %vm572_vm0, %v5297_v33, 0  ;;  %v6337_v33 = vld [vmem:[%s10355_s8 + $0x10] sm:$0xff] }
 0x2b9   :  { %7422 = vmatmul.mubr.msk.bf16.vlgmr.msra.gmra.mrb[32].mxu1 %vm1445_vm5, %v9664_v35 }
 0x2ba   :  { %7609 = vmatpush3.bf16.msra.mxu1 %v4810_v60  ;;  %7610 = vmatprep.mubr.msk.bf16.mxu1 %vm8167_vm2, %v10375_v6  ;;  %v5792_v5 = vpop.permute.xlu0 %5791  ;;  %v5790_v32 = vpop.permute.xlu1 %5789 }
 0x2bb   :  { %7428 = vmatprep.subr.msk.bf16.mxu1 %vm572_vm0, %v5284_v62  ;;  %v5828_v57 = vsel %vm5827_vm12, %v5790_v32, %v5792_v5 }
 0x2bc   :  { %v5850_v4 = vsel %vm572_vm0, %v5828_v57, 0 }
 0x2bd   :  { %7424 = vmatmul.mubr.msk.bf16.vlgmr.msra.gmra.mrb[36].mxu0 %vm1445_vm5, %v9664_v35 }
 0x2be   :  { %5360 = vmatpush1.bf16.msra.mxu0 %v5303_v10  ;;  %5391 = vmatprep.mubr.bf16.mxu0 %v10374_v47  ;;  %v5796_v8 = vpop.permute.xlu0 %5795  ;;  %v5794_v53 = vpop.permute.xlu1 %5793 }
 0x2bf   :  { %7430 = vmatprep.subr.msk.bf16.mxu0 %vm572_vm0, %v5286_v17  ;;  %v5830_v45 = vsel %vm5827_vm12, %v5794_v53, %v5796_v8 }
 0x2c0   :  { %v5856_v37 = vsel %vm572_vm0, %v5830_v45, 0 }
 0x2c1   :  { %7611 = vmatmul.mubr.msk.bf16.vlgmr.msra.gmra.mrb[36].mxu1 %vm1445_vm5, %v9664_v35  ;;  %v5287_v35 = vsel %vm5280_vm11, %v9825_v54, %v9842_v13  ;;  %v5292_v54 = vsel %vm5280_vm11, %v9875_v41, %v9873_v61  ;;  %v5294_v13 = vsel %vm5280_vm11, %v9896_v30, %v9894_v31  ;;  %v5345_v41 = vsel %vm572_vm0, %v5295_v43, 0 }
 0x2c2   :  { %5401 = vmatpush1.bf16.msra.mxu1 %v5309_v55  ;;  %5432 = vmatprep.mubr.bf16.mxu1 %v10374_v47  ;;  %v5321_v40 = vsel %vm572_vm0, %v5287_v35, 0  ;;  %v9988_v44 = vpop.permute.xlu0 %5787  ;;  %v5798_v58 = vpop.permute.xlu1 %5797  ;;  %v5829_v31 = vsel %vm5827_vm12, %v5792_v5, %v5794_v53  ;;  %v5357_v30 = vsel %vm572_vm0, %v9940_v7, 0  ;;  %v7465_v43 = vcombine.high %v6335_v25, %v6335_v25 }
 0x2c3   :  { %7432 = vmatprep.subr.msk.bf16.mxu1 %vm572_vm0, %v5288_v38  ;;  %v5831_v15 = vsel %vm5827_vm12, %v5796_v8, %v5798_v58 }
 0x2c5   :  { %7427 = vmatmul.mubr.msk.bf16.vlgmr.msra.gmra.mrb[20].mxu0 %vm1445_vm5, %v9810_v42 }
 0x2c6   :  { %5442 = vmatpush1.bf16.msra.mxu0 %v5315_v36  ;;  %5473 = vmatprep.mubr.bf16.mxu0 %v10374_v47  ;;  %v5802_v21 = vpop.permute.xlu0 %5801  ;;  %v5800_v61 = vpop.permute.xlu1 %5799 }
 0x2c7   :  { %7434 = vmatprep.subr.msk.bf16.mxu0 %vm572_vm0, %v5290_v39  ;;  %v5833_v62 = vsel %vm5827_vm12, %v5800_v61, %v5802_v21  ;;  %v5832_v3 = vsel %vm5827_vm12, %v5798_v58, %v5800_v61  ;;  %v7464_v61 = vcombine.low %v6335_v25, %v6335_v25 }
 0x2c8   :  { %v5862_v7 = vsel %vm572_vm0, %v5832_v3, 0 }
 0x2c9   :  { %7429 = vmatmul.mubr.msk.bf16.vlgmr.msra.gmra.mrb[20].mxu1 %vm1445_vm5, %v9810_v42 }
 0x2ca   :  { %5483 = vmatpush1.bf16.msra.mxu1 %v5321_v40  ;;  %5514 = vmatprep.mubr.bf16.mxu1 %v10374_v47  ;;  %v5806_v51 = vpop.permute.xlu0 %5805  ;;  %v5804_v52 = vpop.permute.xlu1 %5803 }
 0x2cb   :  { %7436 = vmatprep.subr.msk.bf16.mxu1 %vm572_vm0, %v5292_v54  ;;  %v5835_v17 = vsel %vm5827_vm12, %v5804_v52, %v5806_v51  ;;  %v5834_v1 = vsel %vm5827_vm12, %v5802_v21, %v5804_v52 }
 0x2cc   :  { %v5868_v38 = vsel %vm572_vm0, %v5834_v1, 0 }
 0x2cd   :  { %7431 = vmatmul.mubr.msk.bf16.vlgmr.msra.gmra.mrb[24].mxu0 %vm1445_vm5, %v9810_v42 }
 0x2ce   :  { %5524 = vmatpush1.bf16.msra.mxu0 %v5327_v20  ;;  %5555 = vmatprep.mubr.bf16.mxu0 %v10374_v47  ;;  %v5810_v60 = vpop.permute.xlu0 %5809  ;;  %v5808_v16 = vpop.permute.xlu1 %5807 }
 0x2cf   :  { %7438 = vmatprep.subr.msk.bf16.mxu0 %vm572_vm0, %v5294_v13  ;;  %v5837_v55 = vsel %vm5827_vm12, %v5808_v16, %v5810_v60  ;;  %v5836_v36 = vsel %vm5827_vm12, %v5806_v51, %v5808_v16  ;;  %v6397_v51 = vsel %vm572_vm0, %v7464_v61, 0  ;;  %v6339_v16 = vld [vmem:[%s10355_s8 + $0x20] sm:$0xff] }
 0x2d0   :  { %v5874_v32 = vsel %vm572_vm0, %v5836_v36, 0 }
 0x2d1   :  { %7433 = vmatmul.mubr.msk.bf16.vlgmr.msra.gmra.mrb[24].mxu1 %vm1445_vm5, %v9810_v42 }
 0x2d2   :  { %5565 = vmatpush1.bf16.msra.mxu1 %v5333_v26  ;;  %5596 = vmatprep.mubr.bf16.mxu1 %v10374_v47  ;;  %v5814_v11 = vpop.permute.xlu0 %5813  ;;  %v5812_v10 = vpop.permute.xlu1 %5811 }
 0x2d3   :  { %7440 = vmatprep.subr.msk.bf16.mxu1 %vm572_vm0, %v5296_v28  ;;  %v5839_v5 = vsel %vm5827_vm12, %v5812_v10, %v5814_v11  ;;  %v5838_v40 = vsel %vm5827_vm12, %v5810_v60, %v5812_v10  ;;  %v7472_v10 = vcombine.low %v6339_v16, %v6339_v16 }
 0x2d4   :  { %v5880_v54 = vsel %vm572_vm0, %v5838_v40, 0 }
 0x2d5   :  { %7435 = vmatmul.mubr.msk.bf16.vlgmr.msra.gmra.mrb[28].mxu0 %vm1445_vm5, %v9810_v42 }
 0x2d6   :  { %5606 = vmatpush1.bf16.msra.mxu0 %v5339_v49  ;;  %5637 = vmatprep.mubr.bf16.mxu0 %v10374_v47  ;;  %v5816_v34 = vpop.permute.xlu1 %5815 }
 0x2d7   :  { %7442 = vmatprep.subr.msk.bf16.mxu0 %vm572_vm0, %v5298_v46  ;;  %v5840_v8 = vsel %vm5827_vm12, %v5814_v11, %v5816_v34  ;;  %v6336_v46 = vld [vmem:[%s10355_s8 + $0x8] sm:$0xff] }
 0x2d8   :  { %v5886_v13 = vsel %vm572_vm0, %v5840_v8, 0  ;;  %v7466_v52 = vcombine.low %v6336_v46, %v6336_v46  ;;  %v6340_v11 = vld [vmem:[%s10355_s8 + $0x28] sm:$0xff] }
 0x2d9   :  { %7437 = vmatmul.mubr.msk.bf16.vlgmr.msra.gmra.mrb[28].mxu1 %vm1445_vm5, %v9810_v42  ;;  %v7475_v3 = vcombine.high %v6340_v11, %v6340_v11  ;;  %v7474_v1 = vcombine.low %v6340_v11, %v6340_v11  ;;  %v8145_v8 = vld [vmem:[%s10355_s8 + $0x48] ss:$0 sps:$4 sm:$0xff]  }
 0x2da   :  { %5647 = vmatpush1.bf16.msra.mxu1 %v5345_v41  ;;  %5678 = vmatprep.mubr.bf16.mxu1 %v10374_v47  ;;  %v5820_v39 = vpop.permute.xlu1 %5819  ;;  %v7467_v41 = vcombine.high %v6336_v46, %v6336_v46  ;;  %v6403_v57 = vsel %vm572_vm0, %v7466_v52, 0 }
 0x2db   :  { %7614 = vmatprep.subr.bf16.mxu1 %v10375_v6 }
 0x2dd   :  { %7439 = vmatmul.mubr.msk.bf16.vlgmr.msra.gmra.mrb[32].mxu0 %vm1445_vm5, %v9810_v42 }
 0x2de   :  { %5688 = vmatpush1.bf16.msra.mxu0 %v5351_v29  ;;  %5719 = vmatprep.mubr.bf16.mxu0 %v10374_v47  ;;  %v5824_v63 = vpop.permute.xlu1 %5823 }
 0x2df   :  { %7445 = vmatprep.subr.msk.bf16.mxu0 %vm572_vm0, %v5829_v31  ;;  %v7469_v31 = vcombine.high %v6337_v33, %v6337_v33 }
 0x2e1   :  { %7441 = vmatmul.mubr.msk.bf16.vlgmr.msra.gmra.mrb[32].mxu1 %vm1445_vm5, %v9810_v42 }
 0x2e2   :  { %7615 = vmatpush3.bf16.msra.mxu1 %v5357_v30  ;;  %7616 = vmatprep.mubr.msk.bf16.mxu1 %vm8167_vm2, %v10375_v6  ;;  %v6338_v30 = vld [vmem:[%s10355_s8 + $0x18] sm:$0xff] }
 0x2e3   :  { %7447 = vmatprep.subr.msk.bf16.mxu1 %vm572_vm0, %v5831_v15  ;;  %v7468_v15 = vcombine.low %v6337_v33, %v6337_v33  ;;  %v7471_v60 = vcombine.high %v6338_v30, %v6338_v30 }
 0x2e5   :  { %7443 = vmatmul.mubr.msk.bf16.vlgmr.msra.gmra.mrb[36].mxu0 %vm1445_vm5, %v9810_v42  ;;  %v6409_v45 = vsel %vm572_vm0, %v7468_v15, 0 }
 0x2e6   :  { %5907 = vmatpush1.bf16.msra.mxu0 %v5850_v4  ;;  %5938 = vmatprep.mubr.bf16.mxu0 %v10374_v47  ;;  %v6334_v4 = vld [vmem:[%s10358_s9] sm:$0xf] }
 0x2e7   :  { %7449 = vmatprep.subr.msk.bf16.mxu0 %vm572_vm0, %v5833_v62  ;;  %v7470_v62 = vcombine.low %v6338_v30, %v6338_v30 }
 0x2e9   :  { %7617 = vmatmul.mubr.msk.bf16.vlgmr.msra.gmra.mrb[36].mxu1 %vm1445_vm5, %v9810_v42  ;;  %v5818_v42 = vpop.permute.xlu0 %5817 }
 0x2ea   :  { %5948 = vmatpush1.bf16.msra.mxu1 %v5856_v37  ;;  %5979 = vmatprep.mubr.bf16.mxu1 %v10374_v47  ;;  %v5841_v27 = vsel %vm5827_vm12, %v5816_v34, %v5818_v42  ;;  %v5842_v26 = vsel %vm5827_vm12, %v5818_v42, %v5820_v39  ;;  %v7473_v37 = vcombine.high %v6339_v16, %v6339_v16  ;;  %v6342_v42 = vld [vmem:[%s10355_s8 + $0x38] sm:$0xff]  ;;  %v6427_v34 = vsel %vm572_vm0, %v7474_v1, 0 }
 0x2eb   :  { %7451 = vmatprep.subr.msk.bf16.mxu1 %vm572_vm0, %v5835_v17  ;;  %v5892_v28 = vsel %vm572_vm0, %v5842_v26, 0  ;;  %v6341_v17 = vld [vmem:[%s10355_s8 + $0x30] sm:$0xff]  ;;  %v7479_v36 = vcombine.high %v6342_v42, %v6342_v42 }
 0x2ed   :  { %7446 = vmatmul.mubr.msk.bf16.vlgmr.msra.gmra.mrb[20].mxu0 %vm1445_vm5, %v9988_v44  ;;  %v5822_v35 = vpop.permute.xlu0 %5821 }
 0x2ee   :  { %5989 = vmatpush1.bf16.msra.mxu0 %v5862_v7  ;;  %6020 = vmatprep.mubr.bf16.mxu0 %v10374_v47  ;;  %v5843_v53 = vsel %vm5827_vm12, %v5820_v39, %v5822_v35  ;;  %v5844_v49 = vsel %vm5827_vm12, %v5822_v35, %v5824_v63  ;;  %v6421_v7 = vsel %vm572_vm0, %v7472_v10, 0  ;;  %v7478_v35 = vcombine.low %v6342_v42, %v6342_v42 }
 0x2ef   :  { %7453 = vmatprep.subr.msk.bf16.mxu0 %vm572_vm0, %v5837_v55  ;;  %v5898_v21 = vsel %vm572_vm0, %v5844_v49, 0  ;;  %v7477_v55 = vcombine.high %v6341_v17, %v6341_v17 }
 0x2f0   :  { %v6439_v40 = vsel %vm572_vm0, %v7478_v35, 0 }
 0x2f1   :  { %7448 = vmatmul.mubr.msk.bf16.vlgmr.msra.gmra.mrb[20].mxu1 %vm1445_vm5, %v9988_v44  ;;  %v5826_v20 = vpop.permute.xlu0 %5825 }
 0x2f2   :  { %6030 = vmatpush1.bf16.msra.mxu1 %v5868_v38  ;;  %6061 = vmatprep.mubr.bf16.mxu1 %v10374_v47  ;;  %v5845_v58 = vsel %vm5827_vm12, %v5824_v63, %v5826_v20  ;;  %v5904_v29 = vsel %vm572_vm0, %v5826_v20, 0  ;;  %v7476_v38 = vcombine.low %v6341_v17, %v6341_v17 }
 0x2f3   :  { %7455 = vmatprep.subr.msk.bf16.mxu1 %vm572_vm0, %v5839_v5  ;;  %v6343_v5 = vld [vmem:[%s10355_s8 + $0x40] sm:$0xff] }
 0x2f4   :  { %v7481_v39 = vcombine.high %v6343_v5, %v6343_v5 }
 0x2f5   :  { %7450 = vmatmul.mubr.msk.bf16.vlgmr.msra.gmra.mrb[24].mxu0 %vm1445_vm5, %v9988_v44  ;;  %v10200_v42 = vpop.permute.xlu0 %6915 }
 0x2f6   :  { %6071 = vmatpush1.bf16.msra.mxu0 %v5874_v32  ;;  %6102 = vmatprep.mubr.bf16.mxu0 %v10374_v47  ;;  %v6433_v32 = vsel %vm572_vm0, %v7476_v38, 0 }
 0x2f7   :  { %7457 = vmatprep.subr.msk.bf16.mxu0 %vm572_vm0, %v5841_v27  ;;  %v7480_v27 = vcombine.low %v6343_v5, %v6343_v5 }
 0x2f9   :  { %7452 = vmatmul.mubr.msk.bf16.vlgmr.msra.gmra.mrb[24].mxu1 %vm1445_vm5, %v9988_v44 }
 0x2fa   :  { %6112 = vmatpush1.bf16.msra.mxu1 %v5880_v54  ;;  %6143 = vmatprep.mubr.bf16.mxu1 %v10374_v47  ;;  %v6445_v54 = vsel %vm572_vm0, %v7480_v27, 0 }
 0x2fb   :  { %7459 = vmatprep.subr.msk.bf16.mxu1 %vm572_vm0, %v5843_v53  ;;  %v6451_v53 = vsel %vm572_vm0, %v8145_v8, 0  ;;  %v10209_v8 = vpop.permute.xlu0 %6940 }
 0x2fd   :  { %7454 = vmatmul.mubr.msk.bf16.vlgmr.msra.gmra.mrb[28].mxu0 %vm1445_vm5, %v9988_v44 }
 0x2fe   :  { %6153 = vmatpush1.bf16.msra.mxu0 %v5886_v13  ;;  %6184 = vmatprep.mubr.bf16.mxu0 %v10374_v47 }
 0x2ff   :  { %7461 = vmatprep.subr.msk.bf16.mxu0 %vm572_vm0, %v5845_v58 }
 0x301   :  { %7456 = vmatmul.mubr.msk.bf16.vlgmr.msra.gmra.mrb[28].mxu1 %vm1445_vm5, %v9988_v44 }
 0x302   :  { %6194 = vmatpush1.bf16.msra.mxu1 %v5892_v28  ;;  %6225 = vmatprep.mubr.bf16.mxu1 %v10374_v47 }
 0x303   :  { %7620 = vmatprep.subr.bf16.mxu1 %v10375_v6 }
 0x305   :  { %7458 = vmatmul.mubr.msk.bf16.vlgmr.msra.gmra.mrb[32].mxu0 %vm1445_vm5, %v9988_v44 }
 0x306   :  { %6235 = vmatpush1.bf16.msra.mxu0 %v5898_v21  ;;  %6266 = vmatprep.mubr.bf16.mxu0 %v10374_v47 }
 0x307   :  { %7483 = vmatprep.subr.msk.bf16.mxu0 %vm572_vm0, %v7465_v43 }
 0x309   :  { %7460 = vmatmul.mubr.msk.bf16.vlgmr.msra.gmra.mrb[32].mxu1 %vm1445_vm5, %v9988_v44 }
 0x30a   :  { %7621 = vmatpush3.bf16.msra.mxu1 %v5904_v29  ;;  %7622 = vmatprep.mubr.msk.bf16.mxu1 %vm8167_vm2, %v10375_v6 }
 0x30b   :  { %7485 = vmatprep.subr.msk.bf16.mxu1 %vm572_vm0, %v7467_v41 }
 0x30d   :  { %7462 = vmatmul.mubr.msk.bf16.vlgmr.msra.gmra.mrb[36].mxu0 %vm1445_vm5, %v9988_v44 }
 0x30e   :  { %6454 = vmatpush1.bf16.msra.mxu0 %v6397_v51  ;;  %6485 = vmatprep.mubr.bf16.mxu0 %v10374_v47 }
 0x30f   :  { %7487 = vmatprep.subr.msk.bf16.mxu0 %vm572_vm0, %v7469_v31 }
 0x311   :  { %7623 = vmatmul.mubr.msk.bf16.vlgmr.msra.gmra.mrb[36].mxu1 %vm1445_vm5, %v9988_v44  ;;  %v6415_v44 = vsel %vm572_vm0, %v7470_v62, 0 }
 0x312   :  { %6495 = vmatpush1.bf16.msra.mxu1 %v6403_v57  ;;  %6526 = vmatprep.mubr.bf16.mxu1 %v10374_v47 }
 0x313   :  { %7489 = vmatprep.subr.msk.bf16.mxu1 %vm572_vm0, %v7471_v60 }
 0x315   :  { %7484 = vmatmul.mubr.msk.bf16.vlgmr.msra.gmra.mrb[40].mxu0 %vm1445_vm5, %v6334_v4 }
 0x316   :  { %6536 = vmatpush1.bf16.msra.mxu0 %v6409_v45  ;;  %6567 = vmatprep.mubr.bf16.mxu0 %v10374_v47 }
 0x317   :  { %7491 = vmatprep.subr.msk.bf16.mxu0 %vm572_vm0, %v7473_v37 }
 0x319   :  { %7486 = vmatmul.mubr.msk.bf16.vlgmr.msra.gmra.mrb[40].mxu1 %vm1445_vm5, %v6334_v4 }
 0x31a   :  { %6577 = vmatpush1.bf16.msra.mxu1 %v6415_v44  ;;  %6608 = vmatprep.mubr.bf16.mxu1 %v10374_v47 }
 0x31b   :  { %7493 = vmatprep.subr.msk.bf16.mxu1 %vm572_vm0, %v7475_v3 }
 0x31c   :  { %v10198_v1 = vpop.permute.xlu1 %6865 }
 0x31d   :  { %7488 = vmatmul.mubr.msk.bf16.vlgmr.msra.gmra.mrb[44].mxu0 %vm1445_vm5, %v6334_v4 }
 0x31e   :  { %6618 = vmatpush1.bf16.msra.mxu0 %v6421_v7  ;;  %6649 = vmatprep.mubr.bf16.mxu0 %v10374_v47 }
 0x31f   :  { %7495 = vmatprep.subr.msk.bf16.mxu0 %vm572_vm0, %v7477_v55 }
 0x321   :  { %7490 = vmatmul.mubr.msk.bf16.vlgmr.msra.gmra.mrb[44].mxu1 %vm1445_vm5, %v6334_v4 }
 0x322   :  { %6659 = vmatpush1.bf16.msra.mxu1 %v6427_v34  ;;  %6690 = vmatprep.mubr.bf16.mxu1 %v10374_v47 }
 0x323   :  { %7497 = vmatprep.subr.msk.bf16.mxu1 %vm572_vm0, %v7479_v36 }
 0x325   :  { %7492 = vmatmul.mubr.msk.bf16.vlgmr.msra.gmra.mrb[48].mxu0 %vm1445_vm5, %v6334_v4 }
 0x326   :  { %6700 = vmatpush1.bf16.msra.mxu0 %v6433_v32  ;;  %6731 = vmatprep.mubr.bf16.mxu0 %v10374_v47 }
 0x327   :  { %7499 = vmatprep.subr.msk.bf16.mxu0 %vm572_vm0, %v7481_v39 }
 0x329   :  { %7494 = vmatmul.mubr.msk.bf16.vlgmr.msra.gmra.mrb[48].mxu1 %vm1445_vm5, %v6334_v4 }
 0x32a   :  { %6741 = vmatpush1.bf16.msra.mxu1 %v6439_v40  ;;  %6772 = vmatprep.mubr.bf16.mxu1 %v10374_v47  ;;  %v10206_v40 = vpop.permute.xlu1 %6890 }
 0x32b   :  { %7626 = vmatprep.subr.bf16.mxu1 %v10375_v6 }
 0x32d   :  { %7496 = vmatmul.mubr.msk.bf16.vlgmr.msra.gmra.mrb[52].mxu0 %vm1445_vm5, %v6334_v4 }
 0x32e   :  { %6782 = vmatpush1.bf16.msra.mxu0 %v6445_v54  ;;  %6813 = vmatprep.mubr.bf16.mxu0 %v10374_v47 }
 0x331   :  { %7498 = vmatmul.mubr.msk.bf16.vlgmr.msra.gmra.mrb[52].mxu1 %vm1445_vm5, %v6334_v4 }
 0x332   :  { %7627 = vmatpush3.bf16.msra.mxu1 %v6451_v53  ;;  %7628 = vmatprep.mubr.msk.bf16.mxu1 %vm8167_vm2, %v10375_v6 }
 0x335   :  { %7500 = vmatmul.mubr.msk.bf16.vlgmr.msra.gmra.mrb[56].mxu0 %vm1445_vm5, %v6334_v4 }
 0x339   :  { %7629 = vmatmul.mubr.msk.bf16.vlgmr.msra.gmra.mrb[56].mxu1 %vm1445_vm5, %v6334_v4 }
 0x3c0   :  { %v5940_v20 = vpop.f32.mrb[20].mxu0 }
 0x3c1   :  { %v5942_v63 = vpop.f32.mrb[21].mxu0  ;;  %v6918_v5 = vmul.f32 %v10200_v42, %v5940_v20 }
 0x3c2   :  { %v5944_v13 = vpop.f32.mrb[22].mxu0  ;;  %v6919_v35 = vmul.f32 %v10200_v42, %v5942_v63 }
 0x3c3   :  { %v5945_v26 = vpop.f32.mrb[23].mxu0 }
 0x3c4   :  { %v5981_v58 = vpop.f32.mrb[20].mxu1  ;;  %v6943_v26 = vadd.f32 %v10209_v8, %v6918_v5  ;;  %v6944_v63 = vadd.f32 %v10209_v8, %v6919_v35 }
 0x3c5   :  { %v5983_v25 = vpop.f32.mrb[21].mxu1 }
 0x3c6   :  { %v5985_v28 = vpop.f32.mrb[22].mxu1 }
 0x3c7   :  { %v5986_v47 = vpop.f32.mrb[23].mxu1  ;;  %v6920_v28 = vmul.f32 %v10200_v42, %v5981_v58 }
 0x3c8   :  { %v6022_v49 = vpop.f32.mrb[24].mxu0 }
 0x3c9   :  { %v6024_v43 = vpop.f32.mrb[25].mxu0  ;;  %v6945_v58 = vadd.f32 %v10209_v8, %v6920_v28 }
 0x3ca   :  { %v6026_v46 = vpop.f32.mrb[26].mxu0 }
 0x3cb   :  { %v6027_v21 = vpop.f32.mrb[27].mxu0  ;;  %v6921_v46 = vmul.f32 %v10200_v42, %v5983_v25 }
 0x3cc   :  { %v10174_v61 = vpop.f32.mrb[24].mxu1 }
 0x3cd   :  { %v10176_v41 = vpop.f32.mrb[25].mxu1  ;;  %v6946_v25 = vadd.f32 %v10209_v8, %v6921_v46 }
 0x3ce   :  { %v6067_v6 = vpop.f32.mrb[26].mxu1  ;;  %v6925_v28 = vmul.f32 %v10200_v42, %v10176_v41 }
 0x3cf   :  { %v6068_v33 = vpop.f32.mrb[27].mxu1 }
 0x3d0   :  { %v10178_v29 = vpop.f32.mrb[28].mxu0 }
 0x3d1   :  { %v10180_v51 = vpop.f32.mrb[29].mxu0 }
 0x3d2   :  { %v6108_v52 = vpop.f32.mrb[30].mxu0 }
 0x3d3   :  { %v6109_v31 = vpop.f32.mrb[31].mxu0 }
 0x3d4   :  { %v10182_v30 = vpop.f32.mrb[28].mxu1 }
 0x3d5   :  { %v10184_v57 = vpop.f32.mrb[29].mxu1 }
 0x3d6   :  { %v6149_v15 = vpop.f32.mrb[30].mxu1 }
 0x3d7   :  { %v6150_v60 = vpop.f32.mrb[31].mxu1 }
 0x3d8   :  { %v10186_v16 = vpop.f32.mrb[32].mxu0 }
 0x3d9   :  { %v10188_v4 = vpop.f32.mrb[33].mxu0 }
 0x3da   :  { %v6190_v45 = vpop.f32.mrb[34].mxu0 }
 0x3db   :  { %v6191_v62 = vpop.f32.mrb[35].mxu0 }
 0x3dc   :  { %v10190_v37 = vpop.f32.mrb[32].mxu1  ;;  %v6922_v62 = vmul.f32 %v10200_v42, %v6022_v49  ;;  %v6924_v49 = vmul.f32 %v10200_v42, %v10174_v61 }
 0x3dd   :  { %v10192_v11 = vpop.f32.mrb[33].mxu1 }
 0x3de   :  { %v6231_v44 = vpop.f32.mrb[34].mxu1 }
 0x3df   :  { %v6232_v10 = vpop.f32.mrb[35].mxu1 }
 0x3e0   :  { %v10194_v3 = vpop.f32.mrb[36].mxu0 }
 0x3e1   :  { %v10196_v17 = vpop.f32.mrb[37].mxu0 }
 0x3e2   :  { %v6272_v7 = vpop.f32.mrb[38].mxu0 }
 0x3e3   :  { %v6273_v55 = vpop.f32.mrb[39].mxu0 }
 0x3e4   :  { %v10202_v34 = vpop.f32.mrb[36].mxu1  ;;  %v6923_v55 = vmul.f32 %v10200_v42, %v6024_v43  ;;  %v6947_v43 = vadd.f32 %v10209_v8, %v6922_v62  ;;  %v6950_v62 = vadd.f32 %v10209_v8, %v6925_v28 }
 0x3e5   :  { %v7624_v38 = vpop.f32.mrb[37].mxu1 }
 0x3e6   :  { %v6312_v36 = vpop.f32.mrb[38].mxu1 }
 0x3e7   :  { %v7625_v32 = vpop.f32.mrb[39].mxu1 }
 0x3e8   :  { %v6487_v39 = vpop.f32.mrb[40].mxu0 }
 0x3e9   :  { %v6868_v27 = vmul.f32 %v10198_v1, %v6487_v39  ;;  %v6489_v54 = vpop.f32.mrb[41].mxu0 }
 0x3ea   :  { %v6869_v53 = vmul.f32 %v10198_v1, %v6489_v54  ;;  %v6491_v13 = vpop.f32.mrb[42].mxu0 }
 0x3eb   :  { %v6893_v20 = vadd.f32 %v10206_v40, %v6868_v27  ;;  %v6492_v47 = vpop.f32.mrb[43].mxu0 }
 0x3ec   :  { %v6528_v21 = vpop.f32.mrb[40].mxu1  ;;  %v6894_v6 = vadd.f32 %v10206_v40, %v6869_v53 }
 0x3ed   :  { %v6870_v33 = vmul.f32 %v10198_v1, %v6528_v21  ;;  %v6530_v52 = vpop.f32.mrb[41].mxu1  ;;  %v6962_v31 = vadd.f32 %v6943_v26, %v6893_v20 }
 0x3ee   :  { %v6871_v15 = vmul.f32 %v10198_v1, %v6530_v52  ;;  %v6963_v60 = vadd.f32 %v6944_v63, %v6894_v6  ;;  %v6532_v45 = vpop.f32.mrb[42].mxu1  ;;  %v6948_v63 = vadd.f32 %v10209_v8, %v6923_v55 }
 0x3ef   :  { %v6895_v44 = vadd.f32 %v10206_v40, %v6870_v33  ;;  %v6981_v10 = vmax.f32 %v6962_v31, 0.0  ;;  %v6533_v7 = vpop.f32.mrb[43].mxu1 }
 0x3f0   :  { %v6896_v38 = vadd.f32 %v10206_v40, %v6871_v15  ;;  %v6982_v36 = vmax.f32 %v6963_v60, 0.0  ;;  %v6569_v5 = vpop.f32.mrb[44].mxu0  ;;  %v6949_v15 = vadd.f32 %v10209_v8, %v6924_v49 }
 0x3f1   :  { %v6964_v32 = vadd.f32 %v6945_v58, %v6895_v44  ;;  %v7000_v35 = vmul.f32 %v6981_v10, %v8626_v18  ;;  %v6872_v39 = vmul.f32 %v10198_v1, %v6569_v5  ;;  %v6571_v27 = vpop.f32.mrb[45].mxu0 }
 0x3f2   :  { %v6965_v54 = vadd.f32 %v6946_v25, %v6896_v38  ;;  %v7001_v53 = vmul.f32 %v6982_v36, %v8636_v22  ;;  %v6873_v13 = vmul.f32 %v10198_v1, %v6571_v27  ;;  %v6573_v26 = vpop.f32.mrb[46].mxu0 }
 0x3f3   :  { %v6983_v20 = vmax.f32 %v6964_v32, 0.0  ;;  %v6897_v18 = vadd.f32 %v10206_v40, %v6872_v39  ;;  %v6574_v47 = vpop.f32.mrb[47].mxu0 }
 0x3f4   :  { %v6984_v46 = vmax.f32 %v6965_v54, 0.0  ;;  %v7522_v21 = vpack.c.bf16 %v7001_v53, %v7000_v35  ;;  %v6898_v61 = vadd.f32 %v10206_v40, %v6873_v13  ;;  %v6610_v6 = vpop.f32.mrb[44].mxu1 }
 0x3f5   :  { %v7002_v22 = vmul.f32 %v6983_v20, %v8630_v19  ;;  %v6966_v33 = vadd.f32 %v6947_v43, %v6897_v18  ;;  %v6874_v52 = vmul.f32 %v10198_v1, %v6610_v6  ;;  %v6612_v31 = vpop.f32.mrb[45].mxu1  ;;  %v6926_v19 = vmul.f32 %v10200_v42, %v10178_v29 }
 0x3f6   :  { %v7003_v41 = vmul.f32 %v6984_v46, %v8641_v23  ;;  %7096 = vst [vmem:[%s10359_s12] sm:$0xff] %v7522_v21  ;;  %v6967_v60 = vadd.f32 %v6948_v63, %v6898_v61  ;;  %v6875_v45 = vmul.f32 %v10198_v1, %v6612_v31  ;;  %v6614_v58 = vpop.f32.mrb[46].mxu1  ;;  %v6927_v23 = vmul.f32 %v10200_v42, %v10180_v51 }
 0x3f7   :  { %v6985_v44 = vmax.f32 %v6966_v33, 0.0  ;;  %v6899_v10 = vadd.f32 %v10206_v40, %v6874_v52  ;;  %v6615_v7 = vpop.f32.mrb[47].mxu1  ;;  %v6928_v29 = vmul.f32 %v10200_v42, %v10182_v30  ;;  %v6951_v53 = vadd.f32 %v10209_v8, %v6926_v19 }
 0x3f8   :  { %v7523_v25 = vpack.c.bf16 %v7003_v41, %v7002_v22  ;;  %v6986_v55 = vmax.f32 %v6967_v60, 0.0  ;;  %v6900_v38 = vadd.f32 %v10206_v40, %v6875_v45  ;;  %v6651_v36 = vpop.f32.mrb[48].mxu0  ;;  %v6952_v30 = vadd.f32 %v10209_v8, %v6927_v23 }
 0x3f9   :  { %v7004_v5 = vmul.f32 %v6985_v44, %v8672_v50  ;;  %v6968_v32 = vadd.f32 %v6949_v15, %v6899_v10  ;;  %v6876_v35 = vmul.f32 %v10198_v1, %v6651_v36  ;;  %v6653_v39 = vpop.f32.mrb[49].mxu0  ;;  %v6929_v50 = vmul.f32 %v10200_v42, %v10184_v57 }
 0x3fa   :  { %7097 = vst [vmem:[%s10359_s12 + $0x8] sm:$0xff] %v7523_v25  ;;  %v7005_v51 = vmul.f32 %v6986_v55, %v8690_v0  ;;  %v6969_v27 = vadd.f32 %v6950_v62, %v6900_v38  ;;  %v6877_v49 = vmul.f32 %v10198_v1, %v6653_v39  ;;  %v6655_v54 = vpop.f32.mrb[50].mxu0  ;;  %v6953_v61 = vadd.f32 %v10209_v8, %v6928_v29 }
 0x3fb   :  { %v6987_v13 = vmax.f32 %v6968_v32, 0.0  ;;  %v6901_v26 = vadd.f32 %v10206_v40, %v6876_v35  ;;  %v6656_v43 = vpop.f32.mrb[51].mxu0  ;;  %v6954_v52 = vadd.f32 %v10209_v8, %v6929_v50  ;;  %v6931_v60 = vmul.f32 %v10200_v42, %v10188_v4 }
 0x3fc   :  { %v7524_v28 = vpack.c.bf16 %v7005_v51, %v7004_v5  ;;  %v6988_v20 = vmax.f32 %v6969_v27, 0.0  ;;  %v6902_v18 = vadd.f32 %v10206_v40, %v6877_v49  ;;  %v6692_v0 = vpop.f32.mrb[48].mxu1 }
 0x3fd   :  { %v7006_v47 = vmul.f32 %v6987_v13, %v8685_v59  ;;  %v6970_v63 = vadd.f32 %v6951_v53, %v6901_v26  ;;  %v6878_v46 = vmul.f32 %v10198_v1, %v6692_v0  ;;  %v6694_v21 = vpop.f32.mrb[49].mxu1  ;;  %v6930_v59 = vmul.f32 %v10200_v42, %v10186_v16 }
 0x3fe   :  { %7098 = vst [vmem:[%s10359_s12 + $0x10] sm:$0xff] %v7524_v28  ;;  %v7007_v57 = vmul.f32 %v6988_v20, %v8697_v9  ;;  %v6971_v6 = vadd.f32 %v6952_v30, %v6902_v18  ;;  %v6879_v22 = vmul.f32 %v10198_v1, %v6694_v21  ;;  %v6696_v33 = vpop.f32.mrb[50].mxu1  ;;  %v6932_v16 = vmul.f32 %v10200_v42, %v10190_v37 }
 0x3ff   :  { %v6989_v31 = vmax.f32 %v6970_v63, 0.0  ;;  %v6903_v15 = vadd.f32 %v10206_v40, %v6878_v46  ;;  %v6697_v41 = vpop.f32.mrb[51].mxu1  ;;  %v6955_v38 = vadd.f32 %v10209_v8, %v6930_v59  ;;  %v6956_v37 = vadd.f32 %v10209_v8, %v6931_v60  ;;  %v10376_v46 = vld [vmem:[#allocation3_spill] sm:$0xff] }
 0x400   :  { %v7525_v45 = vpack.c.bf16 %v7007_v57, %v7006_v47  ;;  %v6990_v58 = vmax.f32 %v6971_v6, 0.0  ;;  %v6904_v9 = vadd.f32 %v10206_v40, %v6879_v22  ;;  %v6733_v62 = vpop.f32.mrb[52].mxu0  ;;  %v6957_v53 = vadd.f32 %v10209_v8, %v6932_v16 }
 0x401   :  { %v7008_v19 = vmul.f32 %v6989_v31, %v8736_v48  ;;  %v6972_v44 = vadd.f32 %v6953_v61, %v6903_v15  ;;  %v6880_v10 = vmul.f32 %v10198_v1, %v6733_v62  ;;  %v6735_v7 = vpop.f32.mrb[53].mxu0  ;;  %v6933_v48 = vmul.f32 %v10200_v42, %v10192_v11 }
 0x402   :  { %7099 = vst [vmem:[%s10359_s12 + $0x18] sm:$0xff] %v7525_v45  ;;  %v7009_v4 = vmul.f32 %v6990_v58, %v8752_v2  ;;  %v6973_v23 = vadd.f32 %v6954_v52, %v6904_v9  ;;  %v6881_v25 = vmul.f32 %v10198_v1, %v6735_v7  ;;  %v6737_v55 = vpop.f32.mrb[54].mxu0  ;;  %v6935_v18 = vmul.f32 %v10200_v42, %v10196_v17 }
 0x403   :  { %v6991_v36 = vmax.f32 %v6972_v44, 0.0  ;;  %v6905_v5 = vadd.f32 %v10206_v40, %v6880_v10  ;;  %v6738_v32 = vpop.f32.mrb[55].mxu0  ;;  %v6958_v43 = vadd.f32 %v10209_v8, %v6933_v48  ;;  %v6936_v31 = vmul.f32 %v10200_v42, %v10202_v34  ;;  %v10378_v44 = vld [vmem:[#allocation4_spill] sm:$0xff] }
 0x404   :  { %v7526_v35 = vpack.c.bf16 %v7009_v4, %v7008_v19  ;;  %v6992_v39 = vmax.f32 %v6973_v23, 0.0  ;;  %v6906_v29 = vadd.f32 %v10206_v40, %v6881_v25  ;;  %v6774_v2 = vpop.f32.mrb[52].mxu1  ;;  %v6960_v45 = vadd.f32 %v10209_v8, %v6935_v18 }
 0x405   :  { %v7010_v51 = vmul.f32 %v6991_v36, %v8748_v56  ;;  %v6974_v27 = vadd.f32 %v6955_v38, %v6905_v5  ;;  %v6882_v49 = vmul.f32 %v10198_v1, %v6774_v2  ;;  %v6776_v54 = vpop.f32.mrb[53].mxu1  ;;  %v6934_v56 = vmul.f32 %v10200_v42, %v10194_v3  ;;  %v10377_v3 = vld [vmem:[#allocation5_spill] sm:$0xff]  ;;  %v10379_v42 = vld [vmem:[#allocation6_spill] sm:$0xff]  ;;  %v10380_v2 = vld [vmem:[#allocation7_spill] sm:$0xff] }
 0x406   :  { %7100 = vst [vmem:[%s10359_s12 + $0x20] sm:$0xff] %v7526_v35  ;;  %v7011_v11 = vmul.f32 %v6992_v39, %v8759_v12  ;;  %v6975_v50 = vadd.f32 %v6956_v37, %v6906_v29  ;;  %v6883_v13 = vmul.f32 %v10198_v1, %v6776_v54  ;;  %v6778_v26 = vpop.f32.mrb[54].mxu1  ;;  %v6961_v55 = vadd.f32 %v10209_v8, %v6936_v31 }
 0x407   :  { %v6993_v30 = vmax.f32 %v6974_v27, 0.0  ;;  %v6907_v28 = vadd.f32 %v10206_v40, %v6882_v49  ;;  %v6779_v20 = vpop.f32.mrb[55].mxu1  ;;  %v6959_v59 = vadd.f32 %v10209_v8, %v6934_v56 }
 0x408   :  { %v7527_v0 = vpack.c.bf16 %v7011_v11, %v7010_v51  ;;  %v6994_v47 = vmax.f32 %v6975_v50, 0.0  ;;  %v6908_v12 = vadd.f32 %v10206_v40, %v6883_v13  ;;  %v6815_v63 = vpop.f32.mrb[56].mxu0 }
 0x409   :  { %v7012_v21 = vmul.f32 %v6993_v30, %v10376_v46  ;;  %v6976_v61 = vadd.f32 %v6957_v53, %v6907_v28  ;;  %v6884_v57 = vmul.f32 %v10198_v1, %v6815_v63  ;;  %v6817_v6 = vpop.f32.mrb[57].mxu0 }
 0x40a   :  { %7101 = vst [vmem:[%s10359_s12 + $0x28] sm:$0xff] %v7527_v0  ;;  %v7013_v22 = vmul.f32 %v6994_v47, %v10377_v3  ;;  %v6977_v33 = vadd.f32 %v6958_v43, %v6908_v12  ;;  %v6885_v17 = vmul.f32 %v10198_v1, %v6817_v6  ;;  %v6819_v52 = vpop.f32.mrb[58].mxu0 }
 0x40b   :  { %v6995_v15 = vmax.f32 %v6976_v61, 0.0  ;;  %v6909_v41 = vadd.f32 %v10206_v40, %v6884_v57  ;;  %v6820_v60 = vpop.f32.mrb[59].mxu0 }
 0x40c   :  { %v7528_v58 = vpack.c.bf16 %v7013_v22, %v7012_v21  ;;  %v6996_v9 = vmax.f32 %v6977_v33, 0.0  ;;  %v6910_v62 = vadd.f32 %v10206_v40, %v6885_v17  ;;  %v6856_v19 = vpop.f32.mrb[56].mxu1 }
 0x40d   :  { %v7014_v10 = vmul.f32 %v6995_v15, %v10378_v44  ;;  %v6978_v7 = vadd.f32 %v6959_v59, %v6909_v41  ;;  %v6886_v16 = vmul.f32 %v10198_v1, %v6856_v19  ;;  %v7630_v4 = vpop.f32.mrb[57].mxu1 }
 0x40e   :  { %7102 = vst [vmem:[%s10359_s12 + $0x30] sm:$0xff] %v7528_v58  ;;  %v7015_v34 = vmul.f32 %v6996_v9, %v10379_v42  ;;  %v6979_v23 = vadd.f32 %v6960_v45, %v6910_v62  ;;  %v6859_v25 = vpop.f32.mrb[58].mxu1 }
 0x40f   :  { %v6997_v38 = vmax.f32 %v6978_v7, 0.0  ;;  %v6911_v48 = vadd.f32 %v10206_v40, %v6886_v16  ;;  %v7631_v36 = vpop.f32.mrb[59].mxu1 }
 0x410   :  { %v7529_v5 = vpack.c.bf16 %v7015_v34, %v7014_v10  ;;  %v6998_v32 = vmax.f32 %v6979_v23, 0.0 }
 0x411   :  { %v7016_v37 = vmul.f32 %v6997_v38, %v8861_v14  ;;  %v6980_v1 = vadd.f32 %v6961_v55, %v6911_v48 }
 0x412   :  { %7103 = vst [vmem:[%s10359_s12 + $0x38] sm:$0xff] %v7529_v5  ;;  %v7017_v35 = vmul.f32 %v6998_v32, %v8869_v24 }
 0x413   :  { %v6999_v39 = vmax.f32 %v6980_v1, 0.0 }
 0x414   :  { %v7530_v29 = vpack.c.bf16 %v7017_v35, %v7016_v37 }
 0x415   :  { %v7018_v51 = vmul.f32 %v6999_v39, %v10380_v2 }
 0x416   :  { %7104 = vst [vmem:[%s10359_s12 + $0x40] sm:$0xff] %v7530_v29 }
 0x417   :  { %v7531_v40 = vpack.c.bf16 %v7018_v51, %v7018_v51 }
 0x419   :  { %7105 = vst.msk [vmem:[%s10359_s12 + $0x48] sm:$0xf] %vm1235_vm3, %v7531_v40 }

// kernel: _lambda_.7
= control target key start
LH: loop header
LB: loop body
LE: loop exit
PB: predicated region body
PF: predicated region fallthrough
CT: control target
= control target key end

     0   :  { %v2623_v1 = vmov 0   ;;  %vm216_vm0 = vcmask 1043456   ;;  %vm212_vm1 = vcmask 588800   ;;  %vm474_vm2 = vcmask 64512   ;;  %s2625_s28 = smov 96   ;;  %s2626_s29 = smov 1   ;;  %s3309_s1 = inlined_call_operand.vmem [shape: bf16[72,648], index: 1, kind: input, shape index: {}]   ;;  %s3310_s2 = inlined_call_operand.vmem [shape: bf16[16,72], index: 2, kind: input, shape index: {}]   ;;  %s3311_s3 = inlined_call_operand.vmem [shape: f32[16,1], index: 3, kind: input, shape index: {}]   ;;  %s3312_s4 = inlined_call_operand.vmem [shape: f32[16,1], index: 4, kind: input, shape index: {}]   ;;  %s3313_s5 = inlined_call_operand.vmem [shape: bf16[16,144], index: 5, kind: input, shape index: {}]   ;;  %s3314_s0 = inlined_call_operand.vmem [shape: f32[1,648], index: 0, kind: input, shape index: {}]   ;;  %s3315_s10 = inlined_call_operand.vmem [shape: f32[16,1], index: 10, kind: input, shape index: {}]   ;;  %s3316_s9 = inlined_call_operand.vmem [shape: bf16[16,8], index: 9, kind: input, shape index: {}]   ;;  %s3317_s6 = inlined_call_operand.vmem [shape: f32[16,1], index: 6, kind: input, shape index: {}]   ;;  %s3318_s11 = inlined_call_operand.vmem [shape: f32[16,1], index: 11, kind: input, shape index: {}]   ;;  %s3319_s7 = inlined_call_operand.vmem [shape: f32[16,1], index: 7, kind: input, shape index: {}]   ;;  %s3320_s8 = inlined_call_operand.vmem [shape: bf16[8,648], index: 8, kind: input, shape index: {}]   ;;  %s3321_s12 = inlined_call_operand.vmem [shape: bf16[16,648], index: 12, kind: output, shape index: {}]  }
   0x1   :  { %v2570_v0 = vld [vmem:[%s3309_s1 + $0x4] ss:$24 sps:$4 sm:$0xff]   ;;  %267 = vmatprep.mubr.bf16.mxu0 %v2623_v1  ;;  %467 = vst [vmem:[#allocation2] sm:$0xff] %v2623_v1  ;;  %473 = vst [vmem:[#allocation2 + $0x30] sm:$0xff] %v2623_v1  ;;  %2568 = vset.pattern.permute.xlu0 %v2623_v1  ;;  %v2572_v2 = vld [vmem:[%s3309_s1] ss:$24 sps:$4 sm:$0xff]   ;;  %v425_v42 = vlaneseq }
   0x2   :  { %2569 = vset.pattern.permute.xlu1 %v2623_v1  ;;  %969 = vmatprep.mubr.bf16.mxu1 %v2623_v1  ;;  %v2573_v3 = vld [vmem:[%s3309_s1 + $0x34] ss:$24 sps:$4 sm:$0xff]   ;;  %v2575_v4 = vld [vmem:[%s3309_s1 + $0x30] ss:$24 sps:$4 sm:$0xff]   ;;  %v2576_v5 = vld [vmem:[%s3309_s1 + $0x64] ss:$24 sps:$4 sm:$0xff]  }
   0x3   :  { %235 = vmatprep.subr.bf16.mxu0 %v2570_v0  ;;  %v2578_v6 = vld [vmem:[%s3309_s1 + $0x60] ss:$24 sps:$4 sm:$0xff]   ;;  %v2579_v7 = vld [vmem:[%s3309_s1 + $0x94] ss:$24 sps:$4 sm:$0xff]   ;;  %v2581_v9 = vld [vmem:[%s3309_s1 + $0x90] ss:$24 sps:$4 sm:$0xff]  }
   0x4   :  { %236 = vmatpush1.bf16.msra.mxu0 %v2572_v2  ;;  %v69_v8 = vld [vmem:[%s3309_s1 + $0xc0] sm:$0xff]  ;;  %v2590_v18 = vld [vmem:[%s3309_s1 + $0x3c] ss:$24 sps:$4 sm:$0xff]   ;;  %v365_v19 = vld [vmem:[%s3311_s3 + $0x8] sm:$0xff]  ;;  %v2820_v44 = vshrl.u32 %v425_v42, 7  ;;  %s2627_s30 = smov 80  }
   0x5   :  { %237 = vmatprep.subr.bf16.mxu0 %v2573_v3  ;;  %v2391_v10 = vcombine.high %v69_v8, %v69_v8  ;;  %v2390_v11 = vcombine.low %v69_v8, %v69_v8  ;;  %v2587_v13 = vld [vmem:[%s3309_s1 + $0xc] ss:$24 sps:$4 sm:$0xff]   ;;  %v2585_v17 = vld [vmem:[%s3309_s1 + $0x8] ss:$24 sps:$4 sm:$0xff]   ;;  %v2588_v21 = vld [vmem:[%s3309_s1 + $0x38] ss:$24 sps:$4 sm:$0xff]  }
   0x6   :  { %v2584_v14 = vld [vmem:[%s3310_s2] sm:$0xff]   ;;  %v389_v20 = vld [vmem:[%s3312_s4 + $0x8] sm:$0xff]  ;;  %v2596_v24 = vld [vmem:[%s3309_s1 + $0x9c] ss:$24 sps:$4 sm:$0xff]   ;;  %v427_v46 = vsub.s32 0, %v2820_v44  ;;  %v431_v53 = vsub.s32 1, %v2820_v44 }
   0x7   :  { %v218_v12 = vsel %vm216_vm0, %v2390_v11, 0  ;;  %v364_v15 = vld [vmem:[%s3311_s3] sm:$0xff]  ;;  %v70_v25 = vld [vmem:[%s3309_s1 + $0xc8] sm:$0xff]  ;;  %v2594_v26 = vld [vmem:[%s3309_s1 + $0x98] ss:$24 sps:$4 sm:$0xff]   ;;  %s2628_s13 = smov 127  }
   0x8   :  { %238 = vmatpush1.bf16.msra.mxu0 %v2575_v4  ;;  %v388_v16 = vld [vmem:[%s3312_s4] sm:$0xff]  ;;  %368 = vperm.xlu0 %2568, %v364_v15   ;;  %v2393_v27 = vcombine.high %v70_v25, %v70_v25  ;;  %v2392_v28 = vcombine.low %v70_v25, %v70_v25  ;;  %v2601_v30 = vld [vmem:[%s3309_s1 + $0x14] ss:$24 sps:$4 sm:$0xff]   ;;  %v2599_v31 = vld [vmem:[%s3309_s1 + $0x10] ss:$24 sps:$4 sm:$0xff]   ;;  %s2629_s14 = smov 64  }
   0x9   :  { %239 = vmatprep.subr.bf16.mxu0 %v2576_v5  ;;  %392 = vperm.xlu1 %2569, %v388_v16   ;;  %v2593_v22 = vld [vmem:[%s3309_s1 + $0x6c] ss:$24 sps:$4 sm:$0xff]   ;;  %v2591_v23 = vld [vmem:[%s3309_s1 + $0x68] ss:$24 sps:$4 sm:$0xff]   ;;  %v71_v37 = vld [vmem:[%s3309_s1 + $0xd0] sm:$0xff]  ;;  %s2630_s2 = smov 18  }
   0xa   :  { %v224_v29 = vsel %vm216_vm0, %v2392_v28, 0  ;;  %v2604_v32 = vld [vmem:[%s3309_s1 + $0x44] ss:$24 sps:$4 sm:$0xff]   ;;  %v2602_v33 = vld [vmem:[%s3309_s1 + $0x40] ss:$24 sps:$4 sm:$0xff]   ;;  %v2395_v39 = vcombine.high %v71_v37, %v71_v37  ;;  %v2394_v40 = vcombine.low %v71_v37, %v71_v37  ;;  %s2631_s15 = smov 48  }
   0xb   :  { %v2607_v34 = vld [vmem:[%s3309_s1 + $0x74] ss:$24 sps:$4 sm:$0xff]   ;;  %v2605_v35 = vld [vmem:[%s3309_s1 + $0x70] ss:$24 sps:$4 sm:$0xff]   ;;  %v2610_v36 = vld [vmem:[%s3309_s1 + $0xa4] ss:$24 sps:$4 sm:$0xff]  }
   0xc   :  { %240 = vmatpush1.bf16.msra.mxu0 %v2578_v6  ;;  %373 = vperm.xlu0 %2568, %v365_v19   ;;  %v2608_v38 = vld [vmem:[%s3309_s1 + $0xa0] ss:$24 sps:$4 sm:$0xff]   ;;  %v230_v41 = vsel %vm216_vm0, %v2394_v40, 0  ;;  %s2632_s16 = smov 112   ;;  %s2633_s17 = smov 111   ;;  %vm836_vm3 = vcmask 138240  }
   0xd   :  { %241 = vmatprep.subr.bf16.mxu0 %v2579_v7  ;;  %397 = vperm.xlu1 %2569, %v389_v20   ;;  %v2828_v47 = vld [vmem:[%s3314_s0] sm:$0x3f]  ;;  %s2624_s0 = smov 17   ;;  %s2634_s18 = smov 19   ;;  %vm533_vm4 = vcmask 130048   ;;  %vm1022_vm5 = vcmask 7168  }
   0xe   :  { %v2839_v57 = vrot.slane %v2828_v47, %v427_v46  ;;  %v2846_v2 = vrot.slane %v2828_v47, %v431_v53  ;;  %s2635_s19 = smov 32   ;;  %s2636_s20 = smov 110   ;;  %vm521_vm6 = vcmask 146432   ;;  %vm1339_vm7 = vcmask 1039360  }
   0xf   :  { %s2637_s21 = smov 16   ;;  %s2638_s3 = smov 109   ;;  %vm678_vm8 = vcmask 154624   ;;  %vm1509_vm9 = vcmask 908288   ;;  %vm1679_vm10 = vcmask 900096   ;;  %vm1854_vm11 = vcmask 891904  }
  0x10   :  { %242 = vmatpush1.bf16.msra.mxu0 %v2581_v9  ;;  %vm2355_vm12 = vcmask 64516  }
  0x11   :  { %2396 = vmatprep.subr.msk.bf16.mxu0 %vm216_vm0, %v2391_v10  ;;  %vm2356_vm13 = vmor %vm2355_vm12, %vm216_vm0 }
  0x14   :  { %244 = vmatpush1.bf16.msra.mxu0 %v218_v12  ;;  %v435_v12 = vsub.s32 2, %v2820_v44 }
  0x15   :  { %278 = vmatprep.subr.bf16.mxu0 %v2587_v13 }
  0x16   :  { %v2863_v20 = vrot.slane %v2828_v47, %v435_v12 }
  0x17   :  { %2397 = vmatmul.mubr.msk.bf16.vlgmr.msra.gmra.mrb[0].mxu0 %vm212_vm1, %v2584_v14 }
  0x18   :  { %279 = vmatpush1.bf16.msra.mxu0 %v2585_v17  ;;  %310 = vmatprep.mubr.bf16.mxu0 %v2623_v1  ;;  %v439_v17 = vsub.s32 3, %v2820_v44 }
  0x19   :  { %280 = vmatprep.subr.bf16.mxu0 %v2590_v18 }
  0x1a   :  { %v2870_v28 = vrot.slane %v2828_v47, %v439_v17 }
  0x1c   :  { %281 = vmatpush1.bf16.msra.mxu0 %v2588_v21 }
  0x1d   :  { %282 = vmatprep.subr.bf16.mxu0 %v2593_v22 }
  0x20   :  { %283 = vmatpush1.bf16.msra.mxu0 %v2591_v23 }
  0x21   :  { %284 = vmatprep.subr.bf16.mxu0 %v2596_v24 }
  0x24   :  { %285 = vmatpush1.bf16.msra.mxu0 %v2594_v26 }
  0x25   :  { %2398 = vmatprep.subr.msk.bf16.mxu0 %vm216_vm0, %v2393_v27 }
  0x28   :  { %287 = vmatpush1.bf16.msra.mxu0 %v224_v29 }
  0x29   :  { %321 = vmatprep.subr.bf16.mxu0 %v2601_v30 }
  0x2b   :  { %2399 = vmatmul.mubr.msk.bf16.vlgmr.msra.gmra.mrb[4].mxu0 %vm212_vm1, %v2584_v14 }
  0x2c   :  { %322 = vmatpush1.bf16.msra.mxu0 %v2599_v31  ;;  %353 = vmatprep.mubr.bf16.mxu0 %v2623_v1 }
  0x2d   :  { %323 = vmatprep.subr.bf16.mxu0 %v2604_v32 }
  0x30   :  { %324 = vmatpush1.bf16.msra.mxu0 %v2602_v33 }
  0x31   :  { %325 = vmatprep.subr.bf16.mxu0 %v2607_v34 }
  0x34   :  { %326 = vmatpush1.bf16.msra.mxu0 %v2605_v35 }
  0x35   :  { %327 = vmatprep.subr.bf16.mxu0 %v2610_v36 }
  0x38   :  { %328 = vmatpush1.bf16.msra.mxu0 %v2608_v38  ;;  %v2886_v38 = vld [vmem:[%s3313_s5] ss:$8 sps:$4 sm:$0xff]  }
  0x39   :  { %2400 = vmatprep.subr.msk.bf16.mxu0 %vm216_vm0, %v2395_v39 }
  0x3c   :  { %330 = vmatpush1.bf16.msra.mxu0 %v230_v41  ;;  %v443_v41 = vsub.s32 4, %v2820_v44 }
  0x3f   :  { %2401 = vmatmul.mubr.msk.bf16.vlgmr.msra.gmra.mrb[8].mxu0 %vm212_vm1, %v2584_v14 }
  0x40   :  { %569 = vmatprep.mubr.bf16.mxu0 %v2623_v1 }
  0x87   :  { %v2818_v43 = vpop.permute.xlu0 %368 }
  0x88   :  { %v2822_v45 = vpop.permute.xlu1 %392 }
  0x8b   :  { %v2830_v49 = vpop.permute.xlu0 %373 }
  0x8c   :  { %v2835_v55 = vpop.permute.xlu1 %397 }
  0xea   :  { %v269_v48 = vpop.f32.mrb[0].mxu0 }
  0xeb   :  { %v376_v50 = vmul.f32 %v2818_v43, %v269_v48  ;;  %v271_v51 = vpop.f32.mrb[1].mxu0  ;;  %v447_v48 = vsub.s32 5, %v2820_v44 }
  0xec   :  { %v377_v52 = vmul.f32 %v2818_v43, %v271_v51  ;;  %v273_v54 = vpop.f32.mrb[2].mxu0 }
  0xed   :  { %v400_v56 = vadd.f32 %v2822_v45, %v376_v50  ;;  %v382_v58 = vmul.f32 %v2830_v49, %v273_v54  ;;  %v275_v59 = vpop.f32.mrb[3].mxu0 }
  0xee   :  { %v401_v60 = vadd.f32 %v2822_v45, %v377_v52  ;;  %v383_v61 = vmul.f32 %v2830_v49, %v275_v59  ;;  %v2900_v59 = vrot.slane %v2828_v47, %v443_v41 }
  0xef   :  { %v412_v62 = vmax.f32 %v400_v56, 0.0  ;;  %v406_v63 = vadd.f32 %v2835_v55, %v382_v58 }
  0xf0   :  { %v413_v0 = vmax.f32 %v401_v60, 0.0  ;;  %v407_v3 = vadd.f32 %v2835_v55, %v383_v61  ;;  %v2904_v60 = vrot.slane %v2828_v47, %v447_v48 }
  0xf1   :  { %v455_v4 = vmul.f32 %v2839_v57, %v412_v62  ;;  %v418_v5 = vmax.f32 %v406_v63, 0.0 }
  0xf2   :  { %v419_v6 = vmax.f32 %v407_v3, 0.0  ;;  %v456_v8 = vmul.f32 %v2846_v2, %v413_v0 }
  0xf3   :  { %v461_v7 = vmul.f32 %v2839_v57, %v418_v5 }
  0xf4   :  { %v462_v9 = vmul.f32 %v2846_v2, %v419_v6  ;;  %v2185_v6 = vld [vmem:[%s3315_s10] sm:$0xff] }
  0xf5   :  { %v2853_v10 = vpack.c.bf16 %v461_v7, %v455_v4 }
  0xf6   :  { %v2855_v11 = vpack.c.bf16 %v462_v9, %v456_v8  ;;  %v2233_v8 = vld [vmem:[%s3317_s6] sm:$0xff] }
  0xf7   :  { %v2209_v9 = vld [vmem:[%s3318_s11] sm:$0xff] }
  0xfe   :  { %v312_v13 = vpop.f32.mrb[4].mxu0 }
  0xff   :  { %v378_v14 = vmul.f32 %v2818_v43, %v312_v13  ;;  %v314_v15 = vpop.f32.mrb[5].mxu0  ;;  %v2186_v13 = vld [vmem:[%s3315_s10 + $0x8] sm:$0xff] }
 0x100   :  { %v379_v16 = vmul.f32 %v2818_v43, %v314_v15  ;;  %v316_v18 = vpop.f32.mrb[6].mxu0 }
 0x101   :  { %v402_v19 = vadd.f32 %v2822_v45, %v378_v14  ;;  %v384_v21 = vmul.f32 %v2830_v49, %v316_v18  ;;  %v318_v22 = vpop.f32.mrb[7].mxu0  ;;  %v2257_v14 = vld [vmem:[%s3319_s7] sm:$0xff] }
 0x102   :  { %v403_v23 = vadd.f32 %v2822_v45, %v379_v16  ;;  %v385_v24 = vmul.f32 %v2830_v49, %v318_v22  ;;  %v2234_v16 = vld [vmem:[%s3317_s6 + $0x8] sm:$0xff] }
 0x103   :  { %v414_v25 = vmax.f32 %v402_v19, 0.0  ;;  %v408_v26 = vadd.f32 %v2835_v55, %v384_v21  ;;  %v2210_v19 = vld [vmem:[%s3318_s11 + $0x8] sm:$0xff] }
 0x104   :  { %v415_v27 = vmax.f32 %v403_v23, 0.0  ;;  %v409_v29 = vadd.f32 %v2835_v55, %v385_v24  ;;  %v2258_v24 = vld [vmem:[%s3319_s7 + $0x8] sm:$0xff] }
 0x105   :  { %v457_v30 = vmul.f32 %v2863_v20, %v414_v25  ;;  %v420_v31 = vmax.f32 %v408_v26, 0.0 }
 0x106   :  { %v421_v32 = vmax.f32 %v409_v29, 0.0  ;;  %v458_v34 = vmul.f32 %v2870_v28, %v415_v27 }
 0x107   :  { %v463_v33 = vmul.f32 %v2863_v20, %v420_v31 }
 0x108   :  { %v464_v35 = vmul.f32 %v2870_v28, %v421_v32 }
 0x109   :  { %v2877_v36 = vpack.c.bf16 %v463_v33, %v457_v30 }
 0x10a   :  { %v2879_v37 = vpack.c.bf16 %v464_v35, %v458_v34 }
 0x10c   :  { %832 = vrot.lane.b32.xlu0 %v2879_v37, %s2624_s0 }
 0x110   :  { %822 = vrot.lane.b32.xlu0 %v2886_v38, %s2625_s28 }
 0x112   :  { %v355_v39 = vpop.f32.mrb[8].mxu0 }
 0x113   :  { %v380_v40 = vmul.f32 %v2818_v43, %v355_v39  ;;  %v357_v42 = vpop.f32.mrb[9].mxu0 }
 0x114   :  { %v381_v46 = vmul.f32 %v2818_v43, %v357_v42  ;;  %v359_v50 = vpop.f32.mrb[10].mxu0  ;;  %1012 = vrot.lane.b32.xlu0 %v2855_v11, %s2626_s29 }
 0x115   :  { %v404_v51 = vadd.f32 %v2822_v45, %v380_v40  ;;  %v386_v52 = vmul.f32 %v2830_v49, %v359_v50  ;;  %v361_v53 = vpop.f32.mrb[11].mxu0 }
 0x116   :  { %v405_v54 = vadd.f32 %v2822_v45, %v381_v46  ;;  %v387_v56 = vmul.f32 %v2830_v49, %v361_v53 }
 0x117   :  { %v416_v58 = vmax.f32 %v404_v51, 0.0  ;;  %v410_v43 = vadd.f32 %v2835_v55, %v386_v52 }
 0x118   :  { %v417_v44 = vmax.f32 %v405_v54, 0.0  ;;  %v411_v61 = vadd.f32 %v2835_v55, %v387_v56  ;;  %999 = vrot.lane.b32.xlu0 %v2886_v38, %s2627_s30 }
 0x119   :  { %v422_v62 = vmax.f32 %v410_v43, 0.0  ;;  %v459_v45 = vmul.f32 %v2900_v59, %v416_v58 }
 0x11a   :  { %v423_v63 = vmax.f32 %v411_v61, 0.0  ;;  %v460_v0 = vmul.f32 %v2904_v60, %v417_v44 }
 0x11b   :  { %v465_v49 = vmul.f32 %v2900_v59, %v422_v62 }
 0x11c   :  { %v466_v3 = vmul.f32 %v2904_v60, %v423_v63  ;;  %1016 = vrot.lane.b32.xlu0 %v2879_v37, %s2626_s29 }
 0x11d   :  { %v2914_v47 = vpack.c.bf16 %v465_v49, %v459_v45 }
 0x11e   :  { %v481_v4 = vpack.c.bf16 %v466_v3, %v460_v0 }
 0x11f   :  { %834 = vrot.lane.b32.xlu1 %v2914_v47, %s2624_s0 }
 0x120   :  { %487 = vst.msk [vmem:[#allocation2 + $0x30] sm:$0xff] %vm474_vm2, %v481_v4 }
 0x123   :  { %1010 = vrot.lane.b32.xlu1 %v2853_v10, %s2626_s29 }
 0x127   :  { %v2921_v55 = vld [vmem:[#allocation2 + $0x30] sm:$0xff]  ;;  %1008 = vrot.lane.b32.xlu1 %v2623_v1, %s2626_s29 }
 0x128   :  { %1020 = vrot.lane.b32.xlu0 %v2921_v55, %s2626_s29 }
 0x12b   :  { %1014 = vrot.lane.b32.xlu1 %v2877_v36, %s2626_s29 }
 0x12c   :  { %1329 = vrot.lane.b32.xlu0 %v2855_v11, %s2628_s13 }
 0x12f   :  { %1018 = vrot.lane.b32.xlu1 %v2914_v47, %s2626_s29 }
 0x130   :  { %1327 = vrot.lane.b32.xlu0 %v2853_v10, %s2628_s13 }
 0x133   :  { %1179 = vrot.lane.b32.xlu1 %v2886_v38, %s2629_s14 }
 0x134   :  { %1333 = vrot.lane.b32.xlu0 %v2879_v37, %s2628_s13 }
 0x137   :  { %1331 = vrot.lane.b32.xlu1 %v2877_v36, %s2628_s13 }
 0x138   :  { %511 = vrot.lane.b32.xlu0 %v2853_v10, %s2630_s2 }
 0x13b   :  { %1325 = vrot.lane.b32.xlu1 %v2886_v38, %s2631_s15 }
 0x13c   :  { %509 = vrot.lane.b32.xlu0 %v2623_v1, %s2630_s2 }
 0x13f   :  { %1335 = vrot.lane.b32.xlu1 %v2914_v47, %s2628_s13 }
 0x140   :  { %517 = vrot.lane.b32.xlu0 %v2879_v37, %s2630_s2 }
 0x143   :  { %513 = vrot.lane.b32.xlu1 %v2855_v11, %s2630_s2 }
 0x144   :  { %1337 = vrot.lane.b32.xlu0 %v2921_v55, %s2628_s13 }
 0x147   :  { %501 = vrot.lane.b32.xlu1 %v2886_v38, %s2632_s16 }
 0x148   :  { %1501 = vrot.lane.b32.xlu0 %v2877_v36, %s2633_s17 }
 0x14b   :  { %515 = vrot.lane.b32.xlu1 %v2877_v36, %s2630_s2 }
 0x14c   :  { %519 = vrot.lane.b32.xlu0 %v2914_v47, %s2630_s2 }
 0x14f   :  { %1499 = vrot.lane.b32.xlu1 %v2855_v11, %s2633_s17 }
 0x150   :  { %1503 = vrot.lane.b32.xlu0 %v2879_v37, %s2633_s17 }
 0x153   :  { %1497 = vrot.lane.b32.xlu1 %v2853_v10, %s2633_s17 }
 0x154   :  { %668 = vrot.lane.b32.xlu0 %v2853_v10, %s2634_s18 }
 0x157   :  { %1495 = vrot.lane.b32.xlu1 %v2886_v38, %s2635_s19 }
 0x158   :  { %666 = vrot.lane.b32.xlu0 %v2623_v1, %s2634_s18 }
 0x15b   :  { %1505 = vrot.lane.b32.xlu1 %v2914_v47, %s2633_s17 }
 0x15c   :  { %672 = vrot.lane.b32.xlu0 %v2877_v36, %s2634_s18 }
 0x15f   :  { %670 = vrot.lane.b32.xlu1 %v2855_v11, %s2634_s18 }
 0x160   :  { %1669 = vrot.lane.b32.xlu0 %v2855_v11, %s2636_s20 }
 0x163   :  { %674 = vrot.lane.b32.xlu1 %v2879_v37, %s2634_s18 }
 0x164   :  { %1667 = vrot.lane.b32.xlu0 %v2853_v10, %s2636_s20 }
 0x167   :  { %1507 = vrot.lane.b32.xlu1 %v2921_v55, %s2633_s17 }
 0x168   :  { %1665 = vrot.lane.b32.xlu0 %v2886_v38, %s2637_s21 }
 0x16b   :  { %1671 = vrot.lane.b32.xlu1 %v2877_v36, %s2636_s20 }
 0x16c   :  { %1675 = vrot.lane.b32.xlu0 %v2914_v47, %s2636_s20 }
 0x16f   :  { %676 = vrot.lane.b32.xlu1 %v2914_v47, %s2634_s18 }
 0x170   :  { %828 = vrot.lane.b32.xlu0 %v2855_v11, %s2624_s0 }
 0x173   :  { %1673 = vrot.lane.b32.xlu1 %v2879_v37, %s2636_s20 }
 0x174   :  { %1677 = vrot.lane.b32.xlu0 %v2921_v55, %s2636_s20 }
 0x177   :  { %826 = vrot.lane.b32.xlu1 %v2853_v10, %s2624_s0 }
 0x178   :  { %1844 = vrot.lane.b32.xlu0 %v2855_v11, %s2638_s3 }
 0x17b   :  { %824 = vrot.lane.b32.xlu1 %v2623_v1, %s2624_s0 }
 0x17c   :  { %1842 = vrot.lane.b32.xlu0 %v2853_v10, %s2638_s3 }
 0x17e   :  { %v2974_v5 = vpop.permute.xlu0 %832 }
 0x17f   :  { %830 = vrot.lane.b32.xlu1 %v2877_v36, %s2624_s0 }
 0x180   :  { %1850 = vrot.lane.b32.xlu0 %v2914_v47, %s2638_s3 }
 0x182   :  { %v2983_v7 = vpop.permute.xlu0 %822 }
 0x183   :  { %1846 = vrot.lane.b32.xlu1 %v2877_v36, %s2638_s3 }
 0x184   :  { %2189 = vperm.xlu0 %2568, %v2185_v6  }
 0x186   :  { %v1013_v12 = vpop.permute.xlu0 %1012 }
 0x187   :  { %1848 = vrot.lane.b32.xlu1 %v2879_v37, %s2638_s3 }
 0x188   :  { %2237 = vperm.xlu0 %2568, %v2233_v8  }
 0x18a   :  { %v1000_v15 = vpop.permute.xlu0 %999 }
 0x18b   :  { %1852 = vrot.lane.b32.xlu1 %v2921_v55, %s2638_s3 }
 0x18c   :  { %2213 = vperm.xlu0 %2568, %v2209_v9  }
 0x18e   :  { %v1017_v22 = vpop.permute.xlu0 %1016 }
 0x18f   :  { %2194 = vperm.xlu1 %2569, %v2186_v13  }
 0x190   :  { %2261 = vperm.xlu0 %2568, %v2257_v14  }
 0x191   :  { %v835_v17 = vpop.permute.xlu1 %834 }
 0x192   :  { %937 = vmatprep.subr.bf16.mxu1 %v835_v17  ;;  %v841_v18 = vsel %vm836_vm3, %v2974_v5, %v835_v17 }
 0x193   :  { %938 = vmatpush1.bf16.msra.mxu1 %v841_v18  ;;  %2242 = vperm.xlu1 %2569, %v2234_v16  }
 0x195   :  { %v1011_v21 = vpop.permute.xlu1 %1010 }
 0x196   :  { %2411 = vmatmul.mubr.msk.bf16.vlgmr.msra.gmra.mrb[0].mxu1 %vm533_vm4, %v2983_v7  ;;  %v1024_v23 = vsel %vm1022_vm5, %v1011_v21, %v1013_v12 }
 0x197   :  { %1038 = vmatprep.subr.bf16.mxu1 %v1024_v23  ;;  %2218 = vperm.xlu1 %2569, %v2210_v19  }
 0x198   :  { %1070 = vmatprep.mubr.bf16.mxu1 %v2623_v1 }
 0x199   :  { %v1009_v25 = vpop.permute.xlu1 %1008 }
 0x19a   :  { %v1021_v26 = vpop.permute.xlu0 %1020  ;;  %v1023_v27 = vsel %vm1022_vm5, %v1009_v25, %v1011_v21 }
 0x19b   :  { %1039 = vmatpush1.bf16.msra.mxu1 %v1023_v27  ;;  %2266 = vperm.xlu1 %2569, %v2258_v24  }
 0x19d   :  { %v1015_v29 = vpop.permute.xlu1 %1014 }
 0x19e   :  { %v3015_v30 = vpop.permute.xlu0 %1329  ;;  %v1025_v31 = vsel %vm1022_vm5, %v1013_v12, %v1015_v29  ;;  %2412 = vmatmul.mubr.msk.bf16.vlgmr.msra.gmra.mrb[4].mxu1 %vm533_vm4, %v1000_v15  ;;  %v1026_v32 = vsel %vm1022_vm5, %v1015_v29, %v1017_v22 }
 0x19f   :  { %1081 = vmatprep.subr.bf16.mxu1 %v1026_v32  ;;  %1113 = vmatprep.mubr.bf16.mxu1 %v2623_v1 }
 0x1a0   :  { %1082 = vmatpush1.bf16.msra.mxu1 %v1025_v31 }
 0x1a1   :  { %v1019_v33 = vpop.permute.xlu1 %1018 }
 0x1a2   :  { %v1328_v34 = vpop.permute.xlu0 %1327  ;;  %v1028_v35 = vsel %vm1022_vm5, %v1019_v33, %v1021_v26  ;;  %v1027_v41 = vsel %vm1022_vm5, %v1017_v22, %v1019_v33 }
 0x1a3   :  { %1124 = vmatprep.subr.bf16.mxu1 %v1028_v35  ;;  %v1340_v0 = vsel %vm1339_vm7, %v1328_v34, %v3015_v30 }
 0x1a5   :  { %v1180_v39 = vpop.permute.xlu1 %1179 }
 0x1a6   :  { %v3022_v40 = vpop.permute.xlu0 %1333  ;;  %2413 = vmatmul.mubr.msk.bf16.vlgmr.msra.gmra.mrb[8].mxu1 %vm533_vm4, %v1000_v15 }
 0x1a7   :  { %1125 = vmatpush1.bf16.msra.mxu1 %v1027_v41  ;;  %1156 = vmatprep.mubr.bf16.mxu1 %v2623_v1 }
 0x1a8   :  { %1184 = vmatprep.subr.bf16.mxu1 %v2855_v11 }
 0x1a9   :  { %v1332_v42 = vpop.permute.xlu1 %1331 }
 0x1aa   :  { %v512_v46 = vpop.permute.xlu0 %511  ;;  %v1341_v61 = vsel %vm1339_vm7, %v3015_v30, %v1332_v42  ;;  %v1342_v8 = vsel %vm1339_vm7, %v1332_v42, %v3022_v40 }
 0x1ad   :  { %v3028_v48 = vpop.permute.xlu1 %1325 }
 0x1ae   :  { %v510_v50 = vpop.permute.xlu0 %509  ;;  %2414 = vmatmul.mubr.msk.bf16.vlgmr.msra.gmra.mrb[0].mxu1 %vm533_vm4, %v1000_v15 }
 0x1af   :  { %1185 = vmatpush1.bf16.msra.mxu1 %v2853_v10  ;;  %1216 = vmatprep.mubr.bf16.mxu1 %v2623_v1  ;;  %v522_v56 = vsel %vm521_vm6, %v510_v50, %v512_v46 }
 0x1b0   :  { %1227 = vmatprep.subr.bf16.mxu1 %v2879_v37 }
 0x1b1   :  { %v3034_v51 = vpop.permute.xlu1 %1335 }
 0x1b2   :  { %v518_v52 = vpop.permute.xlu0 %517 }
 0x1b5   :  { %v514_v53 = vpop.permute.xlu1 %513 }
 0x1b6   :  { %v1338_v54 = vpop.permute.xlu0 %1337  ;;  %2415 = vmatmul.mubr.msk.bf16.vlgmr.msra.gmra.mrb[4].mxu1 %vm533_vm4, %v1180_v39  ;;  %v523_v11 = vsel %vm521_vm6, %v512_v46, %v514_v53 }
 0x1b7   :  { %1228 = vmatpush1.bf16.msra.mxu1 %v2877_v36  ;;  %537 = vmatprep.subr.bf16.mxu0 %v523_v11  ;;  %v1344_v17 = vsel %vm1339_vm7, %v3034_v51, %v1338_v54 }
 0x1b8   :  { %1270 = vmatprep.subr.bf16.mxu1 %v2921_v55  ;;  %538 = vmatpush1.bf16.msra.mxu0 %v522_v56 }
 0x1b9   :  { %v502_v10 = vpop.permute.xlu1 %501  ;;  %1259 = vmatprep.mubr.bf16.mxu1 %v2623_v1 }
 0x1ba   :  { %v3042_v37 = vpop.permute.xlu0 %1501 }
 0x1bb   :  { %2403 = vmatmul.mubr.msk.bf16.vlgmr.msra.gmra.mrb[12].mxu0 %vm533_vm4, %v502_v10 }
 0x1bc   :  { %612 = vmatprep.mubr.bf16.mxu0 %v2623_v1 }
 0x1bd   :  { %v516_v58 = vpop.permute.xlu1 %515 }
 0x1be   :  { %v520_v43 = vpop.permute.xlu0 %519  ;;  %v524_v44 = vsel %vm521_vm6, %v514_v53, %v516_v58  ;;  %2416 = vmatmul.mubr.msk.bf16.vlgmr.msra.gmra.mrb[8].mxu1 %vm533_vm4, %v1180_v39  ;;  %v525_v36 = vsel %vm521_vm6, %v516_v58, %v518_v52 }
 0x1bf   :  { %1271 = vmatpush1.bf16.msra.mxu1 %v2914_v47  ;;  %580 = vmatprep.subr.bf16.mxu0 %v525_v36  ;;  %v526_v45 = vsel %vm521_vm6, %v518_v52, %v520_v43  ;;  %v1343_v47 = vsel %vm1339_vm7, %v3022_v40, %v3034_v51 }
 0x1c0   :  { %1354 = vmatprep.subr.bf16.mxu1 %v1341_v61  ;;  %581 = vmatpush1.bf16.msra.mxu0 %v524_v44 }
 0x1c1   :  { %v1500_v62 = vpop.permute.xlu1 %1499  ;;  %623 = vmatprep.subr.bf16.mxu0 %v520_v43  ;;  %1302 = vmatprep.mubr.bf16.mxu1 %v2623_v1  ;;  %v2014_v43 = vld [vmem:[%s3320_s8 + $0x10] sm:$0xff] }
 0x1c2   :  { %v3053_v63 = vpop.permute.xlu0 %1503  ;;  %v1511_v21 = vsel %vm1509_vm9, %v1500_v62, %v3042_v37  ;;  %v2437_v61 = vcombine.high %v2014_v43, %v2014_v43 }
 0x1c3   :  { %2404 = vmatmul.mubr.msk.bf16.vlgmr.msra.gmra.mrb[16].mxu0 %vm533_vm4, %v502_v10  ;;  %v1512_v33 = vsel %vm1509_vm9, %v3042_v37, %v3053_v63 }
 0x1c4   :  { %624 = vmatpush1.bf16.msra.mxu0 %v526_v45  ;;  %655 = vmatprep.mubr.bf16.mxu0 %v2623_v1  ;;  %v2436_v45 = vcombine.low %v2014_v43, %v2014_v43 }
 0x1c5   :  { %v1498_v49 = vpop.permute.xlu1 %1497 }
 0x1c6   :  { %v669_v3 = vpop.permute.xlu0 %668  ;;  %2417 = vmatmul.mubr.msk.bf16.vlgmr.msra.gmra.mrb[0].mxu1 %vm533_vm4, %v1180_v39  ;;  %v1510_v26 = vsel %vm1509_vm9, %v1498_v49, %v1500_v62 }
 0x1c7   :  { %1355 = vmatpush1.bf16.msra.mxu1 %v1340_v0  ;;  %1386 = vmatprep.mubr.bf16.mxu1 %v2623_v1 }
 0x1c8   :  { %1397 = vmatprep.subr.bf16.mxu1 %v1343_v47 }
 0x1c9   :  { %v3065_v4 = vpop.permute.xlu1 %1495 }
 0x1ca   :  { %v667_v55 = vpop.permute.xlu0 %666 }
 0x1cb   :  { %2405 = vmatmul.mubr.msk.bf16.vlgmr.msra.gmra.mrb[20].mxu0 %vm533_vm4, %v502_v10  ;;  %v679_v15 = vsel %vm678_vm8, %v667_v55, %v669_v3 }
 0x1cc   :  { %725 = vmatprep.mubr.bf16.mxu0 %v2623_v1 }
 0x1cd   :  { %v1506_v6 = vpop.permute.xlu1 %1505 }
 0x1ce   :  { %v673_v9 = vpop.permute.xlu0 %672  ;;  %2418 = vmatmul.mubr.msk.bf16.vlgmr.msra.gmra.mrb[4].mxu1 %vm533_vm4, %v3028_v48  ;;  %v1513_v27 = vsel %vm1509_vm9, %v3053_v63, %v1506_v6 }
 0x1cf   :  { %1398 = vmatpush1.bf16.msra.mxu1 %v1342_v8  ;;  %1429 = vmatprep.mubr.bf16.mxu1 %v2623_v1 }
 0x1d0   :  { %1440 = vmatprep.subr.bf16.mxu1 %v1338_v54  ;;  %v2013_v54 = vld [vmem:[%s3320_s8 + $0x8] sm:$0xff] }
 0x1d1   :  { %v671_v12 = vpop.permute.xlu1 %670  ;;  %v2435_v10 = vcombine.high %v2013_v54, %v2013_v54  ;;  %v2434_v58 = vcombine.low %v2013_v54, %v2013_v54 }
 0x1d2   :  { %v3074_v13 = vpop.permute.xlu0 %1669  ;;  %v680_v14 = vsel %vm678_vm8, %v669_v3, %v671_v12  ;;  %v681_v22 = vsel %vm678_vm8, %v671_v12, %v673_v9  ;;  %v2622_v3 = vld [vmem:[#allocation2] sm:$0xff] }
 0x1d3   :  { %693 = vmatprep.subr.bf16.mxu0 %v680_v14  ;;  %v2045_v36 = vsel %vm216_vm0, %v2434_v58, 0 }
 0x1d4   :  { %694 = vmatpush1.bf16.msra.mxu0 %v679_v15 }
 0x1d5   :  { %v675_v16 = vpop.permute.xlu1 %674 }
 0x1d6   :  { %2419 = vmatmul.mubr.msk.bf16.vlgmr.msra.gmra.mrb[8].mxu1 %vm533_vm4, %v3028_v48  ;;  %v682_v18 = vsel %vm678_vm8, %v673_v9, %v675_v16  ;;  %v1668_v19 = vpop.permute.xlu0 %1667  ;;  %v2621_v9 = vld [vmem:[%s3313_s5 + $0x4] ss:$8 sps:$4 sm:$0xff]  }
 0x1d7   :  { %1441 = vmatpush1.bf16.msra.mxu1 %v1344_v17  ;;  %2406 = vmatmul.mubr.msk.bf16.vlgmr.msra.gmra.mrb[12].mxu0 %vm533_vm4, %v2886_v38  ;;  %v1680_v11 = vsel %vm1679_vm10, %v1668_v19, %v3074_v13 }
 0x1d8   :  { %736 = vmatprep.subr.bf16.mxu0 %v682_v18  ;;  %1524 = vmatprep.subr.bf16.mxu1 %v1511_v21 }
 0x1d9   :  { %737 = vmatpush1.bf16.msra.mxu0 %v681_v22  ;;  %v1508_v23 = vpop.permute.xlu1 %1507  ;;  %1472 = vmatprep.mubr.bf16.mxu1 %v2623_v1 }
 0x1da   :  { %768 = vmatprep.mubr.bf16.mxu0 %v2623_v1  ;;  %v3090_v24 = vpop.permute.xlu0 %1665  ;;  %v1514_v41 = vsel %vm1509_vm9, %v1506_v6, %v1508_v23 }
 0x1dd   :  { %v3092_v25 = vpop.permute.xlu1 %1671 }
 0x1de   :  { %2420 = vmatmul.mubr.msk.bf16.vlgmr.msra.gmra.mrb[0].mxu1 %vm533_vm4, %v3028_v48  ;;  %v3104_v31 = vpop.permute.xlu0 %1675  ;;  %v1681_v46 = vsel %vm1679_vm10, %v3074_v13, %v3092_v25 }
 0x1df   :  { %1525 = vmatpush1.bf16.msra.mxu1 %v1510_v26  ;;  %2407 = vmatmul.mubr.msk.bf16.vlgmr.msra.gmra.mrb[16].mxu0 %vm533_vm4, %v2886_v38 }
 0x1e0   :  { %1567 = vmatprep.subr.bf16.mxu1 %v1513_v27  ;;  %1556 = vmatprep.mubr.bf16.mxu1 %v2623_v1 }
 0x1e1   :  { %v677_v29 = vpop.permute.xlu1 %676  ;;  %811 = vmatprep.mubr.bf16.mxu0 %v2623_v1 }
 0x1e2   :  { %v683_v30 = vsel %vm678_vm8, %v675_v16, %v677_v29  ;;  %779 = vmatprep.subr.bf16.mxu0 %v677_v29  ;;  %v829_v34 = vpop.permute.xlu0 %828 }
 0x1e3   :  { %780 = vmatpush1.bf16.msra.mxu0 %v683_v30 }
 0x1e5   :  { %v1674_v32 = vpop.permute.xlu1 %1673 }
 0x1e6   :  { %2421 = vmatmul.mubr.msk.bf16.vlgmr.msra.gmra.mrb[4].mxu1 %vm533_vm4, %v3065_v4  ;;  %v1678_v37 = vpop.permute.xlu0 %1677  ;;  %v1682_v44 = vsel %vm1679_vm10, %v3092_v25, %v1674_v32 }
 0x1e7   :  { %1568 = vmatpush1.bf16.msra.mxu1 %v1512_v33  ;;  %2408 = vmatmul.mubr.msk.bf16.vlgmr.msra.gmra.mrb[20].mxu0 %vm533_vm4, %v2886_v38  ;;  %v2012_v38 = vld [vmem:[%s3320_s8] sm:$0xff]  ;;  %v1684_v49 = vsel %vm1679_vm10, %v3104_v31, %v1678_v37 }
 0x1e8   :  { %1610 = vmatprep.subr.bf16.mxu1 %v1508_v23  ;;  %1599 = vmatprep.mubr.bf16.mxu1 %v2623_v1  ;;  %v2433_v50 = vcombine.high %v2012_v38, %v2012_v38  ;;  %v2432_v53 = vcombine.low %v2012_v38, %v2012_v38 }
 0x1e9   :  { %v827_v35 = vpop.permute.xlu1 %826  ;;  %883 = vmatprep.mubr.bf16.mxu0 %v2623_v1 }
 0x1ea   :  { %v838_v39 = vsel %vm836_vm3, %v827_v35, %v829_v34  ;;  %v2039_v56 = vsel %vm216_vm0, %v2432_v53, 0  ;;  %v1845_v62 = vpop.permute.xlu0 %1844 }
 0x1eb   :  { %851 = vmatprep.subr.bf16.mxu0 %v838_v39 }
 0x1ed   :  { %v825_v40 = vpop.permute.xlu1 %824 }
 0x1ee   :  { %v837_v42 = vsel %vm836_vm3, %v825_v40, %v827_v35  ;;  %2422 = vmatmul.mubr.msk.bf16.vlgmr.msra.gmra.mrb[8].mxu1 %vm533_vm4, %v3065_v4  ;;  %v1843_v47 = vpop.permute.xlu0 %1842 }
 0x1ef   :  { %1611 = vmatpush1.bf16.msra.mxu1 %v1514_v41  ;;  %852 = vmatpush1.bf16.msra.mxu0 %v837_v42  ;;  %v1855_v55 = vsel %vm1854_vm11, %v1843_v47, %v1845_v62 }
 0x1f0   :  { %1694 = vmatprep.subr.bf16.mxu1 %v1681_v46  ;;  %1642 = vmatprep.mubr.bf16.mxu1 %v2623_v1 }
 0x1f1   :  { %v831_v48 = vpop.permute.xlu1 %830 }
 0x1f2   :  { %v839_v51 = vsel %vm836_vm3, %v829_v34, %v831_v48  ;;  %2409 = vmatmul.mubr.msk.bf16.vlgmr.msra.gmra.mrb[12].mxu0 %vm533_vm4, %v2983_v7  ;;  %v840_v52 = vsel %vm836_vm3, %v831_v48, %v2974_v5  ;;  %v1683_v5 = vsel %vm1679_vm10, %v1674_v32, %v3104_v31  ;;  %v1851_v6 = vpop.permute.xlu0 %1850 }
 0x1f3   :  { %894 = vmatprep.subr.bf16.mxu0 %v840_v52  ;;  %926 = vmatprep.mubr.bf16.mxu0 %v2623_v1 }
 0x1f4   :  { %895 = vmatpush1.bf16.msra.mxu0 %v839_v51 }
 0x1f5   :  { %2438 = vmatprep.subr.msk.bf16.mxu0 %vm216_vm0, %v2433_v50  ;;  %v1847_v63 = vpop.permute.xlu1 %1846 }
 0x1f6   :  { %2423 = vmatmul.mubr.msk.bf16.vlgmr.msra.gmra.mrb[0].mxu1 %vm533_vm4, %v3065_v4  ;;  %v1856_v0 = vsel %vm1854_vm11, %v1845_v62, %v1847_v63 }
 0x1f7   :  { %1695 = vmatpush1.bf16.msra.mxu1 %v1680_v11  ;;  %1726 = vmatprep.mubr.bf16.mxu1 %v2623_v1 }
 0x1f8   :  { %1737 = vmatprep.subr.bf16.mxu1 %v1683_v5 }
 0x1f9   :  { %v1849_v4 = vpop.permute.xlu1 %1848 }
 0x1fa   :  { %2410 = vmatmul.mubr.msk.bf16.vlgmr.msra.gmra.mrb[16].mxu0 %vm533_vm4, %v2983_v7  ;;  %v2616_v7 = vld [vmem:[%s3316_s9] sm:$0xff]   ;;  %v1858_v8 = vsel %vm1854_vm11, %v1849_v4, %v1851_v6  ;;  %v1857_v12 = vsel %vm1854_vm11, %v1847_v63, %v1849_v4 }
 0x1fb   :  { %2057 = vmatpush1.bf16.msra.mxu0 %v2039_v56  ;;  %2088 = vmatprep.mubr.bf16.mxu0 %v2623_v1 }
 0x1fc   :  { %2440 = vmatprep.subr.msk.bf16.mxu0 %vm216_vm0, %v2435_v10 }
 0x1fd   :  { %v1853_v13 = vpop.permute.xlu1 %1852 }
 0x1fe   :  { %2424 = vmatmul.mubr.msk.bf16.vlgmr.msra.gmra.mrb[4].mxu1 %vm533_vm4, %v3090_v24  ;;  %v1859_v14 = vsel %vm1854_vm11, %v1851_v6, %v1853_v13 }
 0x1ff   :  { %1738 = vmatpush1.bf16.msra.mxu1 %v1682_v44  ;;  %1769 = vmatprep.mubr.bf16.mxu1 %v2623_v1 }
 0x200   :  { %1780 = vmatprep.subr.bf16.mxu1 %v1678_v37 }
 0x202   :  { %2439 = vmatmul.mubr.msk.bf16.vlgmr.msra.gmra.mrb[24].mxu0 %vm474_vm2, %v2616_v7 }
 0x203   :  { %2100 = vmatpush1.bf16.msra.mxu0 %v2045_v36  ;;  %2131 = vmatprep.mubr.bf16.mxu0 %v2623_v1  ;;  %v2051_v1 = vsel %vm216_vm0, %v2436_v45, 0  ;;  %v3198_v33 = vpop.permute.xlu0 %2189 }
 0x204   :  { %2442 = vmatprep.subr.msk.bf16.mxu0 %vm216_vm0, %v2437_v61 }
 0x206   :  { %2425 = vmatmul.mubr.msk.bf16.vlgmr.msra.gmra.mrb[8].mxu1 %vm533_vm4, %v3090_v24 }
 0x207   :  { %1781 = vmatpush1.bf16.msra.mxu1 %v1684_v49  ;;  %1812 = vmatprep.mubr.bf16.mxu1 %v2622_v3  ;;  %v3202_v42 = vpop.permute.xlu0 %2237 }
 0x208   :  { %1869 = vmatprep.subr.bf16.mxu1 %v1856_v0 }
 0x20a   :  { %2441 = vmatmul.mubr.msk.bf16.vlgmr.msra.gmra.mrb[28].mxu0 %vm474_vm2, %v2616_v7 }
 0x20b   :  { %2143 = vmatpush1.bf16.msra.mxu0 %v2051_v1  ;;  %2174 = vmatprep.mubr.bf16.mxu0 %v2622_v3  ;;  %v3208_v50 = vpop.permute.xlu0 %2213 }
 0x20e   :  { %2426 = vmatmul.mubr.msk.bf16.vlgmr.msra.gmra.mrb[0].mxu1 %vm533_vm4, %v3090_v24  ;;  %v3200_v34 = vpop.permute.xlu1 %2194 }
 0x20f   :  { %1870 = vmatpush1.bf16.msra.mxu1 %v1855_v55  ;;  %1901 = vmatprep.mubr.bf16.mxu1 %v2622_v3  ;;  %v3222_v63 = vpop.permute.xlu0 %2261 }
 0x210   :  { %1912 = vmatprep.subr.bf16.mxu1 %v1858_v8 }
 0x212   :  { %2443 = vmatmul.mubr.msk.bf16.vlgmr.msra.gmra.mrb[32].mxu0 %vm474_vm2, %v2616_v7  ;;  %v3204_v38 = vpop.permute.xlu1 %2242 }
 0x216   :  { %2428 = vmatmul.mubr.msk.bf16.vlgmr.msra.gmra.mrb[4].mxu1 %vm533_vm4, %v2621_v9  ;;  %v3214_v53 = vpop.permute.xlu1 %2218 }
 0x217   :  { %1913 = vmatpush1.bf16.msra.mxu1 %v1857_v12  ;;  %1944 = vmatprep.mubr.bf16.mxu1 %v2622_v3 }
 0x218   :  { %1955 = vmatprep.subr.bf16.mxu1 %v1853_v13 }
 0x21a   :  { %v3229_v4 = vpop.permute.xlu1 %2266 }
 0x21e   :  { %2429 = vmatmul.mubr.msk.bf16.vlgmr.msra.gmra.mrb[8].mxu1 %vm533_vm4, %v2621_v9 }
 0x21f   :  { %1956 = vmatpush1.bf16.msra.mxu1 %v1859_v14  ;;  %1987 = vmatprep.mubr.bf16.mxu1 %v2622_v3 }
 0x226   :  { %2430 = vmatmul.mubr.msk.bf16.vlgmr.msra.gmra.mrb[0].mxu1 %vm533_vm4, %v2621_v9 }
 0x2ba   :  { %v3184_v15 = vpop.f32.mrb[20].mxu0 }
 0x2bb   :  { %v3186_v16 = vpop.f32.mrb[21].mxu0 }
 0x2bc   :  { %v3188_v17 = vpop.f32.mrb[22].mxu0 }
 0x2bd   :  { %v3190_v18 = vpop.f32.mrb[23].mxu0 }
 0x2c5   :  { %v885_v19 = vpop.f32.mrb[12].mxu0 }
 0x2c6   :  { %v887_v21 = vpop.f32.mrb[13].mxu0 }
 0x2c7   :  { %v889_v22 = vpop.f32.mrb[14].mxu0 }
 0x2c8   :  { %v891_v23 = vpop.f32.mrb[15].mxu0 }
 0x2cd   :  { %v928_v24 = vpop.f32.mrb[16].mxu0 }
 0x2ce   :  { %v3192_v25 = vpop.f32.mrb[17].mxu0 }
 0x2cf   :  { %v3194_v26 = vpop.f32.mrb[18].mxu0 }
 0x2d0   :  { %v3196_v27 = vpop.f32.mrb[19].mxu0 }
 0x2d5   :  { %v2090_v29 = vpop.f32.mrb[24].mxu0 }
 0x2d6   :  { %v2092_v30 = vpop.f32.mrb[25].mxu0  ;;  %v2197_v11 = vmul.f32 %v3198_v33, %v2090_v29 }
 0x2d7   :  { %v2094_v31 = vpop.f32.mrb[26].mxu0  ;;  %v2198_v10 = vmul.f32 %v3198_v33, %v2092_v30 }
 0x2d8   :  { %v2096_v32 = vpop.f32.mrb[27].mxu0  ;;  %v2203_v37 = vmul.f32 %v3200_v34, %v2094_v31  ;;  %v2221_v3 = vadd.f32 %v3208_v50, %v2197_v11 }
 0x2d9   :  { %v2204_v44 = vmul.f32 %v3200_v34, %v2096_v32  ;;  %v2222_v55 = vadd.f32 %v3208_v50, %v2198_v10 }
 0x2da   :  { %v2227_v6 = vadd.f32 %v3214_v53, %v2203_v37 }
 0x2db   :  { %v2228_v12 = vadd.f32 %v3214_v53, %v2204_v44 }
 0x2dd   :  { %v2133_v35 = vpop.f32.mrb[28].mxu0 }
 0x2de   :  { %v2135_v39 = vpop.f32.mrb[29].mxu0  ;;  %v2199_v7 = vmul.f32 %v3198_v33, %v2133_v35 }
 0x2df   :  { %v2137_v40 = vpop.f32.mrb[30].mxu0  ;;  %v2200_v45 = vmul.f32 %v3198_v33, %v2135_v39 }
 0x2e0   :  { %v2139_v41 = vpop.f32.mrb[31].mxu0  ;;  %v2223_v13 = vadd.f32 %v3208_v50, %v2199_v7 }
 0x2e1   :  { %v2206_v31 = vmul.f32 %v3200_v34, %v2139_v41 }
 0x2e5   :  { %v2176_v46 = vpop.f32.mrb[32].mxu0 }
 0x2e6   :  { %v3206_v48 = vpop.f32.mrb[33].mxu0  ;;  %v2201_v11 = vmul.f32 %v3198_v33, %v2176_v46 }
 0x2e7   :  { %v3210_v51 = vpop.f32.mrb[34].mxu0 }
 0x2e8   :  { %v3212_v52 = vpop.f32.mrb[35].mxu0 }
 0x2e9   :  { %v1903_v54 = vpop.f32.mrb[4].mxu1 }
 0x2ea   :  { %v2456_v5 = vadd.f32 %v1903_v54, %v885_v19  ;;  %v1905_v56 = vpop.f32.mrb[5].mxu1 }
 0x2eb   :  { %v2457_v58 = vadd.f32 %v1905_v56, %v887_v21  ;;  %v1907_v43 = vpop.f32.mrb[6].mxu1  ;;  %v2224_v21 = vadd.f32 %v3208_v50, %v2200_v45 }
 0x2ec   :  { %v2245_v36 = vmul.f32 %v2456_v5, %v3202_v42  ;;  %v2458_v61 = vadd.f32 %v1907_v43, %v889_v22  ;;  %v1909_v62 = vpop.f32.mrb[7].mxu1  ;;  %v2205_v22 = vmul.f32 %v3200_v34, %v2137_v40 }
 0x2ed   :  { %v2246_v49 = vmul.f32 %v2457_v58, %v3202_v42  ;;  %v2459_v0 = vadd.f32 %v1909_v62, %v891_v23 }
 0x2ee   :  { %v2269_v47 = vadd.f32 %v3222_v63, %v2245_v36  ;;  %v2251_v1 = vmul.f32 %v2458_v61, %v3204_v38  ;;  %v2229_v61 = vadd.f32 %v3214_v53, %v2205_v22 }
 0x2ef   :  { %v2270_v8 = vadd.f32 %v3222_v63, %v2246_v49  ;;  %v2252_v9 = vmul.f32 %v2459_v0, %v3204_v38 }
 0x2f0   :  { %v2281_v14 = vadd.f32 %v2269_v47, %v2221_v3  ;;  %v2275_v19 = vadd.f32 %v3229_v4, %v2251_v1  ;;  %v2230_v47 = vadd.f32 %v3214_v53, %v2206_v31 }
 0x2f1   :  { %v2282_v23 = vadd.f32 %v2270_v8, %v2222_v55  ;;  %v2276_v29 = vadd.f32 %v3229_v4, %v2252_v9  ;;  %v1946_v30 = vpop.f32.mrb[8].mxu1 }
 0x2f2   :  { %v2293_v32 = vmax.f32 %v2281_v14, 0.0  ;;  %v2287_v35 = vadd.f32 %v2275_v19, %v2227_v6  ;;  %v2460_v39 = vadd.f32 %v1946_v30, %v928_v24  ;;  %v1948_v54 = vpop.f32.mrb[9].mxu1 }
 0x2f3   :  { %v2294_v5 = vmax.f32 %v2282_v23, 0.0  ;;  %v2288_v56 = vadd.f32 %v2276_v29, %v2228_v12  ;;  %v2461_v10 = vadd.f32 %v1948_v54, %v3192_v25  ;;  %v1950_v37 = vpop.f32.mrb[10].mxu1  ;;  %v2207_v12 = vmul.f32 %v3200_v34, %v3210_v51 }
 0x2f4   :  { %v2305_v58 = vmul.f32 %v2293_v32, %v2839_v57  ;;  %v2299_v40 = vmax.f32 %v2287_v35, 0.0  ;;  %v2247_v43 = vmul.f32 %v2460_v39, %v3202_v42  ;;  %v2462_v44 = vadd.f32 %v1950_v37, %v3194_v26  ;;  %v1952_v7 = vpop.f32.mrb[11].mxu1 }
 0x2f5   :  { %v2306_v41 = vmul.f32 %v2294_v5, %v2846_v2  ;;  %v2300_v36 = vmax.f32 %v2288_v56, 0.0  ;;  %v2248_v24 = vmul.f32 %v2461_v10, %v3202_v42  ;;  %v2463_v46 = vadd.f32 %v1952_v7, %v3196_v27 }
 0x2f6   :  { %v2311_v25 = vmul.f32 %v2299_v40, %v2839_v57  ;;  %v2271_v62 = vadd.f32 %v3222_v63, %v2247_v43  ;;  %v2253_v45 = vmul.f32 %v2462_v44, %v3204_v38  ;;  %v2202_v27 = vmul.f32 %v3198_v33, %v3206_v48 }
 0x2f7   :  { %v2450_v49 = vpack.c.bf16 %v2306_v41, %v2305_v58  ;;  %v2312_v0 = vmul.f32 %v2300_v36, %v2846_v2  ;;  %v2272_v26 = vadd.f32 %v3222_v63, %v2248_v24  ;;  %v2254_v3 = vmul.f32 %v2463_v46, %v3204_v38 }
 0x2f8   :  { %v2283_v1 = vadd.f32 %v2271_v62, %v2223_v13  ;;  %v2277_v55 = vadd.f32 %v3229_v4, %v2253_v45  ;;  %v2225_v57 = vadd.f32 %v3208_v50, %v2201_v11  ;;  %v2208_v13 = vmul.f32 %v3200_v34, %v3212_v52 }
 0x2f9   :  { %2353 = vst [vmem:[%s3321_s12] sm:$0xff] %v2450_v49  ;;  %v2453_v6 = vpack.c.bf16 %v2312_v0, %v2311_v25  ;;  %v2284_v2 = vadd.f32 %v2272_v26, %v2224_v21  ;;  %v2278_v8 = vadd.f32 %v3229_v4, %v2254_v3  ;;  %v1989_v9 = vpop.f32.mrb[0].mxu1  ;;  %v2226_v54 = vadd.f32 %v3208_v50, %v2202_v27 }
 0x2fa   :  { %v2295_v14 = vmax.f32 %v2283_v1, 0.0  ;;  %v2289_v19 = vadd.f32 %v2277_v55, %v2229_v61  ;;  %v2464_v33 = vadd.f32 %v1989_v9, %v3184_v15  ;;  %v1991_v48 = vpop.f32.mrb[1].mxu1  ;;  %v2231_v58 = vadd.f32 %v3214_v53, %v2207_v12 }
 0x2fb   :  { %2358 = vst [vmem:[%s3321_s12 + $0x18] sm:$0xff] %v2453_v6  ;;  %v2296_v22 = vmax.f32 %v2284_v2, 0.0  ;;  %v2290_v21 = vadd.f32 %v2278_v8, %v2230_v47  ;;  %v2465_v23 = vadd.f32 %v1991_v48, %v3186_v16  ;;  %v1993_v29 = vpop.f32.mrb[2].mxu1  ;;  %v2232_v50 = vadd.f32 %v3214_v53, %v2208_v13 }
 0x2fc   :  { %v2307_v30 = vmul.f32 %v2295_v14, %v2863_v20  ;;  %v2301_v51 = vmax.f32 %v2289_v19, 0.0  ;;  %v2249_v31 = vmul.f32 %v2464_v33, %v3202_v42  ;;  %v2466_v15 = vadd.f32 %v1993_v29, %v3188_v17  ;;  %v1995_v32 = vpop.f32.mrb[3].mxu1 }
 0x2fd   :  { %v2308_v35 = vmul.f32 %v2296_v22, %v2870_v28  ;;  %v2302_v34 = vmax.f32 %v2290_v21, 0.0  ;;  %v2250_v52 = vmul.f32 %v2465_v23, %v3202_v42  ;;  %v2467_v39 = vadd.f32 %v1995_v32, %v3190_v18 }
 0x2fe   :  { %v2313_v16 = vmul.f32 %v2301_v51, %v2863_v20  ;;  %v2273_v11 = vadd.f32 %v3222_v63, %v2249_v31  ;;  %v2255_v5 = vmul.f32 %v2466_v15, %v3204_v38 }
 0x2ff   :  { %v2451_v56 = vpack.c.bf16 %v2308_v35, %v2307_v30  ;;  %v2314_v10 = vmul.f32 %v2302_v34, %v2870_v28  ;;  %v2274_v17 = vadd.f32 %v3222_v63, %v2250_v52  ;;  %v2256_v37 = vmul.f32 %v2467_v39, %v3204_v38 }
 0x300   :  { %v2285_v42 = vadd.f32 %v2273_v11, %v2225_v57  ;;  %v2279_v18 = vadd.f32 %v3229_v4, %v2255_v5 }
 0x301   :  { %2354 = vst [vmem:[%s3321_s12 + $0x8] sm:$0xff] %v2451_v56  ;;  %v2454_v20 = vpack.c.bf16 %v2314_v10, %v2313_v16  ;;  %v2286_v40 = vadd.f32 %v2274_v17, %v2226_v54  ;;  %v2280_v43 = vadd.f32 %v3229_v4, %v2256_v37 }
 0x302   :  { %v2297_v28 = vmax.f32 %v2285_v42, 0.0  ;;  %v2291_v44 = vadd.f32 %v2279_v18, %v2231_v58 }
 0x303   :  { %2359 = vst [vmem:[%s3321_s12 + $0x20] sm:$0xff] %v2454_v20  ;;  %v2298_v38 = vmax.f32 %v2286_v40, 0.0  ;;  %v2292_v63 = vadd.f32 %v2280_v43, %v2232_v50 }
 0x304   :  { %v2309_v7 = vmul.f32 %v2297_v28, %v2900_v59  ;;  %v2303_v53 = vmax.f32 %v2291_v44, 0.0 }
 0x305   :  { %v2310_v41 = vmul.f32 %v2298_v38, %v2904_v60  ;;  %v2304_v36 = vmax.f32 %v2292_v63, 0.0 }
 0x306   :  { %v2315_v24 = vmul.f32 %v2303_v53, %v2900_v59 }
 0x307   :  { %v2452_v4 = vpack.c.bf16 %v2310_v41, %v2309_v7  ;;  %v2316_v46 = vmul.f32 %v2304_v36, %v2904_v60 }
 0x309   :  { %2357 = vst.msk [vmem:[%s3321_s12 + $0x10] sm:$0xff] %vm2356_vm13, %v2452_v4  ;;  %v2455_v61 = vpack.c.bf16 %v2316_v46, %v2315_v24 }
 0x30b   :  { %2360 = vst.msk [vmem:[%s3321_s12 + $0x28] sm:$0xff] %vm2356_vm13, %v2455_v61 }

// kernel: _lambda_.8
= control target key start
LH: loop header
LB: loop body
LE: loop exit
PB: predicated region body
PF: predicated region fallthrough
CT: control target
= control target key end

     0   :  { %v1626_v1 = vmov 0   ;;  %vm173_vm0 = vcmask 130048   ;;  %vm327_vm1 = vcmask 588800   ;;  %v306_v32 = vlaneseq  ;;  %s1629_s28 = smov 64   ;;  %s1630_s13 = smov 32   ;;  %s2123_s1 = inlined_call_operand.vmem [shape: bf16[144,200], index: 1, kind: input, shape index: {}]   ;;  %s2124_s2 = inlined_call_operand.vmem [shape: bf16[32,144], index: 2, kind: input, shape index: {}]   ;;  %s2125_s3 = inlined_call_operand.vmem [shape: f32[32,1], index: 3, kind: input, shape index: {}]   ;;  %s2126_s4 = inlined_call_operand.vmem [shape: f32[32,1], index: 4, kind: input, shape index: {}]   ;;  %s2127_s5 = inlined_call_operand.vmem [shape: bf16[32,288], index: 5, kind: input, shape index: {}]   ;;  %s2128_s0 = inlined_call_operand.vmem [shape: f32[1,200], index: 0, kind: input, shape index: {}]   ;;  %s2129_s8 = inlined_call_operand.vmem [shape: bf16[16,200], index: 8, kind: input, shape index: {}]   ;;  %s2130_s9 = inlined_call_operand.vmem [shape: bf16[32,16], index: 9, kind: input, shape index: {}]   ;;  %s2131_s10 = inlined_call_operand.vmem [shape: f32[32,1], index: 10, kind: input, shape index: {}]   ;;  %s2132_s6 = inlined_call_operand.vmem [shape: f32[32,1], index: 6, kind: input, shape index: {}]   ;;  %s2133_s11 = inlined_call_operand.vmem [shape: f32[32,1], index: 11, kind: input, shape index: {}]   ;;  %s2134_s7 = inlined_call_operand.vmem [shape: f32[32,1], index: 7, kind: input, shape index: {}]   ;;  %s2135_s12 = inlined_call_operand.vmem [shape: bf16[32,200], index: 12, kind: output, shape index: {}]  }
   0x1   :  { %v1582_v0 = vld [vmem:[%s2123_s1 + $0x4] ss:$8 sps:$4 sm:$0xff]   ;;  %1565 = vset.pattern.permute.xlu0 %v1626_v1  ;;  %326 = vst [vmem:[#allocation2 + $0x10] sm:$0xff] %v1626_v1  ;;  %331 = vst [vmem:[#allocation2 + $0x30] sm:$0xff] %v1626_v1  ;;  %1566 = vset.pattern.permute.xlu1 %v1626_v1  ;;  %v1584_v2 = vld [vmem:[%s2123_s1] ss:$8 sps:$4 sm:$0xff]  }
   0x2   :  { %605 = vmatprep.mubr.bf16.mxu1 %v1626_v1  ;;  %180 = vmatprep.subr.bf16.mxu0 %v1582_v0  ;;  %v1585_v3 = vld [vmem:[%s2123_s1 + $0x14] ss:$8 sps:$4 sm:$0xff]   ;;  %v1587_v4 = vld [vmem:[%s2123_s1 + $0x10] ss:$8 sps:$4 sm:$0xff]   ;;  %v1588_v5 = vld [vmem:[%s2123_s1 + $0x24] ss:$8 sps:$4 sm:$0xff]  }
   0x3   :  { %181 = vmatpush1.bf16.msra.mxu0 %v1584_v2  ;;  %v1590_v6 = vld [vmem:[%s2123_s1 + $0x20] ss:$8 sps:$4 sm:$0xff]   ;;  %v1591_v7 = vld [vmem:[%s2123_s1 + $0x34] ss:$8 sps:$4 sm:$0xff]   ;;  %v1593_v8 = vld [vmem:[%s2123_s1 + $0x30] ss:$8 sps:$4 sm:$0xff]  }
   0x4   :  { %182 = vmatprep.subr.bf16.mxu0 %v1585_v3  ;;  %v1594_v9 = vld [vmem:[%s2123_s1 + $0x44] ss:$8 sps:$4 sm:$0xff]   ;;  %v1596_v12 = vld [vmem:[%s2123_s1 + $0x40] ss:$8 sps:$4 sm:$0xff]   ;;  %v1597_v14 = vld [vmem:[%s2123_s1 + $0x54] ss:$8 sps:$4 sm:$0xff]  }
   0x5   :  { %v1611_v10 = vld [vmem:[%s2124_s2 + $0x4] ss:$8 sps:$4 sm:$0xff]   ;;  %v1599_v17 = vld [vmem:[%s2123_s1 + $0x50] ss:$8 sps:$4 sm:$0xff]   ;;  %v1602_v21 = vld [vmem:[%s2123_s1 + $0x60] ss:$8 sps:$4 sm:$0xff]  }
   0x6   :  { %v233_v11 = vld [vmem:[%s2125_s3] sm:$0xff]  ;;  %1445 = vmatprep.mubr.msk.bf16.mxu0 %vm173_vm0, %v1611_v10  ;;  %v234_v15 = vld [vmem:[%s2125_s3 + $0x8] sm:$0xff]  ;;  %v235_v19 = vld [vmem:[%s2125_s3 + $0x10] sm:$0xff]  ;;  %v307_v34 = vshrl.u32 %v306_v32, 7  ;;  %s1631_s14 = smov 127   ;;  %s1633_s17 = smov 96  }
   0x7   :  { %183 = vmatpush1.bf16.msra.mxu0 %v1587_v4  ;;  %v265_v13 = vld [vmem:[%s2126_s4] sm:$0xff]  ;;  %239 = vperm.xlu0 %1565, %v233_v11   ;;  %v266_v16 = vld [vmem:[%s2126_s4 + $0x8] sm:$0xff]  ;;  %v236_v20 = vld [vmem:[%s2125_s3 + $0x18] sm:$0xff]  ;;  %s1632_s3 = smov 10   ;;  %s1634_s18 = smov 119   ;;  %vm548_vm2 = vcmask 72704  }
   0x8   :  { %184 = vmatprep.subr.bf16.mxu0 %v1588_v5  ;;  %271 = vperm.xlu1 %1566, %v265_v13   ;;  %v1600_v18 = vld [vmem:[%s2123_s1 + $0x64] ss:$8 sps:$4 sm:$0xff]   ;;  %v1603_v22 = vld [vmem:[%s2123_s1 + $0x74] ss:$8 sps:$4 sm:$0xff]   ;;  %v1605_v25 = vld [vmem:[%s2123_s1 + $0x70] ss:$8 sps:$4 sm:$0xff]  }
   0x9   :  { %v267_v23 = vld [vmem:[%s2126_s4 + $0x10] sm:$0xff]  ;;  %v268_v24 = vld [vmem:[%s2126_s4 + $0x18] sm:$0xff]  ;;  %v1606_v26 = vld [vmem:[%s2123_s1 + $0x84] ss:$8 sps:$4 sm:$0xff]   ;;  %v308_v39 = vsub.s32 0, %v307_v34  ;;  %v312_v43 = vsub.s32 1, %v307_v34 }
   0xa   :  { %v1608_v27 = vld [vmem:[%s2123_s1 + $0x80] ss:$8 sps:$4 sm:$0xff]   ;;  %v1612_v29 = vld [vmem:[%s2124_s2 + $0x14] ss:$8 sps:$4 sm:$0xff]   ;;  %v1614_v30 = vld [vmem:[%s2124_s2 + $0x10] ss:$8 sps:$4 sm:$0xff]  }
   0xb   :  { %185 = vmatpush1.bf16.msra.mxu0 %v1590_v6  ;;  %244 = vperm.xlu0 %1565, %v234_v15   ;;  %v1609_v28 = vld [vmem:[%s2124_s2] ss:$8 sps:$4 sm:$0xff]   ;;  %s1627_s1 = smov 9   ;;  %s1635_s4 = smov 11   ;;  %vm640_vm3 = vcmask 7168   ;;  %vm392_vm4 = vcmask 261120  }
   0xc   :  { %186 = vmatprep.subr.bf16.mxu0 %v1591_v7  ;;  %276 = vperm.xlu1 %1566, %v266_v16   ;;  %v42_v41 = vld [vmem:[%s2128_s0] sm:$0x3]  ;;  %s1628_s0 = smov 1   ;;  %v1876_v32 = vld [vmem:[%s2127_s5 + $0x1c] ss:$12 sps:$4 sm:$0xff]   ;;  %s1636_s21 = smov 118  }
   0xd   :  { %v1806_v52 = vrot.slane %v42_v41, %v308_v39  ;;  %v1808_v56 = vrot.slane %v42_v41, %v312_v43  ;;  %s1637_s22 = smov 117   ;;  %v1237_v34 = vld [vmem:[%s2131_s10 + $0x8] sm:$0xff]  ;;  %v1302_v39 = vld [vmem:[%s2132_s6 + $0x10] sm:$0xff]  ;;  %v1268_v41 = vld [vmem:[%s2133_s11] sm:$0xff]  ;;  %vm809_vm5 = vcmask 1039360   ;;  %vm383_vm6 = vcmask 80896  }
   0xe   :  { %v1269_v43 = vld [vmem:[%s2133_s11 + $0x8] sm:$0xff]  ;;  %vm895_vm7 = vcmask 973824   ;;  %vm464_vm8 = vcmask 89088   ;;  %vm981_vm9 = vcmask 965632   ;;  %vm1077_vm10 = vcmask 957440  }
   0xf   :  { %187 = vmatpush1.bf16.msra.mxu0 %v1593_v8  ;;  %249 = vperm.xlu0 %1565, %v235_v19   ;;  %vm1412_vm11 = vcmask 1043456   ;;  %vm1413_vm12 = vcmask 588804  }
  0x10   :  { %188 = vmatprep.subr.bf16.mxu0 %v1594_v9  ;;  %254 = vperm.xlu1 %1566, %v236_v20   ;;  %vm2088_vm13 = vmor %vm1413_vm12, %vm1412_vm11 }
  0x13   :  { %189 = vmatpush1.bf16.msra.mxu0 %v1596_v12  ;;  %281 = vperm.xlu0 %1565, %v267_v23  }
  0x14   :  { %190 = vmatprep.subr.bf16.mxu0 %v1597_v14  ;;  %286 = vperm.xlu1 %1566, %v268_v24  }
  0x17   :  { %191 = vmatpush1.bf16.msra.mxu0 %v1599_v17  ;;  %1568 = vrot.lane.b32.xlu0 %v1626_v1, %s1627_s1 }
  0x18   :  { %192 = vmatprep.subr.bf16.mxu0 %v1600_v18 }
  0x1b   :  { %193 = vmatpush1.bf16.msra.mxu0 %v1602_v21 }
  0x1c   :  { %194 = vmatprep.subr.bf16.mxu0 %v1603_v22 }
  0x1f   :  { %195 = vmatpush1.bf16.msra.mxu0 %v1605_v25 }
  0x20   :  { %196 = vmatprep.subr.bf16.mxu0 %v1606_v26 }
  0x23   :  { %197 = vmatpush1.bf16.msra.mxu0 %v1608_v27 }
  0x26   :  { %213 = vmatmul.mubr.bf16.vlgmr.msra.gmra.mrb[0].mxu0 %v1609_v28  ;;  %v1837_v28 = vld [vmem:[%s2127_s5 + $0x18] ss:$12 sps:$4 sm:$0xff]  }
  0x27   :  { %1446 = vmatprep.mubr.msk.bf16.mxu0 %vm173_vm0, %v1612_v29 }
  0x2e   :  { %223 = vmatmul.mubr.bf16.gmra.mrb[4].mxu0 %v1614_v30  ;;  %v1852_v30 = vld [vmem:[%s2127_s5] ss:$12 sps:$4 sm:$0xff]  }
  0x2f   :  { %431 = vmatprep.mubr.bf16.mxu0 %v1626_v1 }
  0x86   :  { %v240_v31 = vpop.permute.xlu0 %239 }
  0x87   :  { %v272_v33 = vpop.permute.xlu1 %271 }
  0x8a   :  { %v245_v35 = vpop.permute.xlu0 %244 }
  0x8b   :  { %v277_v36 = vpop.permute.xlu1 %276 }
  0x8e   :  { %v250_v48 = vpop.permute.xlu0 %249 }
  0x8f   :  { %v255_v54 = vpop.permute.xlu1 %254 }
  0x92   :  { %v282_v2 = vpop.permute.xlu0 %281 }
  0x93   :  { %v287_v11 = vpop.permute.xlu1 %286 }
  0xf9   :  { %v214_v37 = vpop.f32.mrb[0].mxu0 }
  0xfa   :  { %v257_v38 = vmul.f32 %v240_v31, %v214_v37  ;;  %v216_v40 = vpop.f32.mrb[1].mxu0  ;;  %v1300_v37 = vld [vmem:[%s2132_s6] sm:$0xff] }
  0xfb   :  { %v258_v42 = vmul.f32 %v240_v31, %v216_v40  ;;  %v218_v44 = vpop.f32.mrb[2].mxu0  ;;  %v1865_v31 = vld [vmem:[%s2127_s5 + $0x4] ss:$12 sps:$4 sm:$0xff]   ;;  %v1303_v40 = vld [vmem:[%s2132_s6 + $0x18] sm:$0xff] }
  0xfc   :  { %v289_v45 = vadd.f32 %v272_v33, %v257_v38  ;;  %v259_v46 = vmul.f32 %v245_v35, %v218_v44  ;;  %v220_v47 = vpop.f32.mrb[3].mxu0  ;;  %v1301_v38 = vld [vmem:[%s2132_s6 + $0x8] sm:$0xff]  ;;  %v1270_v44 = vld [vmem:[%s2133_s11 + $0x10] sm:$0xff] }
  0xfd   :  { %v290_v49 = vadd.f32 %v272_v33, %v258_v42  ;;  %v260_v50 = vmul.f32 %v245_v35, %v220_v47  ;;  %v1236_v33 = vld [vmem:[%s2131_s10] sm:$0xff]  ;;  %v1238_v35 = vld [vmem:[%s2131_s10 + $0x10] sm:$0xff]  ;;  %v1569_v42 = vpop.permute.xlu0 %1568  ;;  %v1271_v47 = vld [vmem:[%s2133_s11 + $0x18] sm:$0xff] }
  0xfe   :  { %v297_v51 = vmax.f32 %v289_v45, 0.0  ;;  %v291_v53 = vadd.f32 %v277_v36, %v259_v46  ;;  %v1570_v46 = vunpack.i.l.bf16 %v1569_v42 }
  0xff   :  { %v298_v55 = vmax.f32 %v290_v49, 0.0  ;;  %v292_v57 = vadd.f32 %v277_v36, %v260_v50  ;;  %v1239_v36 = vld [vmem:[%s2131_s10 + $0x18] sm:$0xff] }
 0x100   :  { %v299_v58 = vmax.f32 %v291_v53, 0.0  ;;  %v316_v61 = vmul.f32 %v1806_v52, %v297_v51  ;;  %v1333_v53 = vld [vmem:[%s2134_s7 + $0x8] sm:$0xff] }
 0x101   :  { %v300_v59 = vmax.f32 %v292_v57, 0.0  ;;  %v224_v60 = vpop.f32.mrb[4].mxu0  ;;  %v317_v3 = vmul.f32 %v1808_v56, %v298_v55  ;;  %v1334_v55 = vld [vmem:[%s2134_s7 + $0x10] sm:$0xff] }
 0x102   :  { %v318_v62 = vmul.f32 %v1806_v52, %v299_v58  ;;  %v261_v63 = vmul.f32 %v250_v48, %v224_v60  ;;  %v226_v0 = vpop.f32.mrb[5].mxu0  ;;  %v1571_v60 = vunpack.i.h.bf16 %v1569_v42 }
 0x103   :  { %v319_v4 = vmul.f32 %v1808_v56, %v300_v59  ;;  %v262_v5 = vmul.f32 %v250_v48, %v226_v0  ;;  %v228_v6 = vpop.f32.mrb[6].mxu0  ;;  %v1332_v48 = vld [vmem:[%s2134_s7] sm:$0xff]  ;;  %v1335_v59 = vld [vmem:[%s2134_s7 + $0x18] sm:$0xff] }
 0x104   :  { %v1814_v7 = vpack.c.bf16 %v318_v62, %v316_v61  ;;  %v293_v8 = vadd.f32 %v282_v2, %v261_v63  ;;  %v263_v9 = vmul.f32 %v255_v54, %v228_v6  ;;  %v230_v10 = vpop.f32.mrb[7].mxu0 }
 0x105   :  { %v334_v12 = vpack.c.bf16 %v319_v4, %v317_v3  ;;  %v294_v13 = vadd.f32 %v282_v2, %v262_v5  ;;  %v264_v14 = vmul.f32 %v255_v54, %v230_v10 }
 0x106   :  { %v301_v15 = vmax.f32 %v293_v8, 0.0  ;;  %v295_v16 = vadd.f32 %v287_v11, %v263_v9  ;;  %630 = vrot.lane.b32.xlu1 %v1814_v7, %s1628_s0  ;;  %538 = vrot.lane.b32.xlu0 %v1814_v7, %s1627_s1 }
 0x107   :  { %338 = vst.msk [vmem:[#allocation2 + $0x10] sm:$0xff] %vm327_vm1, %v334_v12  ;;  %v302_v17 = vmax.f32 %v294_v13, 0.0  ;;  %v296_v18 = vadd.f32 %v287_v11, %v264_v14 }
 0x108   :  { %v303_v19 = vmax.f32 %v295_v16, 0.0  ;;  %v320_v21 = vmul.f32 %v1806_v52, %v301_v15 }
 0x109   :  { %v304_v20 = vmax.f32 %v296_v18, 0.0  ;;  %v321_v23 = vmul.f32 %v1808_v56, %v302_v17 }
 0x10a   :  { %v322_v22 = vmul.f32 %v1806_v52, %v303_v19 }
 0x10b   :  { %v323_v24 = vmul.f32 %v1808_v56, %v304_v20 }
 0x10c   :  { %v1824_v25 = vpack.c.bf16 %v322_v22, %v320_v21 }
 0x10d   :  { %v336_v26 = vpack.c.bf16 %v323_v24, %v321_v23 }
 0x10e   :  { %v1826_v27 = vld [vmem:[#allocation2 + $0x10] sm:$0xff] }
 0x10f   :  { %340 = vst.msk [vmem:[#allocation2 + $0x30] sm:$0xff] %vm327_vm1, %v336_v26  ;;  %540 = vrot.lane.b32.xlu1 %v1826_v27, %s1627_s1  ;;  %632 = vrot.lane.b32.xlu0 %v1826_v27, %s1628_s0 }
 0x113   :  { %544 = vrot.lane.b32.xlu1 %v1824_v25, %s1627_s1 }
 0x116   :  { %v1839_v29 = vld [vmem:[#allocation2 + $0x30] sm:$0xff] }
 0x117   :  { %546 = vrot.lane.b32.xlu0 %v1839_v29, %s1627_s1  ;;  %534 = vrot.lane.b32.xlu1 %v1837_v28, %s1629_s28 }
 0x11b   :  { %628 = vrot.lane.b32.xlu0 %v1626_v1, %s1628_s0  ;;  %636 = vrot.lane.b32.xlu1 %v1824_v25, %s1628_s0 }
 0x11f   :  { %638 = vrot.lane.b32.xlu0 %v1839_v29, %s1628_s0  ;;  %634 = vrot.lane.b32.xlu1 %v1626_v1, %s1628_s0 }
 0x123   :  { %624 = vrot.lane.b32.xlu0 %v1852_v30, %s1630_s13  ;;  %626 = vrot.lane.b32.xlu1 %v1837_v28, %s1630_s13 }
 0x127   :  { %801 = vrot.lane.b32.xlu0 %v1814_v7, %s1631_s14  ;;  %803 = vrot.lane.b32.xlu1 %v1826_v27, %s1631_s14 }
 0x12b   :  { %805 = vrot.lane.b32.xlu0 %v1824_v25, %s1631_s14  ;;  %373 = vrot.lane.b32.xlu1 %v1814_v7, %s1632_s3 }
 0x12f   :  { %797 = vrot.lane.b32.xlu0 %v1865_v31, %s1633_s17  ;;  %1573 = vrot.lane.b32.xlu1 %v1626_v1, %s1632_s3 }
 0x133   :  { %375 = vrot.lane.b32.xlu0 %v1826_v27, %s1632_s3  ;;  %887 = vrot.lane.b32.xlu1 %v1814_v7, %s1634_s18 }
 0x137   :  { %379 = vrot.lane.b32.xlu0 %v1824_v25, %s1632_s3  ;;  %361 = vrot.lane.b32.xlu1 %v1852_v30, %s1633_s17 }
 0x13b   :  { %799 = vrot.lane.b32.xlu0 %v1876_v32, %s1633_s17  ;;  %807 = vrot.lane.b32.xlu1 %v1839_v29, %s1631_s14 }
 0x13f   :  { %889 = vrot.lane.b32.xlu0 %v1826_v27, %s1634_s18  ;;  %454 = vrot.lane.b32.xlu1 %v1814_v7, %s1635_s4 }
 0x143   :  { %891 = vrot.lane.b32.xlu0 %v1824_v25, %s1634_s18  ;;  %381 = vrot.lane.b32.xlu1 %v1839_v29, %s1632_s3 }
 0x147   :  { %883 = vrot.lane.b32.xlu0 %v1865_v31, %s1629_s28  ;;  %363 = vrot.lane.b32.xlu1 %v1837_v28, %s1633_s17 }
 0x14b   :  { %456 = vrot.lane.b32.xlu0 %v1826_v27, %s1635_s4  ;;  %893 = vrot.lane.b32.xlu1 %v1839_v29, %s1634_s18 }
 0x14f   :  { %1578 = vrot.lane.b32.xlu0 %v1626_v1, %s1635_s4  ;;  %460 = vrot.lane.b32.xlu1 %v1824_v25, %s1635_s4 }
 0x153   :  { %462 = vrot.lane.b32.xlu0 %v1839_v29, %s1635_s4  ;;  %885 = vrot.lane.b32.xlu1 %v1876_v32, %s1629_s28 }
 0x157   :  { %973 = vrot.lane.b32.xlu0 %v1814_v7, %s1636_s21  ;;  %975 = vrot.lane.b32.xlu1 %v1826_v27, %s1636_s21 }
 0x15b   :  { %977 = vrot.lane.b32.xlu0 %v1824_v25, %s1636_s21  ;;  %979 = vrot.lane.b32.xlu1 %v1839_v29, %s1636_s21 }
 0x15f   :  { %969 = vrot.lane.b32.xlu0 %v1865_v31, %s1630_s13  ;;  %971 = vrot.lane.b32.xlu1 %v1876_v32, %s1630_s13 }
 0x163   :  { %1069 = vrot.lane.b32.xlu0 %v1814_v7, %s1637_s22  ;;  %1071 = vrot.lane.b32.xlu1 %v1826_v27, %s1637_s22 }
 0x167   :  { %532 = vrot.lane.b32.xlu0 %v1852_v30, %s1629_s28  ;;  %1073 = vrot.lane.b32.xlu1 %v1824_v25, %s1637_s22 }
 0x16b   :  { %1075 = vrot.lane.b32.xlu0 %v1839_v29, %s1637_s22  ;;  %1242 = vperm.xlu1 %1566, %v1236_v33  }
 0x16f   :  { %1247 = vperm.xlu0 %1565, %v1237_v34   ;;  %1252 = vperm.xlu1 %1566, %v1238_v35  }
 0x173   :  { %1257 = vperm.xlu0 %1565, %v1239_v36   ;;  %1306 = vperm.xlu1 %1566, %v1300_v37  }
 0x177   :  { %1311 = vperm.xlu0 %1565, %v1301_v38   ;;  %1316 = vperm.xlu1 %1566, %v1302_v39  }
 0x178   :  { %v631_v45 = vpop.permute.xlu1 %630  ;;  %v539_v49 = vpop.permute.xlu0 %538 }
 0x179   :  { %v1955_v54 = vsel %vm548_vm2, %v1570_v46, %v539_v49 }
 0x17b   :  { %1321 = vperm.xlu0 %1565, %v1303_v40   ;;  %1274 = vperm.xlu1 %1566, %v1268_v41  }
 0x17f   :  { %1279 = vperm.xlu0 %1565, %v1269_v43   ;;  %1284 = vperm.xlu1 %1566, %v1270_v44  }
 0x181   :  { %v541_v50 = vpop.permute.xlu1 %540  ;;  %v633_v57 = vpop.permute.xlu0 %632 }
 0x182   :  { %v1948_v51 = vsel %vm548_vm2, %v539_v49, %v541_v50  ;;  %v642_v2 = vsel %vm640_vm3, %v631_v45, %v633_v57 }
 0x183   :  { %1289 = vperm.xlu0 %1565, %v1271_v47   ;;  %1338 = vperm.xlu1 %1566, %v1332_v48  }
 0x184   :  { %1485 = vmatprep.subr.bf16.mxu1 %v1948_v51 }
 0x185   :  { %1487 = vmatpush1.bf16.msra.mxu1 %v1955_v54  ;;  %v545_v58 = vpop.permute.xlu1 %544 }
 0x186   :  { %v1969_v0 = vsel %vm548_vm2, %v1571_v60, %v545_v58 }
 0x187   :  { %1343 = vperm.xlu0 %1565, %v1333_v53   ;;  %1348 = vperm.xlu1 %1566, %v1334_v55  }
 0x189   :  { %v547_v61 = vpop.permute.xlu0 %546  ;;  %v535_v62 = vpop.permute.xlu1 %534 }
 0x18a   :  { %v1965_v63 = vsel %vm548_vm2, %v545_v58, %v547_v61 }
 0x18b   :  { %1353 = vperm.xlu0 %1565, %v1335_v59   ;;  %1486 = vmatprep.subr.bf16.mxu1 %v1965_v63 }
 0x18c   :  { %1488 = vmatpush1.bf16.msra.mxu1 %v1969_v0 }
 0x18d   :  { %655 = vmatprep.subr.bf16.mxu1 %v642_v2  ;;  %v629_v3 = vpop.permute.xlu0 %628  ;;  %v637_v4 = vpop.permute.xlu1 %636 }
 0x18e   :  { %v641_v5 = vsel %vm640_vm3, %v629_v3, %v631_v45 }
 0x18f   :  { %1454 = vmatmul.mubr.msk.bf16.vlgmr.msra.gmra.mrb[0].mxu1 %vm392_vm4, %v535_v62 }
 0x190   :  { %656 = vmatpush1.bf16.msra.mxu1 %v641_v5  ;;  %687 = vmatprep.mubr.bf16.mxu1 %v1626_v1 }
 0x191   :  { %v639_v6 = vpop.permute.xlu0 %638  ;;  %v635_v8 = vpop.permute.xlu1 %634 }
 0x192   :  { %v644_v9 = vsel %vm640_vm3, %v637_v4, %v639_v6  ;;  %v643_v10 = vsel %vm640_vm3, %v635_v8, %v637_v4 }
 0x193   :  { %657 = vmatprep.subr.bf16.mxu1 %v644_v9  ;;  %v1622_v9 = vld [vmem:[%s2130_s9] sm:$0xff]  }
 0x194   :  { %658 = vmatpush1.bf16.msra.mxu1 %v643_v10  ;;  %v1623_v10 = vld [vmem:[%s2127_s5 + $0x8] ss:$12 sps:$4 sm:$0xff]  }
 0x195   :  { %v625_v11 = vpop.permute.xlu0 %624  ;;  %736 = vmatprep.subr.bf16.mxu1 %v1826_v27  ;;  %v627_v12 = vpop.permute.xlu1 %626 }
 0x197   :  { %1455 = vmatmul.mubr.msk.bf16.vlgmr.msra.gmra.mrb[4].mxu1 %vm392_vm4, %v625_v11  ;;  %v1624_v11 = vld [vmem:[%s2130_s9 + $0x8] sm:$0xff]  }
 0x198   :  { %737 = vmatpush1.bf16.msra.mxu1 %v1814_v7  ;;  %697 = vmatprep.mubr.bf16.mxu1 %v1626_v1 }
 0x199   :  { %v802_v13 = vpop.permute.xlu0 %801  ;;  %738 = vmatprep.subr.bf16.mxu1 %v1839_v29  ;;  %v804_v14 = vpop.permute.xlu1 %803 }
 0x19a   :  { %v810_v22 = vsel %vm809_vm5, %v802_v13, %v804_v14 }
 0x19c   :  { %739 = vmatpush1.bf16.msra.mxu1 %v1824_v25 }
 0x19d   :  { %v806_v15 = vpop.permute.xlu0 %805  ;;  %822 = vmatprep.subr.bf16.mxu1 %v804_v14  ;;  %v374_v16 = vpop.permute.xlu1 %373 }
 0x19f   :  { %1456 = vmatmul.mubr.msk.bf16.gmra.mrb[0].mxu1 %vm392_vm4, %v627_v12  ;;  %v1625_v12 = vld [vmem:[%s2127_s5 + $0x20] ss:$12 sps:$4 sm:$0xff]  }
 0x1a0   :  { %768 = vmatprep.mubr.bf16.mxu1 %v1626_v1 }
 0x1a1   :  { %v798_v17 = vpop.permute.xlu0 %797  ;;  %v1574_v18 = vpop.permute.xlu1 %1573 }
 0x1a2   :  { %v1575_v19 = vunpack.i.l.bf16 %v1574_v18 }
 0x1a4   :  { %v384_v23 = vsel %vm383_vm6, %v1575_v19, %v374_v16 }
 0x1a5   :  { %v376_v7 = vpop.permute.xlu0 %375  ;;  %v888_v20 = vpop.permute.xlu1 %887 }
 0x1a6   :  { %v385_v21 = vsel %vm383_vm6, %v374_v16, %v376_v7 }
 0x1a7   :  { %399 = vmatprep.subr.bf16.mxu0 %v385_v21  ;;  %1459 = vmatmul.mubr.msk.bf16.vlgmr.msra.gmra.mrb[4].mxu1 %vm392_vm4, %v1865_v31  ;;  %v1576_v31 = vunpack.i.h.bf16 %v1574_v18 }
 0x1a8   :  { %400 = vmatpush1.bf16.msra.mxu0 %v384_v23  ;;  %823 = vmatpush1.bf16.msra.mxu1 %v810_v22 }
 0x1a9   :  { %v380_v24 = vpop.permute.xlu0 %379  ;;  %v362_v25 = vpop.permute.xlu1 %361  ;;  %778 = vmatprep.mubr.bf16.mxu1 %v1626_v1 }
 0x1aa   :  { %v386_v38 = vsel %vm383_vm6, %v1576_v31, %v380_v24 }
 0x1ad   :  { %v800_v26 = vpop.permute.xlu0 %799  ;;  %v808_v27 = vpop.permute.xlu1 %807 }
 0x1ae   :  { %v811_v29 = vsel %vm809_vm5, %v806_v15, %v808_v27  ;;  %824 = vmatprep.subr.bf16.mxu1 %v808_v27 }
 0x1af   :  { %1460 = vmatmul.mubr.msk.bf16.gmra.mrb[0].mxu1 %vm392_vm4, %v1876_v32 }
 0x1b0   :  { %825 = vmatpush1.bf16.msra.mxu1 %v811_v29  ;;  %854 = vmatprep.mubr.bf16.mxu1 %v1626_v1 }
 0x1b1   :  { %v890_v33 = vpop.permute.xlu0 %889  ;;  %v455_v34 = vpop.permute.xlu1 %454 }
 0x1b2   :  { %908 = vmatprep.subr.bf16.mxu1 %v890_v33  ;;  %v896_v39 = vsel %vm895_vm7, %v888_v20, %v890_v33 }
 0x1b5   :  { %v892_v35 = vpop.permute.xlu0 %891  ;;  %v382_v36 = vpop.permute.xlu1 %381 }
 0x1b6   :  { %v387_v37 = vsel %vm383_vm6, %v380_v24, %v382_v36 }
 0x1b7   :  { %1461 = vmatmul.mubr.msk.bf16.vlgmr.msra.gmra.mrb[4].mxu1 %vm392_vm4, %v798_v17  ;;  %401 = vmatprep.subr.bf16.mxu0 %v387_v37 }
 0x1b8   :  { %909 = vmatpush1.bf16.msra.mxu1 %v896_v39  ;;  %402 = vmatpush1.bf16.msra.mxu0 %v386_v38 }
 0x1b9   :  { %v884_v32 = vpop.permute.xlu0 %883  ;;  %v364_v40 = vpop.permute.xlu1 %363  ;;  %864 = vmatprep.mubr.bf16.mxu1 %v1626_v1 }
 0x1bb   :  { %1449 = vmatmul.mubr.msk.bf16.vlgmr.msra.gmra.mrb[8].mxu0 %vm392_vm4, %v362_v25 }
 0x1bc   :  { %441 = vmatprep.mubr.bf16.mxu0 %v1626_v1 }
 0x1bd   :  { %v457_v41 = vpop.permute.xlu0 %456  ;;  %v894_v42 = vpop.permute.xlu1 %893 }
 0x1be   :  { %v466_v43 = vsel %vm464_vm8, %v455_v34, %v457_v41  ;;  %v897_v44 = vsel %vm895_vm7, %v892_v35, %v894_v42  ;;  %910 = vmatprep.subr.bf16.mxu1 %v894_v42 }
 0x1bf   :  { %479 = vmatprep.subr.bf16.mxu0 %v466_v43  ;;  %1462 = vmatmul.mubr.msk.bf16.gmra.mrb[0].mxu1 %vm392_vm4, %v800_v26 }
 0x1c0   :  { %911 = vmatpush1.bf16.msra.mxu1 %v897_v44  ;;  %940 = vmatprep.mubr.bf16.mxu1 %v1626_v1 }
 0x1c1   :  { %v1579_v45 = vpop.permute.xlu0 %1578  ;;  %v461_v46 = vpop.permute.xlu1 %460 }
 0x1c2   :  { %v1580_v47 = vunpack.i.l.bf16 %v1579_v45  ;;  %v1581_v48 = vunpack.i.h.bf16 %v1579_v45 }
 0x1c3   :  { %1450 = vmatmul.mubr.msk.bf16.gmra.mrb[12].mxu0 %vm392_vm4, %v364_v40 }
 0x1c4   :  { %v465_v49 = vsel %vm464_vm8, %v1580_v47, %v455_v34  ;;  %511 = vmatprep.mubr.bf16.mxu0 %v1626_v1  ;;  %v467_v57 = vsel %vm464_vm8, %v1581_v48, %v461_v46 }
 0x1c5   :  { %v463_v50 = vpop.permute.xlu0 %462  ;;  %480 = vmatpush1.bf16.msra.mxu0 %v465_v49  ;;  %v886_v53 = vpop.permute.xlu1 %885 }
 0x1c6   :  { %v468_v55 = vsel %vm464_vm8, %v461_v46, %v463_v50 }
 0x1c7   :  { %481 = vmatprep.subr.bf16.mxu0 %v468_v55  ;;  %1463 = vmatmul.mubr.msk.bf16.vlgmr.msra.gmra.mrb[4].mxu1 %vm392_vm4, %v884_v32 }
 0x1c8   :  { %950 = vmatprep.mubr.bf16.mxu1 %v1626_v1 }
 0x1c9   :  { %v974_v58 = vpop.permute.xlu0 %973  ;;  %482 = vmatpush1.bf16.msra.mxu0 %v467_v57  ;;  %v976_v59 = vpop.permute.xlu1 %975 }
 0x1ca   :  { %563 = vmatprep.subr.bf16.mxu0 %v1948_v51  ;;  %v982_v60 = vsel %vm981_vm9, %v974_v58, %v976_v59  ;;  %994 = vmatprep.subr.bf16.mxu1 %v976_v59  ;;  %v1621_v51 = vld [vmem:[%s2129_s8 + $0x4] ss:$8 sps:$4 sm:$0xff]  }
 0x1cb   :  { %995 = vmatpush1.bf16.msra.mxu1 %v982_v60 }
 0x1cc   :  { %1451 = vmatmul.mubr.msk.bf16.vlgmr.msra.gmra.mrb[8].mxu0 %vm392_vm4, %v1852_v30 }
 0x1cd   :  { %v978_v61 = vpop.permute.xlu0 %977  ;;  %564 = vmatpush1.bf16.msra.mxu0 %v1955_v54  ;;  %v980_v62 = vpop.permute.xlu1 %979  ;;  %521 = vmatprep.mubr.bf16.mxu0 %v1626_v1 }
 0x1ce   :  { %565 = vmatprep.subr.bf16.mxu0 %v1965_v63  ;;  %v983_v2 = vsel %vm981_vm9, %v978_v61, %v980_v62  ;;  %996 = vmatprep.subr.bf16.mxu1 %v980_v62 }
 0x1cf   :  { %1464 = vmatmul.mubr.msk.bf16.gmra.mrb[0].mxu1 %vm392_vm4, %v886_v53 }
 0x1d0   :  { %997 = vmatpush1.bf16.msra.mxu1 %v983_v2  ;;  %1026 = vmatprep.mubr.bf16.mxu1 %v1626_v1 }
 0x1d1   :  { %v970_v30 = vpop.permute.xlu0 %969  ;;  %566 = vmatpush1.bf16.msra.mxu0 %v1969_v0  ;;  %v972_v54 = vpop.permute.xlu1 %971  ;;  %v1619_v0 = vld [vmem:[%s2129_s8] ss:$8 sps:$4 sm:$0xff]  }
 0x1d2   :  { %1183 = vmatprep.subr.bf16.mxu0 %v1621_v51 }
 0x1d4   :  { %1452 = vmatmul.mubr.msk.bf16.gmra.mrb[12].mxu0 %vm392_vm4, %v1837_v28 }
 0x1d5   :  { %v1070_v63 = vpop.permute.xlu0 %1069  ;;  %v1072_v3 = vpop.permute.xlu1 %1071  ;;  %595 = vmatprep.mubr.bf16.mxu0 %v1626_v1 }
 0x1d6   :  { %v1078_v4 = vsel %vm1077_vm10, %v1070_v63, %v1072_v3  ;;  %1090 = vmatprep.subr.bf16.mxu1 %v1072_v3 }
 0x1d7   :  { %1465 = vmatmul.mubr.msk.bf16.vlgmr.msra.gmra.mrb[4].mxu1 %vm392_vm4, %v970_v30 }
 0x1d8   :  { %1091 = vmatpush1.bf16.msra.mxu1 %v1078_v4  ;;  %1036 = vmatprep.mubr.bf16.mxu1 %v1626_v1 }
 0x1d9   :  { %v533_v5 = vpop.permute.xlu0 %532  ;;  %v1074_v28 = vpop.permute.xlu1 %1073 }
 0x1dc   :  { %1453 = vmatmul.mubr.msk.bf16.vlgmr.msra.gmra.mrb[8].mxu0 %vm392_vm4, %v533_v5 }
 0x1dd   :  { %v1076_v6 = vpop.permute.xlu0 %1075  ;;  %1184 = vmatpush1.bf16.msra.mxu0 %v1619_v0  ;;  %1215 = vmatprep.mubr.bf16.mxu0 %v1626_v1 }
 0x1de   :  { %v1079_v8 = vsel %vm1077_vm10, %v1074_v28, %v1076_v6  ;;  %1092 = vmatprep.subr.bf16.mxu1 %v1076_v6 }
 0x1df   :  { %1093 = vmatpush1.bf16.msra.mxu1 %v1079_v8 }
 0x1e0   :  { %1466 = vmatmul.mubr.msk.bf16.gmra.mrb[0].mxu1 %vm392_vm4, %v972_v54 }
 0x1e1   :  { %1122 = vmatprep.mubr.bf16.mxu1 %v1626_v1 }
 0x1e4   :  { %1475 = vmatmul.mubr.msk.bf16.vlgmr.msra.gmra.mrb[16].mxu0 %vm173_vm0, %v1622_v9 }
 0x1e5   :  { %1225 = vmatprep.mubr.bf16.mxu0 %v1626_v1 }
 0x1e8   :  { %1469 = vmatmul.mubr.msk.bf16.vlgmr.msra.gmra.mrb[4].mxu1 %vm392_vm4, %v1623_v10 }
 0x1e9   :  { %1132 = vmatprep.mubr.bf16.mxu1 %v1626_v1 }
 0x1ea   :  { %v1243_v13 = vpop.permute.xlu1 %1242 }
 0x1ec   :  { %1476 = vmatmul.mubr.msk.bf16.gmra.mrb[20].mxu0 %vm173_vm0, %v1624_v11 }
 0x1ee   :  { %v1248_v14 = vpop.permute.xlu0 %1247  ;;  %v1253_v15 = vpop.permute.xlu1 %1252 }
 0x1f0   :  { %1470 = vmatmul.mubr.msk.bf16.gmra.mrb[0].mxu1 %vm392_vm4, %v1625_v12 }
 0x1f2   :  { %v2060_v16 = vpop.permute.xlu0 %1257  ;;  %v1307_v17 = vpop.permute.xlu1 %1306 }
 0x1f6   :  { %v1312_v7 = vpop.permute.xlu0 %1311  ;;  %v2068_v21 = vpop.permute.xlu1 %1316 }
 0x1fa   :  { %v2070_v22 = vpop.permute.xlu0 %1321  ;;  %v1275_v27 = vpop.permute.xlu1 %1274 }
 0x1fe   :  { %v1280_v29 = vpop.permute.xlu0 %1279  ;;  %v2072_v31 = vpop.permute.xlu1 %1284 }
 0x202   :  { %v2074_v37 = vpop.permute.xlu0 %1289  ;;  %v1339_v49 = vpop.permute.xlu1 %1338 }
 0x206   :  { %v1344_v62 = vpop.permute.xlu0 %1343 }
 0x2a7   :  { %v523_v18 = vpop.f32.mrb[12].mxu0 }
 0x2a8   :  { %v2062_v19 = vpop.f32.mrb[13].mxu0 }
 0x2a9   :  { %v2064_v20 = vpop.f32.mrb[14].mxu0 }
 0x2aa   :  { %v2066_v1 = vpop.f32.mrb[15].mxu0 }
 0x2af   :  { %v597_v23 = vpop.f32.mrb[8].mxu0 }
 0x2b0   :  { %v599_v24 = vpop.f32.mrb[9].mxu0 }
 0x2b1   :  { %v601_v25 = vpop.f32.mrb[10].mxu0 }
 0x2b2   :  { %v603_v26 = vpop.f32.mrb[11].mxu0 }
 0x2b7   :  { %v1217_v33 = vpop.f32.mrb[16].mxu0 }
 0x2b8   :  { %v1219_v34 = vpop.f32.mrb[17].mxu0  ;;  %v1260_v39 = vmul.f32 %v1243_v13, %v1217_v33 }
 0x2b9   :  { %v1221_v35 = vpop.f32.mrb[18].mxu0  ;;  %v1261_v41 = vmul.f32 %v1243_v13, %v1219_v34 }
 0x2ba   :  { %v1223_v36 = vpop.f32.mrb[19].mxu0  ;;  %v1262_v44 = vmul.f32 %v1248_v14, %v1221_v35  ;;  %v1292_v57 = vadd.f32 %v1275_v27, %v1260_v39  ;;  %v1349_v35 = vpop.permute.xlu1 %1348 }
 0x2bb   :  { %v1124_v38 = vpop.f32.mrb[4].mxu1  ;;  %v1263_v46 = vmul.f32 %v1248_v14, %v1223_v36  ;;  %v1293_v2 = vadd.f32 %v1275_v27, %v1261_v41  ;;  %v1354_v41 = vpop.permute.xlu0 %1353 }
 0x2bc   :  { %v1489_v32 = vadd.f32 %v1124_v38, %v597_v23  ;;  %v1126_v40 = vpop.f32.mrb[5].mxu1  ;;  %v1294_v63 = vadd.f32 %v1280_v29, %v1262_v44 }
 0x2bd   :  { %v1490_v42 = vadd.f32 %v1126_v40, %v599_v24  ;;  %v1128_v43 = vpop.f32.mrb[6].mxu1  ;;  %v1295_v4 = vadd.f32 %v1280_v29, %v1263_v46 }
 0x2be   :  { %v1324_v45 = vmul.f32 %v1489_v32, %v1307_v17  ;;  %v1491_v47 = vadd.f32 %v1128_v43, %v601_v25  ;;  %v1130_v48 = vpop.f32.mrb[7].mxu1 }
 0x2bf   :  { %v1325_v50 = vmul.f32 %v1490_v42, %v1307_v17  ;;  %v1492_v53 = vadd.f32 %v1130_v48, %v603_v26  ;;  %v1227_v55 = vpop.f32.mrb[20].mxu0 }
 0x2c0   :  { %v1356_v58 = vadd.f32 %v1339_v49, %v1324_v45  ;;  %v1326_v59 = vmul.f32 %v1491_v47, %v1312_v7  ;;  %v1264_v60 = vmul.f32 %v1253_v15, %v1227_v55  ;;  %v1229_v61 = vpop.f32.mrb[21].mxu0 }
 0x2c1   :  { %v1357_v51 = vadd.f32 %v1339_v49, %v1325_v50  ;;  %v1327_v30 = vmul.f32 %v1492_v53, %v1312_v7  ;;  %v1231_v54 = vpop.f32.mrb[22].mxu0  ;;  %v1265_v9 = vmul.f32 %v1253_v15, %v1229_v61 }
 0x2c2   :  { %v1364_v3 = vadd.f32 %v1356_v58, %v1292_v57  ;;  %v1358_v5 = vadd.f32 %v1344_v62, %v1326_v59  ;;  %v1233_v0 = vpop.f32.mrb[23].mxu0  ;;  %v1296_v8 = vadd.f32 %v2072_v31, %v1264_v60  ;;  %v1266_v13 = vmul.f32 %v2060_v16, %v1231_v54 }
 0x2c3   :  { %v1365_v28 = vadd.f32 %v1357_v51, %v1293_v2  ;;  %v1359_v6 = vadd.f32 %v1344_v62, %v1327_v30  ;;  %v1134_v10 = vpop.f32.mrb[0].mxu1  ;;  %v1267_v24 = vmul.f32 %v2060_v16, %v1233_v0  ;;  %v1297_v32 = vadd.f32 %v2072_v31, %v1265_v9 }
 0x2c4   :  { %v1372_v11 = vmax.f32 %v1364_v3, 0.0  ;;  %v1366_v12 = vadd.f32 %v1358_v5, %v1294_v63  ;;  %v1493_v14 = vadd.f32 %v1134_v10, %v523_v18  ;;  %v1136_v17 = vpop.f32.mrb[1].mxu1  ;;  %v1298_v44 = vadd.f32 %v2074_v37, %v1266_v13 }
 0x2c5   :  { %v1373_v23 = vmax.f32 %v1365_v28, 0.0  ;;  %v1367_v7 = vadd.f32 %v1359_v6, %v1295_v4  ;;  %v1494_v25 = vadd.f32 %v1136_v17, %v2062_v19  ;;  %v1138_v26 = vpop.f32.mrb[2].mxu1  ;;  %v1299_v47 = vadd.f32 %v2074_v37, %v1267_v24 }
 0x2c6   :  { %v1380_v27 = vmul.f32 %v1372_v11, %v1806_v52  ;;  %v1374_v29 = vmax.f32 %v1366_v12, 0.0  ;;  %v1328_v33 = vmul.f32 %v1493_v14, %v2068_v21  ;;  %v1495_v15 = vadd.f32 %v1138_v26, %v2064_v20  ;;  %v1140_v34 = vpop.f32.mrb[3].mxu1 }
 0x2c7   :  { %v1381_v36 = vmul.f32 %v1373_v23, %v1808_v56  ;;  %v1375_v18 = vmax.f32 %v1367_v7, 0.0  ;;  %v1329_v38 = vmul.f32 %v1494_v25, %v2068_v21  ;;  %v1496_v39 = vadd.f32 %v1140_v34, %v2066_v1 }
 0x2c8   :  { %v1382_v19 = vmul.f32 %v1374_v29, %v1806_v52  ;;  %v1360_v20 = vadd.f32 %v1349_v35, %v1328_v33  ;;  %v1330_v40 = vmul.f32 %v1495_v15, %v2070_v22 }
 0x2c9   :  { %v1481_v42 = vpack.c.bf16 %v1381_v36, %v1380_v27  ;;  %v1383_v43 = vmul.f32 %v1375_v18, %v1808_v56  ;;  %v1361_v21 = vadd.f32 %v1349_v35, %v1329_v38  ;;  %v1331_v1 = vmul.f32 %v1496_v39, %v2070_v22 }
 0x2ca   :  { %v1368_v45 = vadd.f32 %v1360_v20, %v1296_v8  ;;  %v1362_v46 = vadd.f32 %v1354_v41, %v1330_v40 }
 0x2cb   :  { %1415 = vst.msk [vmem:[%s2135_s12] sm:$0xff] %vm2088_vm13, %v1481_v42  ;;  %v1482_v31 = vpack.c.bf16 %v1383_v43, %v1382_v19  ;;  %v1369_v48 = vadd.f32 %v1361_v21, %v1297_v32  ;;  %v1363_v49 = vadd.f32 %v1354_v41, %v1331_v1 }
 0x2cc   :  { %v1376_v50 = vmax.f32 %v1368_v45, 0.0  ;;  %v1370_v53 = vadd.f32 %v1362_v46, %v1298_v44 }
 0x2cd   :  { %1416 = vst.msk [vmem:[%s2135_s12 + $0x8] sm:$0xff] %vm2088_vm13, %v1482_v31  ;;  %v1377_v22 = vmax.f32 %v1369_v48, 0.0  ;;  %v1371_v55 = vadd.f32 %v1363_v49, %v1299_v47 }
 0x2ce   :  { %v1384_v57 = vmul.f32 %v1376_v50, %v1806_v52  ;;  %v1378_v58 = vmax.f32 %v1370_v53, 0.0 }
 0x2cf   :  { %v1385_v59 = vmul.f32 %v1377_v22, %v1808_v56  ;;  %v1379_v60 = vmax.f32 %v1371_v55, 0.0 }
 0x2d0   :  { %v1386_v37 = vmul.f32 %v1378_v58, %v1806_v52 }
 0x2d1   :  { %v1483_v61 = vpack.c.bf16 %v1385_v59, %v1384_v57  ;;  %v1387_v62 = vmul.f32 %v1379_v60, %v1808_v56 }
 0x2d3   :  { %1417 = vst.msk [vmem:[%s2135_s12 + $0x10] sm:$0xff] %vm2088_vm13, %v1483_v61  ;;  %v1484_v2 = vpack.c.bf16 %v1387_v62, %v1386_v37 }
 0x2d5   :  { %1418 = vst.msk [vmem:[%s2135_s12 + $0x18] sm:$0xff] %vm2088_vm13, %v1484_v2 }

// kernel: _lambda_.9
= control target key start
LH: loop header
LB: loop body
LE: loop exit
PB: predicated region body
PF: predicated region fallthrough
CT: control target
= control target key end

     0   :  { %s3765_s0 = inlined_call_operand.vmem [shape: f32[1,72], index: 0, kind: input, shape index: {}]   ;;  %s3766_s1 = inlined_call_operand.vmem [shape: bf16[288,72], index: 1, kind: input, shape index: {}]   ;;  %s3767_s2 = inlined_call_operand.vmem [shape: bf16[64,288], index: 2, kind: input, shape index: {}]   ;;  %s3768_s3 = inlined_call_operand.vmem [shape: f32[64,1], index: 3, kind: input, shape index: {}]   ;;  %s3769_s4 = inlined_call_operand.vmem [shape: f32[64,1], index: 4, kind: input, shape index: {}]   ;;  %s3770_s5 = inlined_call_operand.vmem [shape: bf16[64,576], index: 5, kind: input, shape index: {}]   ;;  %s3771_s6 = inlined_call_operand.vmem [shape: f32[64,1], index: 6, kind: input, shape index: {}]   ;;  %s3772_s7 = inlined_call_operand.vmem [shape: f32[64,1], index: 7, kind: input, shape index: {}]   ;;  %s3773_s8 = inlined_call_operand.vmem [shape: bf16[32,72], index: 8, kind: input, shape index: {}]   ;;  %s3774_s9 = inlined_call_operand.vmem [shape: bf16[64,32], index: 9, kind: input, shape index: {}]   ;;  %s3775_s10 = inlined_call_operand.vmem [shape: f32[64,1], index: 10, kind: input, shape index: {}]   ;;  %s3776_s11 = inlined_call_operand.vmem [shape: f32[64,1], index: 11, kind: input, shape index: {}]   ;;  %s3777_s12 = inlined_call_operand.vmem [shape: f32[72,2], index: 12, kind: input, shape index: {}]   ;;  %s3778_s13 = inlined_call_operand.vmem [shape: f32[10,64], index: 13, kind: input, shape index: {}]   ;;  %s3779_s14 = inlined_call_operand.vmem [shape: f32[10,1], index: 14, kind: input, shape index: {}]   ;;  %s3780_s15 = inlined_call_operand.vmem [shape: f32[10,2], index: 15, kind: output, shape index: {0}]   ;;  %s3781_s16 = inlined_call_operand.hbm [shape: f32[64,2], index: 16, kind: output, shape index: {1}]  }
   0x1   :  { %3783 = sst [smem:[#allocation6_spill]] %s3765_s0 }
   0x2   :  { %v2923_v0 = vld [vmem:[%s3766_s1 + $0x40] sm:$0xff]   ;;  %v2925_v2 = vld [vmem:[%s3766_s1 + $0x48] sm:$0xff]   ;;  %v3008_v3 = vmov 0   ;;  %v2927_v5 = vld [vmem:[%s3766_s1 + $0x50] sm:$0xff]   ;;  %vm275_vm0 = vcmask 261120  }
   0x3   :  { %v2924_v1 = vld [vmem:[%s3766_s1] sm:$0xff]   ;;  %2404 = vmatprep.subr.bf16.mxu0 %v2923_v0  ;;  %2882 = vset.pattern.permute.xlu1 %v3008_v3  ;;  %553 = vst [vmem:[#allocation2 + $0x8] sm:$0xff] %v3008_v3  ;;  %557 = vst [vmem:[#allocation2 + $0x20] sm:$0xff] %v3008_v3  ;;  %v2926_v4 = vld [vmem:[%s3766_s1 + $0x8] sm:$0xff]  }
   0x4   :  { %560 = vst [vmem:[#allocation2 + $0x38] sm:$0xff] %v3008_v3  ;;  %563 = vst [vmem:[#allocation2 + $0x50] sm:$0xff] %v3008_v3  ;;  %2405 = vmatpush3.bf16.msra.mxu0 %v2924_v1  ;;  %2881 = vset.pattern.permute.xlu0 %v3008_v3  ;;  %v2928_v6 = vld [vmem:[%s3766_s1 + $0x10] sm:$0xff]   ;;  %v2929_v7 = vld [vmem:[%s3766_s1 + $0x58] sm:$0xff]  }
   0x5   :  { %2406 = vmatprep.subr.bf16.mxu0 %v2925_v2  ;;  %v2930_v8 = vld [vmem:[%s3766_s1 + $0x18] sm:$0xff]   ;;  %v2931_v9 = vld [vmem:[%s3766_s1 + $0x60] sm:$0xff]   ;;  %v2933_v12 = vld [vmem:[%s3766_s1 + $0x68] sm:$0xff]  }
   0x6   :  { %v2937_v10 = vld [vmem:[%s3766_s1 + $0x80] sm:$0xff]   ;;  %v2934_v13 = vld [vmem:[%s3766_s1 + $0x28] sm:$0xff]   ;;  %v2935_v15 = vld [vmem:[%s3766_s1 + $0x70] sm:$0xff]  }
   0x7   :  { %v2932_v11 = vld [vmem:[%s3766_s1 + $0x20] sm:$0xff]   ;;  %2555 = vmatprep.subr.bf16.mxu1 %v2937_v10  ;;  %v2940_v14 = vld [vmem:[%s3766_s1 + $0x88] sm:$0xff]   ;;  %v2936_v19 = vld [vmem:[%s3766_s1 + $0x30] sm:$0xff]  }
   0x8   :  { %2407 = vmatpush3.bf16.msra.mxu0 %v2926_v4  ;;  %2556 = vmatpush3.bf16.msra.mxu1 %v2937_v10  ;;  %v2943_v16 = vld [vmem:[%s3767_s2 + $0x4] ss:$12 sps:$4 sm:$0xff]   ;;  %v2944_v17 = vld [vmem:[%s3767_s2 + $0x8] ss:$12 sps:$4 sm:$0xff]   ;;  %v2945_v18 = vld [vmem:[%s3767_s2 + $0x20] ss:$12 sps:$4 sm:$0xff]  }
   0x9   :  { %2408 = vmatprep.subr.bf16.mxu0 %v2927_v5  ;;  %2557 = vmatprep.subr.bf16.mxu1 %v2940_v14  ;;  %v2938_v20 = vld [vmem:[%s3766_s1 + $0x78] sm:$0xff]   ;;  %v474_v23 = vld [vmem:[%s3769_s4] sm:$0xff]  ;;  %v475_v26 = vld [vmem:[%s3769_s4 + $0x8] sm:$0xff] }
   0xa   :  { %320 = vmatprep.mubr.bf16.mxu0 %v2943_v16  ;;  %2559 = vmatprep.mubr.msk.bf16.mxu1 %vm275_vm0, %v2944_v17  ;;  %v2952_v21 = vld [vmem:[%s3767_s2 + $0x38] ss:$12 sps:$4 sm:$0xff]   ;;  %v2953_v25 = vld [vmem:[%s3767_s2 + $0x50] ss:$12 sps:$4 sm:$0xff]   ;;  %v2941_v27 = vld [vmem:[%s3767_s2] ss:$12 sps:$4 sm:$0xff]  }
   0xb   :  { %v2939_v22 = vld [vmem:[%s3766_s1 + $0x38] sm:$0xff]   ;;  %v418_v24 = vld [vmem:[%s3768_s3] sm:$0xff]  ;;  %484 = vperm.xlu1 %2882, %v474_v23   ;;  %v419_v28 = vld [vmem:[%s3768_s3 + $0x8] sm:$0xff] }
   0xc   :  { %2409 = vmatpush3.bf16.msra.mxu0 %v2928_v6  ;;  %2558 = vmatpush3.bf16.msra.mxu1 %v2940_v14  ;;  %v2946_v29 = vld [vmem:[%s3767_s2 + $0x1c] ss:$12 sps:$4 sm:$0xff]   ;;  %v420_v31 = vld [vmem:[%s3768_s3 + $0x10] sm:$0xff]  ;;  %v2948_v33 = vld [vmem:[%s3767_s2 + $0x18] ss:$12 sps:$4 sm:$0xff]  }
   0xd   :  { %2410 = vmatprep.subr.bf16.mxu0 %v2929_v7  ;;  %428 = vperm.xlu0 %2881, %v418_v24   ;;  %v421_v30 = vld [vmem:[%s3768_s3 + $0x18] sm:$0xff]  ;;  %v476_v34 = vld [vmem:[%s3769_s4 + $0x10] sm:$0xff]  ;;  %v423_v36 = vld [vmem:[%s3768_s3 + $0x28] sm:$0xff] }
   0xe   :  { %v477_v32 = vld [vmem:[%s3769_s4 + $0x18] sm:$0xff]  ;;  %v2949_v35 = vld [vmem:[%s3767_s2 + $0x34] ss:$12 sps:$4 sm:$0xff]   ;;  %v479_v38 = vld [vmem:[%s3769_s4 + $0x28] sm:$0xff] }
   0xf   :  { %2560 = vmatmul.mubr.msk.bf16.vlgmr.msra.gmra.mrb[0].mxu1 %vm275_vm0, %v2945_v18  ;;  %489 = vperm.xlu1 %2882, %v475_v26   ;;  %v422_v37 = vld [vmem:[%s3768_s3 + $0x20] sm:$0xff]  ;;  %v2951_v39 = vld [vmem:[%s3767_s2 + $0x30] ss:$12 sps:$4 sm:$0xff]   ;;  %v2954_v41 = vld [vmem:[%s3767_s2 + $0x4c] ss:$12 sps:$4 sm:$0xff]  }
  0x10   :  { %2411 = vmatpush3.bf16.msra.mxu0 %v2930_v8  ;;  %2563 = vmatprep.mubr.msk.bf16.mxu1 %vm275_vm0, %v2952_v21  ;;  %v478_v40 = vld [vmem:[%s3769_s4 + $0x20] sm:$0xff]  ;;  %v425_v42 = vld [vmem:[%s3768_s3 + $0x38] sm:$0xff]  ;;  %v424_v43 = vld [vmem:[%s3768_s3 + $0x30] sm:$0xff] }
  0x11   :  { %2412 = vmatprep.subr.bf16.mxu0 %v2931_v9  ;;  %433 = vperm.xlu0 %2881, %v419_v28  }
  0x13   :  { %443 = vperm.xlu1 %2882, %v421_v30  }
  0x14   :  { %2413 = vmatpush3.bf16.msra.mxu0 %v2932_v11 }
  0x15   :  { %2414 = vmatprep.subr.bf16.mxu0 %v2933_v12  ;;  %438 = vperm.xlu0 %2881, %v420_v31  }
  0x17   :  { %2564 = vmatmul.mubr.msk.bf16.gmra.mrb[4].mxu1 %vm275_vm0, %v2953_v25  ;;  %499 = vperm.xlu1 %2882, %v477_v32  }
  0x18   :  { %2415 = vmatpush3.bf16.msra.mxu0 %v2934_v13 }
  0x19   :  { %2416 = vmatprep.subr.bf16.mxu0 %v2935_v15  ;;  %494 = vperm.xlu0 %2881, %v476_v34  }
  0x1b   :  { %453 = vperm.xlu1 %2882, %v423_v36  }
  0x1c   :  { %2417 = vmatpush3.bf16.msra.mxu0 %v2936_v19 }
  0x1d   :  { %2418 = vmatprep.subr.bf16.mxu0 %v2938_v20  ;;  %448 = vperm.xlu0 %2881, %v422_v37  }
  0x1f   :  { %509 = vperm.xlu1 %2882, %v479_v38  }
  0x20   :  { %2419 = vmatpush3.bf16.msra.mxu0 %v2939_v22 }
  0x21   :  { %504 = vperm.xlu0 %2881, %v478_v40  }
  0x23   :  { %321 = vmatmul.mubr.bf16.vlgmr.msra.gmra.mrb[0].mxu0 %v2941_v27 }
  0x24   :  { %328 = vmatprep.mubr.bf16.mxu0 %v2946_v29 }
  0x2b   :  { %329 = vmatmul.mubr.bf16.gmra.mrb[4].mxu0 %v2948_v33 }
  0x2c   :  { %336 = vmatprep.mubr.bf16.mxu0 %v2949_v35 }
  0x33   :  { %337 = vmatmul.mubr.bf16.gmra.mrb[8].mxu0 %v2951_v39 }
  0x34   :  { %22 = vsyncpa [#allocation4], 0  ;;  %344 = vmatprep.mubr.bf16.mxu0 %v2954_v41  ;;  %463 = vperm.xlu1 %2882, %v425_v42   ;;  %v481_v44 = vld [vmem:[%s3769_s4 + $0x38] sm:$0xff]  ;;  %v2956_v45 = vld [vmem:[%s3767_s2 + $0x48] ss:$12 sps:$4 sm:$0xff]   ;;  %vm554_vm1 = vcmask 588800  }
  0x35   :  { %458 = vperm.xlu0 %2881, %v424_v43   ;;  %v480_v46 = vld [vmem:[%s3769_s4 + $0x30] sm:$0xff]  ;;  %s3009_s3 = smov 5   ;;  %s3784_s20 = sld [smem:[#allocation6_spill]]  ;;  %vm650_vm2 = vcmask 523264   ;;  %vm874_vm3 = vcmask 39936   ;;  %vm992_vm4 = vcmask 7168  }
  0x36   :  { %s3010_s23 = smov 1   ;;  %s3011_s24 = smov 64   ;;  %vm641_vm5 = vcmask 48128   ;;  %vm744_vm6 = vcmask 56320   ;;  %vm2166_vm7 = vcmask 15360  }
  0x37   :  { %s3012_s28 = smov 127   ;;  %s3014_s2 = smov 6  }
  0x38   :  { %519 = vperm.xlu1 %2882, %v481_v44   ;;  %s3015_s25 = smov 122   ;;  %s3016_s26 = smov 7  }
  0x39   :  { %514 = vperm.xlu0 %2881, %v480_v46   ;;  %s3018_s0 = smov [#allocation3]  }
  0x3a   :  { %s2280_s17 = sshll.u32 %s3018_s0, 4  ;;  %s2281_s17 = int_to_ptr.vmem [resolvable:$true] %s2280_s17 }
  0x3b   :  { %345 = vmatmul.mubr.bf16.gmra.mrb[12].mxu0 %v2956_v45  ;;  %v3263_v17 = vld [vmem:[%s3784_s20] ss:$0 sm:$0xff]  ;;  %s2984_s18 = scalar_lea.vmem %s2281_s17, 1024  ;;  %p2989_p1 = scmp.lt.s32.totalorder %s2281_s17, %s2281_s17 }
  0x3c   :  { %p2985_p0 = scmp.ne.s32.totalorder %s2281_s17, %s2984_s18  ;;  %p2990_p2 = scmp.lt.s32.totalorder %s2984_s18, %s2984_s18 }
  0x3d   :  { %2884 = vrot.lane.b32.xlu0 %v3008_v3, %s3009_s3 }
  0x3e   :  { %p2991_p3 = por %p2990_p2, %p2989_p1 }
  0x40   :  { %p2992_p4 = pnand %p2991_p3, %p2985_p0 }
  0x8a   :  { %v485_v49 = vpop.permute.xlu1 %484 }
  0x8c   :  { %v429_v47 = vpop.permute.xlu0 %428 }
  0x8e   :  { %v490_v54 = vpop.permute.xlu1 %489 }
  0x90   :  { %v434_v52 = vpop.permute.xlu0 %433 }
  0x92   :  { %v444_v0 = vpop.permute.xlu1 %443 }
  0x94   :  { %v439_v56 = vpop.permute.xlu0 %438 }
  0x96   :  { %v500_v11 = vpop.permute.xlu1 %499 }
  0x98   :  { %v495_v7 = vpop.permute.xlu0 %494 }
  0x9a   :  { %v454_v27 = vpop.permute.xlu1 %453 }
  0x9c   :  { %v449_v22 = vpop.permute.xlu0 %448 }
  0x9e   :  { %v510_v42 = vpop.permute.xlu1 %509 }
  0xa0   :  { %v505_v37 = vpop.permute.xlu0 %504 }
  0xe2   :  { %v2561_v48 = vpop.f32.mrb[0].mxu1 }
  0xe3   :  { %v387_v50 = vpop.f32.mrb[1].mxu1 }
  0xe4   :  { %v2562_v51 = vpop.f32.mrb[2].mxu1 }
  0xe5   :  { %v390_v53 = vpop.f32.mrb[3].mxu1 }
  0xea   :  { %v3256_v55 = vpop.f32.mrb[4].mxu1 }
  0xeb   :  { %v403_v57 = vpop.f32.mrb[5].mxu1 }
  0xec   :  { %v3258_v59 = vpop.f32.mrb[6].mxu1 }
  0xed   :  { %v406_v61 = vpop.f32.mrb[7].mxu1 }
  0xf6   :  { %v2420_v58 = vpop.f32.mrb[0].mxu0 }
  0xf7   :  { %v2421_v60 = vpop.f32.mrb[1].mxu0 }
  0xf8   :  { %v2422_v62 = vadd.f32 %v2421_v60, %v2420_v58  ;;  %v2423_v63 = vpop.f32.mrb[2].mxu0  ;;  %v464_v60 = vpop.permute.xlu1 %463 }
  0xf9   :  { %v2424_v1 = vpop.f32.mrb[3].mxu0 }
  0xfa   :  { %v2425_v2 = vadd.f32 %v2424_v1, %v2423_v63  ;;  %v388_v4 = vadd.f32 %v2422_v62, %v387_v50 }
  0xfc   :  { %v466_v5 = vmul.f32 %v429_v47, %v388_v4  ;;  %v391_v6 = vadd.f32 %v2425_v2, %v390_v53 }
  0xfe   :  { %v522_v8 = vadd.f32 %v485_v49, %v466_v5  ;;  %v467_v9 = vmul.f32 %v434_v52, %v391_v6  ;;  %v2426_v10 = vpop.f32.mrb[4].mxu0 }
  0xff   :  { %v2427_v12 = vpop.f32.mrb[5].mxu0 }
 0x100   :  { %v530_v13 = vmax.f32 %v522_v8, 0.0  ;;  %v523_v14 = vadd.f32 %v490_v54, %v467_v9  ;;  %v2428_v15 = vadd.f32 %v2427_v12, %v2426_v10  ;;  %v2429_v16 = vpop.f32.mrb[6].mxu0  ;;  %v520_v10 = vpop.permute.xlu1 %519 }
 0x101   :  { %v2430_v18 = vpop.f32.mrb[7].mxu0 }
 0x102   :  { %v531_v19 = vmax.f32 %v523_v14, 0.0  ;;  %v396_v20 = vadd.f32 %v2561_v48, %v2428_v15  ;;  %v2431_v21 = vadd.f32 %v2430_v18, %v2429_v16  ;;  %v544_v23 = vmul.f32 %v3263_v17, %v530_v13  ;;  %v2957_v15 = vld [vmem:[%s3770_s5 + $0x4] ss:$20 sps:$4 sm:$0xff]  }
 0x103   :  { %2607 = vmatprep.mubr.msk.bf16.mxu1 %vm650_vm2, %v2957_v15 }
 0x104   :  { %v545_v24 = vmul.f32 %v3263_v17, %v531_v19  ;;  %v468_v25 = vmul.f32 %v439_v56, %v396_v20  ;;  %v399_v26 = vadd.f32 %v2562_v51, %v2431_v21  ;;  %v459_v51 = vpop.permute.xlu0 %458  ;;  %v3315_v20 = vld [vmem:[%s3770_s5 + $0x2c] ss:$20 sps:$4 sm:$0xff]   ;;  %v3326_v21 = vld [vmem:[%s3770_s5 + $0x7c] ss:$20 sps:$4 sm:$0xff]  }
 0x106   :  { %v565_v28 = vpack.c.bf16 %v545_v24, %v544_v23  ;;  %v524_v29 = vadd.f32 %v495_v7, %v468_v25  ;;  %v469_v30 = vmul.f32 %v444_v0, %v399_v26  ;;  %v2432_v31 = vpop.f32.mrb[8].mxu0  ;;  %v3342_v23 = vld [vmem:[%s3770_s5 + $0x30] ss:$20 sps:$4 sm:$0xff]   ;;  %v3354_v24 = vld [vmem:[%s3770_s5 + $0x80] ss:$20 sps:$4 sm:$0xff]  }
 0x107   :  { %v2433_v32 = vpop.f32.mrb[9].mxu0  ;;  %v3359_v25 = vld [vmem:[%s3770_s5 + $0x58] ss:$20 sps:$4 sm:$0xff]   ;;  %v3374_v26 = vld [vmem:[%s3770_s5 + $0x28] ss:$20 sps:$4 sm:$0xff]  }
 0x108   :  { %569 = vst.msk [vmem:[#allocation2 + $0x8] sm:$0xff] %vm554_vm1, %v565_v28  ;;  %v532_v33 = vmax.f32 %v524_v29, 0.0  ;;  %v525_v34 = vadd.f32 %v500_v11, %v469_v30  ;;  %v2434_v35 = vadd.f32 %v2433_v32, %v2432_v31  ;;  %v2435_v36 = vpop.f32.mrb[10].mxu0  ;;  %v515_v6 = vpop.permute.xlu0 %514  ;;  %v3392_v28 = vld [vmem:[%s3770_s5 + $0x50] ss:$20 sps:$4 sm:$0xff]  }
 0x109   :  { %v2436_v38 = vpop.f32.mrb[11].mxu0  ;;  %v3402_v29 = vld [vmem:[%s3770_s5 + $0xc] ss:$20 sps:$4 sm:$0xff]   ;;  %v3425_v32 = vld [vmem:[%s3770_s5 + $0x34] ss:$20 sps:$4 sm:$0xff]  }
 0x10a   :  { %v533_v39 = vmax.f32 %v525_v34, 0.0  ;;  %v2437_v40 = vadd.f32 %v2436_v38, %v2435_v36  ;;  %v404_v41 = vadd.f32 %v2434_v35, %v403_v57  ;;  %v546_v43 = vmul.f32 %v3263_v17, %v532_v33  ;;  %v3410_v30 = vld [vmem:[%s3770_s5 + $0x78] ss:$20 sps:$4 sm:$0xff]  }
 0x10b   :  { %v3437_v36 = vld [vmem:[%s3770_s5 + $0x84] ss:$20 sps:$4 sm:$0xff]  }
 0x10c   :  { %v547_v44 = vmul.f32 %v3263_v17, %v533_v39  ;;  %v470_v45 = vmul.f32 %v449_v22, %v404_v41  ;;  %v407_v46 = vadd.f32 %v2437_v40, %v406_v61  ;;  %v3334_v22 = vld [vmem:[%s3770_s5 + $0x8] ss:$20 sps:$4 sm:$0xff]   ;;  %v2885_v31 = vpop.permute.xlu0 %2884 }
 0x10d   :  { %v2886_v33 = vunpack.i.l.bf16 %v2885_v31  ;;  %v2887_v38 = vunpack.i.h.bf16 %v2885_v31  ;;  %v1781_v39 = vld [vmem:[%s3775_s10 + $0x8] sm:$0xff] }
 0x10e   :  { %v566_v47 = vpack.c.bf16 %v547_v44, %v546_v43  ;;  %v526_v48 = vadd.f32 %v505_v37, %v470_v45  ;;  %v471_v49 = vmul.f32 %v454_v27, %v407_v46  ;;  %v2438_v50 = vpop.f32.mrb[12].mxu0  ;;  %v3379_v27 = vld [vmem:[%s3770_s5] ss:$20 sps:$4 sm:$0xff]   ;;  %v1837_v46 = vld [vmem:[%s3776_s11 + $0x8] sm:$0xff] }
 0x10f   :  { %v2439_v52 = vpop.f32.mrb[13].mxu0  ;;  %v3270_v53 = vld [vmem:[#allocation2 + $0x8] sm:$0xff]  ;;  %v1780_v37 = vld [vmem:[%s3775_s10] sm:$0xff] }
 0x110   :  { %570 = vst.msk [vmem:[#allocation2 + $0x20] sm:$0xff] %vm554_vm1, %v566_v47  ;;  %v534_v54 = vmax.f32 %v526_v48, 0.0  ;;  %v527_v56 = vadd.f32 %v510_v42, %v471_v49  ;;  %v2440_v57 = vadd.f32 %v2439_v52, %v2438_v50  ;;  %v2441_v58 = vpop.f32.mrb[14].mxu0  ;;  %860 = vrot.lane.b32.xlu1 %v3270_v53, %s3009_s3  ;;  %v1836_v43 = vld [vmem:[%s3776_s11] sm:$0xff]  ;;  %v1893_v47 = vld [vmem:[%s3771_s6 + $0x8] sm:$0xff]  ;;  %v1782_v50 = vld [vmem:[%s3775_s10 + $0x10] sm:$0xff] }
 0x111   :  { %v2442_v62 = vpop.f32.mrb[15].mxu0  ;;  %v1892_v44 = vld [vmem:[%s3771_s6] sm:$0xff] }
 0x112   :  { %v535_v61 = vmax.f32 %v527_v56, 0.0  ;;  %v412_v63 = vadd.f32 %v3256_v55, %v2440_v57  ;;  %v2443_v0 = vadd.f32 %v2442_v62, %v2441_v58  ;;  %v548_v1 = vmul.f32 %v3263_v17, %v534_v54  ;;  %v1783_v56 = vld [vmem:[%s3775_s10 + $0x18] sm:$0xff]  ;;  %v1949_v57 = vld [vmem:[%s3772_s7 + $0x8] sm:$0xff] }
 0x114   :  { %v549_v2 = vmul.f32 %v3263_v17, %v535_v61  ;;  %v472_v4 = vmul.f32 %v459_v51, %v412_v63  ;;  %v415_v5 = vadd.f32 %v3258_v59, %v2443_v0  ;;  %2889 = vrot.lane.b32.xlu1 %v3008_v3, %s3009_s3  ;;  %v1948_v51 = vld [vmem:[%s3772_s7] sm:$0xff]  ;;  %v1838_v63 = vld [vmem:[%s3776_s11 + $0x10] sm:$0xff] }
 0x115   :  { %v1894_v0 = vld [vmem:[%s3771_s6 + $0x10] sm:$0xff] }
 0x116   :  { %v567_v7 = vpack.c.bf16 %v549_v2, %v548_v1  ;;  %v528_v8 = vadd.f32 %v515_v6, %v472_v4  ;;  %v473_v9 = vmul.f32 %v464_v60, %v415_v5  ;;  %v1839_v6 = vld [vmem:[%s3776_s11 + $0x18] sm:$0xff] }
 0x117   :  { %v3281_v11 = vld [vmem:[#allocation2 + $0x20] sm:$0xff] }
 0x118   :  { %571 = vst.msk [vmem:[#allocation2 + $0x38] sm:$0xff] %vm554_vm1, %v567_v7  ;;  %v536_v55 = vmax.f32 %v528_v8, 0.0  ;;  %v529_v12 = vadd.f32 %v520_v10, %v473_v9  ;;  %864 = vrot.lane.b32.xlu0 %v3281_v11, %s3009_s3  ;;  %v1895_v7 = vld [vmem:[%s3771_s6 + $0x18] sm:$0xff] }
 0x11a   :  { %v537_v13 = vmax.f32 %v529_v12, 0.0  ;;  %v550_v59 = vmul.f32 %v3263_v17, %v536_v55 }
 0x11c   :  { %v551_v14 = vmul.f32 %v3263_v17, %v537_v13  ;;  %v3310_v17 = vld [vmem:[%s3770_s5 + $0x54] ss:$20 sps:$4 sm:$0xff]   ;;  %v1784_v13 = vld [vmem:[%s3775_s10 + $0x20] sm:$0xff] }
 0x11e   :  { %v568_v16 = vpack.c.bf16 %v551_v14, %v550_v59  ;;  %v1950_v59 = vld [vmem:[%s3772_s7 + $0x10] sm:$0xff] }
 0x11f   :  { %v3291_v18 = vld [vmem:[#allocation2 + $0x38] sm:$0xff] }
 0x120   :  { %572 = vst.msk [vmem:[#allocation2 + $0x50] sm:$0xff] %vm554_vm1, %v568_v16  ;;  %868 = vrot.lane.b32.xlu0 %v3291_v18, %s3009_s3 }
 0x124   :  { %2894 = vrot.lane.b32.xlu0 %v3008_v3, %s3010_s23 }
 0x127   :  { %v3298_v19 = vld [vmem:[#allocation2 + $0x50] sm:$0xff] }
 0x128   :  { %982 = vrot.lane.b32.xlu0 %v3281_v11, %s3010_s23  ;;  %872 = vrot.lane.b32.xlu1 %v3298_v19, %s3009_s3  ;;  %s3013_s3 = smov 123  }
 0x12c   :  { %986 = vrot.lane.b32.xlu0 %v3291_v18, %s3010_s23  ;;  %978 = vrot.lane.b32.xlu1 %v3270_v53, %s3010_s23 }
 0x130   :  { %968 = vrot.lane.b32.xlu0 %v2957_v15, %s3011_s24  ;;  %2899 = vrot.lane.b32.xlu1 %v3008_v3, %s3010_s23 }
 0x134   :  { %972 = vrot.lane.b32.xlu0 %v3310_v17, %s3011_s24  ;;  %970 = vrot.lane.b32.xlu1 %v3315_v20, %s3011_s24 }
 0x138   :  { %1207 = vrot.lane.b32.xlu0 %v3270_v53, %s3012_s28  ;;  %990 = vrot.lane.b32.xlu1 %v3298_v19, %s3010_s23 }
 0x13c   :  { %1211 = vrot.lane.b32.xlu0 %v3291_v18, %s3012_s28  ;;  %974 = vrot.lane.b32.xlu1 %v3326_v21, %s3011_s24 }
 0x140   :  { %1199 = vrot.lane.b32.xlu0 %v3334_v22, %s3011_s24  ;;  %1209 = vrot.lane.b32.xlu1 %v3281_v11, %s3012_s28 }
 0x144   :  { %1332 = vrot.lane.b32.xlu0 %v3270_v53, %s3013_s3  ;;  %1201 = vrot.lane.b32.xlu1 %v3342_v23, %s3011_s24 }
 0x148   :  { %627 = vrot.lane.b32.xlu0 %v3270_v53, %s3014_s2  ;;  %2904 = vrot.lane.b32.xlu1 %v3008_v3, %s3014_s2 }
 0x14c   :  { %631 = vrot.lane.b32.xlu0 %v3281_v11, %s3014_s2  ;;  %1334 = vrot.lane.b32.xlu1 %v3281_v11, %s3013_s3 }
 0x150   :  { %1205 = vrot.lane.b32.xlu0 %v3354_v24, %s3011_s24  ;;  %1203 = vrot.lane.b32.xlu1 %v3359_v25, %s3011_s24 }
 0x154   :  { %2909 = vrot.lane.b32.xlu0 %v3008_v3, %s3014_s2  ;;  %1336 = vrot.lane.b32.xlu1 %v3291_v18, %s3013_s3 }
 0x158   :  { %1437 = vrot.lane.b32.xlu0 %v3270_v53, %s3015_s25  ;;  %635 = vrot.lane.b32.xlu1 %v3291_v18, %s3014_s2 }
 0x15c   :  { %2914 = vrot.lane.b32.xlu0 %v3008_v3, %s3016_s26  ;;  %1213 = vrot.lane.b32.xlu1 %v3298_v19, %s3012_s28 }
 0x160   :  { %611 = vrot.lane.b32.xlu0 %v3374_v26, %s3011_s24  ;;  %609 = vrot.lane.b32.xlu1 %v3379_v27, %s3011_s24 }
 0x164   :  { %734 = vrot.lane.b32.xlu0 %v3281_v11, %s3016_s26  ;;  %730 = vrot.lane.b32.xlu1 %v3270_v53, %s3016_s26 }
 0x168   :  { %1338 = vrot.lane.b32.xlu0 %v3298_v19, %s3013_s3  ;;  %1439 = vrot.lane.b32.xlu1 %v3281_v11, %s3015_s25 }
 0x16c   :  { %613 = vrot.lane.b32.xlu0 %v3392_v28, %s3011_s24  ;;  %639 = vrot.lane.b32.xlu1 %v3298_v19, %s3014_s2  ;;  %s3017_s2 = smov 121  }
 0x170   :  { %738 = vrot.lane.b32.xlu0 %v3291_v18, %s3016_s26  ;;  %1441 = vrot.lane.b32.xlu1 %v3291_v18, %s3015_s25 }
 0x174   :  { %1429 = vrot.lane.b32.xlu0 %v3402_v29, %s3011_s24  ;;  %2919 = vrot.lane.b32.xlu1 %v3008_v3, %s3016_s26  ;;  %v3420_v3 = vld [vmem:[%s3770_s5 + $0x5c] ss:$20 sps:$4 sm:$0xff]  }
 0x178   :  { %1443 = vrot.lane.b32.xlu0 %v3298_v19, %s3015_s25  ;;  %615 = vrot.lane.b32.xlu1 %v3410_v30, %s3011_s24 }
 0x17c   :  { %1562 = vrot.lane.b32.xlu0 %v3270_v53, %s3017_s2  ;;  %742 = vrot.lane.b32.xlu1 %v3298_v19, %s3016_s26 }
 0x180   :  { %1433 = vrot.lane.b32.xlu0 %v3420_v3, %s3011_s24  ;;  %1431 = vrot.lane.b32.xlu1 %v3425_v32, %s3011_s24 }
 0x182   :  { %v861_v34 = vpop.permute.xlu1 %860 }
 0x183   :  { %v875_v35 = vsel %vm874_vm3, %v2886_v33, %v861_v34 }
 0x184   :  { %1566 = vrot.lane.b32.xlu0 %v3291_v18, %s3017_s2  ;;  %1564 = vrot.lane.b32.xlu1 %v3281_v11, %s3017_s2 }
 0x185   :  { %2599 = vmatprep.subr.bf16.mxu1 %v875_v35 }
 0x186   :  { %2600 = vmatpush3.bf16.msra.mxu1 %v875_v35  ;;  %v2890_v42 = vpop.permute.xlu1 %2889  ;;  %v1896_v35 = vld [vmem:[%s3771_s6 + $0x20] sm:$0xff] }
 0x187   :  { %v2891_v45 = vunpack.i.l.bf16 %v2890_v42  ;;  %v2892_v54 = vunpack.i.h.bf16 %v2890_v42 }
 0x188   :  { %1790 = vperm.xlu0 %2881, %v1780_v37   ;;  %1435 = vrot.lane.b32.xlu1 %v3437_v36, %s3011_s24 }
 0x18a   :  { %v865_v40 = vpop.permute.xlu0 %864 }
 0x18b   :  { %v876_v41 = vsel %vm874_vm3, %v2887_v38, %v865_v40  ;;  %v1897_v40 = vld [vmem:[%s3771_s6 + $0x28] sm:$0xff] }
 0x18c   :  { %1795 = vperm.xlu0 %2881, %v1781_v39   ;;  %1568 = vrot.lane.b32.xlu1 %v3298_v19, %s3017_s2  ;;  %v1841_v39 = vld [vmem:[%s3776_s11 + $0x28] sm:$0xff] }
 0x18d   :  { %2601 = vmatprep.subr.bf16.mxu1 %v876_v41 }
 0x18e   :  { %2602 = vmatpush3.bf16.msra.mxu1 %v876_v41 }
 0x190   :  { %1846 = vperm.xlu0 %2881, %v1836_v43   ;;  %1902 = vperm.xlu1 %2882, %v1892_v44   ;;  %v1786_v43 = vld [vmem:[%s3775_s10 + $0x30] sm:$0xff]  ;;  %v1952_v44 = vld [vmem:[%s3772_s7 + $0x20] sm:$0xff] }
 0x192   :  { %v869_v48 = vpop.permute.xlu0 %868 }
 0x193   :  { %v877_v49 = vsel %vm874_vm3, %v2891_v45, %v869_v48 }
 0x194   :  { %1851 = vperm.xlu0 %2881, %v1837_v46   ;;  %1907 = vperm.xlu1 %2882, %v1893_v47   ;;  %v1953_v47 = vld [vmem:[%s3772_s7 + $0x28] sm:$0xff] }
 0x195   :  { %2603 = vmatprep.subr.bf16.mxu1 %v877_v49 }
 0x196   :  { %2604 = vmatpush3.bf16.msra.mxu1 %v877_v49  ;;  %v2895_v52 = vpop.permute.xlu0 %2894 }
 0x197   :  { %v2896_v61 = vunpack.i.l.bf16 %v2895_v52  ;;  %v2897_v1 = vunpack.i.h.bf16 %v2895_v52  ;;  %v1842_v52 = vld [vmem:[%s3776_s11 + $0x30] sm:$0xff] }
 0x198   :  { %1800 = vperm.xlu0 %2881, %v1782_v50   ;;  %1958 = vperm.xlu1 %2882, %v1948_v51  }
 0x19a   :  { %v983_v58 = vpop.permute.xlu0 %982  ;;  %v873_v60 = vpop.permute.xlu1 %872 }
 0x19b   :  { %v878_v62 = vsel %vm874_vm3, %v2892_v54, %v873_v60  ;;  %v994_v10 = vsel %vm992_vm4, %v2897_v1, %v983_v58 }
 0x19c   :  { %1805 = vperm.xlu0 %2881, %v1783_v56   ;;  %1963 = vperm.xlu1 %2882, %v1949_v57   ;;  %v1843_v57 = vld [vmem:[%s3776_s11 + $0x38] sm:$0xff] }
 0x19d   :  { %2605 = vmatprep.subr.bf16.mxu1 %v878_v62 }
 0x19e   :  { %2606 = vmatpush3.bf16.msra.mxu1 %v878_v62  ;;  %v987_v2 = vpop.permute.xlu0 %986  ;;  %v979_v4 = vpop.permute.xlu1 %978  ;;  %v1954_v62 = vld [vmem:[%s3772_s7 + $0x30] sm:$0xff] }
 0x19f   :  { %v993_v5 = vsel %vm992_vm4, %v2896_v61, %v979_v4 }
 0x1a0   :  { %1856 = vperm.xlu0 %2881, %v1838_v63   ;;  %1912 = vperm.xlu1 %2882, %v1894_v0  }
 0x1a1   :  { %2608 = vmatmul.mubr.msk.bf16.vlgmr.msra.gmra.mrb[8].mxu1 %vm650_vm2, %v3315_v20  ;;  %2615 = vmatprep.subr.bf16.mxu1 %v993_v5  ;;  %v1951_v20 = vld [vmem:[%s3772_s7 + $0x18] sm:$0xff] }
 0x1a2   :  { %2616 = vmatpush3.bf16.msra.mxu1 %v993_v5  ;;  %v969_v8 = vpop.permute.xlu0 %968  ;;  %v2900_v9 = vpop.permute.xlu1 %2899  ;;  %2611 = vmatprep.mubr.msk.bf16.mxu1 %vm650_vm2, %v3310_v17  ;;  %v1785_v17 = vld [vmem:[%s3775_s10 + $0x28] sm:$0xff] }
 0x1a3   :  { %v2901_v55 = vunpack.i.l.bf16 %v2900_v9  ;;  %2617 = vmatprep.subr.bf16.mxu1 %v994_v10  ;;  %v2902_v16 = vunpack.i.h.bf16 %v2900_v9  ;;  %v2178_v5 = vld [vmem:[%s3779_s14 + $0x8] sm:$0x3] }
 0x1a4   :  { %1861 = vperm.xlu0 %2881, %v1839_v6   ;;  %1917 = vperm.xlu1 %2882, %v1895_v7  }
 0x1a5   :  { %v995_v12 = vsel %vm992_vm4, %v2901_v55, %v987_v2 }
 0x1a6   :  { %2618 = vmatpush3.bf16.msra.mxu1 %v994_v10  ;;  %v973_v14 = vpop.permute.xlu0 %972  ;;  %v971_v15 = vpop.permute.xlu1 %970 }
 0x1a7   :  { %2619 = vmatprep.subr.bf16.mxu1 %v995_v12 }
 0x1a8   :  { %1810 = vperm.xlu0 %2881, %v1784_v13   ;;  %1968 = vperm.xlu1 %2882, %v1950_v59  }
 0x1a9   :  { %2612 = vmatmul.mubr.msk.bf16.gmra.mrb[12].mxu1 %vm650_vm2, %v3326_v21  ;;  %v1840_v21 = vld [vmem:[%s3776_s11 + $0x20] sm:$0xff] }
 0x1aa   :  { %2620 = vmatpush3.bf16.msra.mxu1 %v995_v12  ;;  %v1208_v31 = vpop.permute.xlu0 %1207  ;;  %v991_v33 = vpop.permute.xlu1 %990  ;;  %2623 = vmatprep.mubr.msk.bf16.mxu1 %vm650_vm2, %v969_v8 }
 0x1ab   :  { %v996_v34 = vsel %vm992_vm4, %v2902_v16, %v991_v33 }
 0x1ac   :  { %1815 = vperm.xlu0 %2881, %v1785_v17   ;;  %1973 = vperm.xlu1 %2882, %v1951_v20  }
 0x1ad   :  { %2621 = vmatprep.subr.bf16.mxu1 %v996_v34 }
 0x1ae   :  { %2622 = vmatpush3.bf16.msra.mxu1 %v996_v34  ;;  %v3516_v37 = vpop.permute.xlu0 %1211  ;;  %v975_v38 = vpop.permute.xlu1 %974 }
 0x1af   :  { %2631 = vmatprep.subr.bf16.mxu1 %v3270_v53 }
 0x1b0   :  { %1866 = vperm.xlu0 %2881, %v1840_v21   ;;  %1922 = vperm.xlu1 %2882, %v1896_v35  }
 0x1b1   :  { %2624 = vmatmul.mubr.msk.bf16.vlgmr.msra.gmra.mrb[8].mxu1 %vm650_vm2, %v971_v15 }
 0x1b2   :  { %2627 = vmatprep.mubr.msk.bf16.mxu1 %vm650_vm2, %v973_v14  ;;  %2632 = vmatpush3.bf16.msra.mxu1 %v3270_v53  ;;  %v1200_v41 = vpop.permute.xlu0 %1199  ;;  %v1210_v42 = vpop.permute.xlu1 %1209  ;;  %v1787_v53 = vld [vmem:[%s3775_s10 + $0x38] sm:$0xff] }
 0x1b3   :  { %2633 = vmatprep.subr.bf16.mxu1 %v3281_v11 }
 0x1b4   :  { %1871 = vperm.xlu0 %2881, %v1841_v39   ;;  %1927 = vperm.xlu1 %2882, %v1897_v40  }
 0x1b6   :  { %2634 = vmatpush3.bf16.msra.mxu1 %v3281_v11  ;;  %v3536_v45 = vpop.permute.xlu0 %1332  ;;  %v3538_v46 = vpop.permute.xlu1 %1201 }
 0x1b7   :  { %2635 = vmatprep.subr.bf16.mxu1 %v3291_v18 }
 0x1b8   :  { %1820 = vperm.xlu0 %2881, %v1786_v43   ;;  %1978 = vperm.xlu1 %2882, %v1952_v44   ;;  %v2974_v44 = vld [vmem:[%s3773_s8 + $0x8] sm:$0xff]  }
 0x1b9   :  { %2628 = vmatmul.mubr.msk.bf16.gmra.mrb[12].mxu1 %vm650_vm2, %v975_v38 }
 0x1ba   :  { %2636 = vmatpush3.bf16.msra.mxu1 %v3291_v18  ;;  %v628_v11 = vpop.permute.xlu0 %627  ;;  %v2905_v48 = vpop.permute.xlu1 %2904  ;;  %2639 = vmatprep.mubr.msk.bf16.mxu1 %vm650_vm2, %v3334_v22  ;;  %v1898_v18 = vld [vmem:[%s3771_s6 + $0x30] sm:$0xff] }
 0x1bb   :  { %v2906_v49 = vunpack.i.l.bf16 %v2905_v48  ;;  %2637 = vmatprep.subr.bf16.mxu1 %v3298_v19  ;;  %v2907_v50 = vunpack.i.h.bf16 %v2905_v48  ;;  %v2981_v48 = vld [vmem:[%s3774_s9 + $0x10] sm:$0xff]  }
 0x1bc   :  { %1825 = vperm.xlu0 %2881, %v1787_v53   ;;  %1983 = vperm.xlu1 %2882, %v1953_v47   ;;  %v2976_v47 = vld [vmem:[%s3770_s5 + $0x38] ss:$20 sps:$4 sm:$0xff]  }
 0x1bd   :  { %v642_v51 = vsel %vm641_vm5, %v2906_v49, %v628_v11  ;;  %v2978_v11 = vld [vmem:[%s3774_s9 + $0x8] sm:$0xff]  }
 0x1be   :  { %2638 = vmatpush3.bf16.msra.mxu1 %v3298_v19  ;;  %v632_v54 = vpop.permute.xlu0 %631  ;;  %v1335_v22 = vpop.permute.xlu1 %1334  ;;  %2567 = vmatprep.subr.bf16.mxu0 %v642_v51  ;;  %v1899_v19 = vld [vmem:[%s3771_s6 + $0x38] sm:$0xff] }
 0x1bf   :  { %2647 = vmatprep.subr.bf16.mxu1 %v1208_v31  ;;  %2568 = vmatpush3.bf16.msra.mxu0 %v642_v51  ;;  %v643_v56 = vsel %vm641_vm5, %v2907_v50, %v632_v54  ;;  %v2980_v49 = vld [vmem:[%s3770_s5 + $0x88] ss:$20 sps:$4 sm:$0xff]   ;;  %v2028_v51 = vld [vmem:[%s3777_s12] sm:$0xff]  ;;  %v2030_v54 = vld [vmem:[%s3777_s12 + $0x10] sm:$0xff] }
 0x1c0   :  { %1876 = vperm.xlu0 %2881, %v1842_v52   ;;  %1932 = vperm.xlu1 %2882, %v1898_v18   ;;  %v2982_v50 = vld [vmem:[%s3774_s9 + $0x18] sm:$0xff]   ;;  %v2029_v52 = vld [vmem:[%s3777_s12 + $0x8] sm:$0xff] }
 0x1c1   :  { %2569 = vmatprep.subr.bf16.mxu0 %v643_v56  ;;  %2640 = vmatmul.mubr.msk.bf16.vlgmr.msra.gmra.mrb[8].mxu1 %vm650_vm2, %v3342_v23  ;;  %v2177_v23 = vld [vmem:[%s3779_s14] sm:$0xff]  ;;  %v2772_v18 = vpack.c.bf16 %v2029_v52, %v2028_v51 }
 0x1c2   :  { %2648 = vmatpush3.bf16.msra.mxu1 %v1208_v31  ;;  %v1206_v58 = vpop.permute.xlu0 %1205  ;;  %v1204_v60 = vpop.permute.xlu1 %1203  ;;  %2643 = vmatprep.mubr.msk.bf16.mxu1 %vm650_vm2, %v3359_v25  ;;  %v1955_v25 = vld [vmem:[%s3772_s7 + $0x38] sm:$0xff] }
 0x1c3   :  { %2649 = vmatprep.subr.bf16.mxu1 %v1210_v42  ;;  %2570 = vmatpush3.bf16.msra.mxu0 %v643_v56 }
 0x1c4   :  { %1881 = vperm.xlu0 %2881, %v1843_v57   ;;  %1937 = vperm.xlu1 %2882, %v1899_v19   ;;  %v2032_v57 = vld [vmem:[%s3777_s12 + $0x20] sm:$0xff]  ;;  %v2033_v19 = vld [vmem:[%s3777_s12 + $0x28] sm:$0xff] }
 0x1c6   :  { %2650 = vmatpush3.bf16.msra.mxu1 %v1210_v42  ;;  %v2910_v61 = vpop.permute.xlu0 %2909  ;;  %v1337_v63 = vpop.permute.xlu1 %1336 }
 0x1c7   :  { %v2911_v0 = vunpack.i.l.bf16 %v2910_v61  ;;  %2651 = vmatprep.subr.bf16.mxu1 %v3516_v37  ;;  %v2912_v13 = vunpack.i.h.bf16 %v2910_v61  ;;  %v2036_v61 = vld [vmem:[%s3777_s12 + $0x40] sm:$0xff] }
 0x1c8   :  { %2181 = vperm.xlu0 %2881, %v2177_v23   ;;  %1988 = vperm.xlu1 %2882, %v1954_v62   ;;  %v2035_v23 = vld [vmem:[%s3777_s12 + $0x38] sm:$0xff] }
 0x1c9   :  { %2644 = vmatmul.mubr.msk.bf16.gmra.mrb[12].mxu1 %vm650_vm2, %v3354_v24 }
 0x1ca   :  { %2652 = vmatpush3.bf16.msra.mxu1 %v3516_v37  ;;  %2655 = vmatprep.mubr.msk.bf16.mxu1 %vm650_vm2, %v1200_v41  ;;  %v1438_v1 = vpop.permute.xlu0 %1437  ;;  %v636_v2 = vpop.permute.xlu1 %635 }
 0x1cb   :  { %v644_v4 = vsel %vm641_vm5, %v2911_v0, %v636_v2 }
 0x1cc   :  { %1993 = vperm.xlu1 %2882, %v1955_v25   ;;  %2571 = vmatprep.subr.bf16.mxu0 %v644_v4 }
 0x1cd   :  { %2572 = vmatpush3.bf16.msra.mxu0 %v644_v4 }
 0x1ce   :  { %v2915_v24 = vpop.permute.xlu0 %2914  ;;  %v1214_v6 = vpop.permute.xlu1 %1213 }
 0x1cf   :  { %2653 = vmatprep.subr.bf16.mxu1 %v1214_v6  ;;  %v2916_v15 = vunpack.i.l.bf16 %v2915_v24  ;;  %v2917_v33 = vunpack.i.h.bf16 %v2915_v24 }
 0x1d0   :  { %2186 = vperm.xlu1 %2882, %v2178_v5   ;;  %2654 = vmatpush3.bf16.msra.mxu1 %v1214_v6 }
 0x1d1   :  { %2663 = vmatprep.subr.bf16.mxu1 %v3536_v45 }
 0x1d2   :  { %v612_v7 = vpop.permute.xlu0 %611  ;;  %v610_v8 = vpop.permute.xlu1 %609 }
 0x1d3   :  { %2575 = vmatprep.mubr.msk.bf16.mxu0 %vm650_vm2, %v610_v8  ;;  %2656 = vmatmul.mubr.msk.bf16.vlgmr.msra.gmra.mrb[8].mxu1 %vm650_vm2, %v3538_v46  ;;  %v2975_v46 = vld [vmem:[%s3770_s5 + $0x10] ss:$20 sps:$4 sm:$0xff]  }
 0x1d4   :  { %2659 = vmatprep.mubr.msk.bf16.mxu1 %vm650_vm2, %v1204_v60  ;;  %2664 = vmatpush3.bf16.msra.mxu1 %v3536_v45  ;;  %v2034_v60 = vld [vmem:[%s3777_s12 + $0x30] sm:$0xff] }
 0x1d5   :  { %2665 = vmatprep.subr.bf16.mxu1 %v1335_v22  ;;  %v2784_v62 = vpack.c.bf16 %v2035_v23, %v2034_v60 }
 0x1d6   :  { %v735_v9 = vpop.permute.xlu0 %734  ;;  %v731_v10 = vpop.permute.xlu1 %730 }
 0x1d7   :  { %v745_v17 = vsel %vm744_vm6, %v2916_v15, %v731_v10 }
 0x1d8   :  { %2666 = vmatpush3.bf16.msra.mxu1 %v1335_v22  ;;  %v2031_v22 = vld [vmem:[%s3777_s12 + $0x18] sm:$0xff] }
 0x1d9   :  { %2667 = vmatprep.subr.bf16.mxu1 %v1337_v63  ;;  %v2776_v56 = vpack.c.bf16 %v2031_v22, %v2030_v54 }
 0x1da   :  { %v1339_v55 = vpop.permute.xlu0 %1338  ;;  %v1440_v12 = vpop.permute.xlu1 %1439 }
 0x1db   :  { %2660 = vmatmul.mubr.msk.bf16.gmra.mrb[12].mxu1 %vm650_vm2, %v1206_v58  ;;  %v2780_v58 = vpack.c.bf16 %v2033_v19, %v2032_v57 }
 0x1dc   :  { %2668 = vmatpush3.bf16.msra.mxu1 %v1337_v63  ;;  %2671 = vmatprep.mubr.msk.bf16.mxu1 %vm650_vm2, %v3402_v29  ;;  %v746_v29 = vsel %vm744_vm6, %v2917_v33, %v735_v9 }
 0x1dd   :  { %2669 = vmatprep.subr.bf16.mxu1 %v1339_v55 }
 0x1de   :  { %v614_v59 = vpop.permute.xlu0 %613  ;;  %v640_v14 = vpop.permute.xlu1 %639 }
 0x1df   :  { %v645_v16 = vsel %vm641_vm5, %v2912_v13, %v640_v14 }
 0x1e0   :  { %2573 = vmatprep.subr.bf16.mxu0 %v645_v16  ;;  %2670 = vmatpush3.bf16.msra.mxu1 %v1339_v55 }
 0x1e1   :  { %2574 = vmatpush3.bf16.msra.mxu0 %v645_v16  ;;  %2679 = vmatprep.subr.bf16.mxu1 %v1438_v1 }
 0x1e2   :  { %v739_v20 = vpop.permute.xlu0 %738  ;;  %v1442_v31 = vpop.permute.xlu1 %1441  ;;  %2583 = vmatprep.subr.bf16.mxu0 %v745_v17 }
 0x1e3   :  { %2672 = vmatmul.mubr.msk.bf16.vlgmr.msra.gmra.mrb[8].mxu1 %vm650_vm2, %v3425_v32 }
 0x1e4   :  { %2576 = vmatmul.mubr.msk.bf16.vlgmr.msra.gmra.mrb[16].mxu0 %vm650_vm2, %v612_v7  ;;  %2680 = vmatpush3.bf16.msra.mxu1 %v1438_v1 }
 0x1e5   :  { %2584 = vmatpush3.bf16.msra.mxu0 %v745_v17  ;;  %2681 = vmatprep.subr.bf16.mxu1 %v1440_v12 }
 0x1e6   :  { %v1430_v34 = vpop.permute.xlu0 %1429  ;;  %v2920_v21 = vpop.permute.xlu1 %2919  ;;  %2579 = vmatprep.mubr.msk.bf16.mxu0 %vm650_vm2, %v614_v59  ;;  %2585 = vmatprep.subr.bf16.mxu0 %v746_v29 }
 0x1e7   :  { %v2921_v35 = vunpack.i.l.bf16 %v2920_v21  ;;  %2675 = vmatprep.mubr.msk.bf16.mxu1 %vm650_vm2, %v3420_v3  ;;  %v2922_v39 = vunpack.i.h.bf16 %v2920_v21  ;;  %v2973_v3 = vld [vmem:[%s3773_s8] sm:$0xff]  }
 0x1e8   :  { %2682 = vmatpush3.bf16.msra.mxu1 %v1440_v12 }
 0x1e9   :  { %2586 = vmatpush3.bf16.msra.mxu0 %v746_v29  ;;  %2683 = vmatprep.subr.bf16.mxu1 %v1442_v31  ;;  %v747_v32 = vsel %vm744_vm6, %v2921_v35, %v739_v20 }
 0x1ea   :  { %v1444_v37 = vpop.permute.xlu0 %1443  ;;  %v616_v38 = vpop.permute.xlu1 %615  ;;  %2587 = vmatprep.subr.bf16.mxu0 %v747_v32 }
 0x1eb   :  { %2676 = vmatmul.mubr.msk.bf16.gmra.mrb[12].mxu1 %vm650_vm2, %v3437_v36 }
 0x1ec   :  { %2580 = vmatmul.mubr.msk.bf16.gmra.mrb[20].mxu0 %vm650_vm2, %v616_v38  ;;  %2684 = vmatpush3.bf16.msra.mxu1 %v1442_v31 }
 0x1ed   :  { %2588 = vmatpush3.bf16.msra.mxu0 %v747_v32  ;;  %2685 = vmatprep.subr.bf16.mxu1 %v1444_v37 }
 0x1ee   :  { %v1563_v40 = vpop.permute.xlu0 %1562  ;;  %v743_v41 = vpop.permute.xlu1 %742  ;;  %2687 = vmatprep.mubr.msk.bf16.mxu1 %vm650_vm2, %v1430_v34  ;;  %2591 = vmatprep.mubr.msk.bf16.mxu0 %vm650_vm2, %v3379_v27 }
 0x1ef   :  { %v748_v42 = vsel %vm744_vm6, %v2922_v39, %v743_v41 }
 0x1f0   :  { %2589 = vmatprep.subr.bf16.mxu0 %v748_v42  ;;  %2686 = vmatpush3.bf16.msra.mxu1 %v1444_v37 }
 0x1f1   :  { %2590 = vmatpush3.bf16.msra.mxu0 %v748_v42  ;;  %2695 = vmatprep.subr.bf16.mxu1 %v1563_v40 }
 0x1f2   :  { %v1434_v36 = vpop.permute.xlu0 %1433  ;;  %v1432_v43 = vpop.permute.xlu1 %1431  ;;  %2711 = vmatprep.subr.bf16.mxu0 %v2973_v3 }
 0x1f3   :  { %2688 = vmatmul.mubr.msk.bf16.vlgmr.msra.gmra.mrb[8].mxu1 %vm650_vm2, %v1432_v43 }
 0x1f4   :  { %2592 = vmatmul.mubr.msk.bf16.vlgmr.msra.gmra.mrb[16].mxu0 %vm650_vm2, %v3374_v26  ;;  %2696 = vmatpush3.bf16.msra.mxu1 %v1563_v40  ;;  %v2977_v26 = vld [vmem:[%s3774_s9] sm:$0xff]  }
 0x1f5   :  { %2712 = vmatpush3.bf16.msra.mxu0 %v2973_v3  ;;  %2691 = vmatprep.mubr.msk.bf16.mxu1 %vm650_vm2, %v1434_v36 }
 0x1f6   :  { %v1565_v27 = vpop.permute.xlu1 %1564  ;;  %2595 = vmatprep.mubr.msk.bf16.mxu0 %vm650_vm2, %v3392_v28  ;;  %2713 = vmatprep.subr.bf16.mxu0 %v2974_v44  ;;  %v1567_v45 = vpop.permute.xlu0 %1566 }
 0x1f7   :  { %2697 = vmatprep.subr.bf16.mxu1 %v1565_v27 }
 0x1f8   :  { %2698 = vmatpush3.bf16.msra.mxu1 %v1565_v27 }
 0x1f9   :  { %2699 = vmatprep.subr.bf16.mxu1 %v1567_v45  ;;  %2714 = vmatpush3.bf16.msra.mxu0 %v2974_v44 }
 0x1fa   :  { %v1436_v53 = vpop.permute.xlu1 %1435  ;;  %2773 = vmatprep.subr.bf16.mxu0 %v2772_v18 }
 0x1fb   :  { %2692 = vmatmul.mubr.msk.bf16.gmra.mrb[12].mxu1 %vm650_vm2, %v1436_v53 }
 0x1fc   :  { %2596 = vmatmul.mubr.msk.bf16.gmra.mrb[20].mxu0 %vm650_vm2, %v3410_v30  ;;  %2700 = vmatpush3.bf16.msra.mxu1 %v1567_v45  ;;  %v2979_v30 = vld [vmem:[%s3770_s5 + $0x60] ss:$20 sps:$4 sm:$0xff]  }
 0x1fd   :  { %2703 = vmatprep.mubr.msk.bf16.mxu1 %vm650_vm2, %v2975_v46  ;;  %2715 = vmatprep.mubr.msk.bf16.mxu0 %vm275_vm0, %v2977_v26 }
 0x1fe   :  { %v1569_v28 = vpop.permute.xlu1 %1568 }
 0x1ff   :  { %2701 = vmatprep.subr.bf16.mxu1 %v1569_v28 }
 0x200   :  { %2702 = vmatpush3.bf16.msra.mxu1 %v1569_v28 }
 0x203   :  { %2704 = vmatmul.mubr.msk.bf16.vlgmr.msra.gmra.mrb[8].mxu1 %vm650_vm2, %v2976_v47 }
 0x204   :  { %2716 = vmatmul.mubr.msk.bf16.vlgmr.msra.gmra.mrb[24].mxu0 %vm275_vm0, %v2978_v11  ;;  %2707 = vmatprep.mubr.msk.bf16.mxu1 %vm650_vm2, %v2979_v30 }
 0x205   :  { %2719 = vmatprep.mubr.msk.bf16.mxu0 %vm275_vm0, %v2981_v48  ;;  %2775 = vmatpush3.bf16.msra.mxu0 %v2772_v18 }
 0x206   :  { %2777 = vmatprep.subr.bf16.mxu0 %v2776_v56 }
 0x207   :  { %v1791_v63 = vpop.permute.xlu0 %1790 }
 0x209   :  { %2779 = vmatpush3.bf16.msra.mxu0 %v2776_v56 }
 0x20a   :  { %2781 = vmatprep.subr.bf16.mxu0 %v2780_v58 }
 0x20b   :  { %2708 = vmatmul.mubr.msk.bf16.gmra.mrb[12].mxu1 %vm650_vm2, %v2980_v49  ;;  %v1796_v25 = vpop.permute.xlu0 %1795 }
 0x20c   :  { %2720 = vmatmul.mubr.msk.bf16.gmra.mrb[28].mxu0 %vm275_vm0, %v2982_v50 }
 0x20d   :  { %2783 = vmatpush3.bf16.msra.mxu0 %v2780_v58 }
 0x20e   :  { %2785 = vmatprep.subr.bf16.mxu0 %v2784_v62 }
 0x20f   :  { %v1903_v0 = vpop.permute.xlu1 %1902  ;;  %v1847_v2 = vpop.permute.xlu0 %1846 }
 0x211   :  { %2787 = vmatpush3.bf16.msra.mxu0 %v2784_v62 }
 0x212   :  { %2739 = vmatprep.subr.mxu0 %v2036_v61 }
 0x213   :  { %v1908_v1 = vpop.permute.xlu1 %1907  ;;  %v1852_v5 = vpop.permute.xlu0 %1851 }
 0x215   :  { %2740 = vmatpush3.msra.mxu0 %v2036_v61 }
 0x217   :  { %v1959_v4 = vpop.permute.xlu1 %1958  ;;  %v1801_v6 = vpop.permute.xlu0 %1800 }
 0x21b   :  { %v1964_v24 = vpop.permute.xlu1 %1963  ;;  %v1806_v8 = vpop.permute.xlu0 %1805 }
 0x21f   :  { %v1913_v7 = vpop.permute.xlu1 %1912  ;;  %v1857_v10 = vpop.permute.xlu0 %1856 }
 0x223   :  { %v1918_v9 = vpop.permute.xlu1 %1917  ;;  %v1862_v12 = vpop.permute.xlu0 %1861 }
 0x227   :  { %v1969_v55 = vpop.permute.xlu1 %1968  ;;  %v3689_v59 = vpop.permute.xlu0 %1810 }
 0x22b   :  { %v1974_v13 = vpop.permute.xlu1 %1973  ;;  %v3693_v15 = vpop.permute.xlu0 %1815 }
 0x22f   :  { %v3691_v14 = vpop.permute.xlu1 %1922  ;;  %v3697_v17 = vpop.permute.xlu0 %1866 }
 0x233   :  { %v3695_v16 = vpop.permute.xlu1 %1927  ;;  %v3701_v29 = vpop.permute.xlu0 %1871 }
 0x237   :  { %v3699_v20 = vpop.permute.xlu1 %1978  ;;  %v1821_v32 = vpop.permute.xlu0 %1820 }
 0x23b   :  { %v3703_v21 = vpop.permute.xlu1 %1983  ;;  %v3707_v3 = vpop.permute.xlu0 %1825 }
 0x23f   :  { %v1933_v38 = vpop.permute.xlu1 %1932  ;;  %v1877_v23 = vpop.permute.xlu0 %1876 }
 0x243   :  { %v1938_v42 = vpop.permute.xlu1 %1937 }
 0x2c7   :  { %v2593_v31 = vpop.f32.mrb[16].mxu0 }
 0x2c8   :  { %v799_v33 = vpop.f32.mrb[17].mxu0 }
 0x2c9   :  { %v2594_v34 = vpop.f32.mrb[18].mxu0 }
 0x2ca   :  { %v802_v35 = vpop.f32.mrb[19].mxu0 }
 0x2cf   :  { %v2597_v37 = vpop.f32.mrb[20].mxu0 }
 0x2d0   :  { %v815_v39 = vpop.f32.mrb[21].mxu0 }
 0x2d1   :  { %v2598_v40 = vpop.f32.mrb[22].mxu0 }
 0x2d2   :  { %v3705_v41 = vpop.f32.mrb[23].mxu0 }
 0x2d6   :  { %v2705_v36 = vpop.f32.mrb[8].mxu1 }
 0x2d7   :  { %v2804_v43 = vadd.f32 %v2705_v36, %v2593_v31  ;;  %v1620_v44 = vpop.f32.mrb[9].mxu1  ;;  %v2717_v27 = vpop.f32.mrb[24].mxu0 }
 0x2d8   :  { %v2805_v45 = vadd.f32 %v1620_v44, %v799_v33  ;;  %v1830_v46 = vmul.f32 %v2717_v27, %v1801_v6  ;;  %v2706_v26 = vpop.f32.mrb[10].mxu1  ;;  %v1749_v53 = vpop.f32.mrb[25].mxu0 }
 0x2d9   :  { %v1942_v28 = vmul.f32 %v2804_v43, %v1913_v7  ;;  %v2806_v47 = vadd.f32 %v2706_v26, %v2594_v34  ;;  %v1828_v11 = vmul.f32 %v1791_v63, %v1749_v53  ;;  %v1623_v30 = vpop.f32.mrb[11].mxu1  ;;  %v2718_v48 = vpop.f32.mrb[26].mxu0 }
 0x2da   :  { %v1940_v49 = vmul.f32 %v2805_v45, %v1903_v0  ;;  %v1886_v50 = vadd.f32 %v1857_v10, %v1830_v46  ;;  %v2807_v51 = vadd.f32 %v1623_v30, %v802_v35  ;;  %v1831_v52 = vmul.f32 %v2718_v48, %v1806_v8  ;;  %v1752_v18 = vpop.f32.mrb[27].mxu0  ;;  %v1989_v7 = vpop.permute.xlu1 %1988 }
 0x2db   :  { %v1998_v54 = vadd.f32 %v1969_v55, %v1942_v28  ;;  %v1943_v22 = vmul.f32 %v2806_v47, %v1918_v9  ;;  %v1884_v56 = vadd.f32 %v1847_v2, %v1828_v11  ;;  %v1829_v57 = vmul.f32 %v1796_v25, %v1752_v18  ;;  %v1882_v30 = vpop.permute.xlu0 %1881 }
 0x2dc   :  { %v1996_v19 = vadd.f32 %v1959_v4, %v1940_v49  ;;  %v1941_v58 = vmul.f32 %v2807_v51, %v1908_v1  ;;  %v1887_v60 = vadd.f32 %v1862_v12, %v1831_v52  ;;  %v2983_v12 = vld [vmem:[%s3784_s20] ss:$0 sm:$0xff] }
 0x2dd   :  { %v2006_v62 = vadd.f32 %v1998_v54, %v1886_v50  ;;  %v1999_v61 = vadd.f32 %v1974_v13, %v1943_v22  ;;  %v1885_v6 = vadd.f32 %v1852_v5, %v1829_v57 }
 0x2de   :  { %v2004_v63 = vadd.f32 %v1996_v19, %v1884_v56  ;;  %v1997_v31 = vadd.f32 %v1964_v24, %v1941_v58  ;;  %v2709_v33 = vpop.f32.mrb[12].mxu1  ;;  %v1994_v28 = vpop.permute.xlu1 %1993 }
 0x2df   :  { %v2014_v0 = vmax.f32 %v2006_v62, 0.0  ;;  %v2007_v10 = vadd.f32 %v1999_v61, %v1887_v60  ;;  %v2808_v34 = vadd.f32 %v2709_v33, %v2597_v37  ;;  %v1636_v8 = vpop.f32.mrb[13].mxu1  ;;  %v2721_v35 = vpop.f32.mrb[28].mxu0 }
 0x2e0   :  { %v2012_v55 = vmax.f32 %v2004_v63, 0.0  ;;  %v2005_v9 = vadd.f32 %v1997_v31, %v1885_v6  ;;  %v2809_v2 = vadd.f32 %v1636_v8, %v815_v39  ;;  %v1834_v25 = vmul.f32 %v2721_v35, %v1821_v32  ;;  %v2710_v4 = vpop.f32.mrb[14].mxu1  ;;  %v1765_v1 = vpop.f32.mrb[29].mxu0 }
 0x2e1   :  { %v2022_v5 = vmul.f32 %v2983_v12, %v2014_v0  ;;  %v1946_v13 = vmul.f32 %v2808_v34, %v1933_v38  ;;  %v2810_v36 = vadd.f32 %v2710_v4, %v2598_v40  ;;  %v1639_v24 = vpop.f32.mrb[15].mxu1  ;;  %v2722_v43 = vpop.f32.mrb[30].mxu0  ;;  %v2015_v26 = vmax.f32 %v2007_v10, 0.0  ;;  %v2176_v10 = vld [vmem:[%s3778_s13 + $0x8] sm:$0x3] }
 0x2e2   :  { %v2020_v44 = vmul.f32 %v2983_v12, %v2012_v55  ;;  %v2013_v27 = vmax.f32 %v2005_v9, 0.0  ;;  %v1944_v37 = vmul.f32 %v2809_v2, %v3691_v14  ;;  %v1890_v45 = vadd.f32 %v1877_v23, %v1834_v25  ;;  %v1768_v46 = vpop.f32.mrb[31].mxu0 }
 0x2e3   :  { %v2002_v39 = vadd.f32 %v1989_v7, %v1946_v13  ;;  %v1947_v32 = vmul.f32 %v2810_v36, %v1938_v42  ;;  %v1832_v53 = vmul.f32 %v3689_v59, %v1765_v1  ;;  %v2811_v38 = vadd.f32 %v1639_v24, %v3705_v41 }
 0x2e4   :  { %v2021_v47 = vmul.f32 %v2983_v12, %v2013_v27  ;;  %v2000_v11 = vadd.f32 %v3699_v20, %v1944_v37  ;;  %v1835_v40 = vmul.f32 %v2722_v43, %v3707_v3  ;;  %2741 = vmatprep.mubr.msk.f32.mxu0 %vm554_vm1, %v2020_v44  ;;  %v1833_v50 = vmul.f32 %v3693_v15, %v1768_v46 }
 0x2e5   :  { %v2010_v48 = vadd.f32 %v2002_v39, %v1890_v45  ;;  %v2003_v14 = vadd.f32 %v1994_v28, %v1947_v32  ;;  %v1888_v49 = vadd.f32 %v3697_v17, %v1832_v53  ;;  %v1945_v42 = vmul.f32 %v2811_v38, %v3695_v16 }
 0x2e6   :  { %v1891_v59 = vadd.f32 %v1882_v30, %v1835_v40  ;;  %2742 = vmatmul.mubr.msk.f32.vlgmr.msra.gmra.mrb[32].mxu0 %vm554_vm1, %v2021_v47  ;;  %v1889_v20 = vadd.f32 %v3701_v29, %v1833_v50  ;;  %v2023_v41 = vmul.f32 %v2983_v12, %v2015_v26 }
 0x2e7   :  { %v2008_v51 = vadd.f32 %v2000_v11, %v1888_v49  ;;  %2744 = vmatprep.mubr.msk.f32.mxu0 %vm554_vm1, %v2022_v5  ;;  %v2001_v3 = vadd.f32 %v3703_v21, %v1945_v42  ;;  %v2018_v17 = vmax.f32 %v2010_v48, 0.0  ;;  %v2175_v21 = vld [vmem:[%s3778_s13] sm:$0xff] }
 0x2e8   :  { %v2011_v52 = vadd.f32 %v2003_v14, %v1891_v59 }
 0x2e9   :  { %v2016_v18 = vmax.f32 %v2008_v51, 0.0  ;;  %v2009_v54 = vadd.f32 %v2001_v3, %v1889_v20  ;;  %v2026_v57 = vmul.f32 %v2983_v12, %v2018_v17 }
 0x2ea   :  { %2745 = vmatmul.mubr.msk.f32.gmra.mrb[34].mxu0 %vm554_vm1, %v2023_v41  ;;  %v2019_v16 = vmax.f32 %v2011_v52, 0.0 }
 0x2eb   :  { %v2024_v15 = vmul.f32 %v2983_v12, %v2016_v18  ;;  %v2017_v22 = vmax.f32 %v2009_v54, 0.0 }
 0x2ec   :  { %v2027_v29 = vmul.f32 %v2983_v12, %v2019_v16 }
 0x2ed   :  { %2747 = vmatprep.mubr.msk.f32.mxu0 %vm554_vm1, %v2024_v15  ;;  %v2025_v56 = vmul.f32 %v2983_v12, %v2017_v22 }
 0x2ef   :  { %2748 = vmatmul.mubr.msk.f32.gmra.mrb[36].mxu0 %vm554_vm1, %v2025_v56 }
 0x2f0   :  { %2750 = vmatprep.mubr.msk.f32.mxu0 %vm554_vm1, %v2026_v57 }
 0x2f3   :  { %2751 = vmatmul.mubr.msk.f32.gmra.mrb[38].mxu0 %vm554_vm1, %v2027_v29 }
 0x2f4   :  { %2769 = vmatprep.mubr.msk.f32.mxu0 %vm650_vm2, %v2175_v21 }
 0x3b9   :  { %v2743_v19 = vpop.f32.mrb[32].mxu0 }
 0x3ba   :  { %2168 = vst.msk [vmem:[#allocation3 + $0x8] sm:$0xff] %vm2166_vm7, %v2743_v19  ;;  %v2127_v58 = vpop.f32.mrb[33].mxu0 }
 0x3bb   :  { %2167 = vst.msk [vmem:[#allocation3] sm:$0xff] %vm2166_vm7, %v2127_v58  ;;  %v2788_v60 = vpack.c.bf16 %v2743_v19, %v2127_v58 }
 0x3bd   :  { %v2746_v23 = vpop.f32.mrb[34].mxu0  ;;  %2789 = vmatprep.subr.bf16.mxu0 %v2788_v60 }
 0x3be   :  { %2170 = vst.msk [vmem:[#allocation3 + $0x18] sm:$0xff] %vm2166_vm7, %v2746_v23  ;;  %v2137_v62 = vpop.f32.mrb[35].mxu0  ;;  %2791 = vmatpush3.bf16.msra.mxu0 %v2788_v60 }
 0x3bf   :  { %2169 = vst.msk [vmem:[#allocation3 + $0x10] sm:$0xff] %vm2166_vm7, %v2137_v62  ;;  %v2792_v61 = vpack.c.bf16 %v2746_v23, %v2137_v62 }
 0x3c1   :  { %2793 = vmatprep.subr.bf16.mxu0 %v2792_v61 }
 0x3c2   :  { %2795 = vmatpush3.bf16.msra.mxu0 %v2792_v61  ;;  %v2749_v6 = vpop.f32.mrb[36].mxu0 }
 0x3c3   :  { %2172 = vst.msk [vmem:[#allocation3 + $0x28] sm:$0xff] %vm2166_vm7, %v2749_v6  ;;  %v2147_v7 = vpop.f32.mrb[37].mxu0 }
 0x3c4   :  { %2171 = vst.msk [vmem:[#allocation3 + $0x20] sm:$0xff] %vm2166_vm7, %v2147_v7  ;;  %v2796_v63 = vpack.c.bf16 %v2749_v6, %v2147_v7 }
 0x3c6   :  { %v2752_v31 = vpop.f32.mrb[38].mxu0  ;;  %2797 = vmatprep.subr.bf16.mxu0 %v2796_v63 }
 0x3c7   :  { %2174 = vst.msk [vmem:[#allocation3 + $0x38] sm:$0xff] %vm2166_vm7, %v2752_v31  ;;  %v2157_v33 = vpop.f32.mrb[39].mxu0  ;;  %2799 = vmatpush3.bf16.msra.mxu0 %v2796_v63 }
 0x3c8   :  { %2173 = vst.msk [vmem:[#allocation3 + $0x30] sm:$0xff] %vm2166_vm7, %v2157_v33  ;;  %v2800_v0 = vpack.c.bf16 %v2752_v31, %v2157_v33 }
 0x3ca   :  { %2801 = vmatprep.subr.bf16.mxu0 %v2800_v0 }
 0x3cb   :  { %2803 = vmatpush3.bf16.msra.mxu0 %v2800_v0 }
 0x3ce   :  { %2770 = vmatmul.mubr.msk.f32.vlgmr.msra.gmra.mrb[40].mxu0 %vm650_vm2, %v2176_v10 }
 0x3cf   :  { %2995 = shalt.err (!%p2992_p4)
}
 0x3d0   :  { %s2996_s24 = scalar_lea.hbm %s3781_s16, 1024 }
 0x3d1   :  { %p2997_p5 = scmp.ne.s32.totalorder %s3781_s16, %s2996_s24  ;;  %p3000_p6 = scmp.lt.u32.totalorder %s2996_s24, %s3781_s16 }
 0x3d3   :  { %p3002_p7 = pnand %p3000_p6, %p2997_p5 }
 0x3d5   :  { %3005 = shalt.err (!%p3002_p7)
}
 0x3d6   :  { %s3019_s7 = smov 128   ;;  %s3020_s9 = smov 8   ;;  %v2187_v34 = vpop.permute.xlu1 %2186  ;;  %vm2271_vm8 = vcmask 9216   ;;  %v2182_v35 = vpop.permute.xlu0 %2181 }
 0x3d7   :  { %2286 = dma.vmem_to_hbm [thread:$0]  %s2281_s17, 1024, %s3781_s16, [#allocation4], %s3019_s7, %s3019_s7, %s3020_s9  }
 0x4a1   :  { %v2771_v8 = vpop.f32.mrb[40].mxu0 }
 0x4a2   :  { %v2267_v55 = vadd.f32 %v2771_v8, %v2187_v34  ;;  %v2261_v9 = vpop.f32.mrb[41].mxu0 }
 0x4a3   :  { %v2262_v2 = vadd.f32 %v2261_v9, %v2182_v35 }
 0x4a4   :  { %2272 = vst.msk [vmem:[%s3780_s15 + $0x8] sm:$0x3] %vm2271_vm8, %v2267_v55 }
 0x4a5   :  { %2270 = vst.msk [vmem:[%s3780_s15] sm:$0xff] %vm2166_vm7, %v2262_v2 }
 0x4a6   :  { %3006 = dma.done.wait [#allocation4], 1024  }
 0x4a7   :  { %3007 = vsyncadd [#allocation4], 4294966272 }
 0x4a8   :  { %2292 = vsyncpa [#allocation4], 1 }

</bundles_post_ra>
